<compile_context>
chip_gen: v7x
topology: tpu7x:2x2x1
jax: 0.10.0
libtpu: 0.0.40
codegen_flags: <defaults>
</compile_context>

<pallas_src>
import functools

import jax
import jax.numpy as jnp
import numpy as np
from jax.experimental import pallas as pl
from jax.experimental.pallas import tpu as pltpu


_CONV_CFG = [(10, 1, 30), (8, 30, 30), (6, 30, 40), (5, 40, 50), (5, 50, 50)]  # (K, Cin, Cout)
_FC1_OUT = 1024
_HALO = 8    # zeroed halo columns read by edge taps (>= max one-sided 'same' pad of 5)
_DL = 128    # data starts at lane 128 inside scratch buffers (keeps stores 128-aligned)


def _rup(x, m):
    return ((x + m - 1) // m) * m


def _conv_cfg_padded():
    # (K, Cin, Cin_pad, Cout): Cin padded to a sublane multiple so im2col concat is aligned.
    return tuple((k, cin, _rup(max(cin, 1), 8), cout) for (k, cin, cout) in _CONV_CFG)


def _pick_bt(B, cap=4):
    # Keep grid length B//Bt >= 2 so the "parallel" batch axis can split across cores (v7x).
    cap = max(1, min(cap, B // 2 if B >= 2 else 1))
    bt = 1
    for c in range(1, cap + 1):
        if B % c == 0:
            bt = c
    return bt


def _pick_wt(wp_pack):
    # 256-wide tiles fill the 256x256 MXU on v6e/v7x; keep 128 on 128-wide-MXU chips.
    try:
        kind = jax.devices()[0].device_kind.lower()
    except Exception:
        kind = ""
    wt = 128 if any(v in kind for v in ("v2", "v3", "v4", "v5")) else 256
    return min(wt, wp_pack)


def _pick_tk(Kp, target=6400):
    best = 128
    for d in range(1, Kp // 128 + 1):
        tk = 128 * d
        if tk <= target and Kp % tk == 0:
            best = tk
    return best


# --------------------------------------------------------------------------------------
# Fused 5-layer conv stack: im2col per tile, channel-major VMEM activations, in-kernel pad.
# --------------------------------------------------------------------------------------
def conv_stack_kernel(*refs, W, WH, DL, Bt, WT, n_wt, cfg):
    n_layers = len(cfg)
    xp_ref = refs[0]                               # (Bt, 8, WH), zero outside row 0 / [DL, DL+W)
    o_ref = refs[1 + 2 * n_layers]                 # (Bt, Cout_last, Wp_out)
    bufs = (refs[2 + 2 * n_layers], refs[3 + 2 * n_layers])

    # Zero both activation scratch buffers once per grid step: supplies the 'same' zero
    # padding halos, the zero tail beyond W, and zero rows above each layer's Cout (so the
    # next layer's Cin_pad-row reads see exact zeros, never stale VMEM garbage).
    for buf in bufs:
        buf[...] = jnp.zeros_like(buf)

    cur_in = xp_ref
    for li, (K, _cin, Cin_pad, Cout) in enumerate(cfg):
        w_l = refs[1 + 2 * li][...]                # (Cout, K*Cin_pad)  stationary per layer
        bias = refs[2 + 2 * li][...]               # (Cout, 1)
        last = li == n_layers - 1
        out_buf = o_ref if last else bufs[li % 2]  # ping-pong; never aliases cur_in
        left = (K - 1) // 2
        col0 = jax.lax.broadcasted_iota(jnp.int32, (Cout, WT), 1)   # hoisted out of loops

        def tile_body(b, w0, cur_in=cur_in, out_buf=out_buf, w_l=w_l, bias=bias,
                      col0=col0, K=K, Cin_pad=Cin_pad, Cout=Cout, left=left, last=last):
            s0 = DL + w0 - left
            # im2col patch: K shifted (Cin_pad, WT) slices stacked along sublanes.
            patch = jnp.concatenate(
                [cur_in[b, 0:Cin_pad, pl.ds(s0 + k, WT)] for k in range(K)], axis=0)
            acc = jnp.dot(w_l, patch, preferred_element_type=jnp.float32)   # (Cout, WT)
            val = jnp.maximum(acc + bias, 0.0)
            val = jnp.where(col0 < (W - w0), val, 0.0)   # zero 'same'-pad tail beyond W
            if last:
                ws = w0 if isinstance(w0, int) else pl.multiple_of(w0, 128)
                out_buf[b, 0:Cout, pl.ds(ws, WT)] = val.astype(out_buf.dtype)
            else:
                start = DL + w0
                ws = start if isinstance(w0, int) else pl.multiple_of(start, 128)
                out_buf[b, 0:Cout, pl.ds(ws, WT)] = val

        for b in range(Bt):
            if n_wt == 1:
                tile_body(b, 0)
            else:
                def wbody(t, carry, b=b):
                    tile_body(b, t * WT)
                    return carry
                jax.lax.fori_loop(0, n_wt, wbody, 0, unroll=2)

        cur_in = out_buf


def conv_stack(x, conv_ws, conv_bs, cfg, *, out_dtype=jnp.bfloat16, bt_cap=4):
    B, W = x.shape
    Wp_pack = _rup(W, 128)
    WT = _pick_wt(Wp_pack)
    Wp_out = _rup(W, WT)
    WH = _DL + Wp_out + _HALO
    n_wt = Wp_out // WT
    Bt = _pick_bt(B, bt_cap)
    cout_last = cfg[-1][3]
    cmax = max(max(cp, co) for (_, _, cp, co) in cfg)
    cin0_pad = cfg[0][2]

    # Only the (tiny) network input is padded in the wrapper; inter-layer activations never
    # leave VMEM and are padded in-kernel.
    xp = jnp.pad(x.astype(jnp.float32)[:, None, :],
                 ((0, 0), (0, cin0_pad - 1), (_DL, WH - _DL - W)))

    in_specs = [pl.BlockSpec((Bt, cin0_pad, WH), lambda i: (i, 0, 0))]
    ins = [xp]
    for w, b in zip(conv_ws, conv_bs):
        in_specs.append(pl.BlockSpec(tuple(w.shape), lambda i: (0, 0)))
        in_specs.append(pl.BlockSpec(tuple(b.shape), lambda i: (0, 0)))
        ins += [w, b]

    kern = functools.partial(conv_stack_kernel, W=W, WH=WH, DL=_DL, Bt=Bt,
                             WT=WT, n_wt=n_wt, cfg=tuple(cfg))
    return pl.pallas_call(
        kern,
        out_shape=jax.ShapeDtypeStruct((B, cout_last, Wp_out), out_dtype),
        grid_spec=pltpu.PrefetchScalarGridSpec(
            num_scalar_prefetch=0,
            grid=(B // Bt,),
            in_specs=in_specs,
            out_specs=pl.BlockSpec((Bt, cout_last, Wp_out), lambda i: (i, 0, 0)),
            scratch_shapes=[pltpu.VMEM((Bt, cmax, WH), jnp.float32),
                            pltpu.VMEM((Bt, cmax, WH), jnp.float32)],
        ),
        compiler_params=pltpu.CompilerParams(dimension_semantics=("parallel",)),
    )(*ins)


# --------------------------------------------------------------------------------------
# Fused fc1(+ReLU)+fc2 head: bf16 K-tiled fc1 weight streaming, fc2 folded into epilogue.
# --------------------------------------------------------------------------------------
def fc_head_kernel(x_ref, w1_ref, b1_ref, w2_ref, o_ref, acc_ref):
    k = pl.program_id(1)

    @pl.when(k == 0)
    def _():
        acc_ref[...] = jnp.zeros_like(acc_ref)

    # bf16 x bf16 on the MXU, f32 accumulation in VMEM scratch.
    acc_ref[...] += jnp.dot(x_ref[...], w1_ref[...], preferred_element_type=jnp.float32)

    @pl.when(k == pl.num_programs(1) - 1)
    def _():
        h = jnp.maximum(acc_ref[...] + b1_ref[...], 0.0)               # fc1 + ReLU (f32)
        o_ref[0] = jnp.dot(h, w2_ref[...], preferred_element_type=jnp.float32)  # fc2 partial


def fc_head(flat, w1, b1, w2, *, tile_n=512, tk_target=6400):
    B, Kp = flat.shape
    _, N = w1.shape
    assert N % tile_n == 0, (N, tile_n)
    tk = _pick_tk(Kp, tk_target)                  # multiple of 128, divides Kp, <= 6400
    n_n, n_k = N // tile_n, Kp // tk
    # Per-N-tile partial fc2 outputs; summed (trivially) in JAX so the N axis can stay
    # "parallel" for megacore sharding.
    return pl.pallas_call(
        fc_head_kernel,
        out_shape=jax.ShapeDtypeStruct((n_n, B, 1), jnp.float32),
        grid_spec=pltpu.PrefetchScalarGridSpec(
            num_scalar_prefetch=0,
            grid=(n_n, n_k),                      # reduction (k) axis last
            in_specs=[
                pl.BlockSpec((B, tk), lambda j, k: (0, k)),
                # TODO(synk): pl.Buffered(3) pipeline_mode on this weight stream for v7x.
                pl.BlockSpec((tk, tile_n), lambda j, k: (k, j)),
                pl.BlockSpec((1, tile_n), lambda j, k: (0, j)),
                pl.BlockSpec((tile_n, 1), lambda j, k: (j, 0)),
            ],
            out_specs=pl.BlockSpec((1, B, 1), lambda j, k: (j, 0, 0)),
            scratch_shapes=[pltpu.VMEM((B, tile_n), jnp.float32)],
        ),
        compiler_params=pltpu.CompilerParams(
            dimension_semantics=("parallel", "arbitrary"),
            vmem_limit_bytes=40 * 1024 * 1024),   # explicit: > v5e's 16MiB default, < v7x 64MiB
    )(flat, w1, b1, w2)


# --------------------------------------------------------------------------------------
# Parameters: logical (PyTorch-equivalent) init + one-time repack into kernel layout.
# --------------------------------------------------------------------------------------
def init_params(window, key):
    params = {}
    keys = jax.random.split(key, 2 * len(_CONV_CFG) + 4)
    ki = 0
    for i, (k, cin, cout) in enumerate(_CONV_CFG):
        std = 1.0 / np.sqrt(k * cin)
        params[f"conv{i + 1}_w"] = std * jax.random.normal(keys[ki], (k, cin, cout), jnp.float32)
        params[f"conv{i + 1}_b"] = std * jax.random.normal(keys[ki + 1], (cout,), jnp.float32)
        ki += 2
    fc1_in = _CONV_CFG[-1][2] * window
    std1 = 1.0 / np.sqrt(fc1_in)
    params["fc1_w"] = std1 * jax.random.normal(keys[ki], (fc1_in, _FC1_OUT), jnp.float32)
    params["fc1_b"] = std1 * jax.random.normal(keys[ki + 1], (_FC1_OUT,), jnp.float32)
    std2 = 1.0 / np.sqrt(_FC1_OUT)
    params["fc2_w"] = std2 * jax.random.normal(keys[ki + 2], (_FC1_OUT, 1), jnp.float32)
    params["fc2_b"] = std2 * jax.random.normal(keys[ki + 3], (1,), jnp.float32)
    return params


def prepare_params(params, window):
    """One-time repack: im2col conv weights (Cout, K*Cin_pad), fc1 weight padded to the
    128-multiple Wp layout and cast to bf16 (the streamed operand; accumulation stays f32)."""
    W = window
    Wp_pack = _rup(W, 128)
    cfg = _conv_cfg_padded()
    c_last = cfg[-1][3]
    kp = {}
    for i, (k, cin, cin_p, cout) in enumerate(cfg):
        w = params[f"conv{i + 1}_w"]                               # (K, Cin, Cout)
        w = jnp.pad(w, ((0, 0), (0, cin_p - cin), (0, 0)))         # zero cols for padded cin
        kp[f"conv{i + 1}_w"] = jnp.transpose(w, (2, 0, 1)).reshape(cout, k * cin_p)
        kp[f"conv{i + 1}_b"] = params[f"conv{i + 1}_b"].reshape(cout, 1)
    w1 = params["fc1_w"].reshape(c_last, W, _FC1_OUT)
    w1 = jnp.pad(w1, ((0, 0), (0, Wp_pack - W), (0, 0))).reshape(c_last * Wp_pack, _FC1_OUT)
    kp["fc1_w"] = w1.astype(jnp.bfloat16)
    kp["fc1_b"] = params["fc1_b"].reshape(1, _FC1_OUT)
    kp["fc2_w"] = params["fc2_w"]
    kp["fc2_b"] = params["fc2_b"]
    return kp


def seq2point_forward(x, kparams):
    # x: (B, W) f32  ->  (B, 1) f32
    B, W = x.shape
    cfg = _conv_cfg_padded()
    conv_ws = [kparams[f"conv{i + 1}_w"] for i in range(len(cfg))]
    conv_bs = [kparams[f"conv{i + 1}_b"] for i in range(len(cfg))]
    h = conv_stack(x, conv_ws, conv_bs, cfg, out_dtype=jnp.bfloat16)  # (B, 50, Wp_out), bf16
    Wp_pack = _rup(W, 128)
    if h.shape[-1] != Wp_pack:
        # Crop the WT=256 conv padding so fc1 weights are NOT streamed at the larger width.
        h = h[:, :, :Wp_pack]
    flat = h.reshape(B, -1)                        # channel-major flatten == free reshape
    partials = fc_head(flat, kparams["fc1_w"], kparams["fc1_b"], kparams["fc2_w"])
    return jnp.sum(partials, axis=0) + kparams["fc2_b"][None, :]


# --------------------------------------------------------------------------------------
# Pure-JAX reference (logical f32 params) for the correctness check.
# --------------------------------------------------------------------------------------
def _conv_ref(x, w, b):
    K = w.shape[0]
    W = x.shape[1]
    left = (K - 1) // 2
    xp = jnp.pad(x, ((0, 0), (left, (K - 1) - left), (0, 0)))
    out = b[None, None, :]
    for k in range(K):
        out = out + jnp.einsum("bwc,cd->bwd", xp[:, k:k + W, :], w[k])
    return jnp.maximum(out, 0.0)


def forward_ref(x, params):
    h = x[:, :, None]
    for i in range(len(_CONV_CFG)):
        h = _conv_ref(h, params[f"conv{i + 1}_w"], params[f"conv{i + 1}_b"])
    B, W, C = h.shape
    flat = jnp.transpose(h, (0, 2, 1)).reshape(B, C * W)     # PyTorch channel-major flatten
    h = jnp.maximum(flat @ params["fc1_w"] + params["fc1_b"], 0.0)
    return h @ params["fc2_w"] + params["fc2_b"]


if __name__ == "__main__":
    key = jax.random.PRNGKey(0)
    fwd = jax.jit(seq2point_forward)
    # Small shapes; the second one exercises the WT-padded ragged width tile, the in-kernel
    # fori_loop tiling and multi-K-tile fc1 accumulation (same paths as the default W=599).
    for (B, W) in [(2, 64), (2, 280)]:
        key, kx, kparam = jax.random.split(key, 3)
        x = jax.random.normal(kx, (B, W), dtype=jnp.float32)
        params = init_params(W, kparam)
        kparams = prepare_params(params, W)

        out = jax.block_until_ready(fwd(x, kparams))
        assert out.shape == (B, 1) and out.dtype == jnp.float32

        ref = np.asarray(forward_ref(x, params))
        err = np.max(np.abs(np.asarray(out) - ref)) / max(1.0, float(np.max(np.abs(ref))))
        assert err < 2e-2, ("mismatch", float(err))
    print("KERNEL_OK")
</pallas_src>

<mosaic_0001>
module attributes {stable_mosaic.version = 11 : i64} {
  func.func @conv_stack_kernel(%arg0: i32, %arg1: memref<1x8x264xf32, #tpu.memory_space<vmem>>, %arg2: memref<30x80xf32, #tpu.memory_space<vmem>>, %arg3: memref<30x1xf32, #tpu.memory_space<vmem>>, %arg4: memref<30x256xf32, #tpu.memory_space<vmem>>, %arg5: memref<30x1xf32, #tpu.memory_space<vmem>>, %arg6: memref<40x192xf32, #tpu.memory_space<vmem>>, %arg7: memref<40x1xf32, #tpu.memory_space<vmem>>, %arg8: memref<50x200xf32, #tpu.memory_space<vmem>>, %arg9: memref<50x1xf32, #tpu.memory_space<vmem>>, %arg10: memref<50x280xf32, #tpu.memory_space<vmem>>, %arg11: memref<50x1xf32, #tpu.memory_space<vmem>>, %arg12: memref<1x50x128xbf16, #tpu.memory_space<vmem>>, %arg13: memref<1x56x264xf32, #tpu.memory_space<vmem>>, %arg14: memref<1x56x264xf32, #tpu.memory_space<vmem>>) attributes {dimension_semantics = [#tpu.dimension_semantics<parallel>], iteration_bounds = array<i64: 2>, scalar_prefetch = 0 : i64, scratch_operands = 2 : i64, tpu.core_type = #tpu.core_type<tc>, window_params = [{transform_indices = @transform_0, window_bounds = array<i64: 1, 8, 264>}, {pipeline_mode = #tpu.pipeline_mode<synchronous>, transform_indices = @transform_1, window_bounds = array<i64: 30, 80>}, {pipeline_mode = #tpu.pipeline_mode<synchronous>, transform_indices = @transform_2, window_bounds = array<i64: 30, 1>}, {pipeline_mode = #tpu.pipeline_mode<synchronous>, transform_indices = @transform_3, window_bounds = array<i64: 30, 256>}, {pipeline_mode = #tpu.pipeline_mode<synchronous>, transform_indices = @transform_4, window_bounds = array<i64: 30, 1>}, {pipeline_mode = #tpu.pipeline_mode<synchronous>, transform_indices = @transform_5, window_bounds = array<i64: 40, 192>}, {pipeline_mode = #tpu.pipeline_mode<synchronous>, transform_indices = @transform_6, window_bounds = array<i64: 40, 1>}, {pipeline_mode = #tpu.pipeline_mode<synchronous>, transform_indices = @transform_7, window_bounds = array<i64: 50, 200>}, {pipeline_mode = #tpu.pipeline_mode<synchronous>, transform_indices = @transform_8, window_bounds = array<i64: 50, 1>}, {pipeline_mode = #tpu.pipeline_mode<synchronous>, transform_indices = @transform_9, window_bounds = array<i64: 50, 280>}, {pipeline_mode = #tpu.pipeline_mode<synchronous>, transform_indices = @transform_10, window_bounds = array<i64: 50, 1>}, {transform_indices = @transform_11, window_bounds = array<i64: 1, 50, 128>}]} {
    %cst = arith.constant 0.000000e+00 : f32
    %0 = vector.broadcast %cst : f32 to vector<1x56x264xf32>
    %c0 = arith.constant 0 : index
    %c0_0 = arith.constant 0 : index
    %c0_1 = arith.constant 0 : index
    %1 = vector.load %arg13[%c0, %c0_0, %c0_1] : memref<1x56x264xf32, #tpu.memory_space<vmem>>, vector<1x56x264xf32>
    tpu.vector_store %arg13[%c0, %c0_0, %c0_1], %0 {strides = array<i32>} : memref<1x56x264xf32, #tpu.memory_space<vmem>>, vector<1x56x264xf32>,
    %cst_2 = arith.constant 0.000000e+00 : f32
    %2 = vector.broadcast %cst_2 : f32 to vector<1x56x264xf32>
    %c0_3 = arith.constant 0 : index
    %c0_4 = arith.constant 0 : index
    %c0_5 = arith.constant 0 : index
    %3 = vector.load %arg14[%c0_3, %c0_4, %c0_5] : memref<1x56x264xf32, #tpu.memory_space<vmem>>, vector<1x56x264xf32>
    tpu.vector_store %arg14[%c0_3, %c0_4, %c0_5], %2 {strides = array<i32>} : memref<1x56x264xf32, #tpu.memory_space<vmem>>, vector<1x56x264xf32>,
    %c0_6 = arith.constant 0 : index
    %c0_7 = arith.constant 0 : index
    %4 = vector.load %arg2[%c0_6, %c0_7] : memref<30x80xf32, #tpu.memory_space<vmem>>, vector<30x80xf32>
    %c0_8 = arith.constant 0 : index
    %c0_9 = arith.constant 0 : index
    %5 = vector.load %arg3[%c0_8, %c0_9] : memref<30x1xf32, #tpu.memory_space<vmem>>, vector<30x1xf32>
    %6 = tpu.iota {dimensions = array<i32: 1>} : vector<30x128xi32>
    %c0_10 = arith.constant 0 : index
    %c0_11 = arith.constant 0 : index
    %c124 = arith.constant 124 : index
    %7 = vector.load %arg1[%c0_10, %c0_11, %c124] : memref<1x8x264xf32, #tpu.memory_space<vmem>>, vector<1x8x128xf32>
    %8 = vector.shape_cast %7 : vector<1x8x128xf32> to vector<8x128xf32>
    %c0_12 = arith.constant 0 : index
    %c0_13 = arith.constant 0 : index
    %c125 = arith.constant 125 : index
    %9 = vector.load %arg1[%c0_12, %c0_13, %c125] : memref<1x8x264xf32, #tpu.memory_space<vmem>>, vector<1x8x128xf32>
    %10 = vector.shape_cast %9 : vector<1x8x128xf32> to vector<8x128xf32>
    %c0_14 = arith.constant 0 : index
    %c0_15 = arith.constant 0 : index
    %c126 = arith.constant 126 : index
    %11 = vector.load %arg1[%c0_14, %c0_15, %c126] : memref<1x8x264xf32, #tpu.memory_space<vmem>>, vector<1x8x128xf32>
    %12 = vector.shape_cast %11 : vector<1x8x128xf32> to vector<8x128xf32>
    %c0_16 = arith.constant 0 : index
    %c0_17 = arith.constant 0 : index
    %c127 = arith.constant 127 : index
    %13 = vector.load %arg1[%c0_16, %c0_17, %c127] : memref<1x8x264xf32, #tpu.memory_space<vmem>>, vector<1x8x128xf32>
    %14 = vector.shape_cast %13 : vector<1x8x128xf32> to vector<8x128xf32>
    %c0_18 = arith.constant 0 : index
    %c0_19 = arith.constant 0 : index
    %c128 = arith.constant 128 : index
    %15 = vector.load %arg1[%c0_18, %c0_19, %c128] : memref<1x8x264xf32, #tpu.memory_space<vmem>>, vector<1x8x128xf32>
    %16 = vector.shape_cast %15 : vector<1x8x128xf32> to vector<8x128xf32>
    %c0_20 = arith.constant 0 : index
    %c0_21 = arith.constant 0 : index
    %c129 = arith.constant 129 : index
    %17 = vector.load %arg1[%c0_20, %c0_21, %c129] : memref<1x8x264xf32, #tpu.memory_space<vmem>>, vector<1x8x128xf32>
    %18 = vector.shape_cast %17 : vector<1x8x128xf32> to vector<8x128xf32>
    %c0_22 = arith.constant 0 : index
    %c0_23 = arith.constant 0 : index
    %c130 = arith.constant 130 : index
    %19 = vector.load %arg1[%c0_22, %c0_23, %c130] : memref<1x8x264xf32, #tpu.memory_space<vmem>>, vector<1x8x128xf32>
    %20 = vector.shape_cast %19 : vector<1x8x128xf32> to vector<8x128xf32>
    %c0_24 = arith.constant 0 : index
    %c0_25 = arith.constant 0 : index
    %c131 = arith.constant 131 : index
    %21 = vector.load %arg1[%c0_24, %c0_25, %c131] : memref<1x8x264xf32, #tpu.memory_space<vmem>>, vector<1x8x128xf32>
    %22 = vector.shape_cast %21 : vector<1x8x128xf32> to vector<8x128xf32>
    %c0_26 = arith.constant 0 : index
    %c0_27 = arith.constant 0 : index
    %c132 = arith.constant 132 : index
    %23 = vector.load %arg1[%c0_26, %c0_27, %c132] : memref<1x8x264xf32, #tpu.memory_space<vmem>>, vector<1x8x128xf32>
    %24 = vector.shape_cast %23 : vector<1x8x128xf32> to vector<8x128xf32>
    %c0_28 = arith.constant 0 : index
    %c0_29 = arith.constant 0 : index
    %c133 = arith.constant 133 : index
    %25 = vector.load %arg1[%c0_28, %c0_29, %c133] : memref<1x8x264xf32, #tpu.memory_space<vmem>>, vector<1x8x128xf32>
    %26 = vector.shape_cast %25 : vector<1x8x128xf32> to vector<8x128xf32>
    %27 = tpu.concatenate %8, %10, %12, %14, %16, %18, %20, %22, %24, %26 in 0 : vector<8x128xf32>, vector<8x128xf32>, vector<8x128xf32>, vector<8x128xf32>, vector<8x128xf32>, vector<8x128xf32>, vector<8x128xf32>, vector<8x128xf32>, vector<8x128xf32>, vector<8x128xf32> -> vector<80x128xf32>
    %cst_30 = arith.constant dense<0.000000e+00> : vector<30x128xf32>
    %28 = tpu.matmul %4, %27, %cst_30 {dimension_numbers = #tpu.dot_dimension_numbers<[1], [0], [0], [1], [0, 0, 1, 1], [], []>} : vector<30x80xf32>, vector<80x128xf32>, vector<30x128xf32> -> vector<30x128xf32>
    %29 = vector.broadcast %5 : vector<30x1xf32> to vector<30x128xf32>
    %30 = arith.addf %28, %29 : vector<30x128xf32>
    %cst_31 = arith.constant 0.000000e+00 : f32
    %31 = vector.broadcast %cst_31 : f32 to vector<30x128xf32>
    %32 = arith.maximumf %30, %31 : vector<30x128xf32>
    %c64_i32 = arith.constant 64 : i32
    %33 = vector.broadcast %c64_i32 : i32 to vector<30x128xi32>
    %34 = arith.cmpi slt, %6, %33 : vector<30x128xi32>
    %cst_32 = arith.constant 0.000000e+00 : f32
    %35 = vector.broadcast %cst_32 : f32 to vector<30x128xf32>
    %36 = arith.select %34, %32, %35 : vector<30x128xi1>, vector<30x128xf32>
    %c0_33 = arith.constant 0 : index
    %c0_34 = arith.constant 0 : index
    %c128_35 = arith.constant 128 : index
    %37 = vector.load %arg13[%c0_33, %c0_34, %c128_35] : memref<1x56x264xf32, #tpu.memory_space<vmem>>, vector<1x30x128xf32>
    %38 = vector.shape_cast %37 : vector<1x30x128xf32> to vector<30x128xf32>
    %39 = vector.shape_cast %36 : vector<30x128xf32> to vector<1x30x128xf32>
    tpu.vector_store %arg13[%c0_33, %c0_34, %c128_35], %39 {strides = array<i32>} : memref<1x56x264xf32, #tpu.memory_space<vmem>>, vector<1x30x128xf32>,
    %c0_36 = arith.constant 0 : index
    %c0_37 = arith.constant 0 : index
    %40 = vector.load %arg4[%c0_36, %c0_37] : memref<30x256xf32, #tpu.memory_space<vmem>>, vector<30x256xf32>
    %c0_38 = arith.constant 0 : index
    %c0_39 = arith.constant 0 : index
    %41 = vector.load %arg5[%c0_38, %c0_39] : memref<30x1xf32, #tpu.memory_space<vmem>>, vector<30x1xf32>
    %42 = tpu.iota {dimensions = array<i32: 1>} : vector<30x128xi32>
    %c0_40 = arith.constant 0 : index
    %c0_41 = arith.constant 0 : index
    %c125_42 = arith.constant 125 : index
    %43 = vector.load %arg13[%c0_40, %c0_41, %c125_42] : memref<1x56x264xf32, #tpu.memory_space<vmem>>, vector<1x32x128xf32>
    %44 = vector.shape_cast %43 : vector<1x32x128xf32> to vector<32x128xf32>
    %c0_43 = arith.constant 0 : index
    %c0_44 = arith.constant 0 : index
    %c126_45 = arith.constant 126 : index
    %45 = vector.load %arg13[%c0_43, %c0_44, %c126_45] : memref<1x56x264xf32, #tpu.memory_space<vmem>>, vector<1x32x128xf32>
    %46 = vector.shape_cast %45 : vector<1x32x128xf32> to vector<32x128xf32>
    %c0_46 = arith.constant 0 : index
    %c0_47 = arith.constant 0 : index
    %c127_48 = arith.constant 127 : index
    %47 = vector.load %arg13[%c0_46, %c0_47, %c127_48] : memref<1x56x264xf32, #tpu.memory_space<vmem>>, vector<1x32x128xf32>
    %48 = vector.shape_cast %47 : vector<1x32x128xf32> to vector<32x128xf32>
    %c0_49 = arith.constant 0 : index
    %c0_50 = arith.constant 0 : index
    %c128_51 = arith.constant 128 : index
    %49 = vector.load %arg13[%c0_49, %c0_50, %c128_51] : memref<1x56x264xf32, #tpu.memory_space<vmem>>, vector<1x32x128xf32>
    %50 = vector.shape_cast %49 : vector<1x32x128xf32> to vector<32x128xf32>
    %c0_52 = arith.constant 0 : index
    %c0_53 = arith.constant 0 : index
    %c129_54 = arith.constant 129 : index
    %51 = vector.load %arg13[%c0_52, %c0_53, %c129_54] : memref<1x56x264xf32, #tpu.memory_space<vmem>>, vector<1x32x128xf32>
    %52 = vector.shape_cast %51 : vector<1x32x128xf32> to vector<32x128xf32>
    %c0_55 = arith.constant 0 : index
    %c0_56 = arith.constant 0 : index
    %c130_57 = arith.constant 130 : index
    %53 = vector.load %arg13[%c0_55, %c0_56, %c130_57] : memref<1x56x264xf32, #tpu.memory_space<vmem>>, vector<1x32x128xf32>
    %54 = vector.shape_cast %53 : vector<1x32x128xf32> to vector<32x128xf32>
    %c0_58 = arith.constant 0 : index
    %c0_59 = arith.constant 0 : index
    %c131_60 = arith.constant 131 : index
    %55 = vector.load %arg13[%c0_58, %c0_59, %c131_60] : memref<1x56x264xf32, #tpu.memory_space<vmem>>, vector<1x32x128xf32>
    %56 = vector.shape_cast %55 : vector<1x32x128xf32> to vector<32x128xf32>
    %c0_61 = arith.constant 0 : index
    %c0_62 = arith.constant 0 : index
    %c132_63 = arith.constant 132 : index
    %57 = vector.load %arg13[%c0_61, %c0_62, %c132_63] : memref<1x56x264xf32, #tpu.memory_space<vmem>>, vector<1x32x128xf32>
    %58 = vector.shape_cast %57 : vector<1x32x128xf32> to vector<32x128xf32>
    %59 = tpu.concatenate %44, %46, %48, %50, %52, %54, %56, %58 in 0 : vector<32x128xf32>, vector<32x128xf32>, vector<32x128xf32>, vector<32x128xf32>, vector<32x128xf32>, vector<32x128xf32>, vector<32x128xf32>, vector<32x128xf32> -> vector<256x128xf32>
    %cst_64 = arith.constant dense<0.000000e+00> : vector<30x128xf32>
    %60 = tpu.matmul %40, %59, %cst_64 {dimension_numbers = #tpu.dot_dimension_numbers<[1], [0], [0], [1], [0, 0, 1, 1], [], []>} : vector<30x256xf32>, vector<256x128xf32>, vector<30x128xf32> -> vector<30x128xf32>
    %61 = vector.broadcast %41 : vector<30x1xf32> to vector<30x128xf32>
    %62 = arith.addf %60, %61 : vector<30x128xf32>
    %cst_65 = arith.constant 0.000000e+00 : f32
    %63 = vector.broadcast %cst_65 : f32 to vector<30x128xf32>
    %64 = arith.maximumf %62, %63 : vector<30x128xf32>
    %c64_i32_66 = arith.constant 64 : i32
    %65 = vector.broadcast %c64_i32_66 : i32 to vector<30x128xi32>
    %66 = arith.cmpi slt, %42, %65 : vector<30x128xi32>
    %cst_67 = arith.constant 0.000000e+00 : f32
    %67 = vector.broadcast %cst_67 : f32 to vector<30x128xf32>
    %68 = arith.select %66, %64, %67 : vector<30x128xi1>, vector<30x128xf32>
    %c0_68 = arith.constant 0 : index
    %c0_69 = arith.constant 0 : index
    %c128_70 = arith.constant 128 : index
    %69 = vector.load %arg14[%c0_68, %c0_69, %c128_70] : memref<1x56x264xf32, #tpu.memory_space<vmem>>, vector<1x30x128xf32>
    %70 = vector.shape_cast %69 : vector<1x30x128xf32> to vector<30x128xf32>
    %71 = vector.shape_cast %68 : vector<30x128xf32> to vector<1x30x128xf32>
    tpu.vector_store %arg14[%c0_68, %c0_69, %c128_70], %71 {strides = array<i32>} : memref<1x56x264xf32, #tpu.memory_space<vmem>>, vector<1x30x128xf32>,
    %c0_71 = arith.constant 0 : index
    %c0_72 = arith.constant 0 : index
    %72 = vector.load %arg6[%c0_71, %c0_72] : memref<40x192xf32, #tpu.memory_space<vmem>>, vector<40x192xf32>
    %c0_73 = arith.constant 0 : index
    %c0_74 = arith.constant 0 : index
    %73 = vector.load %arg7[%c0_73, %c0_74] : memref<40x1xf32, #tpu.memory_space<vmem>>, vector<40x1xf32>
    %74 = tpu.iota {dimensions = array<i32: 1>} : vector<40x128xi32>
    %c0_75 = arith.constant 0 : index
    %c0_76 = arith.constant 0 : index
    %c126_77 = arith.constant 126 : index
    %75 = vector.load %arg14[%c0_75, %c0_76, %c126_77] : memref<1x56x264xf32, #tpu.memory_space<vmem>>, vector<1x32x128xf32>
    %76 = vector.shape_cast %75 : vector<1x32x128xf32> to vector<32x128xf32>
    %c0_78 = arith.constant 0 : index
    %c0_79 = arith.constant 0 : index
    %c127_80 = arith.constant 127 : index
    %77 = vector.load %arg14[%c0_78, %c0_79, %c127_80] : memref<1x56x264xf32, #tpu.memory_space<vmem>>, vector<1x32x128xf32>
    %78 = vector.shape_cast %77 : vector<1x32x128xf32> to vector<32x128xf32>
    %c0_81 = arith.constant 0 : index
    %c0_82 = arith.constant 0 : index
    %c128_83 = arith.constant 128 : index
    %79 = vector.load %arg14[%c0_81, %c0_82, %c128_83] : memref<1x56x264xf32, #tpu.memory_space<vmem>>, vector<1x32x128xf32>
    %80 = vector.shape_cast %79 : vector<1x32x128xf32> to vector<32x128xf32>
    %c0_84 = arith.constant 0 : index
    %c0_85 = arith.constant 0 : index
    %c129_86 = arith.constant 129 : index
    %81 = vector.load %arg14[%c0_84, %c0_85, %c129_86] : memref<1x56x264xf32, #tpu.memory_space<vmem>>, vector<1x32x128xf32>
    %82 = vector.shape_cast %81 : vector<1x32x128xf32> to vector<32x128xf32>
    %c0_87 = arith.constant 0 : index
    %c0_88 = arith.constant 0 : index
    %c130_89 = arith.constant 130 : index
    %83 = vector.load %arg14[%c0_87, %c0_88, %c130_89] : memref<1x56x264xf32, #tpu.memory_space<vmem>>, vector<1x32x128xf32>
    %84 = vector.shape_cast %83 : vector<1x32x128xf32> to vector<32x128xf32>
    %c0_90 = arith.constant 0 : index
    %c0_91 = arith.constant 0 : index
    %c131_92 = arith.constant 131 : index
    %85 = vector.load %arg14[%c0_90, %c0_91, %c131_92] : memref<1x56x264xf32, #tpu.memory_space<vmem>>, vector<1x32x128xf32>
    %86 = vector.shape_cast %85 : vector<1x32x128xf32> to vector<32x128xf32>
    %87 = tpu.concatenate %76, %78, %80, %82, %84, %86 in 0 : vector<32x128xf32>, vector<32x128xf32>, vector<32x128xf32>, vector<32x128xf32>, vector<32x128xf32>, vector<32x128xf32> -> vector<192x128xf32>
    %cst_93 = arith.constant dense<0.000000e+00> : vector<40x128xf32>
    %88 = tpu.matmul %72, %87, %cst_93 {dimension_numbers = #tpu.dot_dimension_numbers<[1], [0], [0], [1], [0, 0, 1, 1], [], []>} : vector<40x192xf32>, vector<192x128xf32>, vector<40x128xf32> -> vector<40x128xf32>
    %89 = vector.broadcast %73 : vector<40x1xf32> to vector<40x128xf32>
    %90 = arith.addf %88, %89 : vector<40x128xf32>
    %cst_94 = arith.constant 0.000000e+00 : f32
    %91 = vector.broadcast %cst_94 : f32 to vector<40x128xf32>
    %92 = arith.maximumf %90, %91 : vector<40x128xf32>
    %c64_i32_95 = arith.constant 64 : i32
    %93 = vector.broadcast %c64_i32_95 : i32 to vector<40x128xi32>
    %94 = arith.cmpi slt, %74, %93 : vector<40x128xi32>
    %cst_96 = arith.constant 0.000000e+00 : f32
    %95 = vector.broadcast %cst_96 : f32 to vector<40x128xf32>
    %96 = arith.select %94, %92, %95 : vector<40x128xi1>, vector<40x128xf32>
    %c0_97 = arith.constant 0 : index
    %c0_98 = arith.constant 0 : index
    %c128_99 = arith.constant 128 : index
    %97 = vector.load %arg13[%c0_97, %c0_98, %c128_99] : memref<1x56x264xf32, #tpu.memory_space<vmem>>, vector<1x40x128xf32>
    %98 = vector.shape_cast %97 : vector<1x40x128xf32> to vector<40x128xf32>
    %99 = vector.shape_cast %96 : vector<40x128xf32> to vector<1x40x128xf32>
    tpu.vector_store %arg13[%c0_97, %c0_98, %c128_99], %99 {strides = array<i32>} : memref<1x56x264xf32, #tpu.memory_space<vmem>>, vector<1x40x128xf32>,
    %c0_100 = arith.constant 0 : index
    %c0_101 = arith.constant 0 : index
    %100 = vector.load %arg8[%c0_100, %c0_101] : memref<50x200xf32, #tpu.memory_space<vmem>>, vector<50x200xf32>
    %c0_102 = arith.constant 0 : index
    %c0_103 = arith.constant 0 : index
    %101 = vector.load %arg9[%c0_102, %c0_103] : memref<50x1xf32, #tpu.memory_space<vmem>>, vector<50x1xf32>
    %102 = tpu.iota {dimensions = array<i32: 1>} : vector<50x128xi32>
    %c0_104 = arith.constant 0 : index
    %c0_105 = arith.constant 0 : index
    %c126_106 = arith.constant 126 : index
    %103 = vector.load %arg13[%c0_104, %c0_105, %c126_106] : memref<1x56x264xf32, #tpu.memory_space<vmem>>, vector<1x40x128xf32>
    %104 = vector.shape_cast %103 : vector<1x40x128xf32> to vector<40x128xf32>
    %c0_107 = arith.constant 0 : index
    %c0_108 = arith.constant 0 : index
    %c127_109 = arith.constant 127 : index
    %105 = vector.load %arg13[%c0_107, %c0_108, %c127_109] : memref<1x56x264xf32, #tpu.memory_space<vmem>>, vector<1x40x128xf32>
    %106 = vector.shape_cast %105 : vector<1x40x128xf32> to vector<40x128xf32>
    %c0_110 = arith.constant 0 : index
    %c0_111 = arith.constant 0 : index
    %c128_112 = arith.constant 128 : index
    %107 = vector.load %arg13[%c0_110, %c0_111, %c128_112] : memref<1x56x264xf32, #tpu.memory_space<vmem>>, vector<1x40x128xf32>
    %108 = vector.shape_cast %107 : vector<1x40x128xf32> to vector<40x128xf32>
    %c0_113 = arith.constant 0 : index
    %c0_114 = arith.constant 0 : index
    %c129_115 = arith.constant 129 : index
    %109 = vector.load %arg13[%c0_113, %c0_114, %c129_115] : memref<1x56x264xf32, #tpu.memory_space<vmem>>, vector<1x40x128xf32>
    %110 = vector.shape_cast %109 : vector<1x40x128xf32> to vector<40x128xf32>
    %c0_116 = arith.constant 0 : index
    %c0_117 = arith.constant 0 : index
    %c130_118 = arith.constant 130 : index
    %111 = vector.load %arg13[%c0_116, %c0_117, %c130_118] : memref<1x56x264xf32, #tpu.memory_space<vmem>>, vector<1x40x128xf32>
    %112 = vector.shape_cast %111 : vector<1x40x128xf32> to vector<40x128xf32>
    %113 = tpu.concatenate %104, %106, %108, %110, %112 in 0 : vector<40x128xf32>, vector<40x128xf32>, vector<40x128xf32>, vector<40x128xf32>, vector<40x128xf32> -> vector<200x128xf32>
    %cst_119 = arith.constant dense<0.000000e+00> : vector<50x128xf32>
    %114 = tpu.matmul %100, %113, %cst_119 {dimension_numbers = #tpu.dot_dimension_numbers<[1], [0], [0], [1], [0, 0, 1, 1], [], []>} : vector<50x200xf32>, vector<200x128xf32>, vector<50x128xf32> -> vector<50x128xf32>
    %115 = vector.broadcast %101 : vector<50x1xf32> to vector<50x128xf32>
    %116 = arith.addf %114, %115 : vector<50x128xf32>
    %cst_120 = arith.constant 0.000000e+00 : f32
    %117 = vector.broadcast %cst_120 : f32 to vector<50x128xf32>
    %118 = arith.maximumf %116, %117 : vector<50x128xf32>
    %c64_i32_121 = arith.constant 64 : i32
    %119 = vector.broadcast %c64_i32_121 : i32 to vector<50x128xi32>
    %120 = arith.cmpi slt, %102, %119 : vector<50x128xi32>
    %cst_122 = arith.constant 0.000000e+00 : f32
    %121 = vector.broadcast %cst_122 : f32 to vector<50x128xf32>
    %122 = arith.select %120, %118, %121 : vector<50x128xi1>, vector<50x128xf32>
    %c0_123 = arith.constant 0 : index
    %c0_124 = arith.constant 0 : index
    %c128_125 = arith.constant 128 : index
    %123 = vector.load %arg14[%c0_123, %c0_124, %c128_125] : memref<1x56x264xf32, #tpu.memory_space<vmem>>, vector<1x50x128xf32>
    %124 = vector.shape_cast %123 : vector<1x50x128xf32> to vector<50x128xf32>
    %125 = vector.shape_cast %122 : vector<50x128xf32> to vector<1x50x128xf32>
    tpu.vector_store %arg14[%c0_123, %c0_124, %c128_125], %125 {strides = array<i32>} : memref<1x56x264xf32, #tpu.memory_space<vmem>>, vector<1x50x128xf32>,
    %c0_126 = arith.constant 0 : index
    %c0_127 = arith.constant 0 : index
    %126 = vector.load %arg10[%c0_126, %c0_127] : memref<50x280xf32, #tpu.memory_space<vmem>>, vector<50x280xf32>
    %c0_128 = arith.constant 0 : index
    %c0_129 = arith.constant 0 : index
    %127 = vector.load %arg11[%c0_128, %c0_129] : memref<50x1xf32, #tpu.memory_space<vmem>>, vector<50x1xf32>
    %128 = tpu.iota {dimensions = array<i32: 1>} : vector<50x128xi32>
    %c0_130 = arith.constant 0 : index
    %c0_131 = arith.constant 0 : index
    %c126_132 = arith.constant 126 : index
    %129 = vector.load %arg14[%c0_130, %c0_131, %c126_132] : memref<1x56x264xf32, #tpu.memory_space<vmem>>, vector<1x56x128xf32>
    %130 = vector.shape_cast %129 : vector<1x56x128xf32> to vector<56x128xf32>
    %c0_133 = arith.constant 0 : index
    %c0_134 = arith.constant 0 : index
    %c127_135 = arith.constant 127 : index
    %131 = vector.load %arg14[%c0_133, %c0_134, %c127_135] : memref<1x56x264xf32, #tpu.memory_space<vmem>>, vector<1x56x128xf32>
    %132 = vector.shape_cast %131 : vector<1x56x128xf32> to vector<56x128xf32>
    %c0_136 = arith.constant 0 : index
    %c0_137 = arith.constant 0 : index
    %c128_138 = arith.constant 128 : index
    %133 = vector.load %arg14[%c0_136, %c0_137, %c128_138] : memref<1x56x264xf32, #tpu.memory_space<vmem>>, vector<1x56x128xf32>
    %134 = vector.shape_cast %133 : vector<1x56x128xf32> to vector<56x128xf32>
    %c0_139 = arith.constant 0 : index
    %c0_140 = arith.constant 0 : index
    %c129_141 = arith.constant 129 : index
    %135 = vector.load %arg14[%c0_139, %c0_140, %c129_141] : memref<1x56x264xf32, #tpu.memory_space<vmem>>, vector<1x56x128xf32>
    %136 = vector.shape_cast %135 : vector<1x56x128xf32> to vector<56x128xf32>
    %c0_142 = arith.constant 0 : index
    %c0_143 = arith.constant 0 : index
    %c130_144 = arith.constant 130 : index
    %137 = vector.load %arg14[%c0_142, %c0_143, %c130_144] : memref<1x56x264xf32, #tpu.memory_space<vmem>>, vector<1x56x128xf32>
    %138 = vector.shape_cast %137 : vector<1x56x128xf32> to vector<56x128xf32>
    %139 = tpu.concatenate %130, %132, %134, %136, %138 in 0 : vector<56x128xf32>, vector<56x128xf32>, vector<56x128xf32>, vector<56x128xf32>, vector<56x128xf32> -> vector<280x128xf32>
    %cst_145 = arith.constant dense<0.000000e+00> : vector<50x128xf32>
    %140 = tpu.matmul %126, %139, %cst_145 {dimension_numbers = #tpu.dot_dimension_numbers<[1], [0], [0], [1], [0, 0, 1, 1], [], []>} : vector<50x280xf32>, vector<280x128xf32>, vector<50x128xf32> -> vector<50x128xf32>
    %141 = vector.broadcast %127 : vector<50x1xf32> to vector<50x128xf32>
    %142 = arith.addf %140, %141 : vector<50x128xf32>
    %cst_146 = arith.constant 0.000000e+00 : f32
    %143 = vector.broadcast %cst_146 : f32 to vector<50x128xf32>
    %144 = arith.maximumf %142, %143 : vector<50x128xf32>
    %c64_i32_147 = arith.constant 64 : i32
    %145 = vector.broadcast %c64_i32_147 : i32 to vector<50x128xi32>
    %146 = arith.cmpi slt, %128, %145 : vector<50x128xi32>
    %cst_148 = arith.constant 0.000000e+00 : f32
    %147 = vector.broadcast %cst_148 : f32 to vector<50x128xf32>
    %148 = arith.select %146, %144, %147 : vector<50x128xi1>, vector<50x128xf32>
    %149 = arith.truncf %148 : vector<50x128xf32> to vector<50x128xbf16>
    %c0_149 = arith.constant 0 : index
    %c0_150 = arith.constant 0 : index
    %c0_151 = arith.constant 0 : index
    %150 = vector.load %arg12[%c0_149, %c0_150, %c0_151] : memref<1x50x128xbf16, #tpu.memory_space<vmem>>, vector<1x50x128xbf16>
    %151 = vector.shape_cast %150 : vector<1x50x128xbf16> to vector<50x128xbf16>
    %152 = vector.shape_cast %149 : vector<50x128xbf16> to vector<1x50x128xbf16>
    tpu.vector_store %arg12[%c0_149, %c0_150, %c0_151], %152 {strides = array<i32>} : memref<1x50x128xbf16, #tpu.memory_space<vmem>>, vector<1x50x128xbf16>,
    return
  }
  func.func @transform_0(%arg0: i32) -> (i32, i32, i32) {
    %c0_i32 = arith.constant 0 : i32
    %c0_i32_0 = arith.constant 0 : i32
    %c0_i32_1 = arith.constant 0 : i32
    return %arg0, %c0_i32, %c0_i32_0 : i32, i32, i32
  }
  func.func @transform_1(%arg0: i32) -> (i32, i32) {
    %c0_i32 = arith.constant 0 : i32
    %c0_i32_0 = arith.constant 0 : i32
    %c0_i32_1 = arith.constant 0 : i32
    return %c0_i32, %c0_i32_0 : i32, i32
  }
  func.func @transform_2(%arg0: i32) -> (i32, i32) {
    %c0_i32 = arith.constant 0 : i32
    %c0_i32_0 = arith.constant 0 : i32
    %c0_i32_1 = arith.constant 0 : i32
    return %c0_i32, %c0_i32_0 : i32, i32
  }
  func.func @transform_3(%arg0: i32) -> (i32, i32) {
    %c0_i32 = arith.constant 0 : i32
    %c0_i32_0 = arith.constant 0 : i32
    %c0_i32_1 = arith.constant 0 : i32
    return %c0_i32, %c0_i32_0 : i32, i32
  }
  func.func @transform_4(%arg0: i32) -> (i32, i32) {
    %c0_i32 = arith.constant 0 : i32
    %c0_i32_0 = arith.constant 0 : i32
    %c0_i32_1 = arith.constant 0 : i32
    return %c0_i32, %c0_i32_0 : i32, i32
  }
  func.func @transform_5(%arg0: i32) -> (i32, i32) {
    %c0_i32 = arith.constant 0 : i32
    %c0_i32_0 = arith.constant 0 : i32
    %c0_i32_1 = arith.constant 0 : i32
    return %c0_i32, %c0_i32_0 : i32, i32
  }
  func.func @transform_6(%arg0: i32) -> (i32, i32) {
    %c0_i32 = arith.constant 0 : i32
    %c0_i32_0 = arith.constant 0 : i32
    %c0_i32_1 = arith.constant 0 : i32
    return %c0_i32, %c0_i32_0 : i32, i32
  }
  func.func @transform_7(%arg0: i32) -> (i32, i32) {
    %c0_i32 = arith.constant 0 : i32
    %c0_i32_0 = arith.constant 0 : i32
    %c0_i32_1 = arith.constant 0 : i32
    return %c0_i32, %c0_i32_0 : i32, i32
  }
  func.func @transform_8(%arg0: i32) -> (i32, i32) {
    %c0_i32 = arith.constant 0 : i32
    %c0_i32_0 = arith.constant 0 : i32
    %c0_i32_1 = arith.constant 0 : i32
    return %c0_i32, %c0_i32_0 : i32, i32
  }
  func.func @transform_9(%arg0: i32) -> (i32, i32) {
    %c0_i32 = arith.constant 0 : i32
    %c0_i32_0 = arith.constant 0 : i32
    %c0_i32_1 = arith.constant 0 : i32
    return %c0_i32, %c0_i32_0 : i32, i32
  }
  func.func @transform_10(%arg0: i32) -> (i32, i32) {
    %c0_i32 = arith.constant 0 : i32
    %c0_i32_0 = arith.constant 0 : i32
    %c0_i32_1 = arith.constant 0 : i32
    return %c0_i32, %c0_i32_0 : i32, i32
  }
  func.func @transform_11(%arg0: i32) -> (i32, i32, i32) {
    %c0_i32 = arith.constant 0 : i32
    %c0_i32_0 = arith.constant 0 : i32
    %c0_i32_1 = arith.constant 0 : i32
    return %arg0, %c0_i32, %c0_i32_0 : i32, i32, i32
  }
}

module attributes {stable_mosaic.version = 11 : i64} {
  func.func @fc_head_kernel(%arg0: i32, %arg1: i32, %arg2: memref<2x6400xbf16, #tpu.memory_space<vmem>>, %arg3: memref<6400x512xbf16, #tpu.memory_space<vmem>>, %arg4: memref<1x512xf32, #tpu.memory_space<vmem>>, %arg5: memref<512x1xf32, #tpu.memory_space<vmem>>, %arg6: memref<1x2x1xf32, #tpu.memory_space<vmem>>, %arg7: memref<2x512xf32, #tpu.memory_space<vmem>>) attributes {dimension_semantics = [#tpu.dimension_semantics<parallel>, #tpu.dimension_semantics<arbitrary>], iteration_bounds = array<i64: 2, 1>, scalar_prefetch = 0 : i64, scratch_operands = 1 : i64, tpu.core_type = #tpu.core_type<tc>, window_params = [{transform_indices = @transform_0, window_bounds = array<i64: 2, 6400>}, {transform_indices = @transform_1, window_bounds = array<i64: 6400, 512>}, {transform_indices = @transform_2, window_bounds = array<i64: 1, 512>}, {transform_indices = @transform_3, window_bounds = array<i64: 512, 1>}, {transform_indices = @transform_4, window_bounds = array<i64: 1, 2, 1>}]} {
    %c0_i32 = arith.constant 0 : i32
    %0 = arith.cmpi eq, %arg1, %c0_i32 : i32
    %1 = arith.extui %0 : i1 to i32
    %c0_i32_0 = arith.constant 0 : i32
    %2 = arith.cmpi ne, %1, %c0_i32_0 : i32
    scf.if %2 {
      %cst_10 = arith.constant 0.000000e+00 : f32
      %12 = vector.broadcast %cst_10 : f32 to vector<2x512xf32>
      %c0_11 = arith.constant 0 : index
      %c0_12 = arith.constant 0 : index
      %13 = vector.load %arg7[%c0_11, %c0_12] : memref<2x512xf32, #tpu.memory_space<vmem>>, vector<2x512xf32>
      tpu.vector_store %arg7[%c0_11, %c0_12], %12 {strides = array<i32>} : memref<2x512xf32, #tpu.memory_space<vmem>>, vector<2x512xf32>,
    } else {
    }
    %c0 = arith.constant 0 : index
    %c0_1 = arith.constant 0 : index
    %3 = vector.load %arg7[%c0, %c0_1] : memref<2x512xf32, #tpu.memory_space<vmem>>, vector<2x512xf32>
    %c0_2 = arith.constant 0 : index
    %c0_3 = arith.constant 0 : index
    %4 = vector.load %arg2[%c0_2, %c0_3] : memref<2x6400xbf16, #tpu.memory_space<vmem>>, vector<2x6400xbf16>
    %c0_4 = arith.constant 0 : index
    %c0_5 = arith.constant 0 : index
    %5 = vector.load %arg3[%c0_4, %c0_5] : memref<6400x512xbf16, #tpu.memory_space<vmem>>, vector<6400x512xbf16>
    %cst = arith.constant dense<0.000000e+00> : vector<2x512xf32>
    %6 = tpu.matmul %4, %5, %cst {dimension_numbers = #tpu.dot_dimension_numbers<[1], [0], [0], [1], [0, 0, 1, 1], [], []>} : vector<2x6400xbf16>, vector<6400x512xbf16>, vector<2x512xf32> -> vector<2x512xf32>
    %7 = arith.addf %3, %6 : vector<2x512xf32>
    %c0_6 = arith.constant 0 : index
    %c0_7 = arith.constant 0 : index
    %8 = vector.load %arg7[%c0_6, %c0_7] : memref<2x512xf32, #tpu.memory_space<vmem>>, vector<2x512xf32>
    tpu.vector_store %arg7[%c0_6, %c0_7], %7 {strides = array<i32>} : memref<2x512xf32, #tpu.memory_space<vmem>>, vector<2x512xf32>,
    %c0_i32_8 = arith.constant 0 : i32
    %9 = arith.cmpi eq, %arg1, %c0_i32_8 : i32
    %10 = arith.extui %9 : i1 to i32
    %c0_i32_9 = arith.constant 0 : i32
    %11 = arith.cmpi ne, %10, %c0_i32_9 : i32
    scf.if %11 {
      %c0_10 = arith.constant 0 : index
      %c0_11 = arith.constant 0 : index
      %12 = vector.load %arg7[%c0_10, %c0_11] : memref<2x512xf32, #tpu.memory_space<vmem>>, vector<2x512xf32>
      %c0_12 = arith.constant 0 : index
      %c0_13 = arith.constant 0 : index
      %13 = vector.load %arg4[%c0_12, %c0_13] : memref<1x512xf32, #tpu.memory_space<vmem>>, vector<1x512xf32>
      %14 = vector.broadcast %13 : vector<1x512xf32> to vector<2x512xf32>
      %15 = arith.addf %12, %14 : vector<2x512xf32>
      %cst_14 = arith.constant 0.000000e+00 : f32
      %16 = vector.broadcast %cst_14 : f32 to vector<2x512xf32>
      %17 = arith.maximumf %15, %16 : vector<2x512xf32>
      %c0_15 = arith.constant 0 : index
      %c0_16 = arith.constant 0 : index
      %18 = vector.load %arg5[%c0_15, %c0_16] : memref<512x1xf32, #tpu.memory_space<vmem>>, vector<512x1xf32>
      %cst_17 = arith.constant dense<0.000000e+00> : vector<2x1xf32>
      %19 = tpu.matmul %17, %18, %cst_17 {dimension_numbers = #tpu.dot_dimension_numbers<[1], [0], [0], [1], [0, 0, 1, 1], [], []>} : vector<2x512xf32>, vector<512x1xf32>, vector<2x1xf32> -> vector<2x1xf32>
      %c0_18 = arith.constant 0 : index
      %c0_19 = arith.constant 0 : index
      %c0_20 = arith.constant 0 : index
      %20 = vector.load %arg6[%c0_18, %c0_19, %c0_20] : memref<1x2x1xf32, #tpu.memory_space<vmem>>, vector<1x2x1xf32>
      %21 = vector.shape_cast %20 : vector<1x2x1xf32> to vector<2x1xf32>
      %22 = vector.shape_cast %19 : vector<2x1xf32> to vector<1x2x1xf32>
      tpu.vector_store %arg6[%c0_18, %c0_19, %c0_20], %22 {strides = array<i32>} : memref<1x2x1xf32, #tpu.memory_space<vmem>>, vector<1x2x1xf32>,
    } else {
    }
    return
  }
  func.func @transform_0(%arg0: i32, %arg1: i32) -> (i32, i32) {
    %c0_i32 = arith.constant 0 : i32
    %c0_i32_0 = arith.constant 0 : i32
    return %c0_i32, %arg1 : i32, i32
  }
  func.func @transform_1(%arg0: i32, %arg1: i32) -> (i32, i32) {
    %c0_i32 = arith.constant 0 : i32
    return %arg1, %arg0 : i32, i32
  }
  func.func @transform_2(%arg0: i32, %arg1: i32) -> (i32, i32) {
    %c0_i32 = arith.constant 0 : i32
    %c0_i32_0 = arith.constant 0 : i32
    return %c0_i32, %arg0 : i32, i32
  }
  func.func @transform_3(%arg0: i32, %arg1: i32) -> (i32, i32) {
    %c0_i32 = arith.constant 0 : i32
    %c0_i32_0 = arith.constant 0 : i32
    return %arg0, %c0_i32 : i32, i32
  }
  func.func @transform_4(%arg0: i32, %arg1: i32) -> (i32, i32, i32) {
    %c0_i32 = arith.constant 0 : i32
    %c0_i32_0 = arith.constant 0 : i32
    %c0_i32_1 = arith.constant 0 : i32
    return %arg0, %c0_i32, %c0_i32_0 : i32, i32, i32
  }
}

</mosaic_0001>

<bundles_post_ra>
// kernel: seq2point_forward.2
= control target key start
LH: loop header
LB: loop body
LE: loop exit
PB: predicated region body
PF: predicated region fallthrough
CT: control target
= control target key end

     0   :  { %16 = vsyncpa [#allocation5], 0  ;;  %s5549_s0 = inlined_call_operand.vmem [shape: f32[2,8,264], index: 0, kind: input, shape index: {}]   ;;  %s5550_s1 = inlined_call_operand.hbm [shape: f32[30,80], index: 1, kind: input, shape index: {}]   ;;  %s5551_s2 = inlined_call_operand.vmem [shape: f32[30,1], index: 2, kind: input, shape index: {}]   ;;  %s5552_s3 = inlined_call_operand.hbm [shape: f32[30,256], index: 3, kind: input, shape index: {}]   ;;  %s5553_s4 = inlined_call_operand.vmem [shape: f32[30,1], index: 4, kind: input, shape index: {}]   ;;  %s5554_s5 = inlined_call_operand.hbm [shape: f32[40,192], index: 5, kind: input, shape index: {}]   ;;  %s5555_s6 = inlined_call_operand.vmem [shape: f32[40,1], index: 6, kind: input, shape index: {}]   ;;  %s5556_s7 = inlined_call_operand.hbm [shape: f32[50,200], index: 7, kind: input, shape index: {}]   ;;  %s5557_s8 = inlined_call_operand.vmem [shape: f32[50,1], index: 8, kind: input, shape index: {}]   ;;  %s5558_s9 = inlined_call_operand.hbm [shape: f32[50,280], index: 9, kind: input, shape index: {}]   ;;  %s5559_s10 = inlined_call_operand.vmem [shape: f32[50,1], index: 10, kind: input, shape index: {}]   ;;  %s5560_s11 = inlined_call_operand.vmem [shape: bf16[2,50,128], index: 11, kind: output, shape index: {}]  }
   0x1   :  { %17 = vsyncpa [#allocation7], 0 }
   0x2   :  { %18 = vsyncpa [#allocation10], 0  ;;  %s4625_s17 = smov 0  }
   0x3 LB: > { %s4538_s18 = smov [#allocation6]   ;;  %s4631_s20 = sadd.s32 4294967295, %s4536_s17   ;;  %s4536_s17 = sphi %s4625_s17, %s24_s17  }
   0x4   : > { %s319_s19 = sshll.u32 %s4538_s18, 4  ;;  %p2868_p0 = scmp.ge.s32.totalorder %s4536_s17, 1  ;;  %s4636_s19 = int_to_ptr.vmem [resolvable:$true] %s319_s19 }
   0x5   : > { %p291_p1 = scmp.lt.s32.totalorder %s4536_s17, 3  ;;  %p5563_p2 = scmp.eq.s32.totalorder %s4631_s20, 0 }
   0x6   : > { %s4539_s22 = smov [#allocation9]   ;;  %s4540_s25 = smov [#allocation4]  }
   0x7   : > { %p4638_p3 = pnand %p2868_p0, %p291_p1  ;;  %s351_s23 = sshll.u32 %s4539_s22, 4  ;;  %s4644_s23 = int_to_ptr.vmem [resolvable:$true] %s351_s23 }
   0x8   : > { %s303_s26 = sshll.u32 %s4540_s25, 4  ;;  %s4378_s29 = scalar_lea.hbm %s5552_s3, 1024  ;;  %s4652_s26 = int_to_ptr.vmem [resolvable:$true] %s303_s26 }
   0x9   : > { %s5565_s21 = scalar_select %p4638_p3, 1, 0 }
   0xa   : > { %p3298_p4 = pneg %p4638_p3  ;;  %p4379_p6 = scmp.ne.s32.totalorder %s5552_s3, %s4378_s29 }
   0xb   : > { %p4385_p10 = scmp.lt.u32.totalorder %s4378_s29, %s5552_s3 }
   0xc   : > { %p4648_p5 = pnand %p5563_p2, %p3298_p4 }
   0xe   : > { %p4662_p7 = pneg %p4648_p5 }
  0x10   : > { %p4381_p8 = pnand %p4662_p7, %p4379_p6 }
  0x12   : > { %p4382_p9 = pneg %p4381_p8 }
  0x14   : > { %p4387_p11 = pnand %p4385_p10, %p4382_p9 }
  0x16   : > { %4390 = shalt.err (!%p4387_p11)
}
  0x17   : > { %s4391_s16 = scalar_lea.vmem %s4636_s19, 1024  ;;  %p4399_p1 = scmp.lt.s32.totalorder %s4636_s19, %s4636_s19 }
  0x18   : > { %p4392_p12 = scmp.ne.s32.totalorder %s4636_s19, %s4391_s16  ;;  %p4400_p4 = scmp.lt.s32.totalorder %s4391_s16, %s4391_s16 }
  0x1a   : > { %p4394_p13 = pnand %p4392_p12, %p4662_p7  ;;  %p4401_p6 = por %p4400_p4, %p4399_p1 }
  0x1c   : > { %p4395_p0 = pneg %p4394_p13 }
  0x1e   : > { %p4402_p8 = pnand %p4401_p6, %p4395_p0 }
  0x20   : > { %4405 = shalt.err (!%p4402_p8)
}
  0x21   : > { %s5561_s18 = smov 256   ;;  %s5562_s22 = smov 16  }
  0x22   : > { %3304 = dma.hbm_to_vmem [thread:$0]  (!%p4648_p5), %s5552_s3, 1024, %s4636_s19, [#allocation7], %s5561_s18, %s5561_s18, %s5562_s22  }
  0x23   : > { %s4406_s30 = scalar_lea.hbm %s5556_s7, 1792 }
  0x24   : > { %p4407_p9 = scmp.ne.s32.totalorder %s5556_s7, %s4406_s30  ;;  %p4413_p12 = scmp.lt.u32.totalorder %s4406_s30, %s5556_s7 }
  0x26   : > { %p4409_p10 = pnand %p4407_p9, %p4662_p7 }
  0x28   : > { %p4410_p11 = pneg %p4409_p10 }
  0x2a   : > { %p4415_p13 = pnand %p4413_p12, %p4410_p11 }
  0x2c   : > { %4418 = shalt.err (!%p4415_p13)
}
  0x2d   : > { %s4419_s19 = scalar_lea.vmem %s4644_s23, 1792  ;;  %p4427_p6 = scmp.lt.s32.totalorder %s4644_s23, %s4644_s23 }
  0x2e   : > { %p4420_p0 = scmp.ne.s32.totalorder %s4644_s23, %s4419_s19  ;;  %p4428_p8 = scmp.lt.s32.totalorder %s4419_s19, %s4419_s19 }
  0x30   : > { %p4422_p1 = pnand %p4420_p0, %p4662_p7  ;;  %p4429_p9 = por %p4428_p8, %p4427_p6 }
  0x32   : > { %p4423_p4 = pneg %p4422_p1 }
  0x34   : > { %p4430_p10 = pnand %p4429_p9, %p4423_p4 }
  0x36   : > { %4433 = shalt.err (!%p4430_p10)
}
  0x37   : > { %3310 = dma.hbm_to_vmem [thread:$0]  (!%p4648_p5), %s5556_s7, 1792, %s4644_s23, [#allocation10], %s5561_s18, %s5561_s18, %s5562_s22  }
  0x38   : > { %s4434_s30 = scalar_lea.hbm %s5550_s1, 512 }
  0x39   : > { %p4435_p11 = scmp.ne.s32.totalorder %s5550_s1, %s4434_s30  ;;  %p4441_p0 = scmp.lt.u32.totalorder %s4434_s30, %s5550_s1 }
  0x3b   : > { %p4437_p12 = pnand %p4435_p11, %p4662_p7 }
  0x3d   : > { %p4438_p13 = pneg %p4437_p12 }
  0x3f   : > { %p4443_p1 = pnand %p4441_p0, %p4438_p13 }
  0x41   : > { %4446 = shalt.err (!%p4443_p1)
}
  0x42   : > { %s4447_s23 = scalar_lea.vmem %s4652_s26, 512  ;;  %p4455_p9 = scmp.lt.s32.totalorder %s4652_s26, %s4652_s26 }
  0x43   : > { %p4448_p4 = scmp.ne.s32.totalorder %s4652_s26, %s4447_s23  ;;  %p4456_p10 = scmp.lt.s32.totalorder %s4447_s23, %s4447_s23 }
  0x45   : > { %p4450_p6 = pnand %p4448_p4, %p4662_p7  ;;  %p4457_p11 = por %p4456_p10, %p4455_p9 }
  0x47   : > { %p4451_p8 = pneg %p4450_p6 }
  0x49   : > { %p4458_p12 = pnand %p4457_p11, %p4451_p8 }
  0x4b   : > { %4461 = shalt.err (!%p4458_p12)
}
  0x4c   : > { %s4543_s19 = smov 128   ;;  %s4544_s25 = smov 8  }
  0x4d   : > { %3301 = dma.hbm_to_vmem [thread:$0]  (!%p4648_p5), %s5550_s1, 512, %s4652_s26, [#allocation5], %s4543_s19, %s4543_s19, %s4544_s25  }
  0x4e   : > { %s4545_s29 = smov [#allocation8]   ;;  %s4546_s12 = smov [#allocation11]  }
  0x4f   : > { %s335_s30 = sshll.u32 %s4545_s29, 4  ;;  %s367_s14 = sshll.u32 %s4546_s12, 4  ;;  %s336_s30 = int_to_ptr.vmem [resolvable:$true] %s335_s30  ;;  %s4735_s14 = int_to_ptr.vmem [resolvable:$true] %s367_s14 }
  0x50   : > { %s4462_s23 = scalar_lea.hbm %s5554_s5, 1280 }
  0x51   : > { %p4463_p13 = scmp.ne.s32.totalorder %s5554_s5, %s4462_s23  ;;  %p4469_p4 = scmp.lt.u32.totalorder %s4462_s23, %s5554_s5 }
  0x53   : > { %p4465_p0 = pnand %p4463_p13, %p4662_p7 }
  0x55   : > { %p4466_p1 = pneg %p4465_p0 }
  0x57   : > { %p4471_p6 = pnand %p4469_p4, %p4466_p1 }
  0x59   : > { %4474 = shalt.err (!%p4471_p6)
}
  0x5a   : > { %s4475_s19 = scalar_lea.vmem %s336_s30, 1280  ;;  %p4483_p11 = scmp.lt.s32.totalorder %s336_s30, %s336_s30 }
  0x5b   : > { %p4476_p8 = scmp.ne.s32.totalorder %s336_s30, %s4475_s19  ;;  %p4484_p12 = scmp.lt.s32.totalorder %s4475_s19, %s4475_s19 }
  0x5d   : > { %p4478_p9 = pnand %p4476_p8, %p4662_p7  ;;  %p4485_p2 = por %p4484_p12, %p4483_p11 }
  0x5f   : > { %p4479_p10 = pneg %p4478_p9 }
  0x61   : > { %p4486_p3 = pnand %p4485_p2, %p4479_p10 }
  0x63   : > { %4489 = shalt.err (!%p4486_p3)
}
  0x64   : > { %s5568_s18 = smov 16   ;;  %s5569_s22 = smov 256  }
  0x65   : > { %3307 = dma.hbm_to_vmem [thread:$0]  (!%p4648_p5), %s5554_s5, 1280, %s336_s30, [#allocation7], %s5569_s22, %s5569_s22, %s5568_s18  }
  0x66   : > { %s4490_s15 = scalar_lea.hbm %s5558_s9, 2688 }
  0x67   : > { %p4491_p13 = scmp.ne.s32.totalorder %s5558_s9, %s4490_s15  ;;  %p4497_p0 = scmp.lt.u32.totalorder %s4490_s15, %s5558_s9 }
  0x69   : > { %p4493_p2 = pnand %p4491_p13, %p4662_p7 }
  0x6b   : > { %p4494_p3 = pneg %p4493_p2 }
  0x6d   : > { %p4499_p1 = pnand %p4497_p0, %p4494_p3 }
  0x6f   : > { %4502 = shalt.err (!%p4499_p1)
}
  0x70   : > { %s4503_s30 = scalar_lea.vmem %s4735_s14, 2688  ;;  %p4511_p9 = scmp.lt.s32.totalorder %s4735_s14, %s4735_s14 }
  0x71   : > { %p4504_p4 = scmp.ne.s32.totalorder %s4735_s14, %s4503_s30  ;;  %p4512_p10 = scmp.lt.s32.totalorder %s4503_s30, %s4503_s30 }
  0x73   : > { %p4506_p6 = pnand %p4504_p4, %p4662_p7  ;;  %p4513_p11 = por %p4512_p10, %p4511_p9 }
  0x75   : > { %p4507_p8 = pneg %p4506_p6 }
  0x77   : > { %p4514_p12 = pnand %p4513_p11, %p4507_p8 }
  0x79   : > { %4517 = shalt.err (!%p4514_p12)
}
  0x7a   : > { %s4547_s19 = smov 384   ;;  %s4548_s18 = smov 24  }
  0x7b   : > { %3313 = dma.hbm_to_vmem [thread:$0]  (!%p4648_p5), %s5558_s9, 2688, %s4735_s14, [#allocation10], %s4547_s19, %s4547_s19, %s4548_s18  }
  0x7c   : > { %p5570_p13 = scmp.ne.s32.totalorder %s5565_s21, 0 }
  0x7d   : > { %p5571_p7 = scmp.eq.s32.totalorder (!%p5570_p13), %s4631_s20, 0 }
  0x7e   : > { %394 = sbr.rel (%p5570_p13) target bundleno = 2712 (0xa98), region = 64 }
  0x85   : > { %4523 = dma.done.wait (%p5571_p7), [#allocation5], 512   ;;  %p5572_p2 = pmov %p5571_p7 }
  0x87   : > { %4525 = vsyncadd (%p5572_p2), [#allocation5], 4294966784  ;;  %p5573_p3 = pmov %p5572_p2 }
  0x88   : > { %p5574_p0 = pmov %p5572_p2 }
  0x89   : > { %4527 = dma.done.wait (%p5573_p3), [#allocation7], 2304  }
  0x8a   : > { %4529 = vsyncadd (%p5574_p0), [#allocation7], 4294964992  ;;  %p5575_p1 = pmov %p5574_p0 }
  0x8b   : > { %p5576_p5 = pmov %p5574_p0 }
  0x8c   : > { %4531 = dma.done.wait (%p5575_p1), [#allocation10], 4480  }
  0x8d   : > { %4533 = vsyncadd (%p5576_p5), [#allocation10], 4294962816  ;;  %p450_p4 = scmp.lt.s32.totalorder %s4631_s20, 1  ;;  %v4549_v0 = vmov 0.0   ;;  %s4550_s28 = smov 125   ;;  %vm522_vm0 = vcmask 1039360  }
  0x8e   : > { %476 = vst [vmem:[#allocation2 + $0x78] sm:$0xff] %v4549_v0  ;;  %471 = vst [vmem:[#allocation2 + $0x50] sm:$0xff] %v4549_v0  ;;  %s4551_s29 = smov 127   ;;  %s4552_s12 = smov 123   ;;  %vm534_vm1 = vcmask 1022976   ;;  %vm528_vm2 = vcmask 1031168  }
  0x8f   : > { %492 = vst [vmem:[#allocation3 + $0x50] sm:$0xff] %v4549_v0  ;;  %501 = vst [vmem:[#allocation3 + $0x98] sm:$0xff] %v4549_v0  ;;  %s5578_s20 = smov (!%p450_p4, %s4631_s20), 1  ;;  %s4553_s15 = smov 126   ;;  %vm543_vm3 = vcmask 1006592   ;;  %vm549_vm4 = vcmask 998400  }
  0x90   : > { %s3276_s21 = smul.u32 24, %s5578_s20  ;;  %s4554_s16 = smov 122   ;;  %vm555_vm5 = vcmask 990208   ;;  %vm561_vm6 = vcmask 982016   ;;  %v503_v40 = vld [vmem:[#allocation4] sm:$0xff]  ;;  %vm647_vm7 = vcmask 654336  }
  0x91   : > { %s4555_s23 = smov 124   ;;  %s4556_s27 = smov 121   ;;  %vm567_vm8 = vcmask 973824   ;;  %3080 = vmatprep.mubr.msk.f32.mxu0 %vm647_vm7, %v503_v40  ;;  %v4560_v48 = vmov 0   ;;  %v507_v49 = vld [vmem:[%s5551_s2] sm:$0xff]  ;;  %v508_v50 = vld [vmem:[%s5551_s2 + $0x8] sm:$0xff] }
  0x92   : > { %s454_s14 = scalar_lea.vmem %s5549_s0, %s3276_s21  ;;  %s4557_s26 = smov 120   ;;  %3444 = vset.pattern.permute.xlu1 %v4560_v48  ;;  %3445 = vset.pattern.permute.xlu0 %v4560_v48  ;;  %v509_v51 = vld [vmem:[%s5551_s2 + $0x10] sm:$0xff]  ;;  %v510_v52 = vld [vmem:[%s5551_s2 + $0x18] sm:$0x3f]  ;;  %vm627_vm9 = vcmask 31744   ;;  %vm462_vm10 = vcmask 64512  }
  0x93   : > { %v513_v1 = vld [vmem:[%s454_s14] sm:$0xff]  ;;  %v514_v2 = vld [vmem:[%s454_s14 + $0x8] sm:$0xff]  ;;  %v515_v3 = vld [vmem:[%s454_s14 + $0x10] sm:$0xff]  ;;  %s4558_s30 = smov 119   ;;  %s4559_s19 = smov 4   ;;  %466 = vst.msk [vmem:[#allocation2 + $0x28] sm:$0xff] %vm462_vm10, %v4549_v0 }
  0x94   : > { %v3369_v4 = vpack.i.bf16 %v514_v2, %v513_v1  ;;  %v3374_v5 = vpack.i.bf16 %v515_v3, %v514_v2  ;;  %463 = vst.msk [vmem:[#allocation2 + $0x10] sm:$0xff] %vm462_vm10, %v4549_v0  ;;  %469 = vst.msk [vmem:[#allocation2 + $0x40] sm:$0xff] %vm462_vm10, %v4549_v0  ;;  %vm858_vm12 = vcmask 1014784   ;;  %vm1063_vm13 = vcmask 23552   ;;  %s4562_s13 = smov 2   ;;  %s3277_s25 = smul.u32 28, %s5578_s20 }
  0x95   : > { %472 = vst.msk [vmem:[#allocation2 + $0x58] sm:$0xff] %vm462_vm10, %v4549_v0  ;;  %475 = vst.msk [vmem:[#allocation2 + $0x70] sm:$0xff] %vm462_vm10, %v4549_v0  ;;  %vm1506_vm14 = vcmask 523264   ;;  %vm1461_vm15 = vcmask 15360  }
  0x96   : > { %3370 = vrot.lane.b32.xlu1 %v3369_v4, %s4550_s28  ;;  %3360 = vrot.lane.b32.xlu0 %v3369_v4, %s4551_s29  ;;  %484 = vst.msk [vmem:[#allocation3 + $0x10] sm:$0xff] %vm462_vm10, %v4549_v0  ;;  %487 = vst.msk [vmem:[#allocation3 + $0x28] sm:$0xff] %vm462_vm10, %v4549_v0 }
  0x97   : > { %490 = vst.msk [vmem:[#allocation3 + $0x40] sm:$0xff] %vm462_vm10, %v4549_v0  ;;  %493 = vst.msk [vmem:[#allocation3 + $0x58] sm:$0xff] %vm462_vm10, %v4549_v0 }
  0x98   : > { %496 = vst.msk [vmem:[#allocation3 + $0x70] sm:$0xff] %vm462_vm10, %v4549_v0  ;;  %499 = vst.msk [vmem:[#allocation3 + $0x88] sm:$0xff] %vm462_vm10, %v4549_v0 }
  0x99   : > { %502 = vst.msk [vmem:[#allocation3 + $0xa0] sm:$0xff] %vm462_vm10, %v4549_v0 }
  0x9a   : > { %3375 = vrot.lane.b32.xlu1 %v3374_v5, %s4552_s12  ;;  %3365 = vrot.lane.b32.xlu0 %v3369_v4, %s4553_s15 }
  0x9e   : > { %3380 = vrot.lane.b32.xlu1 %v3374_v5, %s4554_s16  ;;  %536 = vrot.lane.b32.xlu0 %v514_v2, %s4555_s23 }
  0xa2   : > { %3385 = vrot.lane.b32.xlu0 %v3374_v5, %s4556_s27  ;;  %3390 = vrot.lane.b32.xlu1 %v3374_v5, %s4557_s26 }
  0xa6   : > { %3395 = vrot.lane.b32.xlu0 %v3374_v5, %s4558_s30  ;;  %3400 = vrot.lane.b32.xlu1 %v3369_v4, %s4559_s19  ;;  %s4561_s30 = smov 3  }
 0x108   : > { %v3371_v6 = vpop.permute.xlu1 %3370  ;;  %v3361_v7 = vpop.permute.xlu0 %3360 }
 0x109   : > { %v3373_v8 = vunpack.i.h.bf16 %v3371_v6  ;;  %v3372_v9 = vunpack.i.l.bf16 %v3371_v6  ;;  %v3363_v10 = vunpack.i.h.bf16 %v3361_v7  ;;  %v3362_v11 = vunpack.i.l.bf16 %v3361_v7 }
 0x10b   : > { %v523_v12 = vsel %vm522_vm0, %v3362_v11, %v3363_v10  ;;  %v535_v16 = vsel %vm534_vm1, %v3372_v9, %v3373_v8 }
 0x10c   : > { %v3376_v13 = vpop.permute.xlu1 %3375  ;;  %v3366_v14 = vpop.permute.xlu0 %3365  ;;  %v3404_v15 = vpack.i.bf16 %v3363_v10, %v523_v12  ;;  %v3414_v25 = vpack.i.bf16 %v3373_v8, %v535_v16 }
 0x10d   : > { %v3378_v17 = vunpack.i.h.bf16 %v3376_v13  ;;  %v3377_v18 = vunpack.i.l.bf16 %v3376_v13  ;;  %v3368_v19 = vunpack.i.h.bf16 %v3366_v14  ;;  %v3367_v20 = vunpack.i.l.bf16 %v3366_v14 }
 0x10e   : > { %3405 = vrot.lane.b32.xlu0 %v3404_v15, %s4559_s19 }
 0x10f   : > { %v529_v21 = vsel %vm528_vm2, %v3367_v20, %v3368_v19  ;;  %v544_v27 = vsel %vm543_vm3, %v3377_v18, %v3378_v17 }
 0x110   : > { %v3381_v22 = vpop.permute.xlu1 %3380  ;;  %v537_v23 = vpop.permute.xlu0 %536  ;;  %v3409_v24 = vpack.i.bf16 %v3368_v19, %v529_v21  ;;  %v3424_v32 = vpack.i.bf16 %v544_v27, %v3377_v18 }
 0x111   : > { %v3382_v26 = vunpack.i.l.bf16 %v3381_v22  ;;  %v3383_v28 = vunpack.i.h.bf16 %v3381_v22 }
 0x112   : > { %3410 = vrot.lane.b32.xlu1 %v3409_v24, %s4559_s19  ;;  %3415 = vrot.lane.b32.xlu0 %v3414_v25, %s4559_s19 }
 0x113   : > { %v3419_v29 = vpack.i.bf16 %v3382_v26, %v537_v23  ;;  %v550_v37 = vsel %vm549_vm4, %v3382_v26, %v3383_v28 }
 0x114   : > { %v3386_v30 = vpop.permute.xlu0 %3385  ;;  %v3391_v31 = vpop.permute.xlu1 %3390 }
 0x115   : > { %v3388_v33 = vunpack.i.h.bf16 %v3386_v30  ;;  %v3387_v34 = vunpack.i.l.bf16 %v3386_v30  ;;  %v3392_v35 = vunpack.i.l.bf16 %v3391_v31  ;;  %v3393_v36 = vunpack.i.h.bf16 %v3391_v31 }
 0x116   : > { %3425 = vrot.lane.b32.xlu1 %v3424_v32, %s4559_s19  ;;  %3420 = vrot.lane.b32.xlu0 %v3419_v29, %s4559_s19  ;;  %v504_v32 = vld [vmem:[#allocation4 + $0x8] sm:$0xff] }
 0x117   : > { %v3429_v38 = vpack.i.bf16 %v3387_v34, %v550_v37  ;;  %v556_v39 = vsel %vm555_vm5, %v3387_v34, %v3388_v33  ;;  %v562_v45 = vsel %vm561_vm6, %v3392_v35, %v3393_v36  ;;  %v505_v33 = vld [vmem:[#allocation4 + $0x10] sm:$0xff]  ;;  %v506_v34 = vld [vmem:[#allocation4 + $0x18] sm:$0x3f]  ;;  %v511_v36 = vlaneseq }
 0x118   : > { %v3396_v41 = vpop.permute.xlu0 %3395  ;;  %v3434_v42 = vpack.i.bf16 %v3392_v35, %v556_v39  ;;  %v3401_v53 = vpop.permute.xlu1 %3400 }
 0x119   : > { %v3398_v43 = vunpack.i.h.bf16 %v3396_v41  ;;  %v3397_v44 = vunpack.i.l.bf16 %v3396_v41  ;;  %v3403_v54 = vunpack.i.h.bf16 %v3401_v53  ;;  %v3402_v55 = vunpack.i.l.bf16 %v3401_v53 }
 0x11a   : > { %3430 = vrot.lane.b32.xlu1 %v3429_v38, %s4559_s19  ;;  %3435 = vrot.lane.b32.xlu0 %v3434_v42, %s4559_s19  ;;  %v4867_v39 = vand.u32 127, %v511_v36 }
 0x11b   : > { %v3439_v46 = vpack.i.bf16 %v3397_v44, %v562_v45  ;;  %v568_v47 = vsel %vm567_vm8, %v3397_v44, %v3398_v43  ;;  %v628_v59 = vsel %vm627_vm9, %v3402_v55, %v3403_v54  ;;  %v779_v45 = vld [vmem:[#allocation2 + $0x28] sm:$0xff] }
 0x11c   : > { %vm749_vm11 = vcmp.lt.s32.totalorder %v4867_v39, 64 }
 0x11e   : > { %3440 = vrot.lane.b32.xlu1 %v3439_v46, %s4559_s19  ;;  %625 = vrot.lane.b32.xlu0 %v568_v47, %s4559_s19 }
 0x122   : > { %571 = vperm.xlu1 %3444, %v507_v49   ;;  %576 = vperm.xlu0 %3445, %v508_v50   ;;  %v778_v49 = vld [vmem:[#allocation2 + $0x10] sm:$0xff] }
 0x126   : > { %581 = vperm.xlu1 %3444, %v509_v51  }
 0x12a   : > { %586 = vperm.xlu1 %3444, %v510_v52  }
 0x180   : > { %v3406_v56 = vpop.permute.xlu0 %3405 }
 0x181   : > { %v3408_v57 = vunpack.i.h.bf16 %v3406_v56  ;;  %v3407_v58 = vunpack.i.l.bf16 %v3406_v56 }
 0x183   : > { %v629_v60 = vsel %vm627_vm9, %v3407_v58, %v3408_v57 }
 0x184   : > { %v3411_v61 = vpop.permute.xlu1 %3410  ;;  %v3416_v62 = vpop.permute.xlu0 %3415  ;;  %v3113_v63 = vpack.c.bf16 %v629_v60, %v628_v59 }
 0x185   : > { %v3413_v1 = vunpack.i.h.bf16 %v3411_v61  ;;  %v3412_v2 = vunpack.i.l.bf16 %v3411_v61  ;;  %v3418_v3 = vunpack.i.h.bf16 %v3416_v62  ;;  %v3417_v4 = vunpack.i.l.bf16 %v3416_v62 }
 0x186   : > { %3114 = vmatprep.subr.bf16.mxu0 %v3113_v63 }
 0x187   : > { %3116 = vmatpush3.bf16.msra.mxu0 %v3113_v63  ;;  %v630_v5 = vsel %vm627_vm9, %v3412_v2, %v3413_v1  ;;  %v631_v6 = vsel %vm627_vm9, %v3417_v4, %v3418_v3  ;;  %v781_v63 = vld [vmem:[#allocation2 + $0x58] sm:$0xff]  ;;  %v780_v4 = vld [vmem:[#allocation2 + $0x40] sm:$0xff] }
 0x188   : > { %v3426_v7 = vpop.permute.xlu1 %3425  ;;  %v3421_v8 = vpop.permute.xlu0 %3420  ;;  %v3117_v9 = vpack.c.bf16 %v631_v6, %v630_v5 }
 0x189   : > { %v3428_v10 = vunpack.i.h.bf16 %v3426_v7  ;;  %v3427_v11 = vunpack.i.l.bf16 %v3426_v7  ;;  %v3422_v12 = vunpack.i.l.bf16 %v3421_v8  ;;  %v3423_v17 = vunpack.i.h.bf16 %v3421_v8 }
 0x18a   : > { %3118 = vmatprep.subr.bf16.mxu0 %v3117_v9 }
 0x18b   : > { %3120 = vmatpush3.bf16.msra.mxu0 %v3117_v9  ;;  %v632_v13 = vsel %vm627_vm9, %v3427_v11, %v3428_v10 }
 0x18c   : > { %v3431_v14 = vpop.permute.xlu1 %3430  ;;  %v3436_v15 = vpop.permute.xlu0 %3435  ;;  %v3121_v16 = vpack.c.bf16 %v632_v13, %v3422_v12 }
 0x18d   : > { %v3433_v18 = vunpack.i.h.bf16 %v3431_v14  ;;  %v3432_v19 = vunpack.i.l.bf16 %v3431_v14  ;;  %v3437_v20 = vunpack.i.l.bf16 %v3436_v15  ;;  %v3438_v25 = vunpack.i.h.bf16 %v3436_v15 }
 0x18e   : > { %3122 = vmatprep.subr.bf16.mxu0 %v3121_v16 }
 0x18f   : > { %3124 = vmatpush3.bf16.msra.mxu0 %v3121_v16  ;;  %v633_v21 = vsel %vm627_vm9, %v3423_v17, %v3432_v19  ;;  %v634_v22 = vsel %vm627_vm9, %v3433_v18, %v3437_v20 }
 0x190   : > { %v3441_v23 = vpop.permute.xlu1 %3440  ;;  %v3125_v24 = vpack.c.bf16 %v634_v22, %v633_v21  ;;  %v626_v28 = vpop.permute.xlu0 %625 }
 0x191   : > { %v3443_v26 = vunpack.i.h.bf16 %v3441_v23  ;;  %v3442_v27 = vunpack.i.l.bf16 %v3441_v23 }
 0x192   : > { %3126 = vmatprep.subr.bf16.mxu0 %v3125_v24 }
 0x193   : > { %v635_v29 = vsel %vm627_vm9, %v3438_v25, %v3442_v27  ;;  %v636_v30 = vsel %vm627_vm9, %v3443_v26, %v626_v28  ;;  %3128 = vmatpush3.bf16.msra.mxu0 %v3125_v24 }
 0x194   : > { %v3129_v31 = vpack.c.bf16 %v636_v30, %v635_v29 }
 0x196   : > { %3130 = vmatprep.subr.bf16.mxu0 %v3129_v31 }
 0x197   : > { %3132 = vmatpush3.bf16.msra.mxu0 %v3129_v31 }
 0x19a   : > { %3081 = vmatmul.mubr.msk.f32.vlgmr.msra.gmra.mrb[0].mxu0 %vm647_vm7, %v504_v32 }
 0x19b   : > { %3083 = vmatprep.mubr.msk.f32.mxu0 %vm647_vm7, %v505_v33 }
 0x19e   : > { %3084 = vmatmul.mubr.msk.f32.gmra.mrb[2].mxu0 %vm647_vm7, %v506_v34 }
 0x1a1   : > { %v572_v35 = vpop.permute.xlu1 %571  ;;  %v577_v38 = vpop.permute.xlu0 %576 }
 0x1a5   : > { %v582_v37 = vpop.permute.xlu1 %581 }
 0x1a9   : > { %v587_v47 = vpop.permute.xlu1 %586 }
 0x26d   : > { %v3082_v40 = vpop.f32.mrb[0].mxu0 }
 0x26e   : > { %v732_v41 = vadd.f32 %v3082_v40, %v577_v38  ;;  %v726_v42 = vpop.f32.mrb[1].mxu0 }
 0x26f   : > { %v727_v43 = vadd.f32 %v726_v42, %v572_v35 }
 0x270   : > { %v746_v44 = vmax.f32 %v732_v41, 0.0 }
 0x271   : > { %v745_v46 = vmax.f32 %v727_v43, 0.0  ;;  %v3085_v48 = vpop.f32.mrb[2].mxu0 }
 0x272   : > { %v751_v50 = vsel %vm749_vm11, %v746_v44, 0.0  ;;  %v742_v51 = vadd.f32 %v3085_v48, %v587_v47  ;;  %v736_v52 = vpop.f32.mrb[3].mxu0 }
 0x273   : > { %v750_v53 = vsel %vm749_vm11, %v745_v46, 0.0  ;;  %v3446_v54 = vpack.i.bf16 %v779_v45, %v751_v50  ;;  %v3456_v59 = vpack.i.bf16 %v751_v50, %v4549_v0  ;;  %v737_v61 = vadd.f32 %v736_v52, %v582_v37 }
 0x274   : > { %v748_v55 = vmax.f32 %v742_v51, 0.0  ;;  %v3471_v56 = vpack.i.bf16 %v778_v49, %v750_v53  ;;  %v3556_v57 = vpack.i.bf16 %v751_v50, %v750_v53  ;;  %v3481_v60 = vpack.i.bf16 %v750_v53, %v4549_v0 }
 0x275   : > { %3447 = vrot.lane.b32.xlu1 %v3446_v54, %s4555_s23  ;;  %v747_v1 = vmax.f32 %v737_v61, 0.0 }
 0x276   : > { %v753_v58 = vsel %vm749_vm11, %v748_v55, 0.0  ;;  %3472 = vrot.lane.b32.xlu0 %v3471_v56, %s4555_s23 }
 0x277   : > { %757 = vst [vmem:[#allocation2 + $0x50] sm:$0x3f] %v753_v58  ;;  %v752_v3 = vsel %vm749_vm11, %v747_v1, 0.0 }
 0x278   : > { %v3531_v5 = vpack.i.bf16 %v780_v4, %v752_v3  ;;  %v3541_v7 = vpack.i.bf16 %v752_v3, %v4549_v0 }
 0x279   : > { %3452 = vrot.lane.b32.xlu1 %v3446_v54, %s4552_s12 }
 0x27a   : > { %3477 = vrot.lane.b32.xlu0 %v3471_v56, %s4552_s12 }
 0x27d   : > { %3457 = vrot.lane.b32.xlu1 %v3456_v59, %s4551_s29 }
 0x27e   : > { %3482 = vrot.lane.b32.xlu0 %v3481_v60, %s4551_s29  ;;  %v777_v62 = vld [vmem:[#allocation2 + $0x50] sm:$0xff] }
 0x27f   : > { %v3501_v2 = vpack.i.bf16 %v781_v63, %v777_v62  ;;  %v3516_v6 = vpack.i.bf16 %v777_v62, %v4549_v0  ;;  %v3576_v8 = vpack.i.bf16 %v777_v62, %v752_v3 }
 0x281   : > { %3462 = vrot.lane.b32.xlu1 %v3446_v54, %s4554_s16 }
 0x282   : > { %3487 = vrot.lane.b32.xlu0 %v3471_v56, %s4554_s16 }
 0x285   : > { %3467 = vrot.lane.b32.xlu1 %v3456_v59, %s4553_s15 }
 0x286   : > { %3492 = vrot.lane.b32.xlu0 %v3481_v60, %s4553_s15 }
 0x289   : > { %3502 = vrot.lane.b32.xlu1 %v3501_v2, %s4555_s23 }
 0x28a   : > { %3497 = vrot.lane.b32.xlu0 %v3471_v56, %s4556_s27 }
 0x28d   : > { %3507 = vrot.lane.b32.xlu1 %v3446_v54, %s4556_s27 }
 0x28e   : > { %3532 = vrot.lane.b32.xlu0 %v3531_v5, %s4555_s23 }
 0x291   : > { %3512 = vrot.lane.b32.xlu1 %v3501_v2, %s4552_s12 }
 0x292   : > { %3537 = vrot.lane.b32.xlu0 %v3531_v5, %s4552_s12 }
 0x295   : > { %3517 = vrot.lane.b32.xlu1 %v3516_v6, %s4551_s29 }
 0x296   : > { %3542 = vrot.lane.b32.xlu0 %v3541_v7, %s4551_s29 }
 0x299   : > { %3522 = vrot.lane.b32.xlu1 %v3501_v2, %s4554_s16 }
 0x29a   : > { %3547 = vrot.lane.b32.xlu0 %v3531_v5, %s4554_s16 }
 0x29d   : > { %3527 = vrot.lane.b32.xlu1 %v3516_v6, %s4553_s15 }
 0x29e   : > { %3552 = vrot.lane.b32.xlu0 %v3541_v7, %s4553_s15 }
 0x2a1   : > { %3572 = vrot.lane.b32.xlu1 %v3531_v5, %s4556_s27 }
 0x2a2   : > { %3557 = vrot.lane.b32.xlu0 %v3556_v57, %s4550_s28 }
 0x2a5   : > { %3577 = vrot.lane.b32.xlu1 %v3576_v8, %s4550_s28 }
 0x2a6   : > { %3562 = vrot.lane.b32.xlu0 %v3501_v2, %s4556_s27 }
 0x2a9   : > { %3582 = vrot.lane.b32.xlu1 %v3456_v59, %s4561_s30 }
 0x2aa   : > { %3567 = vrot.lane.b32.xlu0 %v3481_v60, %s4561_s30 }
 0x2ad   : > { %3587 = vrot.lane.b32.xlu1 %v3516_v6, %s4561_s30 }
 0x2ae   : > { %3592 = vrot.lane.b32.xlu0 %v3541_v7, %s4561_s30 }
 0x2e7   : > { %v3448_v0 = vpop.permute.xlu1 %3447 }
 0x2e8   : > { %v3450_v9 = vunpack.i.h.bf16 %v3448_v0  ;;  %v3449_v10 = vunpack.i.l.bf16 %v3448_v0  ;;  %v3473_v11 = vpop.permute.xlu0 %3472 }
 0x2e9   : > { %v3475_v12 = vunpack.i.h.bf16 %v3473_v11  ;;  %v3474_v13 = vunpack.i.l.bf16 %v3473_v11 }
 0x2ea   : > { %v860_v14 = vsel %vm858_vm12, %v3449_v10, %v3450_v9 }
 0x2eb   : > { %v3453_v15 = vpop.permute.xlu1 %3452  ;;  %v3596_v16 = vpack.i.bf16 %v860_v14, %v3449_v10  ;;  %v859_v17 = vsel %vm858_vm12, %v3474_v13, %v3475_v12 }
 0x2ec   : > { %v3455_v18 = vunpack.i.h.bf16 %v3453_v15  ;;  %v3454_v19 = vunpack.i.l.bf16 %v3453_v15  ;;  %v3478_v20 = vpop.permute.xlu0 %3477  ;;  %v3621_v21 = vpack.i.bf16 %v859_v17, %v3474_v13 }
 0x2ed   : > { %v3480_v22 = vunpack.i.h.bf16 %v3478_v20  ;;  %v3479_v23 = vunpack.i.l.bf16 %v3478_v20  ;;  %3597 = vrot.lane.b32.xlu1 %v3596_v16, %s4561_s30 }
 0x2ee   : > { %3622 = vrot.lane.b32.xlu0 %v3621_v21, %s4561_s30  ;;  %v880_v24 = vsel %vm543_vm3, %v3454_v19, %v3455_v18 }
 0x2ef   : > { %v3458_v25 = vpop.permute.xlu1 %3457  ;;  %v3601_v26 = vpack.i.bf16 %v880_v24, %v3454_v19  ;;  %v879_v27 = vsel %vm543_vm3, %v3479_v23, %v3480_v22 }
 0x2f0   : > { %v3460_v28 = vunpack.i.h.bf16 %v3458_v25  ;;  %v3459_v29 = vunpack.i.l.bf16 %v3458_v25  ;;  %v3483_v30 = vpop.permute.xlu0 %3482  ;;  %v3626_v31 = vpack.i.bf16 %v879_v27, %v3479_v23 }
 0x2f1   : > { %v3485_v32 = vunpack.i.h.bf16 %v3483_v30  ;;  %v3484_v33 = vunpack.i.l.bf16 %v3483_v30  ;;  %3602 = vrot.lane.b32.xlu1 %v3601_v26, %s4561_s30 }
 0x2f2   : > { %3627 = vrot.lane.b32.xlu0 %v3626_v31, %s4561_s30  ;;  %v807_v34 = vsel %vm522_vm0, %v3459_v29, %v3460_v28 }
 0x2f3   : > { %v3463_v35 = vpop.permute.xlu1 %3462  ;;  %v3606_v36 = vpack.i.bf16 %v3460_v28, %v807_v34  ;;  %v806_v37 = vsel %vm522_vm0, %v3484_v33, %v3485_v32 }
 0x2f4   : > { %v3465_v38 = vunpack.i.h.bf16 %v3463_v35  ;;  %v3464_v40 = vunpack.i.l.bf16 %v3463_v35  ;;  %v3488_v41 = vpop.permute.xlu0 %3487  ;;  %v3631_v42 = vpack.i.bf16 %v3485_v32, %v806_v37 }
 0x2f5   : > { %v3490_v43 = vunpack.i.h.bf16 %v3488_v41  ;;  %v3489_v44 = vunpack.i.l.bf16 %v3488_v41  ;;  %3607 = vrot.lane.b32.xlu1 %v3606_v36, %s4561_s30 }
 0x2f6   : > { %3632 = vrot.lane.b32.xlu0 %v3631_v42, %s4561_s30  ;;  %v900_v45 = vsel %vm549_vm4, %v3464_v40, %v3465_v38 }
 0x2f7   : > { %v3468_v46 = vpop.permute.xlu1 %3467  ;;  %v3611_v47 = vpack.i.bf16 %v900_v45, %v3464_v40  ;;  %v899_v48 = vsel %vm549_vm4, %v3489_v44, %v3490_v43 }
 0x2f8   : > { %v3470_v49 = vunpack.i.h.bf16 %v3468_v46  ;;  %v3469_v50 = vunpack.i.l.bf16 %v3468_v46  ;;  %v3493_v51 = vpop.permute.xlu0 %3492  ;;  %v3636_v52 = vpack.i.bf16 %v899_v48, %v3489_v44 }
 0x2f9   : > { %v3495_v53 = vunpack.i.h.bf16 %v3493_v51  ;;  %v3494_v54 = vunpack.i.l.bf16 %v3493_v51  ;;  %3612 = vrot.lane.b32.xlu1 %v3611_v47, %s4561_s30 }
 0x2fa   : > { %3637 = vrot.lane.b32.xlu0 %v3636_v52, %s4561_s30  ;;  %v827_v55 = vsel %vm528_vm2, %v3469_v50, %v3470_v49 }
 0x2fb   : > { %v3503_v56 = vpop.permute.xlu1 %3502  ;;  %v3616_v57 = vpack.i.bf16 %v3470_v49, %v827_v55  ;;  %v826_v58 = vsel %vm528_vm2, %v3494_v54, %v3495_v53 }
 0x2fc   : > { %v3505_v59 = vunpack.i.h.bf16 %v3503_v56  ;;  %v3504_v60 = vunpack.i.l.bf16 %v3503_v56  ;;  %v3498_v61 = vpop.permute.xlu0 %3497  ;;  %v3641_v62 = vpack.i.bf16 %v3495_v53, %v826_v58 }
 0x2fd   : > { %v3500_v63 = vunpack.i.h.bf16 %v3498_v61  ;;  %v3499_v1 = vunpack.i.l.bf16 %v3498_v61  ;;  %3617 = vrot.lane.b32.xlu1 %v3616_v57, %s4561_s30 }
 0x2fe   : > { %3642 = vrot.lane.b32.xlu0 %v3641_v62, %s4561_s30  ;;  %v862_v2 = vsel %vm858_vm12, %v3504_v60, %v3505_v59 }
 0x2ff   : > { %v4933_v3 = vpop.permute.xlu1 %3507  ;;  %v3651_v4 = vpack.i.bf16 %v862_v2, %v3504_v60  ;;  %v919_v5 = vsel %vm555_vm5, %v3499_v1, %v3500_v63  ;;  %v759_v63 = vld [vmem:[#allocation6 + $0x8] sm:$0xff] }
 0x300   : > { %v3533_v6 = vpop.permute.xlu0 %3532  ;;  %v3646_v7 = vpack.i.bf16 %v919_v5, %v3499_v1  ;;  %v3510_v38 = vunpack.i.h.bf16 %v4933_v3  ;;  %v3509_v43 = vunpack.i.l.bf16 %v4933_v3  ;;  %1188 = vmatprep.mubr.f32.mxu1 %v759_v63 }
 0x301   : > { %v3535_v8 = vunpack.i.h.bf16 %v3533_v6  ;;  %v3534_v0 = vunpack.i.l.bf16 %v3533_v6  ;;  %3652 = vrot.lane.b32.xlu1 %v3651_v4, %s4561_s30  ;;  %v766_v6 = vld [vmem:[%s5553_s4] sm:$0xff] }
 0x302   : > { %3647 = vrot.lane.b32.xlu0 %v3646_v7, %s4561_s30  ;;  %v920_v58 = vsel %vm555_vm5, %v3509_v43, %v3510_v38  ;;  %v767_v7 = vld [vmem:[%s5553_s4 + $0x8] sm:$0xff] }
 0x303   : > { %v3513_v9 = vpop.permute.xlu1 %3512  ;;  %v861_v10 = vsel %vm858_vm12, %v3534_v0, %v3535_v8  ;;  %v3676_v59 = vpack.i.bf16 %v920_v58, %v3509_v43  ;;  %v768_v8 = vld [vmem:[%s5553_s4 + $0x10] sm:$0xff] }
 0x304   : > { %v3515_v11 = vunpack.i.h.bf16 %v3513_v9  ;;  %v3514_v12 = vunpack.i.l.bf16 %v3513_v9  ;;  %v3538_v13 = vpop.permute.xlu0 %3537  ;;  %v3681_v14 = vpack.i.bf16 %v861_v10, %v3534_v0  ;;  %v769_v0 = vld [vmem:[%s5553_s4 + $0x18] sm:$0x3f] }
 0x305   : > { %v3540_v15 = vunpack.i.h.bf16 %v3538_v13  ;;  %v3539_v16 = vunpack.i.l.bf16 %v3538_v13 }
 0x306   : > { %3682 = vrot.lane.b32.xlu0 %v3681_v14, %s4561_s30  ;;  %v882_v17 = vsel %vm543_vm3, %v3514_v12, %v3515_v11 }
 0x307   : > { %v3518_v18 = vpop.permute.xlu1 %3517  ;;  %v3656_v19 = vpack.i.bf16 %v882_v17, %v3514_v12  ;;  %v881_v20 = vsel %vm543_vm3, %v3539_v16, %v3540_v15 }
 0x308   : > { %v3520_v21 = vunpack.i.h.bf16 %v3518_v18  ;;  %v3519_v22 = vunpack.i.l.bf16 %v3518_v18  ;;  %v3543_v23 = vpop.permute.xlu0 %3542  ;;  %v3686_v24 = vpack.i.bf16 %v881_v20, %v3539_v16 }
 0x309   : > { %v3545_v25 = vunpack.i.h.bf16 %v3543_v23  ;;  %v3544_v26 = vunpack.i.l.bf16 %v3543_v23  ;;  %3657 = vrot.lane.b32.xlu1 %v3656_v19, %s4561_s30 }
 0x30a   : > { %3687 = vrot.lane.b32.xlu0 %v3686_v24, %s4561_s30  ;;  %v809_v27 = vsel %vm522_vm0, %v3519_v22, %v3520_v21 }
 0x30b   : > { %v3523_v28 = vpop.permute.xlu1 %3522  ;;  %v3661_v29 = vpack.i.bf16 %v3520_v21, %v809_v27  ;;  %v808_v30 = vsel %vm522_vm0, %v3544_v26, %v3545_v25 }
 0x30c   : > { %v3525_v31 = vunpack.i.h.bf16 %v3523_v28  ;;  %v3524_v32 = vunpack.i.l.bf16 %v3523_v28  ;;  %v3548_v33 = vpop.permute.xlu0 %3547  ;;  %v3691_v34 = vpack.i.bf16 %v3545_v25, %v808_v30 }
 0x30d   : > { %v3550_v35 = vunpack.i.h.bf16 %v3548_v33  ;;  %v3549_v36 = vunpack.i.l.bf16 %v3548_v33  ;;  %3662 = vrot.lane.b32.xlu1 %v3661_v29, %s4561_s30 }
 0x30e   : > { %3692 = vrot.lane.b32.xlu0 %v3691_v34, %s4561_s30  ;;  %v902_v37 = vsel %vm549_vm4, %v3524_v32, %v3525_v31 }
 0x30f   : > { %v3528_v40 = vpop.permute.xlu1 %3527  ;;  %v3666_v41 = vpack.i.bf16 %v902_v37, %v3524_v32  ;;  %v901_v42 = vsel %vm549_vm4, %v3549_v36, %v3550_v35 }
 0x310   : > { %v3530_v44 = vunpack.i.h.bf16 %v3528_v40  ;;  %v3529_v45 = vunpack.i.l.bf16 %v3528_v40  ;;  %v3553_v46 = vpop.permute.xlu0 %3552  ;;  %v3696_v47 = vpack.i.bf16 %v901_v42, %v3549_v36 }
 0x311   : > { %v3555_v48 = vunpack.i.h.bf16 %v3553_v46  ;;  %v3554_v49 = vunpack.i.l.bf16 %v3553_v46  ;;  %3667 = vrot.lane.b32.xlu1 %v3666_v41, %s4561_s30 }
 0x312   : > { %3697 = vrot.lane.b32.xlu0 %v3696_v47, %s4561_s30  ;;  %v829_v50 = vsel %vm528_vm2, %v3529_v45, %v3530_v44 }
 0x313   : > { %v3573_v51 = vpop.permute.xlu1 %3572  ;;  %v3671_v52 = vpack.i.bf16 %v3530_v44, %v829_v50  ;;  %v828_v53 = vsel %vm528_vm2, %v3554_v49, %v3555_v48  ;;  %vm1933_vm2 = vcmask 588800  }
 0x314   : > { %v3575_v54 = vunpack.i.h.bf16 %v3573_v51  ;;  %v3574_v55 = vunpack.i.l.bf16 %v3573_v51  ;;  %v3558_v56 = vpop.permute.xlu0 %3557  ;;  %v3701_v57 = vpack.i.bf16 %v3555_v48, %v828_v53 }
 0x315   : > { %3672 = vrot.lane.b32.xlu1 %v3671_v52, %s4561_s30 }
 0x316   : > { %3702 = vrot.lane.b32.xlu0 %v3701_v57, %s4561_s30  ;;  %v921_v62 = vsel %vm555_vm5, %v3574_v55, %v3575_v54 }
 0x317   : > { %v3578_v60 = vpop.permute.xlu1 %3577  ;;  %v3716_v3 = vpack.i.bf16 %v921_v62, %v3574_v55 }
 0x318   : > { %v3563_v61 = vpop.permute.xlu0 %3562 }
 0x319   : > { %v3565_v1 = vunpack.i.h.bf16 %v3563_v61  ;;  %v3564_v2 = vunpack.i.l.bf16 %v3563_v61  ;;  %3677 = vrot.lane.b32.xlu1 %v3676_v59, %s4561_s30 }
 0x31a   : > { %3707 = vrot.lane.b32.xlu0 %v3558_v56, %s4561_s30 }
 0x31b   : > { %v922_v4 = vsel %vm555_vm5, %v3564_v2, %v3565_v1  ;;  %v3583_v9 = vpop.permute.xlu1 %3582 }
 0x31c   : > { %v3711_v5 = vpack.i.bf16 %v922_v4, %v3564_v2  ;;  %v3568_v10 = vpop.permute.xlu0 %3567  ;;  %v3585_v13 = vunpack.i.h.bf16 %v3583_v9  ;;  %v3584_v14 = vunpack.i.l.bf16 %v3583_v9 }
 0x31d   : > { %3717 = vrot.lane.b32.xlu1 %v3716_v3, %s4561_s30  ;;  %v3570_v15 = vunpack.i.h.bf16 %v3568_v10  ;;  %v3569_v16 = vunpack.i.l.bf16 %v3568_v10 }
 0x31e   : > { %3712 = vrot.lane.b32.xlu0 %v3711_v5, %s4561_s30  ;;  %v1065_v25 = vsel %vm1063_vm13, %v3584_v14, %v3585_v13 }
 0x31f   : > { %v3588_v11 = vpop.permute.xlu1 %3587  ;;  %v1064_v24 = vsel %vm1063_vm13, %v3569_v16, %v3570_v15 }
 0x320   : > { %v3593_v12 = vpop.permute.xlu0 %3592  ;;  %v3135_v30 = vpack.c.bf16 %v1065_v25, %v1064_v24  ;;  %v3590_v37 = vunpack.i.h.bf16 %v3588_v11  ;;  %v3589_v38 = vunpack.i.l.bf16 %v3588_v11 }
 0x321   : > { %3722 = vrot.lane.b32.xlu1 %v3578_v60, %s4561_s30  ;;  %v3595_v40 = vunpack.i.h.bf16 %v3593_v12  ;;  %v3594_v41 = vunpack.i.l.bf16 %v3593_v12 }
 0x322   : > { %925 = vperm.xlu0 %3445, %v766_v6   ;;  %v1067_v54 = vsel %vm1063_vm13, %v3589_v38, %v3590_v37 }
 0x323   : > { %v1066_v53 = vsel %vm1063_vm13, %v3594_v41, %v3595_v40 }
 0x324   : > { %v3139_v5 = vpack.c.bf16 %v1067_v54, %v1066_v53 }
 0x325   : > { %930 = vperm.xlu1 %3444, %v767_v7  }
 0x326   : > { %935 = vperm.xlu0 %3445, %v768_v8  }
 0x329   : > { %940 = vperm.xlu1 %3444, %v769_v0  }
 0x35f   : > { %v3598_v17 = vpop.permute.xlu1 %3597 }
 0x360   : > { %v3600_v18 = vunpack.i.h.bf16 %v3598_v17  ;;  %v3599_v19 = vunpack.i.l.bf16 %v3598_v17  ;;  %v3623_v20 = vpop.permute.xlu0 %3622 }
 0x361   : > { %v3625_v21 = vunpack.i.h.bf16 %v3623_v20  ;;  %v3624_v22 = vunpack.i.l.bf16 %v3623_v20 }
 0x362   : > { %v1077_v23 = vsel %vm1063_vm13, %v3599_v19, %v3600_v18 }
 0x363   : > { %v3603_v26 = vpop.permute.xlu1 %3602  ;;  %v1076_v27 = vsel %vm1063_vm13, %v3624_v22, %v3625_v21 }
 0x364   : > { %v3628_v28 = vpop.permute.xlu0 %3627  ;;  %v3133_v29 = vpack.c.bf16 %v1077_v23, %v1076_v27  ;;  %v3605_v44 = vunpack.i.h.bf16 %v3603_v26  ;;  %v3604_v45 = vunpack.i.l.bf16 %v3603_v26 }
 0x365   : > { %v3630_v46 = vunpack.i.h.bf16 %v3628_v28  ;;  %v3629_v47 = vunpack.i.l.bf16 %v3628_v28 }
 0x366   : > { %3134 = vmatprep.subr.bf16.mxu1 %v3133_v29  ;;  %v1081_v63 = vsel %vm1063_vm13, %v3604_v45, %v3605_v44 }
 0x367   : > { %v3608_v31 = vpop.permute.xlu1 %3607  ;;  %3136 = vmatpush3.bf16.msra.mxu1 %v3135_v30  ;;  %v1080_v62 = vsel %vm1063_vm13, %v3629_v47, %v3630_v46 }
 0x368   : > { %v3633_v32 = vpop.permute.xlu0 %3632  ;;  %v3610_v50 = vunpack.i.h.bf16 %v3608_v31  ;;  %v3609_v51 = vunpack.i.l.bf16 %v3608_v31  ;;  %v3141_v11 = vpack.c.bf16 %v1081_v63, %v1080_v62 }
 0x369   : > { %v3635_v55 = vunpack.i.h.bf16 %v3633_v32  ;;  %v3634_v56 = vunpack.i.l.bf16 %v3633_v32 }
 0x36a   : > { %v1069_v0 = vsel %vm1063_vm13, %v3609_v51, %v3610_v50 }
 0x36b   : > { %v4982_v33 = vpop.permute.xlu1 %3612  ;;  %v1068_v8 = vsel %vm1063_vm13, %v3634_v56, %v3635_v55 }
 0x36c   : > { %v4984_v34 = vpop.permute.xlu0 %3637  ;;  %v3615_v9 = vunpack.i.h.bf16 %v4982_v33  ;;  %v3614_v10 = vunpack.i.l.bf16 %v4982_v33  ;;  %v3143_v20 = vpack.c.bf16 %v1069_v0, %v1068_v8 }
 0x36d   : > { %v3640_v12 = vunpack.i.h.bf16 %v4984_v34  ;;  %v3639_v13 = vunpack.i.l.bf16 %v4984_v34 }
 0x36e   : > { %v1085_v32 = vsel %vm1063_vm13, %v3614_v10, %v3615_v9 }
 0x36f   : > { %v4986_v35 = vpop.permute.xlu1 %3617  ;;  %v1084_v31 = vsel %vm1063_vm13, %v3639_v13, %v3640_v12 }
 0x370   : > { %v4988_v36 = vpop.permute.xlu0 %3642  ;;  %v3620_v21 = vunpack.i.h.bf16 %v4986_v35  ;;  %v3619_v22 = vunpack.i.l.bf16 %v4986_v35  ;;  %v3149_v41 = vpack.c.bf16 %v1085_v32, %v1084_v31 }
 0x371   : > { %v3645_v25 = vunpack.i.h.bf16 %v4988_v36  ;;  %v3644_v26 = vunpack.i.l.bf16 %v4988_v36 }
 0x373   : > { %v3653_v42 = vpop.permute.xlu1 %3652  ;;  %v1072_v36 = vsel %vm1063_vm13, %v3644_v26, %v3645_v25 }
 0x374   : > { %v4990_v43 = vpop.permute.xlu0 %3647  ;;  %v3655_v48 = vunpack.i.h.bf16 %v3653_v42  ;;  %v3654_v49 = vunpack.i.l.bf16 %v3653_v42  ;;  %v1073_v42 = vsel %vm1063_vm13, %v3619_v22, %v3620_v21  ;;  %v762_v21 = vld [vmem:[#allocation6 + $0x20] sm:$0xff]  ;;  %v765_v22 = vld [vmem:[#allocation6 + $0x38] sm:$0x3f] }
 0x375   : > { %v3650_v53 = vunpack.i.h.bf16 %v4990_v43  ;;  %v3649_v54 = vunpack.i.l.bf16 %v4990_v43 }
 0x376   : > { %v1079_v61 = vsel %vm1063_vm13, %v3654_v49, %v3655_v48 }
 0x378   : > { %v3683_v52 = vpop.permute.xlu0 %3682 }
 0x379   : > { %v3685_v57 = vunpack.i.h.bf16 %v3683_v52  ;;  %v3684_v58 = vunpack.i.l.bf16 %v3683_v52  ;;  %v3151_v52 = vpack.c.bf16 %v1073_v42, %v1072_v36 }
 0x37b   : > { %v3658_v59 = vpop.permute.xlu1 %3657  ;;  %v1078_v60 = vsel %vm1063_vm13, %v3684_v58, %v3685_v57 }
 0x37c   : > { %v3660_v1 = vunpack.i.h.bf16 %v3658_v59  ;;  %v3659_v2 = vunpack.i.l.bf16 %v3658_v59  ;;  %v3688_v3 = vpop.permute.xlu0 %3687  ;;  %v3137_v4 = vpack.c.bf16 %v1079_v61, %v1078_v60 }
 0x37d   : > { %v3690_v6 = vunpack.i.h.bf16 %v3688_v3  ;;  %v3689_v7 = vunpack.i.l.bf16 %v3688_v3 }
 0x37e   : > { %3138 = vmatprep.subr.bf16.mxu1 %v3137_v4  ;;  %v1083_v16 = vsel %vm1063_vm13, %v3659_v2, %v3660_v1  ;;  %v1088_v2 = vsel %vm1063_vm13, %v3649_v54, %v3650_v53 }
 0x37f   : > { %v3663_v14 = vpop.permute.xlu1 %3662  ;;  %3140 = vmatpush3.bf16.msra.mxu1 %v3139_v5  ;;  %v1082_v15 = vsel %vm1063_vm13, %v3689_v7, %v3690_v6 }
 0x380   : > { %v3665_v17 = vunpack.i.h.bf16 %v3663_v14  ;;  %v3664_v18 = vunpack.i.l.bf16 %v3663_v14  ;;  %v3693_v19 = vpop.permute.xlu0 %3692  ;;  %3142 = vmatprep.subr.bf16.mxu1 %v3141_v11  ;;  %v3145_v27 = vpack.c.bf16 %v1083_v16, %v1082_v15 }
 0x381   : > { %v3695_v23 = vunpack.i.h.bf16 %v3693_v19  ;;  %v3694_v24 = vunpack.i.l.bf16 %v3693_v19  ;;  %v760_v19 = vld [vmem:[#allocation6 + $0x10] sm:$0xff] }
 0x382   : > { %v1071_v28 = vsel %vm1063_vm13, %v3664_v18, %v3665_v17  ;;  %v758_v17 = vld [vmem:[#allocation6] sm:$0xff]  ;;  %v761_v18 = vld [vmem:[#allocation6 + $0x18] sm:$0xff] }
 0x383   : > { %v3668_v29 = vpop.permute.xlu1 %3667  ;;  %3144 = vmatpush3.bf16.msra.mxu1 %v3143_v20  ;;  %v1070_v30 = vsel %vm1063_vm13, %v3694_v24, %v3695_v23  ;;  %v763_v20 = vld [vmem:[#allocation6 + $0x28] sm:$0xff]  ;;  %v764_v23 = vld [vmem:[#allocation6 + $0x30] sm:$0x3f] }
 0x384   : > { %v3670_v33 = vunpack.i.h.bf16 %v3668_v29  ;;  %v3669_v34 = vunpack.i.l.bf16 %v3668_v29  ;;  %v3698_v35 = vpop.permute.xlu0 %3697  ;;  %3146 = vmatprep.subr.bf16.mxu1 %v3145_v27  ;;  %v3147_v37 = vpack.c.bf16 %v1071_v28, %v1070_v30 }
 0x385   : > { %v3700_v38 = vunpack.i.h.bf16 %v3698_v35  ;;  %v3699_v40 = vunpack.i.l.bf16 %v3698_v35 }
 0x386   : > { %v1087_v46 = vsel %vm1063_vm13, %v3669_v34, %v3670_v33 }
 0x387   : > { %v3673_v44 = vpop.permute.xlu1 %3672  ;;  %3148 = vmatpush3.bf16.msra.mxu1 %v3147_v37  ;;  %v1086_v45 = vsel %vm1063_vm13, %v3699_v40, %v3700_v38  ;;  %v5028_v40 = vld [vmem:[#allocation2 + $0x78] sm:$0xff] }
 0x388   : > { %v3675_v47 = vunpack.i.h.bf16 %v3673_v44  ;;  %v3674_v48 = vunpack.i.l.bf16 %v3673_v44  ;;  %v3703_v49 = vpop.permute.xlu0 %3702  ;;  %3150 = vmatprep.subr.bf16.mxu1 %v3149_v41  ;;  %v3153_v55 = vpack.c.bf16 %v1087_v46, %v1086_v45 }
 0x389   : > { %v3705_v50 = vunpack.i.h.bf16 %v3703_v49  ;;  %v3704_v51 = vunpack.i.l.bf16 %v3703_v49 }
 0x38a   : > { %v1075_v56 = vsel %vm1063_vm13, %v3674_v48, %v3675_v47 }
 0x38b   : > { %v3678_v57 = vpop.permute.xlu1 %3677  ;;  %3152 = vmatpush3.bf16.msra.mxu1 %v3151_v52  ;;  %v1074_v58 = vsel %vm1063_vm13, %v3704_v51, %v3705_v50 }
 0x38c   : > { %v3680_v59 = vunpack.i.h.bf16 %v3678_v57  ;;  %v3679_v60 = vunpack.i.l.bf16 %v3678_v57  ;;  %v3708_v61 = vpop.permute.xlu0 %3707  ;;  %3154 = vmatprep.subr.bf16.mxu1 %v3153_v55  ;;  %v3155_v62 = vpack.c.bf16 %v1075_v56, %v1074_v58 }
 0x38d   : > { %v3710_v63 = vunpack.i.h.bf16 %v3708_v61  ;;  %v3709_v1 = vunpack.i.l.bf16 %v3708_v61  ;;  %v1246_v61 = vld [vmem:[#allocation3 + $0x40] sm:$0xff] }
 0x38e   : > { %v1089_v3 = vsel %vm1063_vm13, %v3679_v60, %v3680_v59  ;;  %v1244_v59 = vld [vmem:[#allocation3 + $0x10] sm:$0xff] }
 0x38f   : > { %v3718_v4 = vpop.permute.xlu1 %3717  ;;  %3156 = vmatpush3.bf16.msra.mxu1 %v3155_v62  ;;  %v3157_v43 = vpack.c.bf16 %v1089_v3, %v1088_v2  ;;  %v3159_v9 = vpack.c.bf16 %v3710_v63, %v3709_v1  ;;  %v1245_v3 = vld [vmem:[#allocation3 + $0x28] sm:$0xff] }
 0x390   : > { %v3720_v5 = vunpack.i.h.bf16 %v3718_v4  ;;  %v3719_v6 = vunpack.i.l.bf16 %v3718_v4  ;;  %v3713_v7 = vpop.permute.xlu0 %3712 }
 0x391   : > { %v3715_v8 = vunpack.i.h.bf16 %v3713_v7  ;;  %v3714_v0 = vunpack.i.l.bf16 %v3713_v7  ;;  %3158 = vmatprep.subr.bf16.mxu1 %v3157_v43  ;;  %v1247_v43 = vld [vmem:[#allocation3 + $0x58] sm:$0xff] }
 0x392   : > { %v1090_v10 = vsel %vm1063_vm13, %v3719_v6, %v3720_v5  ;;  %v4563_v6 = vmov 0.0|0.0  }
 0x393   : > { %v3723_v11 = vpop.permute.xlu1 %3722  ;;  %3160 = vmatpush3.bf16.msra.mxu1 %v3159_v9  ;;  %v1091_v12 = vsel %vm1063_vm13, %v3714_v0, %v3715_v8  ;;  %3165 = vmatprep.subr.bf16.mxu0 %v4563_v6 }
 0x394   : > { %v3725_v13 = vunpack.i.h.bf16 %v3723_v11  ;;  %v3724_v14 = vunpack.i.l.bf16 %v3723_v11  ;;  %v3161_v15 = vpack.c.bf16 %v1091_v12, %v1090_v10 }
 0x396   : > { %3162 = vmatprep.subr.bf16.mxu1 %v3161_v15  ;;  %v3163_v16 = vpack.c.bf16 %v3725_v13, %v3724_v14 }
 0x398   : > { %3164 = vmatpush3.bf16.msra.mxu1 %v3163_v16 }
 0x399   : > { %3201 = vmatprep.subr.bf16.mxu1 %v4563_v6 }
 0x39b   : > { %1189 = vmatmul.mubr.f32.vlgmr.msra.gmra.mrb[0].mxu1 %v758_v17 }
 0x39c   : > { %1193 = vmatprep.mubr.f32.mxu1 %v761_v18 }
 0x39f   : > { %1194 = vmatmul.mubr.f32.gmra.mrb[2].mxu1 %v760_v19 }
 0x3a0   : > { %1198 = vmatprep.mubr.f32.mxu1 %v763_v20 }
 0x3a1   : > { %v926_v27 = vpop.permute.xlu0 %925 }
 0x3a3   : > { %1199 = vmatmul.mubr.f32.gmra.mrb[4].mxu1 %v762_v21 }
 0x3a4   : > { %1203 = vmatprep.mubr.f32.mxu1 %v765_v22  ;;  %v931_v33 = vpop.permute.xlu1 %930 }
 0x3a5   : > { %v936_v44 = vpop.permute.xlu0 %935 }
 0x3a7   : > { %1204 = vmatmul.mubr.f32.gmra.mrb[6].mxu1 %v764_v23 }
 0x3a8   : > { %v941_v53 = vpop.permute.xlu1 %940 }
 0x46e   : > { %v2985_v24 = vpop.f32.mrb[0].mxu1 }
 0x46f   : > { %v2986_v25 = vpop.f32.mrb[1].mxu1 }
 0x470   : > { %v2987_v26 = vadd.f32 %v2986_v25, %v2985_v24 }
 0x472   : > { %v1191_v28 = vadd.f32 %v2987_v26, %v926_v27  ;;  %v2988_v29 = vpop.f32.mrb[2].mxu1 }
 0x473   : > { %v2989_v30 = vpop.f32.mrb[3].mxu1 }
 0x474   : > { %v1209_v31 = vmax.f32 %v1191_v28, 0.0  ;;  %v2990_v32 = vadd.f32 %v2989_v30, %v2988_v29 }
 0x476   : > { %v1213_v34 = vsel %vm749_vm11, %v1209_v31, 0.0  ;;  %v1196_v35 = vadd.f32 %v2990_v32, %v931_v33  ;;  %v2991_v37 = vpop.f32.mrb[4].mxu1 }
 0x477   : > { %v2992_v38 = vpop.f32.mrb[5].mxu1  ;;  %v3816_v41 = vpack.i.bf16 %v1213_v34, %v5028_v40  ;;  %v3751_v60 = vpack.i.bf16 %v1244_v59, %v1213_v34 }
 0x478   : > { %v1210_v36 = vmax.f32 %v1196_v35, 0.0  ;;  %v2993_v42 = vadd.f32 %v2992_v38, %v2991_v37 }
 0x479   : > { %3727 = vrot.lane.b32.xlu0 %v3816_v41, %s4551_s29 }
 0x47a   : > { %v1214_v45 = vsel %vm749_vm11, %v1210_v36, 0.0  ;;  %v1201_v46 = vadd.f32 %v2993_v42, %v936_v44  ;;  %v2994_v47 = vpop.f32.mrb[6].mxu1 }
 0x47b   : > { %v2995_v48 = vpop.f32.mrb[7].mxu1  ;;  %v3821_v49 = vpack.i.bf16 %v1214_v45, %v5028_v40  ;;  %v3746_v50 = vpack.i.bf16 %v1214_v45, %v1213_v34  ;;  %v3761_v4 = vpack.i.bf16 %v1245_v3, %v1214_v45 }
 0x47c   : > { %v1211_v51 = vmax.f32 %v1201_v46, 0.0  ;;  %v2996_v52 = vadd.f32 %v2995_v48, %v2994_v47 }
 0x47d   : > { %3732 = vrot.lane.b32.xlu1 %v3821_v49, %s4551_s29 }
 0x47e   : > { %v1215_v54 = vsel %vm749_vm11, %v1211_v51, 0.0  ;;  %v1206_v55 = vadd.f32 %v2996_v52, %v941_v53 }
 0x47f   : > { %v3826_v56 = vpack.i.bf16 %v1215_v54, %v5028_v40  ;;  %v3766_v1 = vpack.i.bf16 %v1246_v61, %v1215_v54 }
 0x480   : > { %v1212_v57 = vmax.f32 %v1206_v55, 0.0 }
 0x481   : > { %3737 = vrot.lane.b32.xlu0 %v3826_v56, %s4551_s29 }
 0x482   : > { %v1216_v58 = vsel %vm749_vm11, %v1212_v57, 0.0 }
 0x483   : > { %1220 = vst [vmem:[#allocation3 + $0x50] sm:$0x3f] %v1216_v58 }
 0x485   : > { %3747 = vrot.lane.b32.xlu0 %v3746_v50, %s4553_s15 }
 0x489   : > { %3752 = vrot.lane.b32.xlu0 %v3751_v60, %s4550_s28 }
 0x48a   : > { %v1243_v62 = vld [vmem:[#allocation3 + $0x50] sm:$0xff] }
 0x48b   : > { %v3831_v63 = vpack.i.bf16 %v1243_v62, %v5028_v40  ;;  %v3756_v2 = vpack.i.bf16 %v1243_v62, %v1215_v54  ;;  %v3776_v5 = vpack.i.bf16 %v1247_v43, %v1243_v62 }
 0x48d   : > { %3742 = vrot.lane.b32.xlu1 %v3831_v63, %s4551_s29  ;;  %3767 = vrot.lane.b32.xlu0 %v3766_v1, %s4550_s28 }
 0x491   : > { %3757 = vrot.lane.b32.xlu1 %v3756_v2, %s4553_s15  ;;  %3772 = vrot.lane.b32.xlu0 %v3751_v60, %s4555_s23 }
 0x495   : > { %3762 = vrot.lane.b32.xlu1 %v3761_v4, %s4550_s28  ;;  %3787 = vrot.lane.b32.xlu0 %v3766_v1, %s4555_s23 }
 0x499   : > { %3777 = vrot.lane.b32.xlu1 %v3776_v5, %s4550_s28  ;;  %3792 = vrot.lane.b32.xlu0 %v3751_v60, %s4552_s12 }
 0x49d   : > { %3782 = vrot.lane.b32.xlu1 %v3761_v4, %s4555_s23  ;;  %3807 = vrot.lane.b32.xlu0 %v3766_v1, %s4552_s12 }
 0x4a1   : > { %3797 = vrot.lane.b32.xlu1 %v3776_v5, %s4555_s23  ;;  %3817 = vrot.lane.b32.xlu0 %v3816_v41, %s4562_s13 }
 0x4a5   : > { %3802 = vrot.lane.b32.xlu1 %v3761_v4, %s4552_s12  ;;  %3827 = vrot.lane.b32.xlu0 %v3826_v56, %s4562_s13 }
 0x4a9   : > { %3812 = vrot.lane.b32.xlu1 %v3776_v5, %s4552_s12 }
 0x4ad   : > { %3822 = vrot.lane.b32.xlu1 %v3821_v49, %s4562_s13 }
 0x4b1   : > { %3832 = vrot.lane.b32.xlu1 %v3831_v63, %s4562_s13 }
 0x4eb   : > { %v3728_v7 = vpop.permute.xlu0 %3727 }
 0x4ec   : > { %v3730_v8 = vunpack.i.h.bf16 %v3728_v7  ;;  %v3729_v0 = vunpack.i.l.bf16 %v3728_v7 }
 0x4ee   : > { %v1272_v9 = vsel %vm522_vm0, %v3729_v0, %v3730_v8 }
 0x4ef   : > { %v3836_v10 = vpack.i.bf16 %v3730_v8, %v1272_v9  ;;  %v3733_v11 = vpop.permute.xlu1 %3732 }
 0x4f0   : > { %v3735_v12 = vunpack.i.h.bf16 %v3733_v11  ;;  %v3734_v13 = vunpack.i.l.bf16 %v3733_v11 }
 0x4f1   : > { %3837 = vrot.lane.b32.xlu0 %v3836_v10, %s4562_s13 }
 0x4f2   : > { %v1273_v14 = vsel %vm522_vm0, %v3734_v13, %v3735_v12 }
 0x4f3   : > { %v3841_v15 = vpack.i.bf16 %v3735_v12, %v1273_v14  ;;  %v3738_v16 = vpop.permute.xlu0 %3737 }
 0x4f4   : > { %v3740_v17 = vunpack.i.h.bf16 %v3738_v16  ;;  %v3739_v18 = vunpack.i.l.bf16 %v3738_v16  ;;  %v1231_v16 = vld [vmem:[%s5555_s6] sm:$0xff] }
 0x4f5   : > { %3842 = vrot.lane.b32.xlu1 %v3841_v15, %s4562_s13 }
 0x4f6   : > { %v1274_v19 = vsel %vm522_vm0, %v3739_v18, %v3740_v17 }
 0x4f7   : > { %v3846_v20 = vpack.i.bf16 %v3740_v17, %v1274_v19  ;;  %v3748_v21 = vpop.permute.xlu0 %3747 }
 0x4f9   : > { %3847 = vrot.lane.b32.xlu0 %v3846_v20, %s4562_s13 }
 0x4fb   : > { %v3753_v22 = vpop.permute.xlu0 %3752 }
 0x4fc   : > { %v3755_v23 = vunpack.i.h.bf16 %v3753_v22  ;;  %v3754_v24 = vunpack.i.l.bf16 %v3753_v22 }
 0x4fd   : > { %3857 = vrot.lane.b32.xlu0 %v3748_v21, %s4562_s13 }
 0x4fe   : > { %v1304_v25 = vsel %vm534_vm1, %v3754_v24, %v3755_v23  ;;  %v1233_v23 = vld [vmem:[%s5555_s6 + $0x10] sm:$0xff] }
 0x4ff   : > { %v3743_v26 = vpop.permute.xlu1 %3742  ;;  %v3866_v27 = vpack.i.bf16 %v1304_v25, %v3754_v24  ;;  %v3768_v28 = vpop.permute.xlu0 %3767 }
 0x500   : > { %v3745_v29 = vunpack.i.h.bf16 %v3743_v26  ;;  %v3744_v30 = vunpack.i.l.bf16 %v3743_v26  ;;  %v3770_v31 = vunpack.i.h.bf16 %v3768_v28  ;;  %v3769_v32 = vunpack.i.l.bf16 %v3768_v28  ;;  %v1222_v28 = vld [vmem:[#allocation8 + $0x8] sm:$0xff] }
 0x501   : > { %3867 = vrot.lane.b32.xlu0 %v3866_v27, %s4562_s13  ;;  %2887 = vmatprep.mubr.msk.f32.mxu0 %vm1506_vm14, %v1222_v28 }
 0x502   : > { %v1275_v33 = vsel %vm522_vm0, %v3744_v30, %v3745_v29  ;;  %v1306_v34 = vsel %vm534_vm1, %v3769_v32, %v3770_v31 }
 0x503   : > { %v3851_v35 = vpack.i.bf16 %v3745_v29, %v1275_v33  ;;  %v3758_v37 = vpop.permute.xlu1 %3757  ;;  %v3876_v38 = vpack.i.bf16 %v1306_v34, %v3769_v32  ;;  %v3773_v41 = vpop.permute.xlu0 %3772  ;;  %v1235_v32 = vld [vmem:[%s5555_s6 + $0x20] sm:$0xff] }
 0x504   : > { %v3775_v36 = vunpack.i.h.bf16 %v3773_v41  ;;  %v3774_v42 = vunpack.i.l.bf16 %v3773_v41 }
 0x505   : > { %3852 = vrot.lane.b32.xlu1 %v3851_v35, %s4562_s13  ;;  %3877 = vrot.lane.b32.xlu0 %v3876_v38, %s4562_s13 }
 0x506   : > { %v1324_v44 = vsel %vm858_vm12, %v3774_v42, %v3775_v36 }
 0x507   : > { %v3763_v45 = vpop.permute.xlu1 %3762  ;;  %v3881_v46 = vpack.i.bf16 %v1324_v44, %v3774_v42  ;;  %v3788_v47 = vpop.permute.xlu0 %3787 }
 0x508   : > { %v3765_v48 = vunpack.i.h.bf16 %v3763_v45  ;;  %v3764_v49 = vunpack.i.l.bf16 %v3763_v45  ;;  %v3790_v50 = vunpack.i.h.bf16 %v3788_v47  ;;  %v3789_v51 = vunpack.i.l.bf16 %v3788_v47  ;;  %v1232_v45 = vld [vmem:[%s5555_s6 + $0x8] sm:$0xff] }
 0x509   : > { %3862 = vrot.lane.b32.xlu1 %v3758_v37, %s4562_s13  ;;  %3882 = vrot.lane.b32.xlu0 %v3881_v46, %s4562_s13 }
 0x50a   : > { %v1305_v52 = vsel %vm534_vm1, %v3764_v49, %v3765_v48  ;;  %v1326_v53 = vsel %vm858_vm12, %v3789_v51, %v3790_v50 }
 0x50b   : > { %v3871_v54 = vpack.i.bf16 %v1305_v52, %v3764_v49  ;;  %v3778_v55 = vpop.permute.xlu1 %3777  ;;  %v3896_v56 = vpack.i.bf16 %v1326_v53, %v3789_v51  ;;  %v3793_v57 = vpop.permute.xlu0 %3792  ;;  %v1234_v52 = vld [vmem:[%s5555_s6 + $0x18] sm:$0xff] }
 0x50c   : > { %v3780_v58 = vunpack.i.h.bf16 %v3778_v55  ;;  %v3779_v59 = vunpack.i.l.bf16 %v3778_v55  ;;  %v3795_v60 = vunpack.i.h.bf16 %v3793_v57  ;;  %v3794_v61 = vunpack.i.l.bf16 %v3793_v57 }
 0x50d   : > { %3872 = vrot.lane.b32.xlu1 %v3871_v54, %s4562_s13  ;;  %3897 = vrot.lane.b32.xlu0 %v3896_v56, %s4562_s13 }
 0x50e   : > { %v1307_v62 = vsel %vm534_vm1, %v3779_v59, %v3780_v58  ;;  %v1344_v63 = vsel %vm543_vm3, %v3794_v61, %v3795_v60 }
 0x50f   : > { %v3886_v1 = vpack.i.bf16 %v1307_v62, %v3779_v59  ;;  %v3783_v2 = vpop.permute.xlu1 %3782  ;;  %v3901_v3 = vpack.i.bf16 %v1344_v63, %v3794_v61  ;;  %v3808_v4 = vpop.permute.xlu0 %3807 }
 0x510   : > { %v3785_v43 = vunpack.i.h.bf16 %v3783_v2  ;;  %v3784_v5 = vunpack.i.l.bf16 %v3783_v2  ;;  %v3810_v7 = vunpack.i.h.bf16 %v3808_v4  ;;  %v3809_v8 = vunpack.i.l.bf16 %v3808_v4 }
 0x511   : > { %3887 = vrot.lane.b32.xlu1 %v3886_v1, %s4562_s13  ;;  %3902 = vrot.lane.b32.xlu0 %v3901_v3, %s4562_s13 }
 0x512   : > { %v1325_v0 = vsel %vm858_vm12, %v3784_v5, %v3785_v43  ;;  %v1346_v9 = vsel %vm543_vm3, %v3809_v8, %v3810_v7 }
 0x513   : > { %v3891_v10 = vpack.i.bf16 %v1325_v0, %v3784_v5  ;;  %v3798_v11 = vpop.permute.xlu1 %3797  ;;  %v3916_v12 = vpack.i.bf16 %v1346_v9, %v3809_v8  ;;  %v3818_v21 = vpop.permute.xlu0 %3817 }
 0x514   : > { %v3800_v13 = vunpack.i.h.bf16 %v3798_v11  ;;  %v3799_v14 = vunpack.i.l.bf16 %v3798_v11  ;;  %v3820_v30 = vunpack.i.h.bf16 %v3818_v21  ;;  %v3819_v31 = vunpack.i.l.bf16 %v3818_v21 }
 0x515   : > { %3892 = vrot.lane.b32.xlu1 %v3891_v10, %s4562_s13  ;;  %3917 = vrot.lane.b32.xlu0 %v3916_v12, %s4562_s13 }
 0x516   : > { %v1327_v15 = vsel %vm858_vm12, %v3799_v14, %v3800_v13  ;;  %v1462_v41 = vsel %vm1461_vm15, %v3819_v31, %v3820_v30 }
 0x517   : > { %v3906_v17 = vpack.i.bf16 %v1327_v15, %v3799_v14  ;;  %v3803_v18 = vpop.permute.xlu1 %3802  ;;  %v3828_v35 = vpop.permute.xlu0 %3827 }
 0x518   : > { %v3805_v19 = vunpack.i.h.bf16 %v3803_v18  ;;  %v3804_v20 = vunpack.i.l.bf16 %v3803_v18  ;;  %v3830_v42 = vunpack.i.h.bf16 %v3828_v35  ;;  %v3829_v44 = vunpack.i.l.bf16 %v3828_v35 }
 0x519   : > { %3907 = vrot.lane.b32.xlu1 %v3906_v17, %s4562_s13  ;;  %1350 = vperm.xlu0 %3445, %v1231_v16  }
 0x51a   : > { %v1345_v22 = vsel %vm543_vm3, %v3804_v20, %v3805_v19  ;;  %v1464_v50 = vsel %vm1461_vm15, %v3829_v44, %v3830_v42 }
 0x51b   : > { %v3911_v24 = vpack.i.bf16 %v1345_v22, %v3804_v20  ;;  %v3813_v25 = vpop.permute.xlu1 %3812 }
 0x51c   : > { %v3815_v26 = vunpack.i.h.bf16 %v3813_v25  ;;  %v3814_v27 = vunpack.i.l.bf16 %v3813_v25 }
 0x51d   : > { %3912 = vrot.lane.b32.xlu1 %v3911_v24, %s4562_s13  ;;  %1360 = vperm.xlu0 %3445, %v1233_v23  }
 0x51e   : > { %v1347_v29 = vsel %vm543_vm3, %v3814_v27, %v3815_v26 }
 0x51f   : > { %v3921_v33 = vpack.i.bf16 %v1347_v29, %v3814_v27  ;;  %v3823_v34 = vpop.permute.xlu1 %3822 }
 0x520   : > { %v3825_v37 = vunpack.i.h.bf16 %v3823_v34  ;;  %v3824_v38 = vunpack.i.l.bf16 %v3823_v34 }
 0x521   : > { %3922 = vrot.lane.b32.xlu1 %v3921_v33, %s4562_s13  ;;  %1370 = vperm.xlu0 %3445, %v1235_v32  }
 0x522   : > { %v1463_v36 = vsel %vm1461_vm15, %v3824_v38, %v3825_v37 }
 0x523   : > { %v3833_v46 = vpop.permute.xlu1 %3832  ;;  %v3166_v47 = vpack.c.bf16 %v1463_v36, %v1462_v41 }
 0x524   : > { %v3835_v48 = vunpack.i.h.bf16 %v3833_v46  ;;  %v3834_v49 = vunpack.i.l.bf16 %v3833_v46 }
 0x525   : > { %1355 = vperm.xlu1 %3444, %v1232_v45   ;;  %3167 = vmatpush1.bf16.msra.mxu0 %v3166_v47 }
 0x526   : > { %v1465_v51 = vsel %vm1461_vm15, %v3834_v49, %v3835_v48  ;;  %3168 = vmatprep.subr.bf16.mxu0 %v4563_v6 }
 0x527   : > { %v3169_v53 = vpack.c.bf16 %v1465_v51, %v1464_v50 }
 0x529   : > { %1365 = vperm.xlu1 %3444, %v1234_v52   ;;  %3170 = vmatpush1.bf16.msra.mxu0 %v3169_v53 }
 0x52a   : > { %3171 = vmatprep.subr.bf16.mxu0 %v4563_v6 }
 0x563   : > { %v3838_v54 = vpop.permute.xlu0 %3837 }
 0x564   : > { %v3840_v55 = vunpack.i.h.bf16 %v3838_v54  ;;  %v3839_v56 = vunpack.i.l.bf16 %v3838_v54 }
 0x566   : > { %v1466_v60 = vsel %vm1461_vm15, %v3839_v56, %v3840_v55 }
 0x567   : > { %v3843_v57 = vpop.permute.xlu1 %3842 }
 0x568   : > { %v3845_v58 = vunpack.i.h.bf16 %v3843_v57  ;;  %v3844_v59 = vunpack.i.l.bf16 %v3843_v57 }
 0x56a   : > { %v1467_v61 = vsel %vm1461_vm15, %v3844_v59, %v3845_v58 }
 0x56b   : > { %v3848_v62 = vpop.permute.xlu0 %3847  ;;  %v3172_v63 = vpack.c.bf16 %v1467_v61, %v1466_v60 }
 0x56c   : > { %v3850_v3 = vunpack.i.h.bf16 %v3848_v62  ;;  %v3849_v4 = vunpack.i.l.bf16 %v3848_v62 }
 0x56d   : > { %3173 = vmatpush1.bf16.msra.mxu0 %v3172_v63 }
 0x56e   : > { %3174 = vmatprep.subr.bf16.mxu0 %v4563_v6  ;;  %v1468_v8 = vsel %vm1461_vm15, %v3849_v4, %v3850_v3 }
 0x56f   : > { %v3858_v1 = vpop.permute.xlu0 %3857 }
 0x570   : > { %v3860_v9 = vunpack.i.h.bf16 %v3858_v1  ;;  %v3859_v10 = vunpack.i.l.bf16 %v3858_v1 }
 0x572   : > { %v3178_v14 = vpack.c.bf16 %v3860_v9, %v3859_v10  ;;  %v1221_v9 = vld [vmem:[#allocation8] sm:$0xff]  ;;  %v1224_v10 = vld [vmem:[#allocation8 + $0x18] sm:$0xff] }
 0x573   : > { %v3868_v2 = vpop.permute.xlu0 %3867 }
 0x574   : > { %v3870_v21 = vunpack.i.h.bf16 %v3868_v2  ;;  %v3869_v22 = vunpack.i.l.bf16 %v3868_v2 }
 0x576   : > { %v1470_v28 = vsel %vm1461_vm15, %v3869_v22, %v3870_v21 }
 0x577   : > { %v3853_v43 = vpop.permute.xlu1 %3852  ;;  %v3878_v13 = vpop.permute.xlu0 %3877 }
 0x578   : > { %v3855_v5 = vunpack.i.h.bf16 %v3853_v43  ;;  %v3854_v7 = vunpack.i.l.bf16 %v3853_v43  ;;  %v3880_v29 = vunpack.i.h.bf16 %v3878_v13  ;;  %v3879_v30 = vunpack.i.l.bf16 %v3878_v13  ;;  %v1225_v13 = vld [vmem:[#allocation8 + $0x20] sm:$0xff] }
 0x57a   : > { %v1469_v0 = vsel %vm1461_vm15, %v3854_v7, %v3855_v5  ;;  %v1472_v38 = vsel %vm1461_vm15, %v3879_v30, %v3880_v29 }
 0x57b   : > { %v3863_v11 = vpop.permute.xlu1 %3862  ;;  %v3175_v12 = vpack.c.bf16 %v1469_v0, %v1468_v8  ;;  %v3883_v20 = vpop.permute.xlu0 %3882 }
 0x57c   : > { %v3865_v15 = vunpack.i.h.bf16 %v3863_v11  ;;  %v3864_v16 = vunpack.i.l.bf16 %v3863_v11  ;;  %v3885_v41 = vunpack.i.h.bf16 %v3883_v20  ;;  %v3884_v36 = vunpack.i.l.bf16 %v3883_v20  ;;  %v1223_v11 = vld [vmem:[#allocation8 + $0x10] sm:$0xff] }
 0x57d   : > { %3176 = vmatpush1.bf16.msra.mxu0 %v3175_v12  ;;  %v1226_v12 = vld [vmem:[#allocation8 + $0x28] sm:$0xff] }
 0x57e   : > { %3177 = vmatprep.subr.bf16.mxu0 %v4563_v6  ;;  %v3181_v23 = vpack.c.bf16 %v3865_v15, %v3864_v16  ;;  %v1474_v49 = vsel %vm1461_vm15, %v3884_v36, %v3885_v41  ;;  %v1227_v15 = vld [vmem:[#allocation8 + $0x30] sm:$0xff]  ;;  %v1230_v16 = vld [vmem:[#allocation8 + $0x48] sm:$0xff] }
 0x57f   : > { %v3873_v17 = vpop.permute.xlu1 %3872  ;;  %v3898_v32 = vpop.permute.xlu0 %3897 }
 0x580   : > { %v3875_v18 = vunpack.i.h.bf16 %v3873_v17  ;;  %v3874_v19 = vunpack.i.l.bf16 %v3873_v17  ;;  %v3900_v50 = vunpack.i.h.bf16 %v3898_v32  ;;  %v3899_v51 = vunpack.i.l.bf16 %v3898_v32  ;;  %v1229_v17 = vld [vmem:[#allocation8 + $0x40] sm:$0xff] }
 0x581   : > { %3179 = vmatpush1.bf16.msra.mxu0 %v3178_v14  ;;  %v1228_v14 = vld [vmem:[#allocation8 + $0x38] sm:$0xff] }
 0x582   : > { %3180 = vmatprep.subr.bf16.mxu0 %v4563_v6  ;;  %v1471_v25 = vsel %vm1461_vm15, %v3874_v19, %v3875_v18  ;;  %v1476_v57 = vsel %vm1461_vm15, %v3899_v51, %v3900_v50 }
 0x583   : > { %v3888_v24 = vpop.permute.xlu1 %3887  ;;  %v3184_v33 = vpack.c.bf16 %v1471_v25, %v1470_v28  ;;  %v3903_v48 = vpop.permute.xlu0 %3902 }
 0x584   : > { %v3890_v26 = vunpack.i.h.bf16 %v3888_v24  ;;  %v3889_v27 = vunpack.i.l.bf16 %v3888_v24  ;;  %v3905_v58 = vunpack.i.h.bf16 %v3903_v48  ;;  %v3904_v59 = vunpack.i.l.bf16 %v3903_v48 }
 0x585   : > { %3182 = vmatpush1.bf16.msra.mxu0 %v3181_v23 }
 0x586   : > { %3183 = vmatprep.subr.bf16.mxu0 %v4563_v6  ;;  %v1473_v34 = vsel %vm1461_vm15, %v3889_v27, %v3890_v26  ;;  %v1478_v3 = vsel %vm1461_vm15, %v3904_v59, %v3905_v58  ;;  %v1658_v58 = vld [vmem:[#allocation2 + $0x10] sm:$0xff] }
 0x587   : > { %v3893_v31 = vpop.permute.xlu1 %3892  ;;  %v3187_v44 = vpack.c.bf16 %v1473_v34, %v1472_v38  ;;  %v3918_v60 = vpop.permute.xlu0 %3917 }
 0x588   : > { %v3895_v35 = vunpack.i.h.bf16 %v3893_v31  ;;  %v3894_v37 = vunpack.i.l.bf16 %v3893_v31  ;;  %v3920_v4 = vunpack.i.h.bf16 %v3918_v60  ;;  %v3919_v43 = vunpack.i.l.bf16 %v3918_v60  ;;  %v1659_v60 = vld [vmem:[#allocation2 + $0x28] sm:$0xff] }
 0x589   : > { %3185 = vmatpush1.bf16.msra.mxu0 %v3184_v33 }
 0x58a   : > { %3186 = vmatprep.subr.bf16.mxu0 %v4563_v6  ;;  %v1475_v45 = vsel %vm1461_vm15, %v3894_v37, %v3895_v35  ;;  %v1480_v8 = vsel %vm1461_vm15, %v3919_v43, %v3920_v4 }
 0x58b   : > { %v3908_v42 = vpop.permute.xlu1 %3907  ;;  %v3190_v53 = vpack.c.bf16 %v1475_v45, %v1474_v49 }
 0x58c   : > { %v3910_v46 = vunpack.i.h.bf16 %v3908_v42  ;;  %v3909_v47 = vunpack.i.l.bf16 %v3908_v42 }
 0x58d   : > { %3188 = vmatpush1.bf16.msra.mxu0 %v3187_v44 }
 0x58e   : > { %3189 = vmatprep.subr.bf16.mxu0 %v4563_v6  ;;  %v1477_v54 = vsel %vm1461_vm15, %v3909_v47, %v3910_v46 }
 0x58f   : > { %v3913_v52 = vpop.permute.xlu1 %3912  ;;  %v3193_v62 = vpack.c.bf16 %v1477_v54, %v1476_v57 }
 0x590   : > { %v3915_v55 = vunpack.i.h.bf16 %v3913_v52  ;;  %v3914_v56 = vunpack.i.l.bf16 %v3913_v52 }
 0x591   : > { %3191 = vmatpush1.bf16.msra.mxu0 %v3190_v53 }
 0x592   : > { %3192 = vmatprep.subr.bf16.mxu0 %v4563_v6  ;;  %v1479_v63 = vsel %vm1461_vm15, %v3914_v56, %v3915_v55 }
 0x593   : > { %v3923_v61 = vpop.permute.xlu1 %3922  ;;  %v3196_v5 = vpack.c.bf16 %v1479_v63, %v1478_v3  ;;  %v1660_v63 = vld [vmem:[#allocation2 + $0x40] sm:$0xff] }
 0x594   : > { %v3925_v1 = vunpack.i.h.bf16 %v3923_v61  ;;  %v3924_v2 = vunpack.i.l.bf16 %v3923_v61 }
 0x595   : > { %3194 = vmatpush1.bf16.msra.mxu0 %v3193_v62  ;;  %v1661_v62 = vld [vmem:[#allocation2 + $0x58] sm:$0xff] }
 0x596   : > { %3195 = vmatprep.subr.bf16.mxu0 %v4563_v6  ;;  %v1481_v7 = vsel %vm1461_vm15, %v3924_v2, %v3925_v1  ;;  %v1662_v2 = vld [vmem:[#allocation2 + $0x70] sm:$0xff] }
 0x597   : > { %v3199_v0 = vpack.c.bf16 %v1481_v7, %v1480_v8 }
 0x598   : > { %v1351_v18 = vpop.permute.xlu0 %1350 }
 0x599   : > { %3197 = vmatpush1.bf16.msra.mxu0 %v3196_v5 }
 0x59a   : > { %3198 = vmatprep.subr.bf16.mxu0 %v4563_v6 }
 0x59c   : > { %v1361_v30 = vpop.permute.xlu0 %1360 }
 0x59d   : > { %3200 = vmatpush1.bf16.msra.mxu0 %v3199_v0 }
 0x5a0   : > { %1587 = vmatmul.mubr.f32.vlgmr.msra.gmra.mrb[4].mxu0 %v1221_v9  ;;  %v1371_v48 = vpop.permute.xlu0 %1370 }
 0x5a1   : > { %2888 = vmatprep.mubr.msk.f32.mxu0 %vm1506_vm14, %v1224_v10 }
 0x5a4   : > { %1592 = vmatmul.mubr.f32.gmra.mrb[6].mxu0 %v1223_v11  ;;  %v1356_v23 = vpop.permute.xlu1 %1355 }
 0x5a5   : > { %2889 = vmatprep.mubr.msk.f32.mxu0 %vm1506_vm14, %v1226_v12 }
 0x5a8   : > { %1597 = vmatmul.mubr.f32.gmra.mrb[8].mxu0 %v1225_v13  ;;  %v1366_v41 = vpop.permute.xlu1 %1365 }
 0x5a9   : > { %2890 = vmatprep.mubr.msk.f32.mxu0 %vm1506_vm14, %v1228_v14 }
 0x5ac   : > { %1602 = vmatmul.mubr.f32.gmra.mrb[10].mxu0 %v1227_v15 }
 0x5ad   : > { %2891 = vmatprep.mubr.msk.f32.mxu0 %vm1506_vm14, %v1230_v16 }
 0x5b0   : > { %1607 = vmatmul.mubr.f32.gmra.mrb[12].mxu0 %v1229_v17 }
 0x673   : > { %v1588_v19 = vpop.f32.mrb[4].mxu0 }
 0x674   : > { %v1589_v20 = vadd.f32 %v1588_v19, %v1351_v18  ;;  %v1590_v21 = vpop.f32.mrb[5].mxu0 }
 0x676   : > { %v1612_v22 = vmax.f32 %v1589_v20, 0.0 }
 0x677   : > { %v1593_v24 = vpop.f32.mrb[6].mxu0 }
 0x678   : > { %v1617_v25 = vsel %vm749_vm11, %v1612_v22, 0.0  ;;  %v1594_v26 = vadd.f32 %v1593_v24, %v1356_v23  ;;  %v1595_v27 = vpop.f32.mrb[7].mxu0 }
 0x679   : > { %v3926_v28 = vpack.i.bf16 %v1617_v25, %v5028_v40  ;;  %v3961_v59 = vpack.i.bf16 %v1658_v58, %v1617_v25 }
 0x67a   : > { %v1613_v29 = vmax.f32 %v1594_v26, 0.0 }
 0x67b   : > { %v1598_v31 = vpop.f32.mrb[8].mxu0  ;;  %3927 = vrot.lane.b32.xlu1 %v3926_v28, %s4551_s29 }
 0x67c   : > { %v1618_v32 = vsel %vm749_vm11, %v1613_v29, 0.0  ;;  %v1599_v33 = vadd.f32 %v1598_v31, %v1361_v30  ;;  %v1600_v34 = vpop.f32.mrb[9].mxu0 }
 0x67d   : > { %v3931_v35 = vpack.i.bf16 %v1618_v32, %v5028_v40  ;;  %v3951_v37 = vpack.i.bf16 %v1618_v32, %v1617_v25  ;;  %v3966_v61 = vpack.i.bf16 %v1659_v60, %v1618_v32 }
 0x67e   : > { %v1614_v38 = vmax.f32 %v1599_v33, 0.0 }
 0x67f   : > { %v1603_v36 = vpop.f32.mrb[10].mxu0  ;;  %3932 = vrot.lane.b32.xlu0 %v3931_v35, %s4551_s29 }
 0x680   : > { %v1619_v42 = vsel %vm749_vm11, %v1614_v38, 0.0  ;;  %v1604_v44 = vadd.f32 %v1603_v36, %v1366_v41  ;;  %v1605_v45 = vpop.f32.mrb[11].mxu0 }
 0x681   : > { %v3936_v46 = vpack.i.bf16 %v1619_v42, %v5028_v40 }
 0x682   : > { %v1615_v47 = vmax.f32 %v1604_v44, 0.0 }
 0x683   : > { %v1608_v49 = vpop.f32.mrb[12].mxu0  ;;  %3937 = vrot.lane.b32.xlu1 %v3936_v46, %s4551_s29 }
 0x684   : > { %v1620_v50 = vsel %vm749_vm11, %v1615_v47, 0.0  ;;  %v1609_v51 = vadd.f32 %v1608_v49, %v1371_v48  ;;  %v1610_v52 = vpop.f32.mrb[13].mxu0 }
 0x685   : > { %1625 = vst [vmem:[#allocation2 + $0x50] sm:$0xff] %v1620_v50  ;;  %v3941_v53 = vpack.i.bf16 %v1620_v50, %v5028_v40  ;;  %v3956_v54 = vpack.i.bf16 %v1620_v50, %v1619_v42  ;;  %v3976_v1 = vpack.i.bf16 %v1661_v62, %v1620_v50 }
 0x686   : > { %v1616_v55 = vmax.f32 %v1609_v51, 0.0 }
 0x687   : > { %3942 = vrot.lane.b32.xlu0 %v3941_v53, %s4551_s29 }
 0x688   : > { %v1621_v56 = vsel %vm749_vm11, %v1616_v55, 0.0 }
 0x689   : > { %v3946_v57 = vpack.i.bf16 %v1621_v56, %v5028_v40  ;;  %v3971_v40 = vpack.i.bf16 %v1660_v63, %v1619_v42  ;;  %v3986_v3 = vpack.i.bf16 %v1662_v2, %v1621_v56 }
 0x68b   : > { %3952 = vrot.lane.b32.xlu0 %v3951_v37, %s4553_s15  ;;  %3947 = vrot.lane.b32.xlu1 %v3946_v57, %s4551_s29 }
 0x68f   : > { %3962 = vrot.lane.b32.xlu0 %v3961_v59, %s4550_s28  ;;  %3957 = vrot.lane.b32.xlu1 %v3956_v54, %s4553_s15 }
 0x693   : > { %3967 = vrot.lane.b32.xlu0 %v3966_v61, %s4550_s28  ;;  %1706 = vrot.lane.b32.xlu1 %v1621_v56, %s4553_s15 }
 0x697   : > { %3977 = vrot.lane.b32.xlu0 %v3976_v1, %s4550_s28  ;;  %3972 = vrot.lane.b32.xlu1 %v3971_v40, %s4550_s28 }
 0x69b   : > { %3982 = vrot.lane.b32.xlu0 %v3961_v59, %s4555_s23  ;;  %3987 = vrot.lane.b32.xlu1 %v3986_v3, %s4550_s28 }
 0x69f   : > { %3997 = vrot.lane.b32.xlu0 %v3971_v40, %s4555_s23  ;;  %3992 = vrot.lane.b32.xlu1 %v3966_v61, %s4555_s23 }
 0x6a3   : > { %1754 = vrot.lane.b32.xlu0 %v1621_v56, %s4555_s23  ;;  %4002 = vrot.lane.b32.xlu1 %v3976_v1, %s4555_s23 }
 0x6a7   : > { %4007 = vrot.lane.b32.xlu0 %v3926_v28, %s4562_s13  ;;  %1756 = vrot.lane.b32.xlu1 %v1662_v2, %s4555_s23 }
 0x6ab   : > { %4017 = vrot.lane.b32.xlu0 %v3936_v46, %s4562_s13  ;;  %4012 = vrot.lane.b32.xlu1 %v3931_v35, %s4562_s13 }
 0x6af   : > { %4027 = vrot.lane.b32.xlu0 %v3946_v57, %s4562_s13  ;;  %4022 = vrot.lane.b32.xlu1 %v3941_v53, %s4562_s13 }
 0x6ed   : > { %v3928_v4 = vpop.permute.xlu1 %3927 }
 0x6ee   : > { %v3930_v43 = vunpack.i.h.bf16 %v3928_v4  ;;  %v3929_v5 = vunpack.i.l.bf16 %v3928_v4 }
 0x6f0   : > { %v1693_v7 = vsel %vm522_vm0, %v3929_v5, %v3930_v43 }
 0x6f1   : > { %v4031_v8 = vpack.i.bf16 %v3930_v43, %v1693_v7  ;;  %v3933_v0 = vpop.permute.xlu0 %3932 }
 0x6f2   : > { %v3935_v9 = vunpack.i.h.bf16 %v3933_v0  ;;  %v3934_v10 = vunpack.i.l.bf16 %v3933_v0 }
 0x6f3   : > { %4032 = vrot.lane.b32.xlu1 %v4031_v8, %s4562_s13 }
 0x6f4   : > { %v1694_v11 = vsel %vm522_vm0, %v3934_v10, %v3935_v9 }
 0x6f5   : > { %v4036_v12 = vpack.i.bf16 %v3935_v9, %v1694_v11  ;;  %v3938_v13 = vpop.permute.xlu1 %3937 }
 0x6f6   : > { %v3940_v14 = vunpack.i.h.bf16 %v3938_v13  ;;  %v3939_v15 = vunpack.i.l.bf16 %v3938_v13 }
 0x6f7   : > { %4037 = vrot.lane.b32.xlu0 %v4036_v12, %s4562_s13 }
 0x6f8   : > { %v1695_v16 = vsel %vm522_vm0, %v3939_v15, %v3940_v14 }
 0x6f9   : > { %v4041_v17 = vpack.i.bf16 %v3940_v14, %v1695_v16  ;;  %v3943_v18 = vpop.permute.xlu0 %3942 }
 0x6fa   : > { %v3945_v19 = vunpack.i.h.bf16 %v3943_v18  ;;  %v3944_v20 = vunpack.i.l.bf16 %v3943_v18 }
 0x6fb   : > { %4042 = vrot.lane.b32.xlu1 %v4041_v17, %s4562_s13  ;;  %v1628_v17 = vld [vmem:[#allocation9 + $0x8] sm:$0xff] }
 0x6fc   : > { %v1696_v21 = vsel %vm522_vm0, %v3944_v20, %v3945_v19  ;;  %2892 = vmatprep.mubr.msk.f32.mxu1 %vm1933_vm2, %v1628_v17 }
 0x6fd   : > { %v4046_v22 = vpack.i.bf16 %v3945_v19, %v1696_v21  ;;  %v3953_v23 = vpop.permute.xlu0 %3952  ;;  %v3948_v24 = vpop.permute.xlu1 %3947 }
 0x6fe   : > { %v3950_v25 = vunpack.i.h.bf16 %v3948_v24  ;;  %v3949_v26 = vunpack.i.l.bf16 %v3948_v24 }
 0x6ff   : > { %4047 = vrot.lane.b32.xlu0 %v4046_v22, %s4562_s13 }
 0x700   : > { %v1697_v27 = vsel %vm522_vm0, %v3949_v26, %v3950_v25 }
 0x701   : > { %v4051_v28 = vpack.i.bf16 %v3950_v25, %v1697_v27  ;;  %v3963_v29 = vpop.permute.xlu0 %3962  ;;  %v3958_v30 = vpop.permute.xlu1 %3957  ;;  %v1643_v25 = vld [vmem:[%s5557_s8 + $0x10] sm:$0xff] }
 0x702   : > { %v3965_v31 = vunpack.i.h.bf16 %v3963_v29  ;;  %v3964_v32 = vunpack.i.l.bf16 %v3963_v29 }
 0x703   : > { %4057 = vrot.lane.b32.xlu0 %v3953_v23, %s4562_s13  ;;  %4052 = vrot.lane.b32.xlu1 %v4051_v28, %s4562_s13 }
 0x704   : > { %v1733_v33 = vsel %vm534_vm1, %v3964_v32, %v3965_v31 }
 0x705   : > { %v4066_v34 = vpack.i.bf16 %v1733_v33, %v3964_v32  ;;  %v3968_v35 = vpop.permute.xlu0 %3967  ;;  %v1707_v37 = vpop.permute.xlu1 %1706 }
 0x706   : > { %v3969_v38 = vunpack.i.l.bf16 %v3968_v35  ;;  %v3970_v41 = vunpack.i.h.bf16 %v3968_v35  ;;  %v1645_v35 = vld [vmem:[%s5557_s8 + $0x20] sm:$0xff] }
 0x707   : > { %4067 = vrot.lane.b32.xlu0 %v4066_v34, %s4562_s13  ;;  %4062 = vrot.lane.b32.xlu1 %v3958_v30, %s4562_s13  ;;  %v1644_v30 = vld [vmem:[%s5557_s8 + $0x18] sm:$0xff] }
 0x708   : > { %v4071_v36 = vpack.i.bf16 %v3969_v38, %v1707_v37  ;;  %v1734_v49 = vsel %vm534_vm1, %v3969_v38, %v3970_v41  ;;  %v1646_v41 = vld [vmem:[%s5557_s8 + $0x28] sm:$0xff] }
 0x709   : > { %v3978_v42 = vpop.permute.xlu0 %3977  ;;  %v3973_v44 = vpop.permute.xlu1 %3972 }
 0x70a   : > { %v3979_v45 = vunpack.i.l.bf16 %v3978_v42  ;;  %v3975_v46 = vunpack.i.h.bf16 %v3973_v44  ;;  %v3974_v47 = vunpack.i.l.bf16 %v3973_v44  ;;  %v3980_v48 = vunpack.i.h.bf16 %v3978_v42  ;;  %v1641_v42 = vld [vmem:[%s5557_s8] sm:$0xff]  ;;  %v1647_v44 = vld [vmem:[%s5557_s8 + $0x30] sm:$0x3] }
 0x70b   : > { %4072 = vrot.lane.b32.xlu1 %v4071_v36, %s4562_s13 }
 0x70c   : > { %v1735_v50 = vsel %vm534_vm1, %v3974_v47, %v3975_v46  ;;  %v4076_v51 = vpack.i.bf16 %v3974_v47, %v1734_v49  ;;  %v1736_v59 = vsel %vm534_vm1, %v3979_v45, %v3980_v48 }
 0x70d   : > { %v3983_v52 = vpop.permute.xlu0 %3982  ;;  %v3988_v53 = vpop.permute.xlu1 %3987  ;;  %v4081_v54 = vpack.i.bf16 %v3979_v45, %v1735_v50  ;;  %v1642_v45 = vld [vmem:[%s5557_s8 + $0x8] sm:$0xff] }
 0x70e   : > { %v3984_v55 = vunpack.i.l.bf16 %v3983_v52  ;;  %v3990_v56 = vunpack.i.h.bf16 %v3988_v53  ;;  %v3989_v57 = vunpack.i.l.bf16 %v3988_v53  ;;  %4077 = vrot.lane.b32.xlu0 %v4076_v51, %s4562_s13  ;;  %v3985_v58 = vunpack.i.h.bf16 %v3983_v52 }
 0x70f   : > { %4082 = vrot.lane.b32.xlu1 %v4081_v54, %s4562_s13 }
 0x710   : > { %v1737_v60 = vsel %vm534_vm1, %v3989_v57, %v3990_v56  ;;  %v4086_v61 = vpack.i.bf16 %v3989_v57, %v1736_v59  ;;  %v1758_v43 = vsel %vm858_vm12, %v3984_v55, %v3985_v58 }
 0x711   : > { %v3998_v62 = vpop.permute.xlu0 %3997  ;;  %v3993_v63 = vpop.permute.xlu1 %3992  ;;  %v4096_v1 = vpack.i.bf16 %v3984_v55, %v1737_v60 }
 0x712   : > { %v3999_v40 = vunpack.i.l.bf16 %v3998_v62  ;;  %v3995_v2 = vunpack.i.h.bf16 %v3993_v63  ;;  %v3994_v3 = vunpack.i.l.bf16 %v3993_v63  ;;  %4087 = vrot.lane.b32.xlu0 %v4086_v61, %s4562_s13  ;;  %v4000_v4 = vunpack.i.h.bf16 %v3998_v62 }
 0x713   : > { %4097 = vrot.lane.b32.xlu1 %v4096_v1, %s4562_s13 }
 0x714   : > { %v1759_v5 = vsel %vm858_vm12, %v3994_v3, %v3995_v2  ;;  %v4091_v7 = vpack.i.bf16 %v3994_v3, %v1758_v43  ;;  %v1760_v12 = vsel %vm858_vm12, %v3999_v40, %v4000_v4 }
 0x715   : > { %v1755_v8 = vpop.permute.xlu0 %1754  ;;  %v4003_v0 = vpop.permute.xlu1 %4002  ;;  %v4101_v9 = vpack.i.bf16 %v3999_v40, %v1759_v5 }
 0x716   : > { %v4005_v10 = vunpack.i.h.bf16 %v4003_v0  ;;  %v4004_v11 = vunpack.i.l.bf16 %v4003_v0  ;;  %4092 = vrot.lane.b32.xlu0 %v4091_v7, %s4562_s13 }
 0x717   : > { %4102 = vrot.lane.b32.xlu1 %v4101_v9, %s4562_s13 }
 0x718   : > { %v4106_v13 = vpack.i.bf16 %v4004_v11, %v1760_v12  ;;  %v1761_v16 = vsel %vm858_vm12, %v4004_v11, %v4005_v10 }
 0x719   : > { %v4008_v14 = vpop.permute.xlu0 %4007  ;;  %v1757_v15 = vpop.permute.xlu1 %1756 }
 0x71a   : > { %4107 = vrot.lane.b32.xlu0 %v4106_v13, %s4562_s13  ;;  %v4010_v18 = vunpack.i.h.bf16 %v4008_v14  ;;  %v4009_v19 = vunpack.i.l.bf16 %v4008_v14  ;;  %v1762_v22 = vsel %vm858_vm12, %v1755_v8, %v1757_v15 }
 0x71b   : > { %1882 = vrot.lane.b32.xlu1 %v1761_v16, %s4562_s13 }
 0x71c   : > { %v1888_v26 = vsel %vm1461_vm15, %v4009_v19, %v4010_v18 }
 0x71d   : > { %v4018_v20 = vpop.permute.xlu0 %4017  ;;  %v4013_v21 = vpop.permute.xlu1 %4012 }
 0x71e   : > { %v4015_v23 = vunpack.i.h.bf16 %v4013_v21  ;;  %v4014_v24 = vunpack.i.l.bf16 %v4013_v21  ;;  %1884 = vrot.lane.b32.xlu0 %v1755_v8, %s4562_s13  ;;  %v4020_v27 = vunpack.i.h.bf16 %v4018_v20  ;;  %v4019_v28 = vunpack.i.l.bf16 %v4018_v20 }
 0x71f   : > { %1886 = vrot.lane.b32.xlu1 %v1762_v22, %s4562_s13 }
 0x720   : > { %v1889_v29 = vsel %vm1461_vm15, %v4014_v24, %v4015_v23  ;;  %v1890_v37 = vsel %vm1461_vm15, %v4019_v28, %v4020_v27 }
 0x721   : > { %v3202_v31 = vpack.c.bf16 %v1889_v29, %v1888_v26  ;;  %v4023_v32 = vpop.permute.xlu1 %4022  ;;  %v4028_v46 = vpop.permute.xlu0 %4027 }
 0x722   : > { %v4025_v33 = vunpack.i.h.bf16 %v4023_v32  ;;  %v4024_v34 = vunpack.i.l.bf16 %v4023_v32  ;;  %1775 = vperm.xlu0 %3445, %v1643_v25   ;;  %v4030_v47 = vunpack.i.h.bf16 %v4028_v46  ;;  %v4029_v48 = vunpack.i.l.bf16 %v4028_v46 }
 0x723   : > { %3203 = vmatpush1.bf16.msra.mxu1 %v3202_v31  ;;  %1780 = vperm.xlu1 %3444, %v1644_v30  }
 0x724   : > { %v1891_v38 = vsel %vm1461_vm15, %v4024_v34, %v4025_v33  ;;  %3204 = vmatprep.subr.bf16.mxu1 %v4563_v6  ;;  %v1892_v52 = vsel %vm1461_vm15, %v4029_v48, %v4030_v47 }
 0x725   : > { %v3205_v36 = vpack.c.bf16 %v1891_v38, %v1890_v37 }
 0x726   : > { %1785 = vperm.xlu0 %3445, %v1645_v35  }
 0x727   : > { %3206 = vmatpush1.bf16.msra.mxu1 %v3205_v36  ;;  %1790 = vperm.xlu1 %3444, %v1646_v41  }
 0x728   : > { %3207 = vmatprep.subr.bf16.mxu1 %v4563_v6 }
 0x72a   : > { %1765 = vperm.xlu0 %3445, %v1641_v42  }
 0x72b   : > { %1795 = vperm.xlu1 %3444, %v1647_v44  }
 0x72e   : > { %1770 = vperm.xlu0 %3445, %v1642_v45  }
 0x765   : > { %v4033_v49 = vpop.permute.xlu1 %4032 }
 0x766   : > { %v4035_v50 = vunpack.i.h.bf16 %v4033_v49  ;;  %v4034_v51 = vunpack.i.l.bf16 %v4033_v49 }
 0x768   : > { %v1893_v53 = vsel %vm1461_vm15, %v4034_v51, %v4035_v50 }
 0x769   : > { %v3208_v54 = vpack.c.bf16 %v1893_v53, %v1892_v52  ;;  %v4038_v55 = vpop.permute.xlu0 %4037 }
 0x76a   : > { %v4040_v56 = vunpack.i.h.bf16 %v4038_v55  ;;  %v4039_v57 = vunpack.i.l.bf16 %v4038_v55 }
 0x76b   : > { %3209 = vmatpush1.bf16.msra.mxu1 %v3208_v54 }
 0x76c   : > { %3210 = vmatprep.subr.bf16.mxu1 %v4563_v6  ;;  %v1894_v61 = vsel %vm1461_vm15, %v4039_v57, %v4040_v56 }
 0x76d   : > { %v4043_v58 = vpop.permute.xlu1 %4042 }
 0x76e   : > { %v4045_v59 = vunpack.i.h.bf16 %v4043_v58  ;;  %v4044_v60 = vunpack.i.l.bf16 %v4043_v58 }
 0x770   : > { %v1895_v62 = vsel %vm1461_vm15, %v4044_v60, %v4045_v59 }
 0x771   : > { %v3211_v63 = vpack.c.bf16 %v1895_v62, %v1894_v61  ;;  %v4048_v1 = vpop.permute.xlu0 %4047 }
 0x772   : > { %v4050_v40 = vunpack.i.h.bf16 %v4048_v1  ;;  %v4049_v2 = vunpack.i.l.bf16 %v4048_v1  ;;  %v1627_v1 = vld [vmem:[#allocation9] sm:$0xff] }
 0x773   : > { %3212 = vmatpush1.bf16.msra.mxu1 %v3211_v63  ;;  %v5274_v63 = vld [vmem:[#allocation2 + $0x78] sm:$0xff] }
 0x774   : > { %3213 = vmatprep.subr.bf16.mxu1 %v4563_v6  ;;  %v1896_v7 = vsel %vm1461_vm15, %v4049_v2, %v4050_v40  ;;  %v1630_v2 = vld [vmem:[#allocation9 + $0x18] sm:$0xff] }
 0x775   : > { %v4053_v3 = vpop.permute.xlu1 %4052  ;;  %v4058_v4 = vpop.permute.xlu0 %4057 }
 0x776   : > { %v4055_v43 = vunpack.i.h.bf16 %v4053_v3  ;;  %v4054_v5 = vunpack.i.l.bf16 %v4053_v3  ;;  %v4060_v0 = vunpack.i.h.bf16 %v4058_v4  ;;  %v4059_v9 = vunpack.i.l.bf16 %v4058_v4  ;;  %v1629_v3 = vld [vmem:[#allocation9 + $0x10] sm:$0xff]  ;;  %v1632_v4 = vld [vmem:[#allocation9 + $0x28] sm:$0xff] }
 0x778   : > { %v1897_v8 = vsel %vm1461_vm15, %v4054_v5, %v4055_v43  ;;  %v3217_v13 = vpack.c.bf16 %v4060_v0, %v4059_v9  ;;  %v1631_v43 = vld [vmem:[#allocation9 + $0x20] sm:$0xff]  ;;  %v1634_v5 = vld [vmem:[#allocation9 + $0x38] sm:$0xff] }
 0x779   : > { %v3214_v10 = vpack.c.bf16 %v1897_v8, %v1896_v7  ;;  %v4063_v11 = vpop.permute.xlu1 %4062  ;;  %v4068_v12 = vpop.permute.xlu0 %4067  ;;  %v1633_v7 = vld [vmem:[#allocation9 + $0x30] sm:$0xff]  ;;  %v1636_v8 = vld [vmem:[#allocation9 + $0x48] sm:$0xff]  ;;  %v1635_v0 = vld [vmem:[#allocation9 + $0x40] sm:$0xff] }
 0x77a   : > { %v4065_v14 = vunpack.i.h.bf16 %v4063_v11  ;;  %v4064_v15 = vunpack.i.l.bf16 %v4063_v11  ;;  %v4070_v17 = vunpack.i.h.bf16 %v4068_v12  ;;  %v4069_v18 = vunpack.i.l.bf16 %v4068_v12  ;;  %v1638_v9 = vld [vmem:[#allocation9 + $0x58] sm:$0xff]  ;;  %v1640_v11 = vld [vmem:[#allocation9 + $0x68] sm:$0x3]  ;;  %v1639_v12 = vld [vmem:[#allocation9 + $0x60] sm:$0x3] }
 0x77b   : > { %3215 = vmatpush1.bf16.msra.mxu1 %v3214_v10  ;;  %v1637_v10 = vld [vmem:[#allocation9 + $0x50] sm:$0xff] }
 0x77c   : > { %3216 = vmatprep.subr.bf16.mxu1 %v4563_v6  ;;  %v3220_v20 = vpack.c.bf16 %v4065_v14, %v4064_v15  ;;  %v1898_v26 = vsel %vm1461_vm15, %v4069_v18, %v4070_v17 }
 0x77d   : > { %v4073_v16 = vpop.permute.xlu1 %4072 }
 0x77e   : > { %v4074_v21 = vunpack.i.l.bf16 %v4073_v16  ;;  %v4075_v27 = vunpack.i.h.bf16 %v4073_v16 }
 0x77f   : > { %3218 = vmatpush1.bf16.msra.mxu1 %v3217_v13 }
 0x780   : > { %v4078_v19 = vpop.permute.xlu0 %4077  ;;  %3219 = vmatprep.subr.bf16.mxu1 %v4563_v6  ;;  %v3223_v29 = vpack.c.bf16 %v1898_v26, %v4074_v21 }
 0x781   : > { %v4083_v22 = vpop.permute.xlu1 %4082  ;;  %v4080_v23 = vunpack.i.h.bf16 %v4078_v19  ;;  %v4079_v24 = vunpack.i.l.bf16 %v4078_v19 }
 0x782   : > { %v4084_v25 = vunpack.i.l.bf16 %v4083_v22  ;;  %v4085_v37 = vunpack.i.h.bf16 %v4083_v22 }
 0x783   : > { %3221 = vmatpush1.bf16.msra.mxu1 %v3220_v20  ;;  %v1899_v32 = vsel %vm1461_vm15, %v4075_v27, %v4079_v24  ;;  %v2118_v20 = vld [vmem:[#allocation3 + $0x10] sm:$0xff] }
 0x784   : > { %v4088_v28 = vpop.permute.xlu0 %4087  ;;  %3222 = vmatprep.subr.bf16.mxu1 %v4563_v6  ;;  %v1900_v33 = vsel %vm1461_vm15, %v4080_v23, %v4084_v25 }
 0x785   : > { %v4089_v30 = vunpack.i.l.bf16 %v4088_v28  ;;  %v4098_v31 = vpop.permute.xlu1 %4097  ;;  %v4090_v34 = vunpack.i.h.bf16 %v4088_v28  ;;  %v3226_v41 = vpack.c.bf16 %v1900_v33, %v1899_v32 }
 0x786   : > { %v4099_v35 = vunpack.i.l.bf16 %v4098_v31  ;;  %v4100_v48 = vunpack.i.h.bf16 %v4098_v31 }
 0x787   : > { %3224 = vmatpush1.bf16.msra.mxu1 %v3223_v29  ;;  %v1901_v36 = vsel %vm1461_vm15, %v4085_v37, %v4089_v30  ;;  %v2119_v37 = vld [vmem:[#allocation3 + $0x28] sm:$0xff] }
 0x788   : > { %v4093_v38 = vpop.permute.xlu0 %4092  ;;  %3225 = vmatprep.subr.bf16.mxu1 %v4563_v6  ;;  %v1902_v44 = vsel %vm1461_vm15, %v4090_v34, %v4099_v35  ;;  %v2120_v35 = vld [vmem:[#allocation3 + $0x40] sm:$0xff] }
 0x789   : > { %v4103_v42 = vpop.permute.xlu1 %4102  ;;  %v4095_v45 = vunpack.i.h.bf16 %v4093_v38  ;;  %v4094_v46 = vunpack.i.l.bf16 %v4093_v38  ;;  %v3229_v50 = vpack.c.bf16 %v1902_v44, %v1901_v36 }
 0x78a   : > { %v4104_v47 = vunpack.i.l.bf16 %v4103_v42  ;;  %v4105_v56 = vunpack.i.h.bf16 %v4103_v42 }
 0x78b   : > { %3227 = vmatpush1.bf16.msra.mxu1 %v3226_v41  ;;  %v1903_v51 = vsel %vm1461_vm15, %v4100_v48, %v4094_v46  ;;  %v2121_v48 = vld [vmem:[#allocation3 + $0x58] sm:$0xff] }
 0x78c   : > { %v4108_v49 = vpop.permute.xlu0 %4107  ;;  %3228 = vmatprep.subr.bf16.mxu1 %v4563_v6  ;;  %v1904_v52 = vsel %vm1461_vm15, %v4095_v45, %v4104_v47 }
 0x78d   : > { %v4110_v53 = vunpack.i.h.bf16 %v4108_v49  ;;  %v4109_v54 = vunpack.i.l.bf16 %v4108_v49  ;;  %v1883_v55 = vpop.permute.xlu1 %1882  ;;  %v3232_v57 = vpack.c.bf16 %v1904_v52, %v1903_v51 }
 0x78f   : > { %3230 = vmatpush1.bf16.msra.mxu1 %v3229_v50  ;;  %v1905_v58 = vsel %vm1461_vm15, %v4105_v56, %v4109_v54  ;;  %v1906_v59 = vsel %vm1461_vm15, %v4110_v53, %v1883_v55 }
 0x790   : > { %3231 = vmatprep.subr.bf16.mxu1 %v4563_v6  ;;  %v3235_v60 = vpack.c.bf16 %v1906_v59, %v1905_v58  ;;  %v1885_v61 = vpop.permute.xlu0 %1884 }
 0x791   : > { %v1887_v62 = vpop.permute.xlu1 %1886 }
 0x792   : > { %v1907_v40 = vsel %vm1461_vm15, %v1885_v61, %v1887_v62 }
 0x793   : > { %3233 = vmatpush1.bf16.msra.mxu1 %v3232_v57 }
 0x794   : > { %3234 = vmatprep.subr.bf16.mxu1 %v4563_v6 }
 0x797   : > { %3236 = vmatpush1.bf16.msra.mxu1 %v3235_v60 }
 0x798   : > { %2003 = vmatprep.subr.mxu1 %v5274_v63 }
 0x79b   : > { %2004 = vmatpush1.msra.mxu1 %v1907_v40  ;;  %v2122_v40 = vld [vmem:[#allocation3 + $0x70] sm:$0xff] }
 0x79c   : > { %2020 = vmatmul.mubr.f32.vlgmr.msra.gmra.mrb[8].mxu1 %v1627_v1  ;;  %3272 = vmatprep.subr.bf16.mxu1 %v4563_v6 }
 0x79d   : > { %2893 = vmatprep.mubr.msk.f32.mxu1 %vm1933_vm2, %v1630_v2 }
 0x7a0   : > { %2025 = vmatmul.mubr.f32.gmra.mrb[10].mxu1 %v1629_v3 }
 0x7a1   : > { %2894 = vmatprep.mubr.msk.f32.mxu1 %vm1933_vm2, %v1632_v4  ;;  %v1776_v13 = vpop.permute.xlu0 %1775 }
 0x7a2   : > { %v1781_v38 = vpop.permute.xlu1 %1780 }
 0x7a4   : > { %2030 = vmatmul.mubr.f32.gmra.mrb[12].mxu1 %v1631_v43 }
 0x7a5   : > { %2895 = vmatprep.mubr.msk.f32.mxu1 %vm1933_vm2, %v1634_v5  ;;  %v1786_v14 = vpop.permute.xlu0 %1785 }
 0x7a6   : > { %v1791_v53 = vpop.permute.xlu1 %1790 }
 0x7a8   : > { %2035 = vmatmul.mubr.f32.gmra.mrb[14].mxu1 %v1633_v7 }
 0x7a9   : > { %2896 = vmatprep.mubr.msk.f32.mxu1 %vm1933_vm2, %v1636_v8  ;;  %v1766_v15 = vpop.permute.xlu0 %1765 }
 0x7aa   : > { %v1796_v2 = vpop.permute.xlu1 %1795 }
 0x7ac   : > { %2040 = vmatmul.mubr.f32.gmra.mrb[16].mxu1 %v1635_v0 }
 0x7ad   : > { %2897 = vmatprep.mubr.msk.f32.mxu1 %vm1933_vm2, %v1638_v9  ;;  %v1771_v21 = vpop.permute.xlu0 %1770  ;;  %v2123_v9 = vld [vmem:[#allocation3 + $0x88] sm:$0xff] }
 0x7b0   : > { %2045 = vmatmul.mubr.f32.gmra.mrb[18].mxu1 %v1637_v10 }
 0x7b1   : > { %2898 = vmatprep.mubr.msk.f32.mxu1 %vm1933_vm2, %v1640_v11 }
 0x7b4   : > { %2050 = vmatmul.mubr.f32.gmra.mrb[20].mxu1 %v1639_v12 }
 0x86f   : > { %v2021_v16 = vpop.f32.mrb[8].mxu1 }
 0x870   : > { %v2022_v17 = vadd.f32 %v2021_v16, %v1766_v15  ;;  %v2023_v18 = vpop.f32.mrb[9].mxu1  ;;  %v2124_v15 = vld [vmem:[#allocation3 + $0xa0] sm:$0xff] }
 0x872   : > { %v2055_v19 = vmax.f32 %v2022_v17, 0.0 }
 0x873   : > { %v2026_v22 = vpop.f32.mrb[10].mxu1 }
 0x874   : > { %v5287_v23 = vsel %vm749_vm11, %v2055_v19, 0.0  ;;  %v2027_v24 = vadd.f32 %v2026_v22, %v1771_v21  ;;  %v2028_v25 = vpop.f32.mrb[11].mxu1 }
 0x875   : > { %v5290_v26 = vpack.i.bf16 %v2118_v20, %v5287_v23  ;;  %v5304_v33 = vpack.i.bf16 %v5287_v23, %v5274_v63 }
 0x876   : > { %v2056_v27 = vmax.f32 %v2027_v24, 0.0 }
 0x877   : > { %v2031_v28 = vpop.f32.mrb[12].mxu1  ;;  %4112 = vrot.lane.b32.xlu1 %v5290_v26, %s4550_s28 }
 0x878   : > { %v5296_v29 = vsel %vm749_vm11, %v2056_v27, 0.0  ;;  %v2032_v30 = vadd.f32 %v2031_v28, %v1776_v13  ;;  %v2033_v31 = vpop.f32.mrb[13].mxu1 }
 0x879   : > { %v5300_v32 = vpack.i.bf16 %v5296_v29, %v5274_v63  ;;  %v4121_v46 = vpack.i.bf16 %v2119_v37, %v5296_v29 }
 0x87a   : > { %v2057_v34 = vmax.f32 %v2032_v30, 0.0 }
 0x87b   : > { %v2036_v41 = vpop.f32.mrb[14].mxu1  ;;  %4127 = vrot.lane.b32.xlu0 %v5300_v32, %s4551_s29  ;;  %4117 = vrot.lane.b32.xlu1 %v5304_v33, %s4551_s29 }
 0x87c   : > { %v2064_v36 = vsel %vm749_vm11, %v2057_v34, 0.0  ;;  %v2037_v42 = vadd.f32 %v2036_v41, %v1781_v38  ;;  %v2038_v44 = vpop.f32.mrb[15].mxu1 }
 0x87d   : > { %v4131_v45 = vpack.i.bf16 %v2120_v35, %v2064_v36  ;;  %v4136_v55 = vpack.i.bf16 %v2064_v36, %v5274_v63 }
 0x87e   : > { %v2058_v47 = vmax.f32 %v2037_v42, 0.0 }
 0x87f   : > { %v2041_v49 = vpop.f32.mrb[16].mxu1  ;;  %4132 = vrot.lane.b32.xlu0 %v4131_v45, %s4550_s28  ;;  %4122 = vrot.lane.b32.xlu1 %v4121_v46, %s4550_s28 }
 0x880   : > { %v2065_v50 = vsel %vm749_vm11, %v2058_v47, 0.0  ;;  %v2042_v51 = vadd.f32 %v2041_v49, %v1786_v14  ;;  %v2043_v52 = vpop.f32.mrb[17].mxu1 }
 0x881   : > { %2072 = vst [vmem:[#allocation3 + $0x50] sm:$0xff] %v2065_v50  ;;  %v4146_v54 = vpack.i.bf16 %v2121_v48, %v2065_v50  ;;  %v4141_v56 = vpack.i.bf16 %v2065_v50, %v2064_v36  ;;  %v4151_v62 = vpack.i.bf16 %v2065_v50, %v5274_v63 }
 0x882   : > { %v2059_v57 = vmax.f32 %v2042_v51, 0.0 }
 0x883   : > { %v2046_v58 = vpop.f32.mrb[18].mxu1  ;;  %4147 = vrot.lane.b32.xlu0 %v4146_v54, %s4550_s28  ;;  %4137 = vrot.lane.b32.xlu1 %v4136_v55, %s4551_s29 }
 0x884   : > { %v2066_v59 = vsel %vm749_vm11, %v2059_v57, 0.0  ;;  %v2047_v60 = vadd.f32 %v2046_v58, %v1791_v53  ;;  %v2048_v61 = vpop.f32.mrb[19].mxu1 }
 0x885   : > { %v4156_v8 = vpack.i.bf16 %v2122_v40, %v2066_v59  ;;  %v4161_v12 = vpack.i.bf16 %v2066_v59, %v5274_v63 }
 0x886   : > { %v2060_v1 = vmax.f32 %v2047_v60, 0.0 }
 0x887   : > { %v2051_v3 = vpop.f32.mrb[20].mxu1  ;;  %4152 = vrot.lane.b32.xlu0 %v4151_v62, %s4551_s29  ;;  %4142 = vrot.lane.b32.xlu1 %v4141_v56, %s4553_s15 }
 0x888   : > { %v2067_v4 = vsel %vm749_vm11, %v2060_v1, 0.0  ;;  %v2052_v43 = vadd.f32 %v2051_v3, %v1796_v2  ;;  %v2053_v5 = vpop.f32.mrb[21].mxu1 }
 0x889   : > { %v4166_v7 = vpack.i.bf16 %v2067_v4, %v2066_v59  ;;  %v4171_v11 = vpack.i.bf16 %v2123_v9, %v2067_v4  ;;  %v4191_v17 = vpack.i.bf16 %v2067_v4, %v5274_v63 }
 0x88a   : > { %v2061_v0 = vmax.f32 %v2052_v43, 0.0 }
 0x88b   : > { %4167 = vrot.lane.b32.xlu0 %v4166_v7, %s4553_s15  ;;  %4157 = vrot.lane.b32.xlu1 %v4156_v8, %s4550_s28 }
 0x88c   : > { %v2068_v10 = vsel %vm749_vm11, %v2061_v0, 0.0 }
 0x88d   : > { %2075 = vst [vmem:[#allocation3 + $0x98] sm:$0x3] %v2068_v10 }
 0x88f   : > { %4172 = vrot.lane.b32.xlu0 %v4171_v11, %s4550_s28  ;;  %4162 = vrot.lane.b32.xlu1 %v4161_v12, %s4551_s29 }
 0x893   : > { %4187 = vrot.lane.b32.xlu1 %v4121_v46, %s4555_s23 }
 0x894   : > { %v2117_v13 = vld [vmem:[#allocation3 + $0x98] sm:$0xff] }
 0x895   : > { %v4176_v14 = vpack.i.bf16 %v5287_v23, %v2117_v13  ;;  %v4206_v16 = vpack.i.bf16 %v2124_v15, %v2117_v13  ;;  %v4221_v18 = vpack.i.bf16 %v2117_v13, %v5274_v63 }
 0x897   : > { %4177 = vrot.lane.b32.xlu0 %v4176_v14, %s4553_s15  ;;  %4202 = vrot.lane.b32.xlu1 %v4146_v54, %s4555_s23 }
 0x89b   : > { %4182 = vrot.lane.b32.xlu0 %v5290_v26, %s4555_s23  ;;  %4207 = vrot.lane.b32.xlu1 %v4206_v16, %s4550_s28  ;;  %s5528_s28 = scalar_lea.vmem %s5560_s11, %s3277_s25 }
 0x89f   : > { %4192 = vrot.lane.b32.xlu0 %v4191_v17, %s4551_s29  ;;  %4212 = vrot.lane.b32.xlu1 %v4156_v8, %s4555_s23 }
 0x8a3   : > { %4197 = vrot.lane.b32.xlu0 %v4131_v45, %s4555_s23  ;;  %4222 = vrot.lane.b32.xlu1 %v4221_v18, %s4551_s29 }
 0x8a7   : > { %2176 = vrot.lane.b32.xlu0 %v5296_v29, %s4553_s15  ;;  %4227 = vrot.lane.b32.xlu1 %v5304_v33, %s4562_s13 }
 0x8ab   : > { %4217 = vrot.lane.b32.xlu0 %v4171_v11, %s4555_s23  ;;  %4242 = vrot.lane.b32.xlu1 %v4151_v62, %s4562_s13 }
 0x8af   : > { %2256 = vrot.lane.b32.xlu0 %v2124_v15, %s4555_s23  ;;  %4252 = vrot.lane.b32.xlu1 %v4191_v17, %s4562_s13 }
 0x8b3   : > { %4232 = vrot.lane.b32.xlu0 %v5300_v32, %s4562_s13  ;;  %2254 = vrot.lane.b32.xlu1 %v2117_v13, %s4555_s23 }
 0x8b7   : > { %4237 = vrot.lane.b32.xlu0 %v4136_v55, %s4562_s13 }
 0x8bb   : > { %4247 = vrot.lane.b32.xlu0 %v4161_v12, %s4562_s13 }
 0x8e9   : > { %v4113_v19 = vpop.permute.xlu1 %4112 }
 0x8ea   : > { %v4115_v20 = vunpack.i.h.bf16 %v4113_v19  ;;  %v4114_v21 = vunpack.i.l.bf16 %v4113_v19 }
 0x8ec   : > { %v2223_v22 = vsel %vm534_vm1, %v4114_v21, %v4115_v20 }
 0x8ed   : > { %v4256_v23 = vpack.i.bf16 %v2223_v22, %v4114_v21  ;;  %v4128_v24 = vpop.permute.xlu0 %4127  ;;  %v4118_v25 = vpop.permute.xlu1 %4117 }
 0x8ee   : > { %v4120_v26 = vunpack.i.h.bf16 %v4118_v25  ;;  %v4119_v27 = vunpack.i.l.bf16 %v4118_v25  ;;  %v4130_v51 = vunpack.i.h.bf16 %v4128_v24  ;;  %v4129_v52 = vunpack.i.l.bf16 %v4128_v24 }
 0x8ef   : > { %4257 = vrot.lane.b32.xlu1 %v4256_v23, %s4562_s13 }
 0x8f0   : > { %v2167_v28 = vsel %vm522_vm0, %v4119_v27, %v4120_v26  ;;  %v2168_v59 = vsel %vm522_vm0, %v4129_v52, %v4130_v51 }
 0x8f1   : > { %v4261_v29 = vpack.i.bf16 %v2167_v28, %v2117_v13  ;;  %v4133_v30 = vpop.permute.xlu0 %4132  ;;  %v4123_v31 = vpop.permute.xlu1 %4122 }
 0x8f2   : > { %v4135_v32 = vunpack.i.h.bf16 %v4133_v30  ;;  %v4134_v33 = vunpack.i.l.bf16 %v4133_v30  ;;  %v4125_v34 = vunpack.i.h.bf16 %v4123_v31  ;;  %v4124_v35 = vunpack.i.l.bf16 %v4123_v31 }
 0x8f3   : > { %4262 = vrot.lane.b32.xlu1 %v4261_v29, %s4562_s13 }
 0x8f4   : > { %v2225_v37 = vsel %vm534_vm1, %v4134_v33, %v4135_v32  ;;  %v2224_v38 = vsel %vm534_vm1, %v4124_v35, %v4125_v34 }
 0x8f5   : > { %v4271_v41 = vpack.i.bf16 %v5274_v63, %v2225_v37  ;;  %v4266_v36 = vpack.i.bf16 %v4134_v33, %v2224_v38  ;;  %v4148_v42 = vpop.permute.xlu0 %4147  ;;  %v4138_v44 = vpop.permute.xlu1 %4137 }
 0x8f6   : > { %v4149_v45 = vunpack.i.l.bf16 %v4148_v42  ;;  %v4140_v47 = vunpack.i.h.bf16 %v4138_v44  ;;  %v4139_v48 = vunpack.i.l.bf16 %v4138_v44  ;;  %v4150_v58 = vunpack.i.h.bf16 %v4148_v42 }
 0x8f7   : > { %4272 = vrot.lane.b32.xlu0 %v4271_v41, %s4562_s13  ;;  %4267 = vrot.lane.b32.xlu1 %v4266_v36, %s4562_s13 }
 0x8f8   : > { %v4286_v46 = vpack.i.bf16 %v4149_v45, %v4120_v26  ;;  %v2169_v53 = vsel %vm522_vm0, %v4139_v48, %v4140_v47  ;;  %v2226_v4 = vsel %vm534_vm1, %v4149_v45, %v4150_v58 }
 0x8f9   : > { %v5369_v49 = vpop.permute.xlu0 %4152  ;;  %v4143_v50 = vpop.permute.xlu1 %4142  ;;  %v4281_v60 = vpack.i.bf16 %v2169_v53, %v4130_v51 }
 0x8fa   : > { %v4155_v0 = vunpack.i.h.bf16 %v5369_v49  ;;  %v4154_v31 = vunpack.i.l.bf16 %v5369_v49 }
 0x8fb   : > { %4287 = vrot.lane.b32.xlu0 %v4286_v46, %s4562_s13  ;;  %4277 = vrot.lane.b32.xlu1 %v4143_v50, %s4562_s13 }
 0x8fd   : > { %v4168_v54 = vpop.permute.xlu0 %4167  ;;  %v4158_v55 = vpop.permute.xlu1 %4157 }
 0x8fe   : > { %v4160_v56 = vunpack.i.h.bf16 %v4158_v55  ;;  %v4159_v57 = vunpack.i.l.bf16 %v4158_v55 }
 0x8ff   : > { %4282 = vrot.lane.b32.xlu1 %v4281_v60, %s4562_s13 }
 0x900   : > { %v2227_v61 = vsel %vm534_vm1, %v4159_v57, %v4160_v56  ;;  %v4291_v43 = vpack.i.bf16 %v4159_v57, %v2226_v4 }
 0x901   : > { %v4296_v62 = vpack.i.bf16 %v2168_v59, %v2227_v61  ;;  %v4163_v1 = vpop.permute.xlu1 %4162  ;;  %v4173_v40 = vpop.permute.xlu0 %4172 }
 0x902   : > { %v4165_v2 = vunpack.i.h.bf16 %v4163_v1  ;;  %v4164_v3 = vunpack.i.l.bf16 %v4163_v1  ;;  %v4174_v5 = vunpack.i.l.bf16 %v4173_v40  ;;  %v4175_v20 = vunpack.i.h.bf16 %v4173_v40 }
 0x903   : > { %4297 = vrot.lane.b32.xlu0 %v4296_v62, %s4562_s13  ;;  %4292 = vrot.lane.b32.xlu1 %v4291_v43, %s4562_s13  ;;  %v2077_v62 = vld [vmem:[#allocation11 + $0x8] sm:$0xff] }
 0x904   : > { %v2171_v7 = vsel %vm522_vm0, %v4164_v3, %v4165_v2  ;;  %v4311_v10 = vpack.i.bf16 %v4174_v5, %v4140_v47  ;;  %v2228_v34 = vsel %vm534_vm1, %v4174_v5, %v4175_v20  ;;  %v2170_v47 = vsel %vm522_vm0, %v4154_v31, %v4155_v0  ;;  %2575 = vmatprep.mubr.f32.mxu0 %v2077_v62 }
 0x905   : > { %v4188_v8 = vpop.permute.xlu1 %4187  ;;  %v4301_v9 = vpack.i.bf16 %v2171_v7, %v4155_v0 }
 0x906   : > { %v4189_v19 = vunpack.i.l.bf16 %v4188_v8  ;;  %v4190_v21 = vunpack.i.h.bf16 %v4188_v8 }
 0x907   : > { %4307 = vrot.lane.b32.xlu0 %v4168_v54, %s4562_s13  ;;  %4302 = vrot.lane.b32.xlu1 %v4301_v9, %s4562_s13 }
 0x908   : > { %v2259_v32 = vsel %vm858_vm12, %v4189_v19, %v4190_v21 }
 0x909   : > { %v5383_v11 = vpop.permute.xlu0 %4177  ;;  %v4203_v12 = vpop.permute.xlu1 %4202 }
 0x90a   : > { %v4179_v13 = vunpack.i.l.bf16 %v5383_v11  ;;  %v4205_v53 = vunpack.i.h.bf16 %v4203_v12  ;;  %v4204_v54 = vunpack.i.l.bf16 %v4203_v12  ;;  %v4180_v56 = vunpack.i.h.bf16 %v5383_v11  ;;  %v2097_v12 = vld [vmem:[%s5559_s10] sm:$0xff] }
 0x90b   : > { %4312 = vrot.lane.b32.xlu0 %v4311_v10, %s4562_s13 }
 0x90c   : > { %v4316_v14 = vpack.i.bf16 %v4124_v35, %v4179_v13  ;;  %v2261_v60 = vsel %vm858_vm12, %v4204_v54, %v4205_v53  ;;  %v2098_v13 = vld [vmem:[%s5559_s10 + $0x8] sm:$0xff] }
 0x90d   : > { %v4183_v15 = vpop.permute.xlu0 %4182  ;;  %v4208_v16 = vpop.permute.xlu1 %4207 }
 0x90e   : > { %v4185_v17 = vunpack.i.h.bf16 %v4183_v15  ;;  %v4184_v18 = vunpack.i.l.bf16 %v4183_v15  ;;  %v4210_v26 = vunpack.i.h.bf16 %v4208_v16  ;;  %v4209_v27 = vunpack.i.l.bf16 %v4208_v16  ;;  %v2100_v15 = vld [vmem:[%s5559_s10 + $0x18] sm:$0xff]  ;;  %v2101_v16 = vld [vmem:[%s5559_s10 + $0x20] sm:$0xff] }
 0x90f   : > { %4317 = vrot.lane.b32.xlu0 %v4316_v14, %s4562_s13  ;;  %v2099_v14 = vld [vmem:[%s5559_s10 + $0x10] sm:$0xff] }
 0x910   : > { %v2258_v22 = vsel %vm858_vm12, %v4184_v18, %v4185_v17  ;;  %v4321_v23 = vpack.i.bf16 %v4184_v18, %v4165_v2  ;;  %v2229_v37 = vsel %vm534_vm1, %v4209_v27, %v4210_v26  ;;  %v4336_v38 = vpack.i.bf16 %v4209_v27, %v2228_v34  ;;  %v2102_v17 = vld [vmem:[%s5559_s10 + $0x28] sm:$0xff]  ;;  %v2103_v18 = vld [vmem:[%s5559_s10 + $0x30] sm:$0x3] }
 0x911   : > { %v4326_v24 = vpack.i.bf16 %v4189_v19, %v2258_v22  ;;  %v4193_v25 = vpop.permute.xlu0 %4192  ;;  %v4213_v28 = vpop.permute.xlu1 %4212  ;;  %v4341_v49 = vpack.i.bf16 %v2170_v47, %v2229_v37  ;;  %v4361_v2 = vpack.i.bf16 %v4180_v56, %v2261_v60  ;;  %vm2489_vm1 = vcmask 195584  }
 0x912   : > { %v4195_v29 = vunpack.i.h.bf16 %v4193_v25  ;;  %v4194_v30 = vunpack.i.l.bf16 %v4193_v25  ;;  %v4214_v1 = vunpack.i.l.bf16 %v4213_v28  ;;  %v4215_v40 = vunpack.i.h.bf16 %v4213_v28 }
 0x913   : > { %4327 = vrot.lane.b32.xlu1 %v4326_v24, %s4562_s13  ;;  %4322 = vrot.lane.b32.xlu0 %v4321_v23, %s4562_s13 }
 0x914   : > { %v2172_v33 = vsel %vm522_vm0, %v4194_v30, %v4195_v29  ;;  %v2262_v7 = vsel %vm858_vm12, %v4214_v1, %v4215_v40 }
 0x915   : > { %v4331_v35 = vpack.i.bf16 %v2172_v33, %v2259_v32  ;;  %v4198_v41 = vpop.permute.xlu0 %4197  ;;  %v4223_v36 = vpop.permute.xlu1 %4222 }
 0x916   : > { %v4200_v42 = vunpack.i.h.bf16 %v4198_v41  ;;  %v4199_v44 = vunpack.i.l.bf16 %v4198_v41  ;;  %v4225_v45 = vunpack.i.h.bf16 %v4223_v36  ;;  %v4224_v46 = vunpack.i.l.bf16 %v4223_v36 }
 0x917   : > { %4337 = vrot.lane.b32.xlu1 %v4336_v38, %s4562_s13  ;;  %4332 = vrot.lane.b32.xlu0 %v4331_v35, %s4562_s13 }
 0x918   : > { %v2173_v48 = vsel %vm522_vm0, %v4224_v46, %v4225_v45  ;;  %v2260_v55 = vsel %vm858_vm12, %v4199_v44, %v4200_v42  ;;  %v4346_v58 = vpack.i.bf16 %v4199_v44, %v4225_v45  ;;  %vm4564_vm0 = vmmov 0  }
 0x919   : > { %v2177_v50 = vpop.permute.xlu0 %2176  ;;  %v4351_v51 = vpack.i.bf16 %v2173_v48, %v4195_v29  ;;  %v5401_v52 = vpop.permute.xlu1 %4227  ;;  %v4356_v57 = vpack.i.bf16 %v4204_v54, %v2260_v55  ;;  %3095 = vmatprep.mubr.msk.f32.mxu1 %vm4564_vm0, %v5274_v63 }
 0x91a   : > { %v4366_v3 = vpack.i.bf16 %v4214_v1, %v2177_v50  ;;  %v4230_v28 = vunpack.i.h.bf16 %v5401_v52  ;;  %v4229_v29 = vunpack.i.l.bf16 %v5401_v52 }
 0x91b   : > { %4342 = vrot.lane.b32.xlu0 %v4341_v49, %s4562_s13  ;;  %4352 = vrot.lane.b32.xlu1 %v4351_v51, %s4562_s13 }
 0x91c   : > { %v2426_v35 = vsel %vm1461_vm15, %v4229_v29, %v4230_v28 }
 0x91d   : > { %v5407_v59 = vpop.permute.xlu1 %4242  ;;  %v4218_v61 = vpop.permute.xlu0 %4217 }
 0x91e   : > { %v4219_v4 = vunpack.i.l.bf16 %v4218_v61  ;;  %v4220_v5 = vunpack.i.h.bf16 %v4218_v61  ;;  %v4245_v45 = vunpack.i.h.bf16 %v5407_v59  ;;  %v4244_v46 = vunpack.i.l.bf16 %v5407_v59 }
 0x91f   : > { %4347 = vrot.lane.b32.xlu0 %v4346_v58, %s4562_s13  ;;  %4357 = vrot.lane.b32.xlu1 %v4356_v57, %s4562_s13 }
 0x920   : > { %v4371_v8 = vpack.i.bf16 %v4219_v4, %v2262_v7  ;;  %v2263_v0 = vsel %vm858_vm12, %v4219_v4, %v4220_v5  ;;  %v2429_v52 = vsel %vm1461_vm15, %v4244_v46, %v4245_v45 }
 0x921   : > { %v5412_v43 = vpop.permute.xlu1 %4252  ;;  %v2257_v10 = vpop.permute.xlu0 %2256 }
 0x922   : > { %v4255_v53 = vunpack.i.h.bf16 %v5412_v43  ;;  %v4254_v55 = vunpack.i.l.bf16 %v5412_v43 }
 0x923   : > { %4362 = vrot.lane.b32.xlu0 %v4361_v2, %s4562_s13  ;;  %4367 = vrot.lane.b32.xlu1 %v4366_v3, %s4562_s13 }
 0x924   : > { %v2431_v40 = vsel %vm1461_vm15, %v4254_v55, %v4255_v53 }
 0x925   : > { %v2255_v9 = vpop.permute.xlu1 %2254  ;;  %v4233_v19 = vpop.permute.xlu0 %4232 }
 0x926   : > { %v2264_v11 = vsel %vm858_vm12, %v2255_v9, %v2257_v10  ;;  %v4235_v26 = vunpack.i.h.bf16 %v4233_v19  ;;  %v4234_v27 = vunpack.i.l.bf16 %v4233_v19 }
 0x927   : > { %4372 = vrot.lane.b32.xlu0 %v4371_v8, %s4562_s13  ;;  %2420 = vrot.lane.b32.xlu1 %v2263_v0, %s4562_s13 }
 0x928   : > { %v2427_v31 = vsel %vm1461_vm15, %v4234_v27, %v4235_v26 }
 0x929   : > { %v4238_v20 = vpop.permute.xlu0 %4237  ;;  %v3239_v38 = vpack.c.bf16 %v2427_v31, %v2426_v35 }
 0x92a   : > { %v4240_v42 = vunpack.i.h.bf16 %v4238_v20  ;;  %v4239_v44 = vunpack.i.l.bf16 %v4238_v20 }
 0x92b   : > { %2422 = vrot.lane.b32.xlu0 %v2255_v9, %s4562_s13  ;;  %2424 = vrot.lane.b32.xlu1 %v2264_v11, %s4562_s13 }
 0x92c   : > { %v2428_v48 = vsel %vm1461_vm15, %v4239_v44, %v4240_v42 }
 0x92d   : > { %v4248_v23 = vpop.permute.xlu0 %4247  ;;  %v3243_v56 = vpack.c.bf16 %v2429_v52, %v2428_v48 }
 0x92e   : > { %v4250_v57 = vunpack.i.h.bf16 %v4248_v23  ;;  %v4249_v58 = vunpack.i.l.bf16 %v4248_v23 }
 0x92f   : > { %2267 = vperm.xlu0 %3445, %v2097_v12   ;;  %2272 = vperm.xlu1 %3444, %v2098_v13  }
 0x930   : > { %v2430_v2 = vsel %vm1461_vm15, %v4249_v58, %v4250_v57 }
 0x933   : > { %2277 = vperm.xlu0 %3445, %v2099_v14   ;;  %2282 = vperm.xlu1 %3444, %v2100_v15  }
 0x937   : > { %2287 = vperm.xlu0 %3445, %v2101_v16   ;;  %2292 = vperm.xlu1 %3444, %v2102_v17   ;;  %v3247_v16 = vpack.c.bf16 %v2431_v40, %v2430_v2 }
 0x93b   : > { %2297 = vperm.xlu0 %3445, %v2103_v18  }
 0x961   : > { %v4258_v21 = vpop.permute.xlu1 %4257 }
 0x962   : > { %v4260_v59 = vunpack.i.h.bf16 %v4258_v21  ;;  %v4259_v61 = vunpack.i.l.bf16 %v4258_v21 }
 0x964   : > { %v2440_v11 = vsel %vm1461_vm15, %v4259_v61, %v4260_v59 }
 0x965   : > { %v5446_v22 = vpop.permute.xlu1 %4262 }
 0x966   : > { %v4265_v0 = vunpack.i.h.bf16 %v5446_v22  ;;  %v4264_v23 = vunpack.i.l.bf16 %v5446_v22 }
 0x969   : > { %v5448_v24 = vpop.permute.xlu0 %4272  ;;  %v4268_v25 = vpop.permute.xlu1 %4267 }
 0x96a   : > { %v4274_v62 = vunpack.i.l.bf16 %v5448_v24  ;;  %v4270_v1 = vunpack.i.h.bf16 %v4268_v25  ;;  %v4269_v5 = vunpack.i.l.bf16 %v4268_v25  ;;  %v4275_v12 = vunpack.i.h.bf16 %v5448_v24 }
 0x96c   : > { %v2442_v15 = vsel %vm1461_vm15, %v4270_v1, %v4274_v62  ;;  %v2432_v28 = vsel %vm1461_vm15, %v4275_v12, %v4264_v23 }
 0x96d   : > { %v4278_v30 = vpop.permute.xlu1 %4277  ;;  %v4288_v32 = vpop.permute.xlu0 %4287 }
 0x96e   : > { %v4280_v33 = vunpack.i.h.bf16 %v4278_v30  ;;  %v4279_v34 = vunpack.i.l.bf16 %v4278_v30  ;;  %v4289_v43 = vunpack.i.l.bf16 %v4288_v32  ;;  %v4290_v17 = vunpack.i.h.bf16 %v4288_v32 }
 0x970   : > { %v3237_v37 = vpack.c.bf16 %v4280_v33, %v4279_v34  ;;  %v2433_v25 = vsel %vm1461_vm15, %v4265_v0, %v4289_v43 }
 0x971   : > { %v5454_v41 = vpop.permute.xlu1 %4282  ;;  %v3251_v22 = vpack.c.bf16 %v2433_v25, %v2432_v28 }
 0x972   : > { %3238 = vmatprep.subr.bf16.mxu0 %v3237_v37  ;;  %v4285_v29 = vunpack.i.h.bf16 %v5454_v41  ;;  %v4284_v30 = vunpack.i.l.bf16 %v5454_v41 }
 0x973   : > { %3240 = vmatpush3.bf16.msra.mxu0 %v3239_v38 }
 0x975   : > { %v5456_v36 = vpop.permute.xlu0 %4297  ;;  %v4293_v51 = vpop.permute.xlu1 %4292 }
 0x976   : > { %v4295_v9 = vunpack.i.h.bf16 %v4293_v51  ;;  %v4294_v10 = vunpack.i.l.bf16 %v4293_v51  ;;  %v4299_v18 = vunpack.i.l.bf16 %v5456_v36  ;;  %v4300_v31 = vunpack.i.h.bf16 %v5456_v36 }
 0x978   : > { %v2443_v24 = vsel %vm1461_vm15, %v4290_v17, %v4294_v10  ;;  %v2444_v27 = vsel %vm1461_vm15, %v4295_v9, %v4299_v18  ;;  %v2434_v42 = vsel %vm1461_vm15, %v4300_v31, %v4284_v30  ;;  %v2080_v31 = vld [vmem:[#allocation11 + $0x20] sm:$0xff] }
 0x979   : > { %v4308_v47 = vpop.permute.xlu0 %4307  ;;  %v4303_v3 = vpop.permute.xlu1 %4302  ;;  %v3253_v35 = vpack.c.bf16 %v2444_v27, %v2443_v24 }
 0x97a   : > { %v4310_v49 = vunpack.i.h.bf16 %v4308_v47  ;;  %v4309_v50 = vunpack.i.l.bf16 %v4308_v47  ;;  %v4305_v44 = vunpack.i.h.bf16 %v4303_v3  ;;  %v4304_v45 = vunpack.i.l.bf16 %v4303_v3 }
 0x97c   : > { %v3241_v54 = vpack.c.bf16 %v4310_v49, %v4309_v50 }
 0x97d   : > { %v5464_v60 = vpop.permute.xlu0 %4312 }
 0x97e   : > { %3242 = vmatprep.subr.bf16.mxu0 %v3241_v54  ;;  %v4314_v26 = vunpack.i.l.bf16 %v5464_v60  ;;  %v4315_v41 = vunpack.i.h.bf16 %v5464_v60 }
 0x97f   : > { %3244 = vmatpush3.bf16.msra.mxu0 %v3243_v56 }
 0x980   : > { %v2435_v34 = vsel %vm1461_vm15, %v4285_v29, %v4314_v26  ;;  %v2076_v29 = vld [vmem:[#allocation11] sm:$0xff] }
 0x981   : > { %v4318_v4 = vpop.permute.xlu0 %4317  ;;  %v3255_v47 = vpack.c.bf16 %v2435_v34, %v2434_v42  ;;  %v2083_v34 = vld [vmem:[#allocation11 + $0x38] sm:$0xff]  ;;  %v2084_v42 = vld [vmem:[#allocation11 + $0x40] sm:$0xff] }
 0x982   : > { %v4320_v7 = vunpack.i.h.bf16 %v4318_v4  ;;  %v4319_v8 = vunpack.i.l.bf16 %v4318_v4 }
 0x984   : > { %v3245_v13 = vpack.c.bf16 %v2440_v11, %v4319_v8  ;;  %v2441_v14 = vsel %vm1461_vm15, %v4320_v7, %v4269_v5 }
 0x985   : > { %v4328_v19 = vpop.permute.xlu1 %4327  ;;  %v4323_v20 = vpop.permute.xlu0 %4322  ;;  %v3249_v21 = vpack.c.bf16 %v2442_v15, %v2441_v14 }
 0x986   : > { %3246 = vmatprep.subr.bf16.mxu0 %v3245_v13  ;;  %v4324_v37 = vunpack.i.l.bf16 %v4323_v20  ;;  %v4330_v36 = vunpack.i.h.bf16 %v4328_v19  ;;  %v4329_v48 = vunpack.i.l.bf16 %v4328_v19  ;;  %v4325_v51 = vunpack.i.h.bf16 %v4323_v20 }
 0x987   : > { %3248 = vmatpush3.bf16.msra.mxu0 %v3247_v16 }
 0x988   : > { %3250 = vmatprep.subr.bf16.mxu0 %v3249_v21  ;;  %v2437_v55 = vsel %vm1461_vm15, %v4305_v44, %v4324_v37  ;;  %v2447_v5 = vsel %vm1461_vm15, %v4325_v51, %v4329_v48  ;;  %v2081_v37 = vld [vmem:[#allocation11 + $0x28] sm:$0xff]  ;;  %v2091_v48 = vld [vmem:[#allocation11 + $0x78] sm:$0xff]  ;;  %v2094_v51 = vld [vmem:[#allocation11 + $0x90] sm:$0x3] }
 0x989   : > { %v4338_v32 = vpop.permute.xlu1 %4337  ;;  %v4333_v33 = vpop.permute.xlu0 %4332  ;;  %v2085_v44 = vld [vmem:[#allocation11 + $0x48] sm:$0xff] }
 0x98a   : > { %v4339_v38 = vunpack.i.l.bf16 %v4338_v32  ;;  %v4334_v46 = vunpack.i.l.bf16 %v4333_v33  ;;  %v4340_v52 = vunpack.i.h.bf16 %v4338_v32  ;;  %v4335_v2 = vunpack.i.h.bf16 %v4333_v33  ;;  %v2079_v33 = vld [vmem:[#allocation11 + $0x18] sm:$0xff] }
 0x98b   : > { %3252 = vmatpush3.bf16.msra.mxu0 %v3251_v22 }
 0x98c   : > { %3254 = vmatprep.subr.bf16.mxu0 %v3253_v35  ;;  %v2445_v56 = vsel %vm1461_vm15, %v4315_v41, %v4339_v38  ;;  %v2448_v60 = vsel %vm1461_vm15, %v4330_v36, %v4334_v46  ;;  %v2086_v38 = vld [vmem:[#allocation11 + $0x50] sm:$0xff]  ;;  %v2087_v46 = vld [vmem:[#allocation11 + $0x58] sm:$0xff]  ;;  %v2088_v41 = vld [vmem:[#allocation11 + $0x60] sm:$0xff] }
 0x98d   : > { %v4343_v49 = vpop.permute.xlu0 %4342  ;;  %v4353_v50 = vpop.permute.xlu1 %4352  ;;  %v3261_v43 = vpack.c.bf16 %v2448_v60, %v2447_v5  ;;  %v2090_v36 = vld [vmem:[#allocation11 + $0x70] sm:$0xff] }
 0x98e   : > { %v4345_v53 = vunpack.i.h.bf16 %v4343_v49  ;;  %v4344_v54 = vunpack.i.l.bf16 %v4343_v49  ;;  %v4354_v58 = vunpack.i.l.bf16 %v4353_v50  ;;  %v4355_v3 = vunpack.i.h.bf16 %v4353_v50  ;;  %v2095_v49 = vld [vmem:[#allocation11 + $0x98] sm:$0x3]  ;;  %v2093_v50 = vld [vmem:[#allocation11 + $0x88] sm:$0xff] }
 0x98f   : > { %3256 = vmatpush3.bf16.msra.mxu0 %v3255_v47  ;;  %v2092_v47 = vld [vmem:[#allocation11 + $0x80] sm:$0xff] }
 0x990   : > { %v2436_v57 = vsel %vm1461_vm15, %v4345_v53, %v4304_v45  ;;  %v2446_v59 = vsel %vm1461_vm15, %v4340_v52, %v4344_v54  ;;  %v2438_v7 = vsel %vm1461_vm15, %v4335_v2, %v4354_v58  ;;  %v2089_v45 = vld [vmem:[#allocation11 + $0x68] sm:$0xff]  ;;  %v2096_v52 = vld [vmem:[#allocation11 + $0xa0] sm:$0x3]  ;;  %v2078_v53 = vld [vmem:[#allocation11 + $0x10] sm:$0xff] }
 0x991   : > { %v3259_v61 = vpack.c.bf16 %v2437_v55, %v2436_v57  ;;  %v4348_v62 = vpop.permute.xlu0 %4347  ;;  %v4358_v1 = vpop.permute.xlu1 %4357  ;;  %v3257_v40 = vpack.c.bf16 %v2446_v59, %v2445_v56 }
 0x992   : > { %v4349_v4 = vunpack.i.l.bf16 %v4348_v62  ;;  %v4350_v8 = vunpack.i.h.bf16 %v4348_v62  ;;  %v4359_v9 = vunpack.i.l.bf16 %v4358_v1  ;;  %v4360_v13 = vunpack.i.h.bf16 %v4358_v1 }
 0x993   : > { %3258 = vmatprep.subr.bf16.mxu0 %v3257_v40 }
 0x994   : > { %v2439_v0 = vsel %vm1461_vm15, %v4355_v3, %v4349_v4  ;;  %3260 = vmatpush3.bf16.msra.mxu0 %v3259_v61  ;;  %v2449_v17 = vsel %vm1461_vm15, %v4350_v8, %v4359_v9 }
 0x995   : > { %v3263_v10 = vpack.c.bf16 %v2439_v0, %v2438_v7  ;;  %v4363_v11 = vpop.permute.xlu0 %4362  ;;  %v4368_v12 = vpop.permute.xlu1 %4367  ;;  %3262 = vmatprep.subr.bf16.mxu0 %v3261_v43 }
 0x996   : > { %v4365_v14 = vunpack.i.h.bf16 %v4363_v11  ;;  %v4364_v15 = vunpack.i.l.bf16 %v4363_v11  ;;  %v4369_v16 = vunpack.i.l.bf16 %v4368_v12  ;;  %v4370_v23 = vunpack.i.h.bf16 %v4368_v12 }
 0x998   : > { %3264 = vmatpush3.bf16.msra.mxu0 %v3263_v10  ;;  %v2450_v18 = vsel %vm1461_vm15, %v4360_v13, %v4364_v15  ;;  %v3267_v25 = vpack.c.bf16 %v4369_v16, %v4365_v14 }
 0x999   : > { %v4373_v19 = vpop.permute.xlu0 %4372  ;;  %v2421_v20 = vpop.permute.xlu1 %2420  ;;  %v3265_v21 = vpack.c.bf16 %v2450_v18, %v2449_v17 }
 0x99a   : > { %v4375_v26 = vunpack.i.h.bf16 %v4373_v19  ;;  %v4374_v24 = vunpack.i.l.bf16 %v4373_v19 }
 0x99b   : > { %3266 = vmatprep.subr.bf16.mxu0 %v3265_v21 }
 0x99c   : > { %v2451_v27 = vsel %vm1461_vm15, %v4370_v23, %v4374_v24  ;;  %v2452_v28 = vsel %vm1461_vm15, %v4375_v26, %v2421_v20  ;;  %3268 = vmatpush3.bf16.msra.mxu0 %v3267_v25 }
 0x99d   : > { %v3270_v30 = vpack.c.bf16 %v2452_v28, %v2451_v27  ;;  %3269 = vmatprep.subr.bf16.mxu0 %v4563_v6  ;;  %v2423_v22 = vpop.permute.xlu0 %2422  ;;  %v2425_v32 = vpop.permute.xlu1 %2424  ;;  %v2082_v6 = vld [vmem:[#allocation11 + $0x30] sm:$0xff] }
 0x99e   : > { %v2453_v35 = vsel %vm1461_vm15, %v2423_v22, %v2425_v32 }
 0x99f   : > { %2576 = vmatmul.mubr.f32.vlgmr.msra.gmra.mrb[14].mxu0 %v2076_v29  ;;  %3274 = vmatpush3.bf16.msra.mxu1 %v3270_v30 }
 0x9a0   : > { %3271 = vmatpush3.bf16.msra.mxu0 %v3270_v30  ;;  %2580 = vmatprep.mubr.f32.mxu0 %v2080_v31 }
 0x9a1   : > { %3273 = vmatprep.subr.mxu1 %v5274_v63  ;;  %3090 = vmatprep.subr.mxu0 %v5274_v63 }
 0x9a3   : > { %2581 = vmatmul.mubr.f32.gmra.mrb[16].mxu0 %v2079_v33  ;;  %3275 = vmatpush3.msra.mxu1 %v2453_v35 }
 0x9a4   : > { %3091 = vmatpush3.msra.mxu0 %v2453_v35  ;;  %2585 = vmatprep.mubr.f32.mxu0 %v2083_v34 }
 0x9a5   : > { %3096 = vmatmul.mubr.msk.f32.vlgmr.msra.gmra.mrb[22].mxu1 %vm2489_vm1, %v2081_v37 }
 0x9a6   : > { %3098 = vmatprep.mubr.msk.f32.mxu1 %vm4564_vm0, %v5274_v63 }
 0x9a7   : > { %2586 = vmatmul.mubr.f32.gmra.mrb[18].mxu0 %v2082_v6 }
 0x9a8   : > { %2590 = vmatprep.mubr.f32.mxu0 %v2086_v38 }
 0x9a9   : > { %3099 = vmatmul.mubr.msk.f32.gmra.mrb[24].mxu1 %vm2489_vm1, %v2084_v42 }
 0x9aa   : > { %3101 = vmatprep.mubr.msk.f32.mxu1 %vm4564_vm0, %v5274_v63 }
 0x9ab   : > { %2591 = vmatmul.mubr.f32.gmra.mrb[20].mxu0 %v2085_v44 }
 0x9ac   : > { %2595 = vmatprep.mubr.f32.mxu0 %v2089_v45 }
 0x9ad   : > { %3102 = vmatmul.mubr.msk.f32.gmra.mrb[26].mxu1 %vm2489_vm1, %v2087_v46 }
 0x9ae   : > { %3104 = vmatprep.mubr.msk.f32.mxu1 %vm4564_vm0, %v5274_v63  ;;  %v2268_v58 = vpop.permute.xlu0 %2267  ;;  %v2273_v62 = vpop.permute.xlu1 %2272 }
 0x9af   : > { %2596 = vmatmul.mubr.f32.gmra.mrb[22].mxu0 %v2088_v41 }
 0x9b0   : > { %2600 = vmatprep.mubr.f32.mxu0 %v2092_v47 }
 0x9b1   : > { %3105 = vmatmul.mubr.msk.f32.gmra.mrb[28].mxu1 %vm2489_vm1, %v2090_v36 }
 0x9b2   : > { %3107 = vmatprep.mubr.msk.f32.mxu1 %vm4564_vm0, %v5274_v63  ;;  %v2278_v43 = vpop.permute.xlu0 %2277  ;;  %v2283_v13 = vpop.permute.xlu1 %2282 }
 0x9b3   : > { %2601 = vmatmul.mubr.f32.gmra.mrb[24].mxu0 %v2091_v48 }
 0x9b4   : > { %2605 = vmatprep.mubr.f32.mxu0 %v2095_v49 }
 0x9b5   : > { %3108 = vmatmul.mubr.msk.f32.gmra.mrb[30].mxu1 %vm2489_vm1, %v2093_v50 }
 0x9b6   : > { %3110 = vmatprep.mubr.msk.f32.mxu1 %vm4564_vm0, %v5274_v63  ;;  %v2288_v23 = vpop.permute.xlu0 %2287  ;;  %v2293_v33 = vpop.permute.xlu1 %2292 }
 0x9b7   : > { %2606 = vmatmul.mubr.f32.gmra.mrb[26].mxu0 %v2094_v51 }
 0x9b8   : > { %3092 = vmatprep.mubr.msk.f32.mxu0 %vm4564_vm0, %v5274_v63 }
 0x9b9   : > { %3111 = vmatmul.mubr.msk.f32.gmra.mrb[32].mxu1 %vm2489_vm1, %v2096_v52 }
 0x9ba   : > { %v2298_v41 = vpop.permute.xlu0 %2297 }
 0x9bb   : > { %3093 = vmatmul.mubr.msk.f32.vlgmr.msra.gmra.mrb[28].mxu0 %vm2489_vm1, %v2078_v53 }
 0xa72   : > { %v3029_v54 = vpop.f32.mrb[14].mxu0 }
 0xa73   : > { %v3030_v55 = vpop.f32.mrb[15].mxu0 }
 0xa74   : > { %v3031_v56 = vadd.f32 %v3030_v55, %v3029_v54 }
 0xa76   : > { %v3032_v57 = vpop.f32.mrb[16].mxu0  ;;  %v2578_v47 = vadd.f32 %v3031_v56, %v2268_v58 }
 0xa77   : > { %v3033_v59 = vpop.f32.mrb[17].mxu0 }
 0xa78   : > { %v3034_v60 = vadd.f32 %v3033_v59, %v3032_v57  ;;  %v2682_v61 = vpop.f32.mrb[22].mxu1 }
 0xa79   : > { %v3097_v1 = vpop.f32.mrb[23].mxu1 }
 0xa7a   : > { %v3035_v40 = vpop.f32.mrb[18].mxu0  ;;  %v2583_v2 = vadd.f32 %v3034_v60, %v2273_v62 }
 0xa7b   : > { %v3036_v3 = vpop.f32.mrb[19].mxu0 }
 0xa7c   : > { %v3037_v4 = vadd.f32 %v3036_v3, %v3035_v40  ;;  %v2683_v63 = vadd.f32 %v2682_v61, %v2583_v2  ;;  %v2687_v5 = vpop.f32.mrb[24].mxu1 }
 0xa7d   : > { %v3100_v7 = vpop.f32.mrb[25].mxu1 }
 0xa7e   : > { %v3038_v8 = vpop.f32.mrb[20].mxu0  ;;  %v2588_v0 = vadd.f32 %v3037_v4, %v2278_v43  ;;  %v2712_v51 = vmax.f32 %v2683_v63, 0.0 }
 0xa7f   : > { %v3039_v9 = vpop.f32.mrb[21].mxu0 }
 0xa80   : > { %v3040_v10 = vadd.f32 %v3039_v9, %v3038_v8  ;;  %v2688_v11 = vadd.f32 %v2687_v5, %v2588_v0  ;;  %v2692_v12 = vpop.f32.mrb[26].mxu1  ;;  %v2719_v56 = vsel %vm749_vm11, %v2712_v51, 0.0 }
 0xa81   : > { %v3103_v14 = vpop.f32.mrb[27].mxu1 }
 0xa82   : > { %v3041_v15 = vpop.f32.mrb[22].mxu0  ;;  %v2593_v16 = vadd.f32 %v3040_v10, %v2283_v13  ;;  %v2713_v18 = vmax.f32 %v2688_v11, 0.0 }
 0xa83   : > { %v3042_v17 = vpop.f32.mrb[23].mxu0 }
 0xa84   : > { %v3043_v19 = vadd.f32 %v3042_v17, %v3041_v15  ;;  %v2693_v20 = vadd.f32 %v2692_v12, %v2593_v16  ;;  %v2697_v21 = vpop.f32.mrb[28].mxu1  ;;  %v2720_v29 = vsel %vm749_vm11, %v2713_v18, 0.0 }
 0xa85   : > { %v3106_v25 = vpop.f32.mrb[29].mxu1 }
 0xa86   : > { %v2714_v26 = vmax.f32 %v2693_v20, 0.0  ;;  %v3044_v24 = vpop.f32.mrb[24].mxu0  ;;  %v2598_v27 = vadd.f32 %v3043_v19, %v2288_v23 }
 0xa87   : > { %v3045_v28 = vpop.f32.mrb[25].mxu0 }
 0xa88   : > { %v2721_v30 = vsel %vm749_vm11, %v2714_v26, 0.0  ;;  %v3046_v31 = vadd.f32 %v3045_v28, %v3044_v24  ;;  %v2698_v22 = vadd.f32 %v2697_v21, %v2598_v27  ;;  %v2702_v32 = vpop.f32.mrb[30].mxu1 }
 0xa89   : > { %v2930_v34 = vpack.c.bf16 %v2721_v30, %v2720_v29  ;;  %v3109_v35 = vpop.f32.mrb[31].mxu1 }
 0xa8a   : > { %v3047_v37 = vpop.f32.mrb[26].mxu0  ;;  %v2603_v6 = vadd.f32 %v3046_v31, %v2293_v33  ;;  %v2715_v42 = vmax.f32 %v2698_v22, 0.0 }
 0xa8b   : > { %2937 = vst [vmem:[%s5528_s28 + $0x8] sm:$0xff] %v2930_v34   ;;  %v3048_v38 = vpop.f32.mrb[27].mxu0 }
 0xa8c   : > { %v3049_v44 = vadd.f32 %v3048_v38, %v3047_v37  ;;  %v2703_v45 = vadd.f32 %v2702_v32, %v2603_v6  ;;  %v2707_v46 = vpop.f32.mrb[32].mxu1  ;;  %v2722_v54 = vsel %vm749_vm11, %v2715_v42, 0.0 }
 0xa8d   : > { %v3112_v36 = vpop.f32.mrb[33].mxu1 }
 0xa8e   : > { %v2716_v48 = vmax.f32 %v2703_v45, 0.0  ;;  %v2677_v49 = vpop.f32.mrb[28].mxu0  ;;  %v2608_v50 = vadd.f32 %v3049_v44, %v2298_v41 }
 0xa8f   : > { %v2678_v52 = vadd.f32 %v2677_v49, %v2578_v47  ;;  %v3094_v53 = vpop.f32.mrb[29].mxu0 }
 0xa90   : > { %v2723_v55 = vsel %vm749_vm11, %v2716_v48, 0.0  ;;  %v2708_v57 = vadd.f32 %v2707_v46, %v2608_v50 }
 0xa91   : > { %v2935_v59 = vpack.c.bf16 %v2723_v55, %v2722_v54  ;;  %v2711_v60 = vmax.f32 %v2678_v52, 0.0 }
 0xa92   : > { %v2717_v61 = vmax.f32 %v2708_v57, 0.0 }
 0xa93   : > { %2938 = vst [vmem:[%s5528_s28 + $0x10] sm:$0xff] %v2935_v59   ;;  %v2718_v58 = vsel %vm749_vm11, %v2711_v60, 0.0 }
 0xa94   : > { %v2925_v62 = vpack.c.bf16 %v2719_v56, %v2718_v58  ;;  %v2724_v1 = vsel %vm749_vm11, %v2717_v61, 0.0 }
 0xa95   : > { %v2921_v40 = vpack.c.bf16 %v2724_v1, %v2724_v1 }
 0xa96   : > { %2926 = vst [vmem:[%s5528_s28] sm:$0xff] %v2925_v62  }
 0xa97   : > { %2760 = vst [vmem:[%s5528_s28 + $0x18] sm:$0x1] %v2921_v40 }
 0xa98 PF: > { %s24_s17 = sadd.s32 1, %s4536_s17  }
 0xa99   : > { %p21_p6 = scmp.ge.s32.totalorder %s24_s17, 4  }
 0xa9b   :  { %23 = sbr.rel (!%p21_p6) target bundleno = 3 (0x3), region = 115 }
 0xaa2   :  { %2782 = vsyncpa [#allocation5], 1 }
 0xaa3   :  { %2784 = vsyncpa [#allocation5 + $0x1], 1 }
 0xaa4   :  { %2785 = vsyncpa [#allocation7], 1 }
 0xaa5   :  { %2786 = vsyncpa [#allocation10], 1 }

// kernel: seq2point_forward.3
= control target key start
LH: loop header
LB: loop body
LE: loop exit
PB: predicated region body
PF: predicated region fallthrough
CT: control target
= control target key end

     0   :  { %9 = vsyncpa [#allocation4], 0  ;;  %s19465_s0 = inlined_call_operand.vmem [shape: bf16[2,6400], index: 0, kind: input, shape index: {}]   ;;  %s19466_s1 = inlined_call_operand.hbm [shape: bf16[6400,1024], index: 1, kind: input, shape index: {}]   ;;  %s19467_s2 = inlined_call_operand.hbm [shape: f32[1,1024], index: 2, kind: input, shape index: {}]   ;;  %s19468_s3 = inlined_call_operand.vmem [shape: f32[1024,1], index: 3, kind: input, shape index: {}]   ;;  %s19469_s4 = inlined_call_operand.vmem [shape: f32[2,2,1], index: 4, kind: output, shape index: {}]  }
   0x1   :  { %11 = vsyncpa [#allocation4 + $0x1], 0 }
   0x2   :  { %12 = vsyncpa [#allocation6], 0 }
   0x3   :  { %14 = vsyncpa [#allocation6 + $0x1], 0  ;;  %s17339_s15 = smov 0   ;;  %s17341_s16 = smov 0  }
   0x4   :  { %s17343_s17 = smov 0   ;;  %s17345_s18 = smov 0  }
   0x5   :  { %s17347_s19 = smov 0   ;;  %s17349_s20 = smov 0  }
   0x6 LB: > { %s12768_s21 = sadd.s32 4294967295, %s17305_s20   ;;  %s32_s22 = sadd.s32 1, %s17301_s19  ;;  %s17305_s20 = sphi %s17349_s20, %s20_s20   ;;  %s17301_s19 = sphi %s17347_s19, %s19481_s19   ;;  %s17297_s18 = sphi %s17345_s18, %s19480_s18   ;;  %s17293_s17 = sphi %s17343_s17, %s19479_s17   ;;  %s17289_s16 = sphi %s17341_s16, %s19478_s16   ;;  %s17285_s15 = sphi %s17339_s15, %s19477_s15  }
   0x7   : > { %p34_p0 = scmp.ge.s32.totalorder %s32_s22, 2  ;;  %s67_s23 = sadd.s32 1, %s17293_s17 }
   0x8   : > { %p74_p1 = scmp.ne.s32.totalorder %s17293_s17, %s17289_s16  ;;  %p75_p2 = scmp.eq.s32.totalorder %s17305_s20, 0 }
   0x9   : > { %s19483_s22 = smov (%p34_p0, %s32_s22), 0  ;;  %p80_p4 = scmp.ne.s32.totalorder %s17289_s16, %s17285_s15 }
   0xa   : > { %p76_p3 = por %p75_p2, %p74_p1  ;;  %s63_s24 = ssub.s32 %s17301_s19, %s19483_s22 }
   0xb   : > { %p81_p5 = scmp.eq.s32.totalorder %s12768_s21, 0  ;;  %p65_p6 = scmp.eq.s32.totalorder %s63_s24, 0 }
   0xc   : > { %p14727_p8 = scmp.lt.s32.totalorder %s17305_s20, 2  ;;  %s17387_s27 = sand.u32 1, %s17293_s17  }
   0xd   : > { %p17378_p7 = por %p81_p5, %p80_p4  ;;  %s14386_s28 = sshll.u32 %s17301_s19, 8 }
   0xe   : > { %s17384_s26 = scalar_select %p65_p6, %s17293_s17, %s67_s23  }
   0xf   : > { %s19471_s25 = scalar_select %p17378_p7, 1, 0 }
  0x10   : > { %s14714_s29 = smul.u32 12800, %s17387_s27  ;;  %s17394_s6 = scalar_lea.hbm %s19466_s1, %s14386_s28 }
  0x11   : > { %p17396_p9 = pnand %p14727_p8, %p76_p3  ;;  %s191_s10 = scalar_lea.sflag [#allocation4], %s17387_s27 }
  0x12   : > { %s194_s8 = scalar_lea.vmem [#allocation3], %s14714_s29  ;;  %s17191_s11 = scalar_lea.hbm %s17394_s6, 204800 }
  0x13   : > { %s204_s9 = sshll.u32 %s194_s8, 4  ;;  %p17192_p11 = scmp.ne.s32.totalorder %s17394_s6, %s17191_s11  ;;  %s17400_s9 = int_to_ptr.vmem [resolvable:$true] %s204_s9 }
  0x14   : > { %p17193_p12 = pneg %p17396_p9  ;;  %s17196_s14 = scalar_lea.hbm %s19466_s1, 409600 }
  0x15   : > { %p17197_p1 = scmp.lt.u32.totalorder %s17394_s6, %s19466_s1  ;;  %p17198_p2 = scmp.lt.u32.totalorder %s17196_s14, %s17191_s11 }
  0x16   : > { %p17194_p13 = pnand %p17193_p12, %p17192_p11  ;;  %p17200_p4 = scmp.lt.u32.totalorder %s17191_s11, %s17394_s6 }
  0x17   : > { %p17199_p3 = por %p17198_p2, %p17197_p1 }
  0x18   : > { %p17195_p0 = pneg %p17194_p13 }
  0x19   : > { %p17201_p5 = por %p17200_p4, %p17199_p3 }
  0x1b   : > { %p17202_p6 = pnand %p17201_p5, %p17195_p0 }
  0x1d   : > { %17205 = shalt.err (!%p17202_p6)
}
  0x1e   : > { %s17206_s23 = scalar_lea.vmem %s17400_s9, 204800  ;;  %s17307_s24 = smov [#allocation3]  }
  0x1f   : > { %p17207_p8 = scmp.ne.s32.totalorder %s17400_s9, %s17206_s23  ;;  %s17211_s28 = sshll.u32 %s17307_s24, 4  ;;  %s17212_s28 = int_to_ptr.vmem [resolvable:$false] %s17211_s28 }
  0x20   : > { %s17213_s29 = scalar_lea.vmem %s17212_s28, 409600  ;;  %p17214_p10 = scmp.lt.s32.totalorder %s17400_s9, %s17212_s28 }
  0x21   : > { %p17209_p11 = pnand %p17207_p8, %p17193_p12  ;;  %p17215_p1 = scmp.lt.s32.totalorder %s17213_s29, %s17206_s23 }
  0x23   : > { %p17210_p13 = pneg %p17209_p11  ;;  %p17216_p2 = por %p17215_p1, %p17214_p10 }
  0x25   : > { %p17217_p3 = pnand %p17216_p2, %p17210_p13 }
  0x27   : > { %17220 = shalt.err (!%p17217_p3)
}
  0x28   : > { %s17308_s30 = smov 512   ;;  %s17309_s5 = smov 256  }
  0x29   : > { %s17310_s8 = smov 16   ;;  %p240_p0 = scmp.lt.s32.totalorder %s17305_s20, 3 }
  0x2a   : > { %14723 = dma.hbm_to_vmem [thread:$0]  (!%p17396_p9), %s17394_s6, 204800, %s17400_s9, %s191_s10, %s17308_s30, %s17309_s5, %s17310_s8  }
  0x2b   : > { %s12775_s11 = sshll.u32 %s17387_s27, 2  ;;  %s14387_s12 = sshll.u32 %s17301_s19, 6 }
  0x2c   : > { %p19473_p10 = scmp.ge.s32.totalorder %s17305_s20, 1  ;;  %s17443_s21 = scalar_lea.hbm %s19467_s2, %s14387_s12 }
  0x2d   : > { %s218_s23 = scalar_lea.vmem [#allocation5], %s12775_s11  ;;  %s215_s6 = scalar_lea.sflag [#allocation6], %s17387_s27 }
  0x2e   : > { %p17436_p4 = pnand %p19473_p10, %p240_p0  ;;  %s226_s24 = sshll.u32 %s218_s23, 4  ;;  %s227_s24 = int_to_ptr.vmem [resolvable:$true] %s226_s24 }
  0x2f   : > { %s17221_s9 = scalar_lea.hbm %s17443_s21, 64  ;;  %s17226_s29 = scalar_lea.hbm %s19467_s2, 128 }
  0x30   : > { %s19474_s13 = scalar_select %p17436_p4, 1, 0 }
  0x31   : > { %p17222_p5 = scmp.ne.s32.totalorder %s17443_s21, %s17221_s9  ;;  %p17227_p11 = scmp.lt.u32.totalorder %s17443_s21, %s19467_s2 }
  0x32   : > { %p17228_p13 = scmp.lt.u32.totalorder %s17226_s29, %s17221_s9  ;;  %p17230_p2 = scmp.lt.u32.totalorder %s17221_s9, %s17443_s21 }
  0x33   : > { %p17224_p6 = pnand %p17222_p5, %p17193_p12 }
  0x34   : > { %p17229_p1 = por %p17228_p13, %p17227_p11 }
  0x35   : > { %p17225_p8 = pneg %p17224_p6 }
  0x36   : > { %p17231_p3 = por %p17230_p2, %p17229_p1 }
  0x38   : > { %p17232_p0 = pnand %p17231_p3, %p17225_p8 }
  0x3a   : > { %17235 = shalt.err (!%p17232_p0)
}
  0x3b   : > { %s17236_s27 = scalar_lea.vmem %s227_s24, 64  ;;  %s17311_s8 = smov [#allocation5]  }
  0x3c   : > { %p17237_p10 = scmp.ne.s32.totalorder %s227_s24, %s17236_s27  ;;  %s17241_s11 = sshll.u32 %s17311_s8, 4  ;;  %s17242_s11 = int_to_ptr.vmem [resolvable:$false] %s17241_s11 }
  0x3d   : > { %s17243_s12 = scalar_lea.vmem %s17242_s11, 128  ;;  %p17244_p7 = scmp.lt.s32.totalorder %s227_s24, %s17242_s11 }
  0x3e   : > { %p17239_p5 = pnand %p17237_p10, %p17193_p12  ;;  %p17245_p4 = scmp.lt.s32.totalorder %s17243_s12, %s17236_s27 }
  0x40   : > { %p17240_p6 = pneg %p17239_p5  ;;  %p17246_p11 = por %p17245_p4, %p17244_p7 }
  0x42   : > { %p17247_p13 = pnand %p17246_p11, %p17240_p6 }
  0x44   : > { %17250 = shalt.err (!%p17247_p13)
}
  0x45   : > { %14726 = dma.hbm_to_vmem [thread:$0]  (!%p17396_p9), %s17443_s21, 64, %s227_s24, %s215_s6  }
  0x46   : > { %p19475_p8 = scmp.ne.s32.totalorder %s19474_s13, 0 }
  0x47   : > { %s246_s14 = sand.u32 (!%p19475_p8), 1, %s17289_s16   ;;  %p19476_p12 = scmp.ne.s32.totalorder (!%p19475_p8), %s19471_s25, 0 }
  0x48   : > { %244 = sbr.rel (%p19475_p8) target bundleno = 2132 (0x854), region = 36  ;;  %s247_s23 = scalar_lea.sflag (!%p19475_p8), [#allocation4], %s246_s14 }
  0x49   : > { %s14715_s15 = smul.u32 (!%p19475_p8), 12800, %s246_s14 }
  0x4b   : > { %s17468_s9 = scalar_lea.vmem (!%p19475_p8), [#allocation3], %s14715_s15 }
  0x4f   : > { %17276 = dma.done.wait (%p19476_p12), %s247_s23, 204800  }
  0x50   : > { %17278 = vsyncadd (%p19476_p12), %s247_s23, 4294762496  ;;  %s12779_s10 = sshll.u32 %s246_s14, 2  ;;  %s256_s7 = scalar_lea.sflag [#allocation6], %s246_s14 }
  0x51   : > { %s17474_s28 = scalar_lea.vmem [#allocation5], %s12779_s10 }
  0x52   : > { %17280 = dma.done.wait (%p19476_p12), %s256_s7, 64  }
  0x53   : > { %17282 = vsyncadd (%p19476_p12), %s256_s7, 4294967232  ;;  %v14781_v0 = vld [vmem:[%s17468_s9 + $0x4] ss:$16 sps:$4 sm:$0xff]   ;;  %v14783_v1 = vld [vmem:[%s17468_s9 + $0xc] ss:$16 sps:$4 sm:$0xff]   ;;  %v1939_v38 = vlaneseq  ;;  %s12780_s13 = sshll.u32 %s17297_s18, 6 }
  0x54   : > { %10301 = vmatprep.subr.bf16.mxu0 %v14781_v0  ;;  %v14785_v2 = vld [vmem:[%s17468_s9] ss:$16 sps:$4 sm:$0xff]   ;;  %v14786_v3 = vld [vmem:[%s17468_s9 + $0x8] ss:$16 sps:$4 sm:$0xff]   ;;  %11326 = vmatprep.subr.bf16.mxu1 %v14783_v1  ;;  %v14787_v4 = vld [vmem:[%s17468_s9 + $0x24] ss:$16 sps:$4 sm:$0xff]  }
  0x55   : > { %10302 = vmatpush1.bf16.msra.mxu0 %v14785_v2  ;;  %11327 = vmatpush1.bf16.msra.mxu1 %v14786_v3  ;;  %v14789_v5 = vld [vmem:[%s17468_s9 + $0x2c] ss:$16 sps:$4 sm:$0xff]   ;;  %v14791_v6 = vld [vmem:[%s17468_s9 + $0x20] ss:$16 sps:$4 sm:$0xff]   ;;  %v14792_v7 = vld [vmem:[%s17468_s9 + $0x28] ss:$16 sps:$4 sm:$0xff]  }
  0x56   : > { %10303 = vmatprep.subr.bf16.mxu0 %v14787_v4  ;;  %11328 = vmatprep.subr.bf16.mxu1 %v14789_v5  ;;  %v14793_v8 = vld [vmem:[%s17468_s9 + $0x44] ss:$16 sps:$4 sm:$0xff]   ;;  %v14795_v9 = vld [vmem:[%s17468_s9 + $0x4c] ss:$16 sps:$4 sm:$0xff]   ;;  %v14797_v10 = vld [vmem:[%s17468_s9 + $0x40] ss:$16 sps:$4 sm:$0xff]  }
  0x57   : > { %v14798_v11 = vld [vmem:[%s17468_s9 + $0x48] ss:$16 sps:$4 sm:$0xff]   ;;  %v14799_v12 = vld [vmem:[%s17468_s9 + $0x64] ss:$16 sps:$4 sm:$0xff]   ;;  %v14801_v13 = vld [vmem:[%s17468_s9 + $0x6c] ss:$16 sps:$4 sm:$0xff]  }
  0x58   : > { %v14803_v14 = vld [vmem:[%s17468_s9 + $0x60] ss:$16 sps:$4 sm:$0xff]   ;;  %v14804_v15 = vld [vmem:[%s17468_s9 + $0x68] ss:$16 sps:$4 sm:$0xff]   ;;  %v14805_v16 = vld [vmem:[%s17468_s9 + $0x84] ss:$16 sps:$4 sm:$0xff]  }
  0x59   : > { %10304 = vmatpush1.bf16.msra.mxu0 %v14791_v6  ;;  %11329 = vmatpush1.bf16.msra.mxu1 %v14792_v7  ;;  %v14807_v17 = vld [vmem:[%s17468_s9 + $0x8c] ss:$16 sps:$4 sm:$0xff]   ;;  %v14809_v18 = vld [vmem:[%s17468_s9 + $0x80] ss:$16 sps:$4 sm:$0xff]   ;;  %v14810_v19 = vld [vmem:[%s17468_s9 + $0x88] ss:$16 sps:$4 sm:$0xff]  }
  0x5a   : > { %10305 = vmatprep.subr.bf16.mxu0 %v14793_v8  ;;  %11330 = vmatprep.subr.bf16.mxu1 %v14795_v9  ;;  %v14811_v20 = vld [vmem:[%s17468_s9 + $0xa4] ss:$16 sps:$4 sm:$0xff]   ;;  %v14813_v21 = vld [vmem:[%s17468_s9 + $0xac] ss:$16 sps:$4 sm:$0xff]   ;;  %v14815_v22 = vld [vmem:[%s17468_s9 + $0xa0] ss:$16 sps:$4 sm:$0xff]  }
  0x5b   : > { %v14816_v23 = vld [vmem:[%s17468_s9 + $0xa8] ss:$16 sps:$4 sm:$0xff]   ;;  %v14817_v24 = vld [vmem:[%s17468_s9 + $0xc4] ss:$16 sps:$4 sm:$0xff]   ;;  %v14819_v25 = vld [vmem:[%s17468_s9 + $0xcc] ss:$16 sps:$4 sm:$0xff]  }
  0x5c   : > { %v14821_v26 = vld [vmem:[%s17468_s9 + $0xc0] ss:$16 sps:$4 sm:$0xff]   ;;  %v14822_v27 = vld [vmem:[%s17468_s9 + $0xc8] ss:$16 sps:$4 sm:$0xff]   ;;  %v14823_v28 = vld [vmem:[%s17468_s9 + $0xe4] ss:$16 sps:$4 sm:$0xff]  }
  0x5d   : > { %10306 = vmatpush1.bf16.msra.mxu0 %v14797_v10  ;;  %11331 = vmatpush1.bf16.msra.mxu1 %v14798_v11  ;;  %v14825_v29 = vld [vmem:[%s17468_s9 + $0xec] ss:$16 sps:$4 sm:$0xff]   ;;  %v14827_v30 = vld [vmem:[%s17468_s9 + $0xe0] ss:$16 sps:$4 sm:$0xff]   ;;  %v14828_v31 = vld [vmem:[%s17468_s9 + $0xe8] ss:$16 sps:$4 sm:$0xff]  }
  0x5e   : > { %10307 = vmatprep.subr.bf16.mxu0 %v14799_v12  ;;  %11332 = vmatprep.subr.bf16.mxu1 %v14801_v13  ;;  %v14829_v32 = vld [vmem:[%s17468_s9 + $0x104] ss:$16 sps:$4 sm:$0xff]   ;;  %v14831_v33 = vld [vmem:[%s17468_s9 + $0x10c] ss:$16 sps:$4 sm:$0xff]   ;;  %v14833_v34 = vld [vmem:[%s17468_s9 + $0x100] ss:$16 sps:$4 sm:$0xff]  }
  0x5f   : > { %v14834_v35 = vld [vmem:[%s17468_s9 + $0x108] ss:$16 sps:$4 sm:$0xff]   ;;  %v17312_v36 = vmov 1966171168   ;;  %v14835_v39 = vld [vmem:[%s17468_s9 + $0x124] ss:$16 sps:$4 sm:$0xff]  }
  0x60   : > { %v1937_v37 = vunpack.c.l.s4 %v17312_v36  ;;  %v14837_v40 = vld [vmem:[%s17468_s9 + $0x12c] ss:$16 sps:$4 sm:$0xff]   ;;  %v14839_v41 = vld [vmem:[%s17468_s9 + $0x120] ss:$16 sps:$4 sm:$0xff]   ;;  %v17519_v43 = vshrl.u32 %v1939_v38, 7  ;;  %p306_p7 = scmp.lt.s32.totalorder %s12780_s13, 127 }
  0x61   : > { %10308 = vmatpush1.bf16.msra.mxu0 %v14803_v14  ;;  %11333 = vmatpush1.bf16.msra.mxu1 %v14804_v15  ;;  %v14840_v44 = vld [vmem:[%s17468_s9 + $0x128] ss:$16 sps:$4 sm:$0xff]   ;;  %v14841_v45 = vld [vmem:[%s17468_s9 + $0x144] ss:$16 sps:$4 sm:$0xff]   ;;  %v14843_v46 = vld [vmem:[%s17468_s9 + $0x14c] ss:$16 sps:$4 sm:$0xff]  }
  0x62   : > { %10309 = vmatprep.subr.bf16.mxu0 %v14805_v16  ;;  %11334 = vmatprep.subr.bf16.mxu1 %v14807_v17  ;;  %v1938_v42 = vunpack.c.0.s8 %v1937_v37  ;;  %v14845_v47 = vld [vmem:[%s17468_s9 + $0x140] ss:$16 sps:$4 sm:$0xff]   ;;  %v14846_v48 = vld [vmem:[%s17468_s9 + $0x148] ss:$16 sps:$4 sm:$0xff]   ;;  %v14847_v50 = vld [vmem:[%s17468_s9 + $0x164] ss:$16 sps:$4 sm:$0xff]  }
  0x63   : > { %v14849_v51 = vld [vmem:[%s17468_s9 + $0x16c] ss:$16 sps:$4 sm:$0xff]   ;;  %v17534_v52 = vld [vmem:[%s19465_s0] sm:$0xff]  ;;  %v14852_v55 = vld [vmem:[%s17468_s9 + $0x168] ss:$16 sps:$4 sm:$0xff]   ;;  %s19485_s13 = smov (!%p306_p7, %s12780_s13), 127 }
  0x64   : > { %v17527_v49 = vsub.s32 %v1938_v42, %v17519_v43  ;;  %v14851_v53 = vld [vmem:[%s17468_s9 + $0x160] ss:$16 sps:$4 sm:$0xff]   ;;  %v14853_v56 = vld [vmem:[%s17468_s9 + $0x184] ss:$16 sps:$4 sm:$0xff]   ;;  %v14855_v57 = vld [vmem:[%s17468_s9 + $0x18c] ss:$16 sps:$4 sm:$0xff]  }
  0x65   : > { %10310 = vmatpush1.bf16.msra.mxu0 %v14809_v18  ;;  %11335 = vmatpush1.bf16.msra.mxu1 %v14810_v19  ;;  %v14857_v59 = vld [vmem:[%s17468_s9 + $0x180] ss:$16 sps:$4 sm:$0xff]   ;;  %v14858_v61 = vld [vmem:[%s17468_s9 + $0x188] ss:$16 sps:$4 sm:$0xff]   ;;  %v14859_v62 = vld [vmem:[%s17468_s9 + $0x1a4] ss:$16 sps:$4 sm:$0xff]  }
  0x66   : > { %10311 = vmatprep.subr.bf16.mxu0 %v14811_v20  ;;  %11336 = vmatprep.subr.bf16.mxu1 %v14813_v21  ;;  %v1942_v54 = vrot.slane %v17534_v52, %v17527_v49  ;;  %v14861_v63 = vld [vmem:[%s17468_s9 + $0x1ac] ss:$16 sps:$4 sm:$0xff]   ;;  %v14863_v0 = vld [vmem:[%s17468_s9 + $0x1a0] ss:$16 sps:$4 sm:$0xff]   ;;  %v14864_v1 = vld [vmem:[%s17468_s9 + $0x1a8] ss:$16 sps:$4 sm:$0xff]  }
  0x67   : > { %v14865_v2 = vld [vmem:[%s17468_s9 + $0x1c4] ss:$16 sps:$4 sm:$0xff]   ;;  %v14867_v3 = vld [vmem:[%s17468_s9 + $0x1cc] ss:$16 sps:$4 sm:$0xff]   ;;  %v14869_v4 = vld [vmem:[%s17468_s9 + $0x1c0] ss:$16 sps:$4 sm:$0xff]  }
  0x68   : > { %v1950_v58 = vcombine.high %v1942_v54, %v1942_v54  ;;  %v14870_v5 = vld [vmem:[%s17468_s9 + $0x1c8] ss:$16 sps:$4 sm:$0xff]   ;;  %v14871_v6 = vld [vmem:[%s17468_s9 + $0x1e4] ss:$16 sps:$4 sm:$0xff]   ;;  %v14873_v7 = vld [vmem:[%s17468_s9 + $0x1ec] ss:$16 sps:$4 sm:$0xff]   ;;  %v17561_v13 = vrot.slane %v1942_v54, %v17527_v49 }
  0x69   : > { %10312 = vmatpush1.bf16.msra.mxu0 %v14815_v22  ;;  %11337 = vmatpush1.bf16.msra.mxu1 %v14816_v23  ;;  %v14875_v8 = vld [vmem:[%s17468_s9 + $0x1e0] ss:$16 sps:$4 sm:$0xff]   ;;  %v14876_v9 = vld [vmem:[%s17468_s9 + $0x1e8] ss:$16 sps:$4 sm:$0xff]   ;;  %v14879_v10 = vld [vmem:[%s17468_s9 + $0x204] ss:$16 sps:$4 sm:$0xff]  }
  0x6a   : > { %10313 = vmatprep.subr.bf16.mxu0 %v14817_v24  ;;  %11338 = vmatprep.subr.bf16.mxu1 %v14819_v25  ;;  %v1972_v60 = vrot.slane %v1950_v58, %v17527_v49  ;;  %v14882_v11 = vld [vmem:[%s17468_s9 + $0x20c] ss:$16 sps:$4 sm:$0xff]   ;;  %v14877_v12 = vld [vmem:[%s17468_s9 + $0x200] ss:$16 sps:$4 sm:$0xff]   ;;  %v14880_v14 = vld [vmem:[%s17468_s9 + $0x208] ss:$16 sps:$4 sm:$0xff]  }
  0x6b   : > { %v14885_v15 = vld [vmem:[%s17468_s9 + $0x224] ss:$16 sps:$4 sm:$0xff]   ;;  %v14888_v16 = vld [vmem:[%s17468_s9 + $0x22c] ss:$16 sps:$4 sm:$0xff]   ;;  %v14883_v18 = vld [vmem:[%s17468_s9 + $0x220] ss:$16 sps:$4 sm:$0xff]  }
  0x6c   : > { %10333 = vmatprep.mubr.bf16.mxu0 %v1972_v60  ;;  %11358 = vmatprep.mubr.bf16.mxu1 %v1972_v60  ;;  %v1982_v17 = vcombine.high %v1972_v60, %v1972_v60  ;;  %v14886_v19 = vld [vmem:[%s17468_s9 + $0x228] ss:$16 sps:$4 sm:$0xff]   ;;  %v14891_v20 = vld [vmem:[%s17468_s9 + $0x244] ss:$16 sps:$4 sm:$0xff]   ;;  %v14894_v21 = vld [vmem:[%s17468_s9 + $0x24c] ss:$16 sps:$4 sm:$0xff]  }
  0x6d   : > { %10314 = vmatpush1.bf16.msra.mxu0 %v14821_v26  ;;  %11339 = vmatpush1.bf16.msra.mxu1 %v14822_v27  ;;  %v14889_v22 = vld [vmem:[%s17468_s9 + $0x240] ss:$16 sps:$4 sm:$0xff]   ;;  %v14892_v23 = vld [vmem:[%s17468_s9 + $0x248] ss:$16 sps:$4 sm:$0xff]   ;;  %v14897_v24 = vld [vmem:[%s17468_s9 + $0x264] ss:$16 sps:$4 sm:$0xff]  }
  0x6e   : > { %10315 = vmatprep.subr.bf16.mxu0 %v14823_v28  ;;  %11340 = vmatprep.subr.bf16.mxu1 %v14825_v29  ;;  %v14900_v25 = vld [vmem:[%s17468_s9 + $0x26c] ss:$16 sps:$4 sm:$0xff]   ;;  %v14895_v26 = vld [vmem:[%s17468_s9 + $0x260] ss:$16 sps:$4 sm:$0xff]   ;;  %v14898_v27 = vld [vmem:[%s17468_s9 + $0x268] ss:$16 sps:$4 sm:$0xff]  }
  0x6f   : > { %v14903_v28 = vld [vmem:[%s17468_s9 + $0x284] ss:$16 sps:$4 sm:$0xff]   ;;  %v14906_v29 = vld [vmem:[%s17468_s9 + $0x28c] ss:$16 sps:$4 sm:$0xff]   ;;  %v14913_v38 = vld [vmem:[%s17468_s9 + $0x2c0] ss:$16 sps:$4 sm:$0xff]  }
  0x70   : > { %v14915_v36 = vld [vmem:[%s17468_s9 + $0x2c4] ss:$16 sps:$4 sm:$0xff]   ;;  %v14918_v37 = vld [vmem:[%s17468_s9 + $0x2cc] ss:$16 sps:$4 sm:$0xff]   ;;  %v14919_v42 = vld [vmem:[%s17468_s9 + $0x2e0] ss:$16 sps:$4 sm:$0xff]  }
  0x71   : > { %10316 = vmatpush1.bf16.msra.mxu0 %v14827_v30  ;;  %11341 = vmatpush1.bf16.msra.mxu1 %v14828_v31  ;;  %v14901_v30 = vld [vmem:[%s17468_s9 + $0x280] ss:$16 sps:$4 sm:$0xff]   ;;  %v14904_v31 = vld [vmem:[%s17468_s9 + $0x288] ss:$16 sps:$4 sm:$0xff]   ;;  %v14948_v60 = vld [vmem:[%s17468_s9 + $0x36c] ss:$16 sps:$4 sm:$0xff]  }
  0x72   : > { %10317 = vmatprep.subr.bf16.mxu0 %v14829_v32  ;;  %11342 = vmatprep.subr.bf16.mxu1 %v14831_v33  ;;  %v14909_v32 = vld [vmem:[%s17468_s9 + $0x2a4] ss:$16 sps:$4 sm:$0xff]   ;;  %v14912_v33 = vld [vmem:[%s17468_s9 + $0x2ac] ss:$16 sps:$4 sm:$0xff]   ;;  %v14934_v54 = vld [vmem:[%s17468_s9 + $0x328] ss:$16 sps:$4 sm:$0xff]  }
  0x73   : > { %v14940_v58 = vld [vmem:[%s17468_s9 + $0x348] ss:$16 sps:$4 sm:$0xff]   ;;  %s12781_s21 = sshll.u32 %s19485_s13, 3  ;;  %p311_p9 = scmp.lt.s32.totalorder %s17297_s18, 1  ;;  %vm12643_vm0 = vcmask 1024  }
  0x74   : > { %s19362_s29 = scalar_lea.vmem %s19468_s3, %s12781_s21 }
  0x75   : > { %10318 = vmatpush1.bf16.msra.mxu0 %v14833_v34  ;;  %11343 = vmatpush1.bf16.msra.mxu1 %v14834_v35  ;;  %v14907_v34 = vld [vmem:[%s17468_s9 + $0x2a0] ss:$16 sps:$4 sm:$0xff]   ;;  %v14910_v35 = vld [vmem:[%s17468_s9 + $0x2a8] ss:$16 sps:$4 sm:$0xff]   ;;  %s19487_s18 = smov (!%p311_p9, %s17297_s18), 1 }
  0x76   : > { %10319 = vmatprep.subr.bf16.mxu0 %v14835_v39  ;;  %11344 = vmatprep.subr.bf16.mxu1 %v14837_v40  ;;  %v14916_v39 = vld [vmem:[%s17468_s9 + $0x2c8] ss:$16 sps:$4 sm:$0xff]   ;;  %v14921_v40 = vld [vmem:[%s17468_s9 + $0x2e4] ss:$16 sps:$4 sm:$0xff]  }
  0x79   : > { %10320 = vmatpush1.bf16.msra.mxu0 %v14839_v41  ;;  %11345 = vmatpush1.bf16.msra.mxu1 %v14840_v44  ;;  %v14924_v41 = vld [vmem:[%s17468_s9 + $0x2ec] ss:$16 sps:$4 sm:$0xff]   ;;  %v14922_v44 = vld [vmem:[%s17468_s9 + $0x2e8] ss:$16 sps:$4 sm:$0xff]  }
  0x7a   : > { %10321 = vmatprep.subr.bf16.mxu0 %v14841_v45  ;;  %11346 = vmatprep.subr.bf16.mxu1 %v14843_v46  ;;  %v14927_v45 = vld [vmem:[%s17468_s9 + $0x304] ss:$16 sps:$4 sm:$0xff]   ;;  %v14930_v46 = vld [vmem:[%s17468_s9 + $0x30c] ss:$16 sps:$4 sm:$0xff]  }
  0x7d   : > { %10322 = vmatpush1.bf16.msra.mxu0 %v14845_v47  ;;  %11347 = vmatpush1.bf16.msra.mxu1 %v14846_v48  ;;  %v14925_v47 = vld [vmem:[%s17468_s9 + $0x300] ss:$16 sps:$4 sm:$0xff]   ;;  %v14928_v48 = vld [vmem:[%s17468_s9 + $0x308] ss:$16 sps:$4 sm:$0xff]  }
  0x7e   : > { %10323 = vmatprep.subr.bf16.mxu0 %v14847_v50  ;;  %11348 = vmatprep.subr.bf16.mxu1 %v14849_v51  ;;  %v14933_v50 = vld [vmem:[%s17468_s9 + $0x324] ss:$16 sps:$4 sm:$0xff]   ;;  %v14936_v51 = vld [vmem:[%s17468_s9 + $0x32c] ss:$16 sps:$4 sm:$0xff]  }
  0x81   : > { %10324 = vmatpush1.bf16.msra.mxu0 %v14851_v53  ;;  %11349 = vmatpush1.bf16.msra.mxu1 %v14852_v55  ;;  %v14931_v53 = vld [vmem:[%s17468_s9 + $0x320] ss:$16 sps:$4 sm:$0xff]   ;;  %v14939_v55 = vld [vmem:[%s17468_s9 + $0x344] ss:$16 sps:$4 sm:$0xff]  }
  0x82   : > { %10325 = vmatprep.subr.bf16.mxu0 %v14853_v56  ;;  %11350 = vmatprep.subr.bf16.mxu1 %v14855_v57  ;;  %v14942_v56 = vld [vmem:[%s17468_s9 + $0x34c] ss:$16 sps:$4 sm:$0xff]   ;;  %v14937_v57 = vld [vmem:[%s17468_s9 + $0x340] ss:$16 sps:$4 sm:$0xff]  }
  0x85   : > { %10326 = vmatpush1.bf16.msra.mxu0 %v14857_v59  ;;  %11351 = vmatpush1.bf16.msra.mxu1 %v14858_v61  ;;  %v14945_v59 = vld [vmem:[%s17468_s9 + $0x364] ss:$16 sps:$4 sm:$0xff]   ;;  %v14943_v61 = vld [vmem:[%s17468_s9 + $0x360] ss:$16 sps:$4 sm:$0xff]  }
  0x86   : > { %10327 = vmatprep.subr.bf16.mxu0 %v14859_v62  ;;  %11352 = vmatprep.subr.bf16.mxu1 %v14861_v63  ;;  %v14946_v62 = vld [vmem:[%s17468_s9 + $0x368] ss:$16 sps:$4 sm:$0xff]   ;;  %v14951_v63 = vld [vmem:[%s17468_s9 + $0x384] ss:$16 sps:$4 sm:$0xff]  }
  0x89   : > { %10328 = vmatpush1.bf16.msra.mxu0 %v14863_v0  ;;  %11353 = vmatpush1.bf16.msra.mxu1 %v14864_v1  ;;  %v14954_v0 = vld [vmem:[%s17468_s9 + $0x38c] ss:$16 sps:$4 sm:$0xff]   ;;  %v14949_v1 = vld [vmem:[%s17468_s9 + $0x380] ss:$16 sps:$4 sm:$0xff]  }
  0x8a   : > { %10329 = vmatprep.subr.bf16.mxu0 %v14865_v2  ;;  %11354 = vmatprep.subr.bf16.mxu1 %v14867_v3  ;;  %v14952_v2 = vld [vmem:[%s17468_s9 + $0x388] ss:$16 sps:$4 sm:$0xff]   ;;  %v14957_v3 = vld [vmem:[%s17468_s9 + $0x3a4] ss:$16 sps:$4 sm:$0xff]  }
  0x8d   : > { %10330 = vmatpush1.bf16.msra.mxu0 %v14869_v4  ;;  %11355 = vmatpush1.bf16.msra.mxu1 %v14870_v5  ;;  %v14960_v4 = vld [vmem:[%s17468_s9 + $0x3ac] ss:$16 sps:$4 sm:$0xff]   ;;  %v14955_v5 = vld [vmem:[%s17468_s9 + $0x3a0] ss:$16 sps:$4 sm:$0xff]  }
  0x8e   : > { %10331 = vmatprep.subr.bf16.mxu0 %v14871_v6  ;;  %11356 = vmatprep.subr.bf16.mxu1 %v14873_v7  ;;  %v14958_v6 = vld [vmem:[%s17468_s9 + $0x3a8] ss:$16 sps:$4 sm:$0xff]   ;;  %v14963_v7 = vld [vmem:[%s17468_s9 + $0x3c4] ss:$16 sps:$4 sm:$0xff]  }
  0x91   : > { %10332 = vmatpush1.bf16.msra.mxu0 %v14875_v8  ;;  %11357 = vmatpush1.bf16.msra.mxu1 %v14876_v9  ;;  %v14966_v8 = vld [vmem:[%s17468_s9 + $0x3cc] ss:$16 sps:$4 sm:$0xff]   ;;  %v1935_v9 = vcombine.high %v17534_v52, %v17534_v52  ;;  %v14970_v52 = vld [vmem:[%s17468_s9 + $0x3e8] ss:$16 sps:$4 sm:$0xff]  }
  0x92   : > { %10342 = vmatprep.subr.bf16.mxu0 %v14879_v10  ;;  %11367 = vmatprep.subr.bf16.mxu1 %v14882_v11  ;;  %v14961_v10 = vld [vmem:[%s17468_s9 + $0x3c0] ss:$16 sps:$4 sm:$0xff]   ;;  %v14964_v11 = vld [vmem:[%s17468_s9 + $0x3c8] ss:$16 sps:$4 sm:$0xff]  }
  0x94   : > { %10334 = vmatmul.mubr.bf16.vlgmr.msra.gmra.mrb[0].mxu0 %v17561_v13  ;;  %11359 = vmatmul.mubr.bf16.vlgmr.msra.gmra.mrb[0].mxu1 %v17561_v13 }
  0x95   : > { %10343 = vmatpush1.bf16.msra.mxu0 %v14877_v12  ;;  %11368 = vmatpush1.bf16.msra.mxu1 %v14880_v14  ;;  %v14969_v12 = vld [vmem:[%s17468_s9 + $0x3e4] ss:$16 sps:$4 sm:$0xff]   ;;  %v14972_v14 = vld [vmem:[%s17468_s9 + $0x3ec] ss:$16 sps:$4 sm:$0xff]  }
  0x96   : > { %10344 = vmatprep.subr.bf16.mxu0 %v14885_v15  ;;  %11369 = vmatprep.subr.bf16.mxu1 %v14888_v16  ;;  %v17627_v15 = vrot.slane %v1935_v9, %v17527_v49  ;;  %v14967_v16 = vld [vmem:[%s17468_s9 + $0x3e0] ss:$16 sps:$4 sm:$0xff]   ;;  %v15048_v9 = vld [vmem:[%s17468_s9 + $0x588] ss:$16 sps:$4 sm:$0xff]  }
  0x97   : > { %10374 = vmatprep.mubr.bf16.mxu0 %v1982_v17  ;;  %11399 = vmatprep.mubr.bf16.mxu1 %v1982_v17  ;;  %v14975_v17 = vld [vmem:[%s17468_s9 + $0x404] ss:$16 sps:$4 sm:$0xff]  }
  0x99   : > { %10345 = vmatpush1.bf16.msra.mxu0 %v14883_v18  ;;  %11370 = vmatpush1.bf16.msra.mxu1 %v14886_v19  ;;  %v14978_v18 = vld [vmem:[%s17468_s9 + $0x40c] ss:$16 sps:$4 sm:$0xff]   ;;  %v1951_v19 = vcombine.high %v17627_v15, %v17627_v15 }
  0x9a   : > { %10346 = vmatprep.subr.bf16.mxu0 %v14891_v20  ;;  %11371 = vmatprep.subr.bf16.mxu1 %v14894_v21  ;;  %v14973_v20 = vld [vmem:[%s17468_s9 + $0x400] ss:$16 sps:$4 sm:$0xff]   ;;  %v1980_v21 = vcombine.high %v17561_v13, %v17561_v13  ;;  %v14982_v13 = vld [vmem:[%s17468_s9 + $0x428] ss:$16 sps:$4 sm:$0xff]  }
  0x9d   : > { %10347 = vmatpush1.bf16.msra.mxu0 %v14889_v22  ;;  %11372 = vmatpush1.bf16.msra.mxu1 %v14892_v23  ;;  %v14976_v22 = vld [vmem:[%s17468_s9 + $0x408] ss:$16 sps:$4 sm:$0xff]   ;;  %v14981_v23 = vld [vmem:[%s17468_s9 + $0x424] ss:$16 sps:$4 sm:$0xff]  }
  0x9e   : > { %10348 = vmatprep.subr.bf16.mxu0 %v14897_v24  ;;  %11373 = vmatprep.subr.bf16.mxu1 %v14900_v25  ;;  %v14984_v24 = vld [vmem:[%s17468_s9 + $0x42c] ss:$16 sps:$4 sm:$0xff]   ;;  %v17642_v25 = vrot.slane %v1951_v19, %v17527_v49  ;;  %v15065_v19 = vld [vmem:[%s17468_s9 + $0x5e4] ss:$16 sps:$4 sm:$0xff]  }
  0xa1   : > { %10349 = vmatpush1.bf16.msra.mxu0 %v14895_v26  ;;  %11374 = vmatpush1.bf16.msra.mxu1 %v14898_v27  ;;  %v14979_v26 = vld [vmem:[%s17468_s9 + $0x420] ss:$16 sps:$4 sm:$0xff]   ;;  %v14987_v27 = vld [vmem:[%s17468_s9 + $0x444] ss:$16 sps:$4 sm:$0xff]  }
  0xa2   : > { %10350 = vmatprep.subr.bf16.mxu0 %v14903_v28  ;;  %11375 = vmatprep.subr.bf16.mxu1 %v14906_v29  ;;  %v14990_v28 = vld [vmem:[%s17468_s9 + $0x44c] ss:$16 sps:$4 sm:$0xff]   ;;  %v14985_v29 = vld [vmem:[%s17468_s9 + $0x440] ss:$16 sps:$4 sm:$0xff]  }
  0xa5   : > { %10351 = vmatpush1.bf16.msra.mxu0 %v14901_v30  ;;  %11376 = vmatpush1.bf16.msra.mxu1 %v14904_v31  ;;  %v14988_v30 = vld [vmem:[%s17468_s9 + $0x448] ss:$16 sps:$4 sm:$0xff]   ;;  %v14993_v31 = vld [vmem:[%s17468_s9 + $0x464] ss:$16 sps:$4 sm:$0xff]  }
  0xa6   : > { %10352 = vmatprep.subr.bf16.mxu0 %v14909_v32  ;;  %11377 = vmatprep.subr.bf16.mxu1 %v14912_v33  ;;  %v14996_v32 = vld [vmem:[%s17468_s9 + $0x46c] ss:$16 sps:$4 sm:$0xff]   ;;  %v14991_v33 = vld [vmem:[%s17468_s9 + $0x460] ss:$16 sps:$4 sm:$0xff]  }
  0xa9   : > { %10353 = vmatpush1.bf16.msra.mxu0 %v14907_v34  ;;  %11378 = vmatpush1.bf16.msra.mxu1 %v14910_v35  ;;  %v14994_v34 = vld [vmem:[%s17468_s9 + $0x468] ss:$16 sps:$4 sm:$0xff]   ;;  %v14999_v35 = vld [vmem:[%s17468_s9 + $0x484] ss:$16 sps:$4 sm:$0xff]  }
  0xaa   : > { %10354 = vmatprep.subr.bf16.mxu0 %v14915_v36  ;;  %11379 = vmatprep.subr.bf16.mxu1 %v14918_v37  ;;  %v15002_v36 = vld [vmem:[%s17468_s9 + $0x48c] ss:$16 sps:$4 sm:$0xff]   ;;  %v14997_v37 = vld [vmem:[%s17468_s9 + $0x480] ss:$16 sps:$4 sm:$0xff]  }
  0xad   : > { %10355 = vmatpush1.bf16.msra.mxu0 %v14913_v38  ;;  %11380 = vmatpush1.bf16.msra.mxu1 %v14916_v39  ;;  %v15000_v38 = vld [vmem:[%s17468_s9 + $0x488] ss:$16 sps:$4 sm:$0xff]   ;;  %v15005_v39 = vld [vmem:[%s17468_s9 + $0x4a4] ss:$16 sps:$4 sm:$0xff]  }
  0xae   : > { %10356 = vmatprep.subr.bf16.mxu0 %v14921_v40  ;;  %11381 = vmatprep.subr.bf16.mxu1 %v14924_v41  ;;  %v15008_v40 = vld [vmem:[%s17468_s9 + $0x4ac] ss:$16 sps:$4 sm:$0xff]   ;;  %v15003_v41 = vld [vmem:[%s17468_s9 + $0x4a0] ss:$16 sps:$4 sm:$0xff]  }
  0xb1   : > { %10357 = vmatpush1.bf16.msra.mxu0 %v14919_v42  ;;  %11382 = vmatpush1.bf16.msra.mxu1 %v14922_v44  ;;  %v15006_v42 = vld [vmem:[%s17468_s9 + $0x4a8] ss:$16 sps:$4 sm:$0xff]   ;;  %v15011_v44 = vld [vmem:[%s17468_s9 + $0x4c4] ss:$16 sps:$4 sm:$0xff]  }
  0xb2   : > { %10358 = vmatprep.subr.bf16.mxu0 %v14927_v45  ;;  %11383 = vmatprep.subr.bf16.mxu1 %v14930_v46  ;;  %v15014_v45 = vld [vmem:[%s17468_s9 + $0x4cc] ss:$16 sps:$4 sm:$0xff]   ;;  %v15009_v46 = vld [vmem:[%s17468_s9 + $0x4c0] ss:$16 sps:$4 sm:$0xff]  }
  0xb5   : > { %10359 = vmatpush1.bf16.msra.mxu0 %v14925_v47  ;;  %11384 = vmatpush1.bf16.msra.mxu1 %v14928_v48  ;;  %v15012_v47 = vld [vmem:[%s17468_s9 + $0x4c8] ss:$16 sps:$4 sm:$0xff]   ;;  %v15017_v48 = vld [vmem:[%s17468_s9 + $0x4e4] ss:$16 sps:$4 sm:$0xff]  }
  0xb6   : > { %10360 = vmatprep.subr.bf16.mxu0 %v14933_v50  ;;  %11385 = vmatprep.subr.bf16.mxu1 %v14936_v51  ;;  %v15020_v50 = vld [vmem:[%s17468_s9 + $0x4ec] ss:$16 sps:$4 sm:$0xff]   ;;  %v15015_v51 = vld [vmem:[%s17468_s9 + $0x4e0] ss:$16 sps:$4 sm:$0xff]  }
  0xb9   : > { %10361 = vmatpush1.bf16.msra.mxu0 %v14931_v53  ;;  %11386 = vmatpush1.bf16.msra.mxu1 %v14934_v54  ;;  %v15018_v53 = vld [vmem:[%s17468_s9 + $0x4e8] ss:$16 sps:$4 sm:$0xff]   ;;  %v15023_v54 = vld [vmem:[%s17468_s9 + $0x504] ss:$16 sps:$4 sm:$0xff]  }
  0xba   : > { %10362 = vmatprep.subr.bf16.mxu0 %v14939_v55  ;;  %11387 = vmatprep.subr.bf16.mxu1 %v14942_v56  ;;  %v15026_v55 = vld [vmem:[%s17468_s9 + $0x50c] ss:$16 sps:$4 sm:$0xff]   ;;  %v15021_v56 = vld [vmem:[%s17468_s9 + $0x500] ss:$16 sps:$4 sm:$0xff]  }
  0xbd   : > { %10363 = vmatpush1.bf16.msra.mxu0 %v14937_v57  ;;  %11388 = vmatpush1.bf16.msra.mxu1 %v14940_v58  ;;  %v15024_v57 = vld [vmem:[%s17468_s9 + $0x508] ss:$16 sps:$4 sm:$0xff]   ;;  %v15029_v58 = vld [vmem:[%s17468_s9 + $0x524] ss:$16 sps:$4 sm:$0xff]  }
  0xbe   : > { %10364 = vmatprep.subr.bf16.mxu0 %v14945_v59  ;;  %11389 = vmatprep.subr.bf16.mxu1 %v14948_v60  ;;  %v15032_v59 = vld [vmem:[%s17468_s9 + $0x52c] ss:$16 sps:$4 sm:$0xff]   ;;  %v15027_v60 = vld [vmem:[%s17468_s9 + $0x520] ss:$16 sps:$4 sm:$0xff]  }
  0xc1   : > { %10365 = vmatpush1.bf16.msra.mxu0 %v14943_v61  ;;  %11390 = vmatpush1.bf16.msra.mxu1 %v14946_v62  ;;  %v15030_v61 = vld [vmem:[%s17468_s9 + $0x528] ss:$16 sps:$4 sm:$0xff]   ;;  %v15035_v62 = vld [vmem:[%s17468_s9 + $0x544] ss:$16 sps:$4 sm:$0xff]  }
  0xc2   : > { %10366 = vmatprep.subr.bf16.mxu0 %v14951_v63  ;;  %11391 = vmatprep.subr.bf16.mxu1 %v14954_v0  ;;  %v15038_v63 = vld [vmem:[%s17468_s9 + $0x54c] ss:$16 sps:$4 sm:$0xff]   ;;  %v15033_v0 = vld [vmem:[%s17468_s9 + $0x540] ss:$16 sps:$4 sm:$0xff]  }
  0xc5   : > { %10367 = vmatpush1.bf16.msra.mxu0 %v14949_v1  ;;  %11392 = vmatpush1.bf16.msra.mxu1 %v14952_v2  ;;  %v15036_v1 = vld [vmem:[%s17468_s9 + $0x548] ss:$16 sps:$4 sm:$0xff]   ;;  %v15041_v2 = vld [vmem:[%s17468_s9 + $0x564] ss:$16 sps:$4 sm:$0xff]  }
  0xc6   : > { %10368 = vmatprep.subr.bf16.mxu0 %v14957_v3  ;;  %11393 = vmatprep.subr.bf16.mxu1 %v14960_v4  ;;  %v15044_v3 = vld [vmem:[%s17468_s9 + $0x56c] ss:$16 sps:$4 sm:$0xff]   ;;  %v15039_v4 = vld [vmem:[%s17468_s9 + $0x560] ss:$16 sps:$4 sm:$0xff]  }
  0xc9   : > { %10369 = vmatpush1.bf16.msra.mxu0 %v14955_v5  ;;  %11394 = vmatpush1.bf16.msra.mxu1 %v14958_v6  ;;  %v15042_v5 = vld [vmem:[%s17468_s9 + $0x568] ss:$16 sps:$4 sm:$0xff]   ;;  %v15047_v6 = vld [vmem:[%s17468_s9 + $0x584] ss:$16 sps:$4 sm:$0xff]  }
  0xca   : > { %10370 = vmatprep.subr.bf16.mxu0 %v14963_v7  ;;  %11395 = vmatprep.subr.bf16.mxu1 %v14966_v8  ;;  %v15050_v7 = vld [vmem:[%s17468_s9 + $0x58c] ss:$16 sps:$4 sm:$0xff]   ;;  %v15045_v8 = vld [vmem:[%s17468_s9 + $0x580] ss:$16 sps:$4 sm:$0xff]  }
  0xcd   : > { %10371 = vmatpush1.bf16.msra.mxu0 %v14961_v10  ;;  %11396 = vmatpush1.bf16.msra.mxu1 %v14964_v11  ;;  %v15053_v10 = vld [vmem:[%s17468_s9 + $0x5a4] ss:$16 sps:$4 sm:$0xff]   ;;  %v15056_v11 = vld [vmem:[%s17468_s9 + $0x5ac] ss:$16 sps:$4 sm:$0xff]  }
  0xce   : > { %10372 = vmatprep.subr.bf16.mxu0 %v14969_v12  ;;  %11397 = vmatprep.subr.bf16.mxu1 %v14972_v14  ;;  %v15051_v12 = vld [vmem:[%s17468_s9 + $0x5a0] ss:$16 sps:$4 sm:$0xff]   ;;  %v15054_v14 = vld [vmem:[%s17468_s9 + $0x5a8] ss:$16 sps:$4 sm:$0xff]  }
  0xd1   : > { %10373 = vmatpush1.bf16.msra.mxu0 %v14967_v16  ;;  %11398 = vmatpush1.bf16.msra.mxu1 %v14970_v52  ;;  %v15059_v16 = vld [vmem:[%s17468_s9 + $0x5c4] ss:$16 sps:$4 sm:$0xff]   ;;  %v15062_v52 = vld [vmem:[%s17468_s9 + $0x5cc] ss:$16 sps:$4 sm:$0xff]  }
  0xd2   : > { %10383 = vmatprep.subr.bf16.mxu0 %v14975_v17  ;;  %11408 = vmatprep.subr.bf16.mxu1 %v14978_v18  ;;  %v15057_v17 = vld [vmem:[%s17468_s9 + $0x5c0] ss:$16 sps:$4 sm:$0xff]   ;;  %v15060_v18 = vld [vmem:[%s17468_s9 + $0x5c8] ss:$16 sps:$4 sm:$0xff]  }
  0xd4   : > { %10375 = vmatmul.mubr.bf16.vlgmr.msra.gmra.mrb[0].mxu0 %v1980_v21  ;;  %11400 = vmatmul.mubr.bf16.vlgmr.msra.gmra.mrb[0].mxu1 %v1980_v21  ;;  %v15063_v21 = vld [vmem:[%s17468_s9 + $0x5e0] ss:$16 sps:$4 sm:$0xff]  }
  0xd5   : > { %10384 = vmatpush1.bf16.msra.mxu0 %v14973_v20  ;;  %11409 = vmatpush1.bf16.msra.mxu1 %v14976_v22  ;;  %v15068_v20 = vld [vmem:[%s17468_s9 + $0x5ec] ss:$16 sps:$4 sm:$0xff]   ;;  %v15066_v22 = vld [vmem:[%s17468_s9 + $0x5e8] ss:$16 sps:$4 sm:$0xff]  }
  0xd6   : > { %10385 = vmatprep.subr.bf16.mxu0 %v14981_v23  ;;  %11410 = vmatprep.subr.bf16.mxu1 %v14984_v24  ;;  %v15072_v23 = vld [vmem:[%s17468_s9 + $0x604] ss:$16 sps:$4 sm:$0xff]   ;;  %v15075_v24 = vld [vmem:[%s17468_s9 + $0x60c] ss:$16 sps:$4 sm:$0xff]  }
  0xd7   : > { %10415 = vmatprep.mubr.bf16.mxu0 %v17642_v25  ;;  %11440 = vmatprep.mubr.bf16.mxu1 %v17642_v25 }
  0xd9   : > { %10386 = vmatpush1.bf16.msra.mxu0 %v14979_v26  ;;  %11411 = vmatpush1.bf16.msra.mxu1 %v14982_v13  ;;  %v15070_v26 = vld [vmem:[%s17468_s9 + $0x600] ss:$16 sps:$4 sm:$0xff]   ;;  %v17709_v13 = vrot.slane %v17627_v15, %v17527_v49 }
  0xda   : > { %10387 = vmatprep.subr.bf16.mxu0 %v14987_v27  ;;  %11412 = vmatprep.subr.bf16.mxu1 %v14990_v28  ;;  %v15073_v27 = vld [vmem:[%s17468_s9 + $0x608] ss:$16 sps:$4 sm:$0xff]   ;;  %v15078_v28 = vld [vmem:[%s17468_s9 + $0x624] ss:$16 sps:$4 sm:$0xff]   ;;  %v15076_v15 = vld [vmem:[%s17468_s9 + $0x620] ss:$16 sps:$4 sm:$0xff]  }
  0xdd   : > { %10388 = vmatpush1.bf16.msra.mxu0 %v14985_v29  ;;  %11413 = vmatpush1.bf16.msra.mxu1 %v14988_v30  ;;  %v15081_v29 = vld [vmem:[%s17468_s9 + $0x62c] ss:$16 sps:$4 sm:$0xff]   ;;  %v1983_v30 = vcombine.high %v17642_v25, %v17642_v25  ;;  %v15082_v25 = vld [vmem:[%s17468_s9 + $0x640] ss:$16 sps:$4 sm:$0xff]  }
  0xde   : > { %10389 = vmatprep.subr.bf16.mxu0 %v14993_v31  ;;  %11414 = vmatprep.subr.bf16.mxu1 %v14996_v32  ;;  %v15079_v31 = vld [vmem:[%s17468_s9 + $0x628] ss:$16 sps:$4 sm:$0xff]   ;;  %v15084_v32 = vld [vmem:[%s17468_s9 + $0x644] ss:$16 sps:$4 sm:$0xff]  }
  0xe1   : > { %10390 = vmatpush1.bf16.msra.mxu0 %v14991_v33  ;;  %11415 = vmatpush1.bf16.msra.mxu1 %v14994_v34  ;;  %v15087_v33 = vld [vmem:[%s17468_s9 + $0x64c] ss:$16 sps:$4 sm:$0xff]   ;;  %v15085_v34 = vld [vmem:[%s17468_s9 + $0x648] ss:$16 sps:$4 sm:$0xff]  }
  0xe2   : > { %10391 = vmatprep.subr.bf16.mxu0 %v14999_v35  ;;  %11416 = vmatprep.subr.bf16.mxu1 %v15002_v36  ;;  %v15090_v35 = vld [vmem:[%s17468_s9 + $0x664] ss:$16 sps:$4 sm:$0xff]   ;;  %v15093_v36 = vld [vmem:[%s17468_s9 + $0x66c] ss:$16 sps:$4 sm:$0xff]  }
  0xe5   : > { %10392 = vmatpush1.bf16.msra.mxu0 %v14997_v37  ;;  %11417 = vmatpush1.bf16.msra.mxu1 %v15000_v38  ;;  %v15088_v37 = vld [vmem:[%s17468_s9 + $0x660] ss:$16 sps:$4 sm:$0xff]   ;;  %v15091_v38 = vld [vmem:[%s17468_s9 + $0x668] ss:$16 sps:$4 sm:$0xff]  }
  0xe6   : > { %10393 = vmatprep.subr.bf16.mxu0 %v15005_v39  ;;  %11418 = vmatprep.subr.bf16.mxu1 %v15008_v40  ;;  %v15096_v39 = vld [vmem:[%s17468_s9 + $0x684] ss:$16 sps:$4 sm:$0xff]   ;;  %v15099_v40 = vld [vmem:[%s17468_s9 + $0x68c] ss:$16 sps:$4 sm:$0xff]  }
  0xe9   : > { %10394 = vmatpush1.bf16.msra.mxu0 %v15003_v41  ;;  %11419 = vmatpush1.bf16.msra.mxu1 %v15006_v42  ;;  %v15094_v41 = vld [vmem:[%s17468_s9 + $0x680] ss:$16 sps:$4 sm:$0xff]   ;;  %v15097_v42 = vld [vmem:[%s17468_s9 + $0x688] ss:$16 sps:$4 sm:$0xff]  }
  0xea   : > { %10395 = vmatprep.subr.bf16.mxu0 %v15011_v44  ;;  %11420 = vmatprep.subr.bf16.mxu1 %v15014_v45  ;;  %v15102_v44 = vld [vmem:[%s17468_s9 + $0x6a4] ss:$16 sps:$4 sm:$0xff]   ;;  %v15105_v45 = vld [vmem:[%s17468_s9 + $0x6ac] ss:$16 sps:$4 sm:$0xff]  }
  0xed   : > { %10396 = vmatpush1.bf16.msra.mxu0 %v15009_v46  ;;  %11421 = vmatpush1.bf16.msra.mxu1 %v15012_v47  ;;  %v15100_v46 = vld [vmem:[%s17468_s9 + $0x6a0] ss:$16 sps:$4 sm:$0xff]   ;;  %v15103_v47 = vld [vmem:[%s17468_s9 + $0x6a8] ss:$16 sps:$4 sm:$0xff]  }
  0xee   : > { %10397 = vmatprep.subr.bf16.mxu0 %v15017_v48  ;;  %11422 = vmatprep.subr.bf16.mxu1 %v15020_v50  ;;  %v15108_v48 = vld [vmem:[%s17468_s9 + $0x6c4] ss:$16 sps:$4 sm:$0xff]   ;;  %v15111_v50 = vld [vmem:[%s17468_s9 + $0x6cc] ss:$16 sps:$4 sm:$0xff]  }
  0xf1   : > { %10398 = vmatpush1.bf16.msra.mxu0 %v15015_v51  ;;  %11423 = vmatpush1.bf16.msra.mxu1 %v15018_v53  ;;  %v15106_v51 = vld [vmem:[%s17468_s9 + $0x6c0] ss:$16 sps:$4 sm:$0xff]   ;;  %v15109_v53 = vld [vmem:[%s17468_s9 + $0x6c8] ss:$16 sps:$4 sm:$0xff]  }
  0xf2   : > { %10399 = vmatprep.subr.bf16.mxu0 %v15023_v54  ;;  %11424 = vmatprep.subr.bf16.mxu1 %v15026_v55  ;;  %v15114_v54 = vld [vmem:[%s17468_s9 + $0x6e4] ss:$16 sps:$4 sm:$0xff]   ;;  %v15117_v55 = vld [vmem:[%s17468_s9 + $0x6ec] ss:$16 sps:$4 sm:$0xff]  }
  0xf5   : > { %10400 = vmatpush1.bf16.msra.mxu0 %v15021_v56  ;;  %11425 = vmatpush1.bf16.msra.mxu1 %v15024_v57  ;;  %v15112_v56 = vld [vmem:[%s17468_s9 + $0x6e0] ss:$16 sps:$4 sm:$0xff]   ;;  %v15115_v57 = vld [vmem:[%s17468_s9 + $0x6e8] ss:$16 sps:$4 sm:$0xff]  }
  0xf6   : > { %10401 = vmatprep.subr.bf16.mxu0 %v15029_v58  ;;  %11426 = vmatprep.subr.bf16.mxu1 %v15032_v59  ;;  %v15120_v58 = vld [vmem:[%s17468_s9 + $0x704] ss:$16 sps:$4 sm:$0xff]   ;;  %v15123_v59 = vld [vmem:[%s17468_s9 + $0x70c] ss:$16 sps:$4 sm:$0xff]  }
  0xf9   : > { %10402 = vmatpush1.bf16.msra.mxu0 %v15027_v60  ;;  %11427 = vmatpush1.bf16.msra.mxu1 %v15030_v61  ;;  %v15118_v60 = vld [vmem:[%s17468_s9 + $0x700] ss:$16 sps:$4 sm:$0xff]   ;;  %v15121_v61 = vld [vmem:[%s17468_s9 + $0x708] ss:$16 sps:$4 sm:$0xff]  }
  0xfa   : > { %10403 = vmatprep.subr.bf16.mxu0 %v15035_v62  ;;  %11428 = vmatprep.subr.bf16.mxu1 %v15038_v63  ;;  %v15126_v62 = vld [vmem:[%s17468_s9 + $0x724] ss:$16 sps:$4 sm:$0xff]   ;;  %v15129_v63 = vld [vmem:[%s17468_s9 + $0x72c] ss:$16 sps:$4 sm:$0xff]  }
  0xfd   : > { %10404 = vmatpush1.bf16.msra.mxu0 %v15033_v0  ;;  %11429 = vmatpush1.bf16.msra.mxu1 %v15036_v1  ;;  %v15124_v0 = vld [vmem:[%s17468_s9 + $0x720] ss:$16 sps:$4 sm:$0xff]   ;;  %v15127_v1 = vld [vmem:[%s17468_s9 + $0x728] ss:$16 sps:$4 sm:$0xff]  }
  0xfe   : > { %10405 = vmatprep.subr.bf16.mxu0 %v15041_v2  ;;  %11430 = vmatprep.subr.bf16.mxu1 %v15044_v3  ;;  %v15132_v2 = vld [vmem:[%s17468_s9 + $0x744] ss:$16 sps:$4 sm:$0xff]   ;;  %v15135_v3 = vld [vmem:[%s17468_s9 + $0x74c] ss:$16 sps:$4 sm:$0xff]  }
 0x101   : > { %10406 = vmatpush1.bf16.msra.mxu0 %v15039_v4  ;;  %11431 = vmatpush1.bf16.msra.mxu1 %v15042_v5  ;;  %v15130_v4 = vld [vmem:[%s17468_s9 + $0x740] ss:$16 sps:$4 sm:$0xff]   ;;  %v15133_v5 = vld [vmem:[%s17468_s9 + $0x748] ss:$16 sps:$4 sm:$0xff]  }
 0x102   : > { %10407 = vmatprep.subr.bf16.mxu0 %v15047_v6  ;;  %11432 = vmatprep.subr.bf16.mxu1 %v15050_v7  ;;  %v15138_v6 = vld [vmem:[%s17468_s9 + $0x764] ss:$16 sps:$4 sm:$0xff]   ;;  %v15141_v7 = vld [vmem:[%s17468_s9 + $0x76c] ss:$16 sps:$4 sm:$0xff]  }
 0x105   : > { %10408 = vmatpush1.bf16.msra.mxu0 %v15045_v8  ;;  %11433 = vmatpush1.bf16.msra.mxu1 %v15048_v9  ;;  %v15136_v8 = vld [vmem:[%s17468_s9 + $0x760] ss:$16 sps:$4 sm:$0xff]   ;;  %v15139_v9 = vld [vmem:[%s17468_s9 + $0x768] ss:$16 sps:$4 sm:$0xff]  }
 0x106   : > { %10409 = vmatprep.subr.bf16.mxu0 %v15053_v10  ;;  %11434 = vmatprep.subr.bf16.mxu1 %v15056_v11  ;;  %v15144_v10 = vld [vmem:[%s17468_s9 + $0x784] ss:$16 sps:$4 sm:$0xff]   ;;  %v15147_v11 = vld [vmem:[%s17468_s9 + $0x78c] ss:$16 sps:$4 sm:$0xff]  }
 0x109   : > { %10410 = vmatpush1.bf16.msra.mxu0 %v15051_v12  ;;  %11435 = vmatpush1.bf16.msra.mxu1 %v15054_v14  ;;  %v15142_v12 = vld [vmem:[%s17468_s9 + $0x780] ss:$16 sps:$4 sm:$0xff]   ;;  %v15145_v14 = vld [vmem:[%s17468_s9 + $0x788] ss:$16 sps:$4 sm:$0xff]  }
 0x10a   : > { %10411 = vmatprep.subr.bf16.mxu0 %v15059_v16  ;;  %11436 = vmatprep.subr.bf16.mxu1 %v15062_v52  ;;  %v15150_v16 = vld [vmem:[%s17468_s9 + $0x7a4] ss:$16 sps:$4 sm:$0xff]   ;;  %v15153_v52 = vld [vmem:[%s17468_s9 + $0x7ac] ss:$16 sps:$4 sm:$0xff]  }
 0x10d   : > { %10412 = vmatpush1.bf16.msra.mxu0 %v15057_v17  ;;  %11437 = vmatpush1.bf16.msra.mxu1 %v15060_v18  ;;  %v15148_v17 = vld [vmem:[%s17468_s9 + $0x7a0] ss:$16 sps:$4 sm:$0xff]   ;;  %v15151_v18 = vld [vmem:[%s17468_s9 + $0x7a8] ss:$16 sps:$4 sm:$0xff]  }
 0x10e   : > { %10413 = vmatprep.subr.bf16.mxu0 %v15065_v19  ;;  %11438 = vmatprep.subr.bf16.mxu1 %v15068_v20  ;;  %v15156_v19 = vld [vmem:[%s17468_s9 + $0x7c4] ss:$16 sps:$4 sm:$0xff]   ;;  %v15159_v20 = vld [vmem:[%s17468_s9 + $0x7cc] ss:$16 sps:$4 sm:$0xff]  }
 0x111   : > { %10414 = vmatpush1.bf16.msra.mxu0 %v15063_v21  ;;  %11439 = vmatpush1.bf16.msra.mxu1 %v15066_v22  ;;  %v17773_v21 = vld.sshfl [vmem:[%s19465_s0 + $0x8] sm:$0xff pattern:$0x75316420]  ;;  %v15154_v22 = vld [vmem:[%s17468_s9 + $0x7c0] ss:$16 sps:$4 sm:$0xff]  }
 0x112   : > { %10424 = vmatprep.subr.bf16.mxu0 %v15072_v23  ;;  %11449 = vmatprep.subr.bf16.mxu1 %v15075_v24  ;;  %v15157_v23 = vld [vmem:[%s17468_s9 + $0x7c8] ss:$16 sps:$4 sm:$0xff]   ;;  %v15162_v24 = vld [vmem:[%s17468_s9 + $0x7e4] ss:$16 sps:$4 sm:$0xff]  }
 0x114   : > { %10416 = vmatmul.mubr.bf16.vlgmr.msra.gmra.mrb[0].mxu0 %v17709_v13  ;;  %11441 = vmatmul.mubr.bf16.vlgmr.msra.gmra.mrb[0].mxu1 %v17709_v13 }
 0x115   : > { %10425 = vmatpush1.bf16.msra.mxu0 %v15070_v26  ;;  %11450 = vmatpush1.bf16.msra.mxu1 %v15073_v27  ;;  %v15165_v26 = vld [vmem:[%s17468_s9 + $0x7ec] ss:$16 sps:$4 sm:$0xff]   ;;  %v15160_v27 = vld [vmem:[%s17468_s9 + $0x7e0] ss:$16 sps:$4 sm:$0xff]  }
 0x116   : > { %10426 = vmatprep.subr.bf16.mxu0 %v15078_v28  ;;  %11451 = vmatprep.subr.bf16.mxu1 %v15081_v29  ;;  %v15163_v28 = vld [vmem:[%s17468_s9 + $0x7e8] ss:$16 sps:$4 sm:$0xff]   ;;  %v15168_v29 = vld [vmem:[%s17468_s9 + $0x804] ss:$16 sps:$4 sm:$0xff]  }
 0x117   : > { %10456 = vmatprep.mubr.bf16.mxu0 %v1983_v30  ;;  %11481 = vmatprep.mubr.bf16.mxu1 %v1983_v30  ;;  %v15171_v30 = vld [vmem:[%s17468_s9 + $0x80c] ss:$16 sps:$4 sm:$0xff]  }
 0x119   : > { %10427 = vmatpush1.bf16.msra.mxu0 %v15076_v15  ;;  %11452 = vmatpush1.bf16.msra.mxu1 %v15079_v31  ;;  %v1999_v15 = vcombine.high %v17773_v21, %v17773_v21  ;;  %v1981_v31 = vcombine.high %v17709_v13, %v17709_v13  ;;  %v15172_v13 = vld [vmem:[%s17468_s9 + $0x820] ss:$16 sps:$4 sm:$0xff]  }
 0x11a   : > { %10428 = vmatprep.subr.bf16.mxu0 %v15084_v32  ;;  %11453 = vmatprep.subr.bf16.mxu1 %v15087_v33  ;;  %v15166_v32 = vld [vmem:[%s17468_s9 + $0x800] ss:$16 sps:$4 sm:$0xff]   ;;  %v15169_v33 = vld [vmem:[%s17468_s9 + $0x808] ss:$16 sps:$4 sm:$0xff]  }
 0x11d   : > { %10429 = vmatpush1.bf16.msra.mxu0 %v15082_v25  ;;  %11454 = vmatpush1.bf16.msra.mxu1 %v15085_v34  ;;  %v15174_v25 = vld [vmem:[%s17468_s9 + $0x824] ss:$16 sps:$4 sm:$0xff]   ;;  %v15177_v34 = vld [vmem:[%s17468_s9 + $0x82c] ss:$16 sps:$4 sm:$0xff]  }
 0x11e   : > { %10430 = vmatprep.subr.bf16.mxu0 %v15090_v35  ;;  %11455 = vmatprep.subr.bf16.mxu1 %v15093_v36  ;;  %v17792_v35 = vrot.slane %v1999_v15, %v17527_v49  ;;  %v15175_v36 = vld [vmem:[%s17468_s9 + $0x828] ss:$16 sps:$4 sm:$0xff]   ;;  %v15258_v15 = vld [vmem:[%s17468_s9 + $0x9e4] ss:$16 sps:$4 sm:$0xff]  }
 0x121   : > { %10431 = vmatpush1.bf16.msra.mxu0 %v15088_v37  ;;  %11456 = vmatpush1.bf16.msra.mxu1 %v15091_v38  ;;  %v15180_v37 = vld [vmem:[%s17468_s9 + $0x844] ss:$16 sps:$4 sm:$0xff]   ;;  %v15183_v38 = vld [vmem:[%s17468_s9 + $0x84c] ss:$16 sps:$4 sm:$0xff]  }
 0x122   : > { %10432 = vmatprep.subr.bf16.mxu0 %v15096_v39  ;;  %11457 = vmatprep.subr.bf16.mxu1 %v15099_v40  ;;  %v15178_v39 = vld [vmem:[%s17468_s9 + $0x840] ss:$16 sps:$4 sm:$0xff]   ;;  %v15181_v40 = vld [vmem:[%s17468_s9 + $0x848] ss:$16 sps:$4 sm:$0xff]  }
 0x125   : > { %10433 = vmatpush1.bf16.msra.mxu0 %v15094_v41  ;;  %11458 = vmatpush1.bf16.msra.mxu1 %v15097_v42  ;;  %v15186_v41 = vld [vmem:[%s17468_s9 + $0x864] ss:$16 sps:$4 sm:$0xff]   ;;  %v15189_v42 = vld [vmem:[%s17468_s9 + $0x86c] ss:$16 sps:$4 sm:$0xff]  }
 0x126   : > { %10434 = vmatprep.subr.bf16.mxu0 %v15102_v44  ;;  %11459 = vmatprep.subr.bf16.mxu1 %v15105_v45  ;;  %v15184_v44 = vld [vmem:[%s17468_s9 + $0x860] ss:$16 sps:$4 sm:$0xff]   ;;  %v15187_v45 = vld [vmem:[%s17468_s9 + $0x868] ss:$16 sps:$4 sm:$0xff]  }
 0x129   : > { %10435 = vmatpush1.bf16.msra.mxu0 %v15100_v46  ;;  %11460 = vmatpush1.bf16.msra.mxu1 %v15103_v47  ;;  %v15192_v46 = vld [vmem:[%s17468_s9 + $0x884] ss:$16 sps:$4 sm:$0xff]   ;;  %v15195_v47 = vld [vmem:[%s17468_s9 + $0x88c] ss:$16 sps:$4 sm:$0xff]  }
 0x12a   : > { %10436 = vmatprep.subr.bf16.mxu0 %v15108_v48  ;;  %11461 = vmatprep.subr.bf16.mxu1 %v15111_v50  ;;  %v15190_v48 = vld [vmem:[%s17468_s9 + $0x880] ss:$16 sps:$4 sm:$0xff]   ;;  %v15193_v50 = vld [vmem:[%s17468_s9 + $0x888] ss:$16 sps:$4 sm:$0xff]  }
 0x12d   : > { %10437 = vmatpush1.bf16.msra.mxu0 %v15106_v51  ;;  %11462 = vmatpush1.bf16.msra.mxu1 %v15109_v53  ;;  %v15198_v51 = vld [vmem:[%s17468_s9 + $0x8a4] ss:$16 sps:$4 sm:$0xff]   ;;  %v15201_v53 = vld [vmem:[%s17468_s9 + $0x8ac] ss:$16 sps:$4 sm:$0xff]  }
 0x12e   : > { %10438 = vmatprep.subr.bf16.mxu0 %v15114_v54  ;;  %11463 = vmatprep.subr.bf16.mxu1 %v15117_v55  ;;  %v15196_v54 = vld [vmem:[%s17468_s9 + $0x8a0] ss:$16 sps:$4 sm:$0xff]   ;;  %v15199_v55 = vld [vmem:[%s17468_s9 + $0x8a8] ss:$16 sps:$4 sm:$0xff]  }
 0x131   : > { %10439 = vmatpush1.bf16.msra.mxu0 %v15112_v56  ;;  %11464 = vmatpush1.bf16.msra.mxu1 %v15115_v57  ;;  %v15204_v56 = vld [vmem:[%s17468_s9 + $0x8c4] ss:$16 sps:$4 sm:$0xff]   ;;  %v15207_v57 = vld [vmem:[%s17468_s9 + $0x8cc] ss:$16 sps:$4 sm:$0xff]  }
 0x132   : > { %10440 = vmatprep.subr.bf16.mxu0 %v15120_v58  ;;  %11465 = vmatprep.subr.bf16.mxu1 %v15123_v59  ;;  %v15202_v58 = vld [vmem:[%s17468_s9 + $0x8c0] ss:$16 sps:$4 sm:$0xff]   ;;  %v15205_v59 = vld [vmem:[%s17468_s9 + $0x8c8] ss:$16 sps:$4 sm:$0xff]  }
 0x135   : > { %10441 = vmatpush1.bf16.msra.mxu0 %v15118_v60  ;;  %11466 = vmatpush1.bf16.msra.mxu1 %v15121_v61  ;;  %v15210_v60 = vld [vmem:[%s17468_s9 + $0x8e4] ss:$16 sps:$4 sm:$0xff]   ;;  %v15213_v61 = vld [vmem:[%s17468_s9 + $0x8ec] ss:$16 sps:$4 sm:$0xff]  }
 0x136   : > { %10442 = vmatprep.subr.bf16.mxu0 %v15126_v62  ;;  %11467 = vmatprep.subr.bf16.mxu1 %v15129_v63  ;;  %v15208_v62 = vld [vmem:[%s17468_s9 + $0x8e0] ss:$16 sps:$4 sm:$0xff]   ;;  %v15211_v63 = vld [vmem:[%s17468_s9 + $0x8e8] ss:$16 sps:$4 sm:$0xff]  }
 0x139   : > { %10443 = vmatpush1.bf16.msra.mxu0 %v15124_v0  ;;  %11468 = vmatpush1.bf16.msra.mxu1 %v15127_v1  ;;  %v15216_v0 = vld [vmem:[%s17468_s9 + $0x904] ss:$16 sps:$4 sm:$0xff]   ;;  %v15219_v1 = vld [vmem:[%s17468_s9 + $0x90c] ss:$16 sps:$4 sm:$0xff]  }
 0x13a   : > { %10444 = vmatprep.subr.bf16.mxu0 %v15132_v2  ;;  %11469 = vmatprep.subr.bf16.mxu1 %v15135_v3  ;;  %v15214_v2 = vld [vmem:[%s17468_s9 + $0x900] ss:$16 sps:$4 sm:$0xff]   ;;  %v15217_v3 = vld [vmem:[%s17468_s9 + $0x908] ss:$16 sps:$4 sm:$0xff]  }
 0x13d   : > { %10445 = vmatpush1.bf16.msra.mxu0 %v15130_v4  ;;  %11470 = vmatpush1.bf16.msra.mxu1 %v15133_v5  ;;  %v15222_v4 = vld [vmem:[%s17468_s9 + $0x924] ss:$16 sps:$4 sm:$0xff]   ;;  %v15225_v5 = vld [vmem:[%s17468_s9 + $0x92c] ss:$16 sps:$4 sm:$0xff]  }
 0x13e   : > { %10446 = vmatprep.subr.bf16.mxu0 %v15138_v6  ;;  %11471 = vmatprep.subr.bf16.mxu1 %v15141_v7  ;;  %v15220_v6 = vld [vmem:[%s17468_s9 + $0x920] ss:$16 sps:$4 sm:$0xff]   ;;  %v15223_v7 = vld [vmem:[%s17468_s9 + $0x928] ss:$16 sps:$4 sm:$0xff]  }
 0x141   : > { %10447 = vmatpush1.bf16.msra.mxu0 %v15136_v8  ;;  %11472 = vmatpush1.bf16.msra.mxu1 %v15139_v9  ;;  %v15228_v8 = vld [vmem:[%s17468_s9 + $0x944] ss:$16 sps:$4 sm:$0xff]   ;;  %v15231_v9 = vld [vmem:[%s17468_s9 + $0x94c] ss:$16 sps:$4 sm:$0xff]  }
 0x142   : > { %10448 = vmatprep.subr.bf16.mxu0 %v15144_v10  ;;  %11473 = vmatprep.subr.bf16.mxu1 %v15147_v11  ;;  %v15226_v10 = vld [vmem:[%s17468_s9 + $0x940] ss:$16 sps:$4 sm:$0xff]   ;;  %v15229_v11 = vld [vmem:[%s17468_s9 + $0x948] ss:$16 sps:$4 sm:$0xff]  }
 0x145   : > { %10449 = vmatpush1.bf16.msra.mxu0 %v15142_v12  ;;  %11474 = vmatpush1.bf16.msra.mxu1 %v15145_v14  ;;  %v15234_v12 = vld [vmem:[%s17468_s9 + $0x964] ss:$16 sps:$4 sm:$0xff]   ;;  %v15237_v14 = vld [vmem:[%s17468_s9 + $0x96c] ss:$16 sps:$4 sm:$0xff]  }
 0x146   : > { %10450 = vmatprep.subr.bf16.mxu0 %v15150_v16  ;;  %11475 = vmatprep.subr.bf16.mxu1 %v15153_v52  ;;  %v15232_v16 = vld [vmem:[%s17468_s9 + $0x960] ss:$16 sps:$4 sm:$0xff]   ;;  %v15235_v52 = vld [vmem:[%s17468_s9 + $0x968] ss:$16 sps:$4 sm:$0xff]  }
 0x149   : > { %10451 = vmatpush1.bf16.msra.mxu0 %v15148_v17  ;;  %11476 = vmatpush1.bf16.msra.mxu1 %v15151_v18  ;;  %v15240_v17 = vld [vmem:[%s17468_s9 + $0x984] ss:$16 sps:$4 sm:$0xff]   ;;  %v15243_v18 = vld [vmem:[%s17468_s9 + $0x98c] ss:$16 sps:$4 sm:$0xff]  }
 0x14a   : > { %10452 = vmatprep.subr.bf16.mxu0 %v15156_v19  ;;  %11477 = vmatprep.subr.bf16.mxu1 %v15159_v20  ;;  %v15238_v19 = vld [vmem:[%s17468_s9 + $0x980] ss:$16 sps:$4 sm:$0xff]   ;;  %v15241_v20 = vld [vmem:[%s17468_s9 + $0x988] ss:$16 sps:$4 sm:$0xff]  }
 0x14d   : > { %10453 = vmatpush1.bf16.msra.mxu0 %v15154_v22  ;;  %11478 = vmatpush1.bf16.msra.mxu1 %v15157_v23  ;;  %v15246_v22 = vld [vmem:[%s17468_s9 + $0x9a4] ss:$16 sps:$4 sm:$0xff]   ;;  %v15249_v23 = vld [vmem:[%s17468_s9 + $0x9ac] ss:$16 sps:$4 sm:$0xff]  }
 0x14e   : > { %10454 = vmatprep.subr.bf16.mxu0 %v15162_v24  ;;  %11479 = vmatprep.subr.bf16.mxu1 %v15165_v26  ;;  %v15244_v24 = vld [vmem:[%s17468_s9 + $0x9a0] ss:$16 sps:$4 sm:$0xff]   ;;  %v15247_v26 = vld [vmem:[%s17468_s9 + $0x9a8] ss:$16 sps:$4 sm:$0xff]  }
 0x151   : > { %10455 = vmatpush1.bf16.msra.mxu0 %v15160_v27  ;;  %11480 = vmatpush1.bf16.msra.mxu1 %v15163_v28  ;;  %v15252_v27 = vld [vmem:[%s17468_s9 + $0x9c4] ss:$16 sps:$4 sm:$0xff]   ;;  %v15255_v28 = vld [vmem:[%s17468_s9 + $0x9cc] ss:$16 sps:$4 sm:$0xff]  }
 0x152   : > { %10465 = vmatprep.subr.bf16.mxu0 %v15168_v29  ;;  %11490 = vmatprep.subr.bf16.mxu1 %v15171_v30  ;;  %v15250_v29 = vld [vmem:[%s17468_s9 + $0x9c0] ss:$16 sps:$4 sm:$0xff]   ;;  %v15253_v30 = vld [vmem:[%s17468_s9 + $0x9c8] ss:$16 sps:$4 sm:$0xff]  }
 0x154   : > { %10457 = vmatmul.mubr.bf16.vlgmr.msra.gmra.mrb[0].mxu0 %v1981_v31  ;;  %11482 = vmatmul.mubr.bf16.vlgmr.msra.gmra.mrb[0].mxu1 %v1981_v31  ;;  %v15261_v31 = vld [vmem:[%s17468_s9 + $0x9ec] ss:$16 sps:$4 sm:$0xff]  }
 0x155   : > { %10466 = vmatpush1.bf16.msra.mxu0 %v15166_v32  ;;  %11491 = vmatpush1.bf16.msra.mxu1 %v15169_v33  ;;  %v15256_v32 = vld [vmem:[%s17468_s9 + $0x9e0] ss:$16 sps:$4 sm:$0xff]   ;;  %v15259_v33 = vld [vmem:[%s17468_s9 + $0x9e8] ss:$16 sps:$4 sm:$0xff]  }
 0x156   : > { %10467 = vmatprep.subr.bf16.mxu0 %v15174_v25  ;;  %11492 = vmatprep.subr.bf16.mxu1 %v15177_v34  ;;  %v15264_v25 = vld [vmem:[%s17468_s9 + $0xa04] ss:$16 sps:$4 sm:$0xff]   ;;  %v15267_v34 = vld [vmem:[%s17468_s9 + $0xa0c] ss:$16 sps:$4 sm:$0xff]  }
 0x157   : > { %10497 = vmatprep.mubr.bf16.mxu0 %v17792_v35  ;;  %11522 = vmatprep.mubr.bf16.mxu1 %v17792_v35 }
 0x159   : > { %10468 = vmatpush1.bf16.msra.mxu0 %v15172_v13  ;;  %11493 = vmatpush1.bf16.msra.mxu1 %v15175_v36  ;;  %v17858_v13 = vrot.slane %v17773_v21, %v17527_v49  ;;  %v15262_v36 = vld [vmem:[%s17468_s9 + $0xa00] ss:$16 sps:$4 sm:$0xff]  }
 0x15a   : > { %10469 = vmatprep.subr.bf16.mxu0 %v15180_v37  ;;  %11494 = vmatprep.subr.bf16.mxu1 %v15183_v38  ;;  %v15265_v37 = vld [vmem:[%s17468_s9 + $0xa08] ss:$16 sps:$4 sm:$0xff]   ;;  %v15270_v38 = vld [vmem:[%s17468_s9 + $0xa24] ss:$16 sps:$4 sm:$0xff]   ;;  %v15268_v21 = vld [vmem:[%s17468_s9 + $0xa20] ss:$16 sps:$4 sm:$0xff]  }
 0x15d   : > { %10470 = vmatpush1.bf16.msra.mxu0 %v15178_v39  ;;  %11495 = vmatpush1.bf16.msra.mxu1 %v15181_v40  ;;  %v15273_v39 = vld [vmem:[%s17468_s9 + $0xa2c] ss:$16 sps:$4 sm:$0xff]   ;;  %v2031_v40 = vcombine.high %v17792_v35, %v17792_v35  ;;  %v15274_v35 = vld [vmem:[%s17468_s9 + $0xa40] ss:$16 sps:$4 sm:$0xff]  }
 0x15e   : > { %10471 = vmatprep.subr.bf16.mxu0 %v15186_v41  ;;  %11496 = vmatprep.subr.bf16.mxu1 %v15189_v42  ;;  %v15271_v41 = vld [vmem:[%s17468_s9 + $0xa28] ss:$16 sps:$4 sm:$0xff]   ;;  %v15276_v42 = vld [vmem:[%s17468_s9 + $0xa44] ss:$16 sps:$4 sm:$0xff]  }
 0x161   : > { %10472 = vmatpush1.bf16.msra.mxu0 %v15184_v44  ;;  %11497 = vmatpush1.bf16.msra.mxu1 %v15187_v45  ;;  %v15279_v44 = vld [vmem:[%s17468_s9 + $0xa4c] ss:$16 sps:$4 sm:$0xff]   ;;  %v15277_v45 = vld [vmem:[%s17468_s9 + $0xa48] ss:$16 sps:$4 sm:$0xff]  }
 0x162   : > { %10473 = vmatprep.subr.bf16.mxu0 %v15192_v46  ;;  %11498 = vmatprep.subr.bf16.mxu1 %v15195_v47  ;;  %v15282_v46 = vld [vmem:[%s17468_s9 + $0xa64] ss:$16 sps:$4 sm:$0xff]   ;;  %v15285_v47 = vld [vmem:[%s17468_s9 + $0xa6c] ss:$16 sps:$4 sm:$0xff]  }
 0x165   : > { %10474 = vmatpush1.bf16.msra.mxu0 %v15190_v48  ;;  %11499 = vmatpush1.bf16.msra.mxu1 %v15193_v50  ;;  %v15280_v48 = vld [vmem:[%s17468_s9 + $0xa60] ss:$16 sps:$4 sm:$0xff]   ;;  %v15283_v50 = vld [vmem:[%s17468_s9 + $0xa68] ss:$16 sps:$4 sm:$0xff]  }
 0x166   : > { %10475 = vmatprep.subr.bf16.mxu0 %v15198_v51  ;;  %11500 = vmatprep.subr.bf16.mxu1 %v15201_v53  ;;  %v15288_v51 = vld [vmem:[%s17468_s9 + $0xa84] ss:$16 sps:$4 sm:$0xff]   ;;  %v15291_v53 = vld [vmem:[%s17468_s9 + $0xa8c] ss:$16 sps:$4 sm:$0xff]  }
 0x169   : > { %10476 = vmatpush1.bf16.msra.mxu0 %v15196_v54  ;;  %11501 = vmatpush1.bf16.msra.mxu1 %v15199_v55  ;;  %v15286_v54 = vld [vmem:[%s17468_s9 + $0xa80] ss:$16 sps:$4 sm:$0xff]   ;;  %v15289_v55 = vld [vmem:[%s17468_s9 + $0xa88] ss:$16 sps:$4 sm:$0xff]  }
 0x16a   : > { %10477 = vmatprep.subr.bf16.mxu0 %v15204_v56  ;;  %11502 = vmatprep.subr.bf16.mxu1 %v15207_v57  ;;  %v15294_v56 = vld [vmem:[%s17468_s9 + $0xaa4] ss:$16 sps:$4 sm:$0xff]   ;;  %v15297_v57 = vld [vmem:[%s17468_s9 + $0xaac] ss:$16 sps:$4 sm:$0xff]  }
 0x16d   : > { %10478 = vmatpush1.bf16.msra.mxu0 %v15202_v58  ;;  %11503 = vmatpush1.bf16.msra.mxu1 %v15205_v59  ;;  %v15292_v58 = vld [vmem:[%s17468_s9 + $0xaa0] ss:$16 sps:$4 sm:$0xff]   ;;  %v15295_v59 = vld [vmem:[%s17468_s9 + $0xaa8] ss:$16 sps:$4 sm:$0xff]  }
 0x16e   : > { %10479 = vmatprep.subr.bf16.mxu0 %v15210_v60  ;;  %11504 = vmatprep.subr.bf16.mxu1 %v15213_v61  ;;  %v15300_v60 = vld [vmem:[%s17468_s9 + $0xac4] ss:$16 sps:$4 sm:$0xff]   ;;  %v15303_v61 = vld [vmem:[%s17468_s9 + $0xacc] ss:$16 sps:$4 sm:$0xff]  }
 0x171   : > { %10480 = vmatpush1.bf16.msra.mxu0 %v15208_v62  ;;  %11505 = vmatpush1.bf16.msra.mxu1 %v15211_v63  ;;  %v15298_v62 = vld [vmem:[%s17468_s9 + $0xac0] ss:$16 sps:$4 sm:$0xff]   ;;  %v15301_v63 = vld [vmem:[%s17468_s9 + $0xac8] ss:$16 sps:$4 sm:$0xff]  }
 0x172   : > { %10481 = vmatprep.subr.bf16.mxu0 %v15216_v0  ;;  %11506 = vmatprep.subr.bf16.mxu1 %v15219_v1  ;;  %v15306_v0 = vld [vmem:[%s17468_s9 + $0xae4] ss:$16 sps:$4 sm:$0xff]   ;;  %v15309_v1 = vld [vmem:[%s17468_s9 + $0xaec] ss:$16 sps:$4 sm:$0xff]  }
 0x175   : > { %10482 = vmatpush1.bf16.msra.mxu0 %v15214_v2  ;;  %11507 = vmatpush1.bf16.msra.mxu1 %v15217_v3  ;;  %v15304_v2 = vld [vmem:[%s17468_s9 + $0xae0] ss:$16 sps:$4 sm:$0xff]   ;;  %v15307_v3 = vld [vmem:[%s17468_s9 + $0xae8] ss:$16 sps:$4 sm:$0xff]  }
 0x176   : > { %10483 = vmatprep.subr.bf16.mxu0 %v15222_v4  ;;  %11508 = vmatprep.subr.bf16.mxu1 %v15225_v5  ;;  %v15312_v4 = vld [vmem:[%s17468_s9 + $0xb04] ss:$16 sps:$4 sm:$0xff]   ;;  %v15315_v5 = vld [vmem:[%s17468_s9 + $0xb0c] ss:$16 sps:$4 sm:$0xff]  }
 0x179   : > { %10484 = vmatpush1.bf16.msra.mxu0 %v15220_v6  ;;  %11509 = vmatpush1.bf16.msra.mxu1 %v15223_v7  ;;  %v15310_v6 = vld [vmem:[%s17468_s9 + $0xb00] ss:$16 sps:$4 sm:$0xff]   ;;  %v15313_v7 = vld [vmem:[%s17468_s9 + $0xb08] ss:$16 sps:$4 sm:$0xff]  }
 0x17a   : > { %10485 = vmatprep.subr.bf16.mxu0 %v15228_v8  ;;  %11510 = vmatprep.subr.bf16.mxu1 %v15231_v9  ;;  %v15318_v8 = vld [vmem:[%s17468_s9 + $0xb24] ss:$16 sps:$4 sm:$0xff]   ;;  %v15321_v9 = vld [vmem:[%s17468_s9 + $0xb2c] ss:$16 sps:$4 sm:$0xff]  }
 0x17d   : > { %10486 = vmatpush1.bf16.msra.mxu0 %v15226_v10  ;;  %11511 = vmatpush1.bf16.msra.mxu1 %v15229_v11  ;;  %v15316_v10 = vld [vmem:[%s17468_s9 + $0xb20] ss:$16 sps:$4 sm:$0xff]   ;;  %v15319_v11 = vld [vmem:[%s17468_s9 + $0xb28] ss:$16 sps:$4 sm:$0xff]  }
 0x17e   : > { %10487 = vmatprep.subr.bf16.mxu0 %v15234_v12  ;;  %11512 = vmatprep.subr.bf16.mxu1 %v15237_v14  ;;  %v15324_v12 = vld [vmem:[%s17468_s9 + $0xb44] ss:$16 sps:$4 sm:$0xff]   ;;  %v15327_v14 = vld [vmem:[%s17468_s9 + $0xb4c] ss:$16 sps:$4 sm:$0xff]  }
 0x181   : > { %10488 = vmatpush1.bf16.msra.mxu0 %v15232_v16  ;;  %11513 = vmatpush1.bf16.msra.mxu1 %v15235_v52  ;;  %v15322_v16 = vld [vmem:[%s17468_s9 + $0xb40] ss:$16 sps:$4 sm:$0xff]   ;;  %v15325_v52 = vld [vmem:[%s17468_s9 + $0xb48] ss:$16 sps:$4 sm:$0xff]  }
 0x182   : > { %10489 = vmatprep.subr.bf16.mxu0 %v15240_v17  ;;  %11514 = vmatprep.subr.bf16.mxu1 %v15243_v18  ;;  %v15330_v17 = vld [vmem:[%s17468_s9 + $0xb64] ss:$16 sps:$4 sm:$0xff]   ;;  %v15333_v18 = vld [vmem:[%s17468_s9 + $0xb6c] ss:$16 sps:$4 sm:$0xff]  }
 0x185   : > { %10490 = vmatpush1.bf16.msra.mxu0 %v15238_v19  ;;  %11515 = vmatpush1.bf16.msra.mxu1 %v15241_v20  ;;  %v15328_v19 = vld [vmem:[%s17468_s9 + $0xb60] ss:$16 sps:$4 sm:$0xff]   ;;  %v15331_v20 = vld [vmem:[%s17468_s9 + $0xb68] ss:$16 sps:$4 sm:$0xff]  }
 0x186   : > { %10491 = vmatprep.subr.bf16.mxu0 %v15246_v22  ;;  %11516 = vmatprep.subr.bf16.mxu1 %v15249_v23  ;;  %v15336_v22 = vld [vmem:[%s17468_s9 + $0xb84] ss:$16 sps:$4 sm:$0xff]   ;;  %v15339_v23 = vld [vmem:[%s17468_s9 + $0xb8c] ss:$16 sps:$4 sm:$0xff]  }
 0x189   : > { %10492 = vmatpush1.bf16.msra.mxu0 %v15244_v24  ;;  %11517 = vmatpush1.bf16.msra.mxu1 %v15247_v26  ;;  %v15334_v24 = vld [vmem:[%s17468_s9 + $0xb80] ss:$16 sps:$4 sm:$0xff]   ;;  %v15337_v26 = vld [vmem:[%s17468_s9 + $0xb88] ss:$16 sps:$4 sm:$0xff]  }
 0x18a   : > { %10493 = vmatprep.subr.bf16.mxu0 %v15252_v27  ;;  %11518 = vmatprep.subr.bf16.mxu1 %v15255_v28  ;;  %v15342_v27 = vld [vmem:[%s17468_s9 + $0xba4] ss:$16 sps:$4 sm:$0xff]   ;;  %v15345_v28 = vld [vmem:[%s17468_s9 + $0xbac] ss:$16 sps:$4 sm:$0xff]  }
 0x18d   : > { %10494 = vmatpush1.bf16.msra.mxu0 %v15250_v29  ;;  %11519 = vmatpush1.bf16.msra.mxu1 %v15253_v30  ;;  %v15340_v29 = vld [vmem:[%s17468_s9 + $0xba0] ss:$16 sps:$4 sm:$0xff]   ;;  %v15343_v30 = vld [vmem:[%s17468_s9 + $0xba8] ss:$16 sps:$4 sm:$0xff]  }
 0x18e   : > { %10495 = vmatprep.subr.bf16.mxu0 %v15258_v15  ;;  %11520 = vmatprep.subr.bf16.mxu1 %v15261_v31  ;;  %v15348_v15 = vld [vmem:[%s17468_s9 + $0xbc4] ss:$16 sps:$4 sm:$0xff]   ;;  %v15351_v31 = vld [vmem:[%s17468_s9 + $0xbcc] ss:$16 sps:$4 sm:$0xff]  }
 0x191   : > { %10496 = vmatpush1.bf16.msra.mxu0 %v15256_v32  ;;  %11521 = vmatpush1.bf16.msra.mxu1 %v15259_v33  ;;  %v17187_v32 = vld [vmem:[%s19465_s0 + $0x8] sm:$0xff] }
 0x192   : > { %10506 = vmatprep.subr.bf16.mxu0 %v15264_v25  ;;  %11531 = vmatprep.subr.bf16.mxu1 %v15267_v34  ;;  %v1984_v33 = vcombine.high %v17187_v32, %v17187_v32  ;;  %v15346_v25 = vld [vmem:[%s17468_s9 + $0xbc0] ss:$16 sps:$4 sm:$0xff]   ;;  %v15349_v34 = vld [vmem:[%s17468_s9 + $0xbc8] ss:$16 sps:$4 sm:$0xff]  }
 0x193   : > { %v15430_v32 = vld [vmem:[%s17468_s9 + $0xd80] ss:$16 sps:$4 sm:$0xff]  }
 0x194   : > { %10498 = vmatmul.mubr.bf16.vlgmr.msra.gmra.mrb[0].mxu0 %v17858_v13  ;;  %11523 = vmatmul.mubr.bf16.vlgmr.msra.gmra.mrb[0].mxu1 %v17858_v13 }
 0x195   : > { %10507 = vmatpush1.bf16.msra.mxu0 %v15262_v36  ;;  %11532 = vmatpush1.bf16.msra.mxu1 %v15265_v37  ;;  %v15354_v36 = vld [vmem:[%s17468_s9 + $0xbe4] ss:$16 sps:$4 sm:$0xff]   ;;  %v15357_v37 = vld [vmem:[%s17468_s9 + $0xbec] ss:$16 sps:$4 sm:$0xff]  }
 0x196   : > { %10508 = vmatprep.subr.bf16.mxu0 %v15270_v38  ;;  %11533 = vmatprep.subr.bf16.mxu1 %v15273_v39  ;;  %v17928_v38 = vrot.slane %v1984_v33, %v17527_v49  ;;  %v15352_v39 = vld [vmem:[%s17468_s9 + $0xbe0] ss:$16 sps:$4 sm:$0xff]   ;;  %v15433_v33 = vld [vmem:[%s17468_s9 + $0xd88] ss:$16 sps:$4 sm:$0xff]  }
 0x197   : > { %10538 = vmatprep.mubr.bf16.mxu0 %v2031_v40  ;;  %11563 = vmatprep.mubr.bf16.mxu1 %v2031_v40  ;;  %v15355_v40 = vld [vmem:[%s17468_s9 + $0xbe8] ss:$16 sps:$4 sm:$0xff]  }
 0x199   : > { %10509 = vmatpush1.bf16.msra.mxu0 %v15268_v21  ;;  %11534 = vmatpush1.bf16.msra.mxu1 %v15271_v41  ;;  %v15360_v21 = vld [vmem:[%s17468_s9 + $0xc04] ss:$16 sps:$4 sm:$0xff]   ;;  %v15363_v41 = vld [vmem:[%s17468_s9 + $0xc0c] ss:$16 sps:$4 sm:$0xff]  }
 0x19a   : > { %10510 = vmatprep.subr.bf16.mxu0 %v15276_v42  ;;  %11535 = vmatprep.subr.bf16.mxu1 %v15279_v44  ;;  %v2000_v42 = vcombine.high %v17928_v38, %v17928_v38  ;;  %v2029_v44 = vcombine.high %v17858_v13, %v17858_v13  ;;  %v15364_v13 = vld [vmem:[%s17468_s9 + $0xc20] ss:$16 sps:$4 sm:$0xff]  }
 0x19d   : > { %10511 = vmatpush1.bf16.msra.mxu0 %v15274_v35  ;;  %11536 = vmatpush1.bf16.msra.mxu1 %v15277_v45  ;;  %v15358_v35 = vld [vmem:[%s17468_s9 + $0xc00] ss:$16 sps:$4 sm:$0xff]   ;;  %v15361_v45 = vld [vmem:[%s17468_s9 + $0xc08] ss:$16 sps:$4 sm:$0xff]  }
 0x19e   : > { %10512 = vmatprep.subr.bf16.mxu0 %v15282_v46  ;;  %11537 = vmatprep.subr.bf16.mxu1 %v15285_v47  ;;  %v15366_v46 = vld [vmem:[%s17468_s9 + $0xc24] ss:$16 sps:$4 sm:$0xff]   ;;  %v15369_v47 = vld [vmem:[%s17468_s9 + $0xc2c] ss:$16 sps:$4 sm:$0xff]  }
 0x1a1   : > { %10513 = vmatpush1.bf16.msra.mxu0 %v15280_v48  ;;  %11538 = vmatpush1.bf16.msra.mxu1 %v15283_v50  ;;  %v17943_v48 = vrot.slane %v2000_v42, %v17527_v49  ;;  %v15367_v50 = vld [vmem:[%s17468_s9 + $0xc28] ss:$16 sps:$4 sm:$0xff]   ;;  %v15450_v42 = vld [vmem:[%s17468_s9 + $0xde4] ss:$16 sps:$4 sm:$0xff]  }
 0x1a2   : > { %10514 = vmatprep.subr.bf16.mxu0 %v15288_v51  ;;  %11539 = vmatprep.subr.bf16.mxu1 %v15291_v53  ;;  %v15372_v51 = vld [vmem:[%s17468_s9 + $0xc44] ss:$16 sps:$4 sm:$0xff]   ;;  %v15375_v53 = vld [vmem:[%s17468_s9 + $0xc4c] ss:$16 sps:$4 sm:$0xff]  }
 0x1a5   : > { %10515 = vmatpush1.bf16.msra.mxu0 %v15286_v54  ;;  %11540 = vmatpush1.bf16.msra.mxu1 %v15289_v55  ;;  %v15370_v54 = vld [vmem:[%s17468_s9 + $0xc40] ss:$16 sps:$4 sm:$0xff]   ;;  %v15373_v55 = vld [vmem:[%s17468_s9 + $0xc48] ss:$16 sps:$4 sm:$0xff]  }
 0x1a6   : > { %10516 = vmatprep.subr.bf16.mxu0 %v15294_v56  ;;  %11541 = vmatprep.subr.bf16.mxu1 %v15297_v57  ;;  %v15378_v56 = vld [vmem:[%s17468_s9 + $0xc64] ss:$16 sps:$4 sm:$0xff]   ;;  %v15381_v57 = vld [vmem:[%s17468_s9 + $0xc6c] ss:$16 sps:$4 sm:$0xff]  }
 0x1a9   : > { %10517 = vmatpush1.bf16.msra.mxu0 %v15292_v58  ;;  %11542 = vmatpush1.bf16.msra.mxu1 %v15295_v59  ;;  %v15376_v58 = vld [vmem:[%s17468_s9 + $0xc60] ss:$16 sps:$4 sm:$0xff]   ;;  %v15379_v59 = vld [vmem:[%s17468_s9 + $0xc68] ss:$16 sps:$4 sm:$0xff]  }
 0x1aa   : > { %10518 = vmatprep.subr.bf16.mxu0 %v15300_v60  ;;  %11543 = vmatprep.subr.bf16.mxu1 %v15303_v61  ;;  %v15384_v60 = vld [vmem:[%s17468_s9 + $0xc84] ss:$16 sps:$4 sm:$0xff]   ;;  %v15387_v61 = vld [vmem:[%s17468_s9 + $0xc8c] ss:$16 sps:$4 sm:$0xff]  }
 0x1ad   : > { %10519 = vmatpush1.bf16.msra.mxu0 %v15298_v62  ;;  %11544 = vmatpush1.bf16.msra.mxu1 %v15301_v63  ;;  %v15382_v62 = vld [vmem:[%s17468_s9 + $0xc80] ss:$16 sps:$4 sm:$0xff]   ;;  %v15385_v63 = vld [vmem:[%s17468_s9 + $0xc88] ss:$16 sps:$4 sm:$0xff]  }
 0x1ae   : > { %10520 = vmatprep.subr.bf16.mxu0 %v15306_v0  ;;  %11545 = vmatprep.subr.bf16.mxu1 %v15309_v1  ;;  %v15390_v0 = vld [vmem:[%s17468_s9 + $0xca4] ss:$16 sps:$4 sm:$0xff]   ;;  %v15393_v1 = vld [vmem:[%s17468_s9 + $0xcac] ss:$16 sps:$4 sm:$0xff]  }
 0x1b1   : > { %10521 = vmatpush1.bf16.msra.mxu0 %v15304_v2  ;;  %11546 = vmatpush1.bf16.msra.mxu1 %v15307_v3  ;;  %v15388_v2 = vld [vmem:[%s17468_s9 + $0xca0] ss:$16 sps:$4 sm:$0xff]   ;;  %v15391_v3 = vld [vmem:[%s17468_s9 + $0xca8] ss:$16 sps:$4 sm:$0xff]  }
 0x1b2   : > { %10522 = vmatprep.subr.bf16.mxu0 %v15312_v4  ;;  %11547 = vmatprep.subr.bf16.mxu1 %v15315_v5  ;;  %v15396_v4 = vld [vmem:[%s17468_s9 + $0xcc4] ss:$16 sps:$4 sm:$0xff]   ;;  %v15399_v5 = vld [vmem:[%s17468_s9 + $0xccc] ss:$16 sps:$4 sm:$0xff]  }
 0x1b5   : > { %10523 = vmatpush1.bf16.msra.mxu0 %v15310_v6  ;;  %11548 = vmatpush1.bf16.msra.mxu1 %v15313_v7  ;;  %v15394_v6 = vld [vmem:[%s17468_s9 + $0xcc0] ss:$16 sps:$4 sm:$0xff]   ;;  %v15397_v7 = vld [vmem:[%s17468_s9 + $0xcc8] ss:$16 sps:$4 sm:$0xff]  }
 0x1b6   : > { %10524 = vmatprep.subr.bf16.mxu0 %v15318_v8  ;;  %11549 = vmatprep.subr.bf16.mxu1 %v15321_v9  ;;  %v15402_v8 = vld [vmem:[%s17468_s9 + $0xce4] ss:$16 sps:$4 sm:$0xff]   ;;  %v15405_v9 = vld [vmem:[%s17468_s9 + $0xcec] ss:$16 sps:$4 sm:$0xff]  }
 0x1b9   : > { %10525 = vmatpush1.bf16.msra.mxu0 %v15316_v10  ;;  %11550 = vmatpush1.bf16.msra.mxu1 %v15319_v11  ;;  %v15400_v10 = vld [vmem:[%s17468_s9 + $0xce0] ss:$16 sps:$4 sm:$0xff]   ;;  %v15403_v11 = vld [vmem:[%s17468_s9 + $0xce8] ss:$16 sps:$4 sm:$0xff]  }
 0x1ba   : > { %10526 = vmatprep.subr.bf16.mxu0 %v15324_v12  ;;  %11551 = vmatprep.subr.bf16.mxu1 %v15327_v14  ;;  %v15408_v12 = vld [vmem:[%s17468_s9 + $0xd04] ss:$16 sps:$4 sm:$0xff]   ;;  %v15411_v14 = vld [vmem:[%s17468_s9 + $0xd0c] ss:$16 sps:$4 sm:$0xff]  }
 0x1bd   : > { %10527 = vmatpush1.bf16.msra.mxu0 %v15322_v16  ;;  %11552 = vmatpush1.bf16.msra.mxu1 %v15325_v52  ;;  %v15406_v16 = vld [vmem:[%s17468_s9 + $0xd00] ss:$16 sps:$4 sm:$0xff]   ;;  %v15409_v52 = vld [vmem:[%s17468_s9 + $0xd08] ss:$16 sps:$4 sm:$0xff]  }
 0x1be   : > { %10528 = vmatprep.subr.bf16.mxu0 %v15330_v17  ;;  %11553 = vmatprep.subr.bf16.mxu1 %v15333_v18  ;;  %v15414_v17 = vld [vmem:[%s17468_s9 + $0xd24] ss:$16 sps:$4 sm:$0xff]   ;;  %v15417_v18 = vld [vmem:[%s17468_s9 + $0xd2c] ss:$16 sps:$4 sm:$0xff]  }
 0x1c1   : > { %10529 = vmatpush1.bf16.msra.mxu0 %v15328_v19  ;;  %11554 = vmatpush1.bf16.msra.mxu1 %v15331_v20  ;;  %v15412_v19 = vld [vmem:[%s17468_s9 + $0xd20] ss:$16 sps:$4 sm:$0xff]   ;;  %v15415_v20 = vld [vmem:[%s17468_s9 + $0xd28] ss:$16 sps:$4 sm:$0xff]  }
 0x1c2   : > { %10530 = vmatprep.subr.bf16.mxu0 %v15336_v22  ;;  %11555 = vmatprep.subr.bf16.mxu1 %v15339_v23  ;;  %v15420_v22 = vld [vmem:[%s17468_s9 + $0xd44] ss:$16 sps:$4 sm:$0xff]   ;;  %v15423_v23 = vld [vmem:[%s17468_s9 + $0xd4c] ss:$16 sps:$4 sm:$0xff]  }
 0x1c5   : > { %10531 = vmatpush1.bf16.msra.mxu0 %v15334_v24  ;;  %11556 = vmatpush1.bf16.msra.mxu1 %v15337_v26  ;;  %v15418_v24 = vld [vmem:[%s17468_s9 + $0xd40] ss:$16 sps:$4 sm:$0xff]   ;;  %v15421_v26 = vld [vmem:[%s17468_s9 + $0xd48] ss:$16 sps:$4 sm:$0xff]  }
 0x1c6   : > { %10532 = vmatprep.subr.bf16.mxu0 %v15342_v27  ;;  %11557 = vmatprep.subr.bf16.mxu1 %v15345_v28  ;;  %v15426_v27 = vld [vmem:[%s17468_s9 + $0xd64] ss:$16 sps:$4 sm:$0xff]   ;;  %v15429_v28 = vld [vmem:[%s17468_s9 + $0xd6c] ss:$16 sps:$4 sm:$0xff]  }
 0x1c9   : > { %10533 = vmatpush1.bf16.msra.mxu0 %v15340_v29  ;;  %11558 = vmatpush1.bf16.msra.mxu1 %v15343_v30  ;;  %v15424_v29 = vld [vmem:[%s17468_s9 + $0xd60] ss:$16 sps:$4 sm:$0xff]   ;;  %v15427_v30 = vld [vmem:[%s17468_s9 + $0xd68] ss:$16 sps:$4 sm:$0xff]  }
 0x1ca   : > { %10534 = vmatprep.subr.bf16.mxu0 %v15348_v15  ;;  %11559 = vmatprep.subr.bf16.mxu1 %v15351_v31  ;;  %v15432_v15 = vld [vmem:[%s17468_s9 + $0xd84] ss:$16 sps:$4 sm:$0xff]   ;;  %v15435_v31 = vld [vmem:[%s17468_s9 + $0xd8c] ss:$16 sps:$4 sm:$0xff]  }
 0x1cd   : > { %10535 = vmatpush1.bf16.msra.mxu0 %v15346_v25  ;;  %11560 = vmatpush1.bf16.msra.mxu1 %v15349_v34  ;;  %v15438_v25 = vld [vmem:[%s17468_s9 + $0xda4] ss:$16 sps:$4 sm:$0xff]   ;;  %v15441_v34 = vld [vmem:[%s17468_s9 + $0xdac] ss:$16 sps:$4 sm:$0xff]  }
 0x1ce   : > { %10536 = vmatprep.subr.bf16.mxu0 %v15354_v36  ;;  %11561 = vmatprep.subr.bf16.mxu1 %v15357_v37  ;;  %v15436_v36 = vld [vmem:[%s17468_s9 + $0xda0] ss:$16 sps:$4 sm:$0xff]   ;;  %v15439_v37 = vld [vmem:[%s17468_s9 + $0xda8] ss:$16 sps:$4 sm:$0xff]  }
 0x1d1   : > { %10537 = vmatpush1.bf16.msra.mxu0 %v15352_v39  ;;  %11562 = vmatpush1.bf16.msra.mxu1 %v15355_v40  ;;  %v15444_v39 = vld [vmem:[%s17468_s9 + $0xdc4] ss:$16 sps:$4 sm:$0xff]   ;;  %v15447_v40 = vld [vmem:[%s17468_s9 + $0xdcc] ss:$16 sps:$4 sm:$0xff]  }
 0x1d2   : > { %10547 = vmatprep.subr.bf16.mxu0 %v15360_v21  ;;  %11572 = vmatprep.subr.bf16.mxu1 %v15363_v41  ;;  %v15442_v21 = vld [vmem:[%s17468_s9 + $0xdc0] ss:$16 sps:$4 sm:$0xff]   ;;  %v15445_v41 = vld [vmem:[%s17468_s9 + $0xdc8] ss:$16 sps:$4 sm:$0xff]  }
 0x1d4   : > { %10539 = vmatmul.mubr.bf16.vlgmr.msra.gmra.mrb[0].mxu0 %v2029_v44  ;;  %11564 = vmatmul.mubr.bf16.vlgmr.msra.gmra.mrb[0].mxu1 %v2029_v44  ;;  %v15453_v44 = vld [vmem:[%s17468_s9 + $0xdec] ss:$16 sps:$4 sm:$0xff]  }
 0x1d5   : > { %10548 = vmatpush1.bf16.msra.mxu0 %v15358_v35  ;;  %11573 = vmatpush1.bf16.msra.mxu1 %v15361_v45  ;;  %v15448_v35 = vld [vmem:[%s17468_s9 + $0xde0] ss:$16 sps:$4 sm:$0xff]   ;;  %v15451_v45 = vld [vmem:[%s17468_s9 + $0xde8] ss:$16 sps:$4 sm:$0xff]  }
 0x1d6   : > { %10549 = vmatprep.subr.bf16.mxu0 %v15366_v46  ;;  %11574 = vmatprep.subr.bf16.mxu1 %v15369_v47  ;;  %v15457_v46 = vld [vmem:[%s17468_s9 + $0xe04] ss:$16 sps:$4 sm:$0xff]   ;;  %v15460_v47 = vld [vmem:[%s17468_s9 + $0xe0c] ss:$16 sps:$4 sm:$0xff]  }
 0x1d7   : > { %10579 = vmatprep.mubr.bf16.mxu0 %v17943_v48  ;;  %11604 = vmatprep.mubr.bf16.mxu1 %v17943_v48 }
 0x1d9   : > { %10550 = vmatpush1.bf16.msra.mxu0 %v15364_v13  ;;  %11575 = vmatpush1.bf16.msra.mxu1 %v15367_v50  ;;  %v18009_v13 = vrot.slane %v17928_v38, %v17527_v49  ;;  %v15455_v50 = vld [vmem:[%s17468_s9 + $0xe00] ss:$16 sps:$4 sm:$0xff]  }
 0x1da   : > { %10551 = vmatprep.subr.bf16.mxu0 %v15372_v51  ;;  %11576 = vmatprep.subr.bf16.mxu1 %v15375_v53  ;;  %v15458_v51 = vld [vmem:[%s17468_s9 + $0xe08] ss:$16 sps:$4 sm:$0xff]   ;;  %v15463_v53 = vld [vmem:[%s17468_s9 + $0xe24] ss:$16 sps:$4 sm:$0xff]   ;;  %v15461_v38 = vld [vmem:[%s17468_s9 + $0xe20] ss:$16 sps:$4 sm:$0xff]  }
 0x1dd   : > { %10552 = vmatpush1.bf16.msra.mxu0 %v15370_v54  ;;  %11577 = vmatpush1.bf16.msra.mxu1 %v15373_v55  ;;  %v15466_v54 = vld [vmem:[%s17468_s9 + $0xe2c] ss:$16 sps:$4 sm:$0xff]   ;;  %v2032_v55 = vcombine.high %v17943_v48, %v17943_v48  ;;  %v15467_v48 = vld [vmem:[%s17468_s9 + $0xe40] ss:$16 sps:$4 sm:$0xff]  }
 0x1de   : > { %10553 = vmatprep.subr.bf16.mxu0 %v15378_v56  ;;  %11578 = vmatprep.subr.bf16.mxu1 %v15381_v57  ;;  %v15464_v56 = vld [vmem:[%s17468_s9 + $0xe28] ss:$16 sps:$4 sm:$0xff]   ;;  %v15469_v57 = vld [vmem:[%s17468_s9 + $0xe44] ss:$16 sps:$4 sm:$0xff]  }
 0x1e1   : > { %10554 = vmatpush1.bf16.msra.mxu0 %v15376_v58  ;;  %11579 = vmatpush1.bf16.msra.mxu1 %v15379_v59  ;;  %v15472_v58 = vld [vmem:[%s17468_s9 + $0xe4c] ss:$16 sps:$4 sm:$0xff]   ;;  %v15470_v59 = vld [vmem:[%s17468_s9 + $0xe48] ss:$16 sps:$4 sm:$0xff]  }
 0x1e2   : > { %10555 = vmatprep.subr.bf16.mxu0 %v15384_v60  ;;  %11580 = vmatprep.subr.bf16.mxu1 %v15387_v61  ;;  %v15475_v60 = vld [vmem:[%s17468_s9 + $0xe64] ss:$16 sps:$4 sm:$0xff]   ;;  %v15478_v61 = vld [vmem:[%s17468_s9 + $0xe6c] ss:$16 sps:$4 sm:$0xff]  }
 0x1e5   : > { %10556 = vmatpush1.bf16.msra.mxu0 %v15382_v62  ;;  %11581 = vmatpush1.bf16.msra.mxu1 %v15385_v63  ;;  %v15473_v62 = vld [vmem:[%s17468_s9 + $0xe60] ss:$16 sps:$4 sm:$0xff]   ;;  %v15476_v63 = vld [vmem:[%s17468_s9 + $0xe68] ss:$16 sps:$4 sm:$0xff]  }
 0x1e6   : > { %10557 = vmatprep.subr.bf16.mxu0 %v15390_v0  ;;  %11582 = vmatprep.subr.bf16.mxu1 %v15393_v1  ;;  %v15481_v0 = vld [vmem:[%s17468_s9 + $0xe84] ss:$16 sps:$4 sm:$0xff]   ;;  %v15484_v1 = vld [vmem:[%s17468_s9 + $0xe8c] ss:$16 sps:$4 sm:$0xff]  }
 0x1e9   : > { %10558 = vmatpush1.bf16.msra.mxu0 %v15388_v2  ;;  %11583 = vmatpush1.bf16.msra.mxu1 %v15391_v3  ;;  %v15479_v2 = vld [vmem:[%s17468_s9 + $0xe80] ss:$16 sps:$4 sm:$0xff]   ;;  %v15482_v3 = vld [vmem:[%s17468_s9 + $0xe88] ss:$16 sps:$4 sm:$0xff]  }
 0x1ea   : > { %10559 = vmatprep.subr.bf16.mxu0 %v15396_v4  ;;  %11584 = vmatprep.subr.bf16.mxu1 %v15399_v5  ;;  %v15487_v4 = vld [vmem:[%s17468_s9 + $0xea4] ss:$16 sps:$4 sm:$0xff]   ;;  %v15490_v5 = vld [vmem:[%s17468_s9 + $0xeac] ss:$16 sps:$4 sm:$0xff]  }
 0x1ed   : > { %10560 = vmatpush1.bf16.msra.mxu0 %v15394_v6  ;;  %11585 = vmatpush1.bf16.msra.mxu1 %v15397_v7  ;;  %v15485_v6 = vld [vmem:[%s17468_s9 + $0xea0] ss:$16 sps:$4 sm:$0xff]   ;;  %v15488_v7 = vld [vmem:[%s17468_s9 + $0xea8] ss:$16 sps:$4 sm:$0xff]  }
 0x1ee   : > { %10561 = vmatprep.subr.bf16.mxu0 %v15402_v8  ;;  %11586 = vmatprep.subr.bf16.mxu1 %v15405_v9  ;;  %v15493_v8 = vld [vmem:[%s17468_s9 + $0xec4] ss:$16 sps:$4 sm:$0xff]   ;;  %v15496_v9 = vld [vmem:[%s17468_s9 + $0xecc] ss:$16 sps:$4 sm:$0xff]  }
 0x1f1   : > { %10562 = vmatpush1.bf16.msra.mxu0 %v15400_v10  ;;  %11587 = vmatpush1.bf16.msra.mxu1 %v15403_v11  ;;  %v15491_v10 = vld [vmem:[%s17468_s9 + $0xec0] ss:$16 sps:$4 sm:$0xff]   ;;  %v15494_v11 = vld [vmem:[%s17468_s9 + $0xec8] ss:$16 sps:$4 sm:$0xff]  }
 0x1f2   : > { %10563 = vmatprep.subr.bf16.mxu0 %v15408_v12  ;;  %11588 = vmatprep.subr.bf16.mxu1 %v15411_v14  ;;  %v15499_v12 = vld [vmem:[%s17468_s9 + $0xee4] ss:$16 sps:$4 sm:$0xff]   ;;  %v15502_v14 = vld [vmem:[%s17468_s9 + $0xeec] ss:$16 sps:$4 sm:$0xff]  }
 0x1f5   : > { %10564 = vmatpush1.bf16.msra.mxu0 %v15406_v16  ;;  %11589 = vmatpush1.bf16.msra.mxu1 %v15409_v52  ;;  %v15497_v16 = vld [vmem:[%s17468_s9 + $0xee0] ss:$16 sps:$4 sm:$0xff]   ;;  %v15500_v52 = vld [vmem:[%s17468_s9 + $0xee8] ss:$16 sps:$4 sm:$0xff]  }
 0x1f6   : > { %10565 = vmatprep.subr.bf16.mxu0 %v15414_v17  ;;  %11590 = vmatprep.subr.bf16.mxu1 %v15417_v18  ;;  %v15505_v17 = vld [vmem:[%s17468_s9 + $0xf04] ss:$16 sps:$4 sm:$0xff]   ;;  %v15508_v18 = vld [vmem:[%s17468_s9 + $0xf0c] ss:$16 sps:$4 sm:$0xff]  }
 0x1f9   : > { %10566 = vmatpush1.bf16.msra.mxu0 %v15412_v19  ;;  %11591 = vmatpush1.bf16.msra.mxu1 %v15415_v20  ;;  %v15503_v19 = vld [vmem:[%s17468_s9 + $0xf00] ss:$16 sps:$4 sm:$0xff]   ;;  %v15506_v20 = vld [vmem:[%s17468_s9 + $0xf08] ss:$16 sps:$4 sm:$0xff]  }
 0x1fa   : > { %10567 = vmatprep.subr.bf16.mxu0 %v15420_v22  ;;  %11592 = vmatprep.subr.bf16.mxu1 %v15423_v23  ;;  %v15511_v22 = vld [vmem:[%s17468_s9 + $0xf24] ss:$16 sps:$4 sm:$0xff]   ;;  %v15514_v23 = vld [vmem:[%s17468_s9 + $0xf2c] ss:$16 sps:$4 sm:$0xff]  }
 0x1fd   : > { %10568 = vmatpush1.bf16.msra.mxu0 %v15418_v24  ;;  %11593 = vmatpush1.bf16.msra.mxu1 %v15421_v26  ;;  %v15509_v24 = vld [vmem:[%s17468_s9 + $0xf20] ss:$16 sps:$4 sm:$0xff]   ;;  %v15512_v26 = vld [vmem:[%s17468_s9 + $0xf28] ss:$16 sps:$4 sm:$0xff]  }
 0x1fe   : > { %10569 = vmatprep.subr.bf16.mxu0 %v15426_v27  ;;  %11594 = vmatprep.subr.bf16.mxu1 %v15429_v28  ;;  %v15517_v27 = vld [vmem:[%s17468_s9 + $0xf44] ss:$16 sps:$4 sm:$0xff]   ;;  %v15520_v28 = vld [vmem:[%s17468_s9 + $0xf4c] ss:$16 sps:$4 sm:$0xff]  }
 0x201   : > { %10570 = vmatpush1.bf16.msra.mxu0 %v15424_v29  ;;  %11595 = vmatpush1.bf16.msra.mxu1 %v15427_v30  ;;  %v15515_v29 = vld [vmem:[%s17468_s9 + $0xf40] ss:$16 sps:$4 sm:$0xff]   ;;  %v15518_v30 = vld [vmem:[%s17468_s9 + $0xf48] ss:$16 sps:$4 sm:$0xff]  }
 0x202   : > { %10571 = vmatprep.subr.bf16.mxu0 %v15432_v15  ;;  %11596 = vmatprep.subr.bf16.mxu1 %v15435_v31  ;;  %v15523_v15 = vld [vmem:[%s17468_s9 + $0xf64] ss:$16 sps:$4 sm:$0xff]   ;;  %v15526_v31 = vld [vmem:[%s17468_s9 + $0xf6c] ss:$16 sps:$4 sm:$0xff]  }
 0x205   : > { %10572 = vmatpush1.bf16.msra.mxu0 %v15430_v32  ;;  %11597 = vmatpush1.bf16.msra.mxu1 %v15433_v33  ;;  %v15521_v32 = vld [vmem:[%s17468_s9 + $0xf60] ss:$16 sps:$4 sm:$0xff]   ;;  %v15524_v33 = vld [vmem:[%s17468_s9 + $0xf68] ss:$16 sps:$4 sm:$0xff]  }
 0x206   : > { %10573 = vmatprep.subr.bf16.mxu0 %v15438_v25  ;;  %11598 = vmatprep.subr.bf16.mxu1 %v15441_v34  ;;  %v15529_v25 = vld [vmem:[%s17468_s9 + $0xf84] ss:$16 sps:$4 sm:$0xff]   ;;  %v15532_v34 = vld [vmem:[%s17468_s9 + $0xf8c] ss:$16 sps:$4 sm:$0xff]  }
 0x209   : > { %10574 = vmatpush1.bf16.msra.mxu0 %v15436_v36  ;;  %11599 = vmatpush1.bf16.msra.mxu1 %v15439_v37  ;;  %v15527_v36 = vld [vmem:[%s17468_s9 + $0xf80] ss:$16 sps:$4 sm:$0xff]   ;;  %v15530_v37 = vld [vmem:[%s17468_s9 + $0xf88] ss:$16 sps:$4 sm:$0xff]  }
 0x20a   : > { %10575 = vmatprep.subr.bf16.mxu0 %v15444_v39  ;;  %11600 = vmatprep.subr.bf16.mxu1 %v15447_v40  ;;  %v15535_v39 = vld [vmem:[%s17468_s9 + $0xfa4] ss:$16 sps:$4 sm:$0xff]   ;;  %v15538_v40 = vld [vmem:[%s17468_s9 + $0xfac] ss:$16 sps:$4 sm:$0xff]  }
 0x20d   : > { %10576 = vmatpush1.bf16.msra.mxu0 %v15442_v21  ;;  %11601 = vmatpush1.bf16.msra.mxu1 %v15445_v41  ;;  %v15533_v21 = vld [vmem:[%s17468_s9 + $0xfa0] ss:$16 sps:$4 sm:$0xff]   ;;  %v15536_v41 = vld [vmem:[%s17468_s9 + $0xfa8] ss:$16 sps:$4 sm:$0xff]  }
 0x20e   : > { %10577 = vmatprep.subr.bf16.mxu0 %v15450_v42  ;;  %11602 = vmatprep.subr.bf16.mxu1 %v15453_v44  ;;  %v15541_v42 = vld [vmem:[%s17468_s9 + $0xfc4] ss:$16 sps:$4 sm:$0xff]   ;;  %v15544_v44 = vld [vmem:[%s17468_s9 + $0xfcc] ss:$16 sps:$4 sm:$0xff]  }
 0x211   : > { %10578 = vmatpush1.bf16.msra.mxu0 %v15448_v35  ;;  %11603 = vmatpush1.bf16.msra.mxu1 %v15451_v45  ;;  %v18074_v35 = vld.sshfl [vmem:[%s19465_s0 + $0x10] sm:$0xff pattern:$0x75316420] }
 0x212   : > { %10588 = vmatprep.subr.bf16.mxu0 %v15457_v46  ;;  %11613 = vmatprep.subr.bf16.mxu1 %v15460_v47  ;;  %v15539_v45 = vld [vmem:[%s17468_s9 + $0xfc0] ss:$16 sps:$4 sm:$0xff]   ;;  %v15542_v46 = vld [vmem:[%s17468_s9 + $0xfc8] ss:$16 sps:$4 sm:$0xff]   ;;  %v15547_v47 = vld [vmem:[%s17468_s9 + $0xfe4] ss:$16 sps:$4 sm:$0xff]  }
 0x214   : > { %10580 = vmatmul.mubr.bf16.vlgmr.msra.gmra.mrb[0].mxu0 %v18009_v13  ;;  %11605 = vmatmul.mubr.bf16.vlgmr.msra.gmra.mrb[0].mxu1 %v18009_v13 }
 0x215   : > { %10589 = vmatpush1.bf16.msra.mxu0 %v15455_v50  ;;  %11614 = vmatpush1.bf16.msra.mxu1 %v15458_v51  ;;  %v15550_v50 = vld [vmem:[%s17468_s9 + $0xfec] ss:$16 sps:$4 sm:$0xff]   ;;  %v15545_v51 = vld [vmem:[%s17468_s9 + $0xfe0] ss:$16 sps:$4 sm:$0xff]  }
 0x216   : > { %10590 = vmatprep.subr.bf16.mxu0 %v15463_v53  ;;  %11615 = vmatprep.subr.bf16.mxu1 %v15466_v54  ;;  %v15548_v53 = vld [vmem:[%s17468_s9 + $0xfe8] ss:$16 sps:$4 sm:$0xff]   ;;  %v15553_v54 = vld [vmem:[%s17468_s9 + $0x1004] ss:$16 sps:$4 sm:$0xff]  }
 0x217   : > { %10620 = vmatprep.mubr.bf16.mxu0 %v2032_v55  ;;  %11645 = vmatprep.mubr.bf16.mxu1 %v2032_v55  ;;  %v15556_v55 = vld [vmem:[%s17468_s9 + $0x100c] ss:$16 sps:$4 sm:$0xff]  }
 0x219   : > { %10591 = vmatpush1.bf16.msra.mxu0 %v15461_v38  ;;  %11616 = vmatpush1.bf16.msra.mxu1 %v15464_v56  ;;  %v2048_v38 = vcombine.high %v18074_v35, %v18074_v35  ;;  %v2030_v56 = vcombine.high %v18009_v13, %v18009_v13  ;;  %v15557_v13 = vld [vmem:[%s17468_s9 + $0x1020] ss:$16 sps:$4 sm:$0xff]  }
 0x21a   : > { %10592 = vmatprep.subr.bf16.mxu0 %v15469_v57  ;;  %11617 = vmatprep.subr.bf16.mxu1 %v15472_v58  ;;  %v15551_v57 = vld [vmem:[%s17468_s9 + $0x1000] ss:$16 sps:$4 sm:$0xff]   ;;  %v15554_v58 = vld [vmem:[%s17468_s9 + $0x1008] ss:$16 sps:$4 sm:$0xff]  }
 0x21d   : > { %10593 = vmatpush1.bf16.msra.mxu0 %v15467_v48  ;;  %11618 = vmatpush1.bf16.msra.mxu1 %v15470_v59  ;;  %v15559_v48 = vld [vmem:[%s17468_s9 + $0x1024] ss:$16 sps:$4 sm:$0xff]   ;;  %v15562_v59 = vld [vmem:[%s17468_s9 + $0x102c] ss:$16 sps:$4 sm:$0xff]  }
 0x21e   : > { %10594 = vmatprep.subr.bf16.mxu0 %v15475_v60  ;;  %11619 = vmatprep.subr.bf16.mxu1 %v15478_v61  ;;  %v18093_v60 = vrot.slane %v2048_v38, %v17527_v49  ;;  %v15560_v61 = vld [vmem:[%s17468_s9 + $0x1028] ss:$16 sps:$4 sm:$0xff]   ;;  %v15643_v38 = vld [vmem:[%s17468_s9 + $0x11e4] ss:$16 sps:$4 sm:$0xff]  }
 0x221   : > { %10595 = vmatpush1.bf16.msra.mxu0 %v15473_v62  ;;  %11620 = vmatpush1.bf16.msra.mxu1 %v15476_v63  ;;  %v15565_v62 = vld [vmem:[%s17468_s9 + $0x1044] ss:$16 sps:$4 sm:$0xff]   ;;  %v15568_v63 = vld [vmem:[%s17468_s9 + $0x104c] ss:$16 sps:$4 sm:$0xff]  }
 0x222   : > { %10596 = vmatprep.subr.bf16.mxu0 %v15481_v0  ;;  %11621 = vmatprep.subr.bf16.mxu1 %v15484_v1  ;;  %v15563_v0 = vld [vmem:[%s17468_s9 + $0x1040] ss:$16 sps:$4 sm:$0xff]   ;;  %v15566_v1 = vld [vmem:[%s17468_s9 + $0x1048] ss:$16 sps:$4 sm:$0xff]  }
 0x225   : > { %10597 = vmatpush1.bf16.msra.mxu0 %v15479_v2  ;;  %11622 = vmatpush1.bf16.msra.mxu1 %v15482_v3  ;;  %v15571_v2 = vld [vmem:[%s17468_s9 + $0x1064] ss:$16 sps:$4 sm:$0xff]   ;;  %v15574_v3 = vld [vmem:[%s17468_s9 + $0x106c] ss:$16 sps:$4 sm:$0xff]  }
 0x226   : > { %10598 = vmatprep.subr.bf16.mxu0 %v15487_v4  ;;  %11623 = vmatprep.subr.bf16.mxu1 %v15490_v5  ;;  %v15569_v4 = vld [vmem:[%s17468_s9 + $0x1060] ss:$16 sps:$4 sm:$0xff]   ;;  %v15572_v5 = vld [vmem:[%s17468_s9 + $0x1068] ss:$16 sps:$4 sm:$0xff]  }
 0x229   : > { %10599 = vmatpush1.bf16.msra.mxu0 %v15485_v6  ;;  %11624 = vmatpush1.bf16.msra.mxu1 %v15488_v7  ;;  %v15577_v6 = vld [vmem:[%s17468_s9 + $0x1084] ss:$16 sps:$4 sm:$0xff]   ;;  %v15580_v7 = vld [vmem:[%s17468_s9 + $0x108c] ss:$16 sps:$4 sm:$0xff]  }
 0x22a   : > { %10600 = vmatprep.subr.bf16.mxu0 %v15493_v8  ;;  %11625 = vmatprep.subr.bf16.mxu1 %v15496_v9  ;;  %v15575_v8 = vld [vmem:[%s17468_s9 + $0x1080] ss:$16 sps:$4 sm:$0xff]   ;;  %v15578_v9 = vld [vmem:[%s17468_s9 + $0x1088] ss:$16 sps:$4 sm:$0xff]  }
 0x22d   : > { %10601 = vmatpush1.bf16.msra.mxu0 %v15491_v10  ;;  %11626 = vmatpush1.bf16.msra.mxu1 %v15494_v11  ;;  %v15583_v10 = vld [vmem:[%s17468_s9 + $0x10a4] ss:$16 sps:$4 sm:$0xff]   ;;  %v15586_v11 = vld [vmem:[%s17468_s9 + $0x10ac] ss:$16 sps:$4 sm:$0xff]  }
 0x22e   : > { %10602 = vmatprep.subr.bf16.mxu0 %v15499_v12  ;;  %11627 = vmatprep.subr.bf16.mxu1 %v15502_v14  ;;  %v15581_v12 = vld [vmem:[%s17468_s9 + $0x10a0] ss:$16 sps:$4 sm:$0xff]   ;;  %v15584_v14 = vld [vmem:[%s17468_s9 + $0x10a8] ss:$16 sps:$4 sm:$0xff]  }
 0x231   : > { %10603 = vmatpush1.bf16.msra.mxu0 %v15497_v16  ;;  %11628 = vmatpush1.bf16.msra.mxu1 %v15500_v52  ;;  %v15589_v16 = vld [vmem:[%s17468_s9 + $0x10c4] ss:$16 sps:$4 sm:$0xff]   ;;  %v15592_v52 = vld [vmem:[%s17468_s9 + $0x10cc] ss:$16 sps:$4 sm:$0xff]  }
 0x232   : > { %10604 = vmatprep.subr.bf16.mxu0 %v15505_v17  ;;  %11629 = vmatprep.subr.bf16.mxu1 %v15508_v18  ;;  %v15587_v17 = vld [vmem:[%s17468_s9 + $0x10c0] ss:$16 sps:$4 sm:$0xff]   ;;  %v15590_v18 = vld [vmem:[%s17468_s9 + $0x10c8] ss:$16 sps:$4 sm:$0xff]  }
 0x235   : > { %10605 = vmatpush1.bf16.msra.mxu0 %v15503_v19  ;;  %11630 = vmatpush1.bf16.msra.mxu1 %v15506_v20  ;;  %v15595_v19 = vld [vmem:[%s17468_s9 + $0x10e4] ss:$16 sps:$4 sm:$0xff]   ;;  %v15598_v20 = vld [vmem:[%s17468_s9 + $0x10ec] ss:$16 sps:$4 sm:$0xff]  }
 0x236   : > { %10606 = vmatprep.subr.bf16.mxu0 %v15511_v22  ;;  %11631 = vmatprep.subr.bf16.mxu1 %v15514_v23  ;;  %v15593_v22 = vld [vmem:[%s17468_s9 + $0x10e0] ss:$16 sps:$4 sm:$0xff]   ;;  %v15596_v23 = vld [vmem:[%s17468_s9 + $0x10e8] ss:$16 sps:$4 sm:$0xff]  }
 0x239   : > { %10607 = vmatpush1.bf16.msra.mxu0 %v15509_v24  ;;  %11632 = vmatpush1.bf16.msra.mxu1 %v15512_v26  ;;  %v15601_v24 = vld [vmem:[%s17468_s9 + $0x1104] ss:$16 sps:$4 sm:$0xff]   ;;  %v15604_v26 = vld [vmem:[%s17468_s9 + $0x110c] ss:$16 sps:$4 sm:$0xff]  }
 0x23a   : > { %10608 = vmatprep.subr.bf16.mxu0 %v15517_v27  ;;  %11633 = vmatprep.subr.bf16.mxu1 %v15520_v28  ;;  %v15599_v27 = vld [vmem:[%s17468_s9 + $0x1100] ss:$16 sps:$4 sm:$0xff]   ;;  %v15602_v28 = vld [vmem:[%s17468_s9 + $0x1108] ss:$16 sps:$4 sm:$0xff]  }
 0x23d   : > { %10609 = vmatpush1.bf16.msra.mxu0 %v15515_v29  ;;  %11634 = vmatpush1.bf16.msra.mxu1 %v15518_v30  ;;  %v15607_v29 = vld [vmem:[%s17468_s9 + $0x1124] ss:$16 sps:$4 sm:$0xff]   ;;  %v15610_v30 = vld [vmem:[%s17468_s9 + $0x112c] ss:$16 sps:$4 sm:$0xff]  }
 0x23e   : > { %10610 = vmatprep.subr.bf16.mxu0 %v15523_v15  ;;  %11635 = vmatprep.subr.bf16.mxu1 %v15526_v31  ;;  %v15605_v15 = vld [vmem:[%s17468_s9 + $0x1120] ss:$16 sps:$4 sm:$0xff]   ;;  %v15608_v31 = vld [vmem:[%s17468_s9 + $0x1128] ss:$16 sps:$4 sm:$0xff]  }
 0x241   : > { %10611 = vmatpush1.bf16.msra.mxu0 %v15521_v32  ;;  %11636 = vmatpush1.bf16.msra.mxu1 %v15524_v33  ;;  %v15613_v32 = vld [vmem:[%s17468_s9 + $0x1144] ss:$16 sps:$4 sm:$0xff]   ;;  %v15616_v33 = vld [vmem:[%s17468_s9 + $0x114c] ss:$16 sps:$4 sm:$0xff]  }
 0x242   : > { %10612 = vmatprep.subr.bf16.mxu0 %v15529_v25  ;;  %11637 = vmatprep.subr.bf16.mxu1 %v15532_v34  ;;  %v15611_v25 = vld [vmem:[%s17468_s9 + $0x1140] ss:$16 sps:$4 sm:$0xff]   ;;  %v15614_v34 = vld [vmem:[%s17468_s9 + $0x1148] ss:$16 sps:$4 sm:$0xff]  }
 0x245   : > { %10613 = vmatpush1.bf16.msra.mxu0 %v15527_v36  ;;  %11638 = vmatpush1.bf16.msra.mxu1 %v15530_v37  ;;  %v15619_v36 = vld [vmem:[%s17468_s9 + $0x1164] ss:$16 sps:$4 sm:$0xff]   ;;  %v15622_v37 = vld [vmem:[%s17468_s9 + $0x116c] ss:$16 sps:$4 sm:$0xff]  }
 0x246   : > { %10614 = vmatprep.subr.bf16.mxu0 %v15535_v39  ;;  %11639 = vmatprep.subr.bf16.mxu1 %v15538_v40  ;;  %v15617_v39 = vld [vmem:[%s17468_s9 + $0x1160] ss:$16 sps:$4 sm:$0xff]   ;;  %v15620_v40 = vld [vmem:[%s17468_s9 + $0x1168] ss:$16 sps:$4 sm:$0xff]  }
 0x249   : > { %10615 = vmatpush1.bf16.msra.mxu0 %v15533_v21  ;;  %11640 = vmatpush1.bf16.msra.mxu1 %v15536_v41  ;;  %v15625_v21 = vld [vmem:[%s17468_s9 + $0x1184] ss:$16 sps:$4 sm:$0xff]   ;;  %v15628_v41 = vld [vmem:[%s17468_s9 + $0x118c] ss:$16 sps:$4 sm:$0xff]  }
 0x24a   : > { %10616 = vmatprep.subr.bf16.mxu0 %v15541_v42  ;;  %11641 = vmatprep.subr.bf16.mxu1 %v15544_v44  ;;  %v15623_v42 = vld [vmem:[%s17468_s9 + $0x1180] ss:$16 sps:$4 sm:$0xff]   ;;  %v15626_v44 = vld [vmem:[%s17468_s9 + $0x1188] ss:$16 sps:$4 sm:$0xff]  }
 0x24d   : > { %10617 = vmatpush1.bf16.msra.mxu0 %v15539_v45  ;;  %11642 = vmatpush1.bf16.msra.mxu1 %v15542_v46  ;;  %v15631_v45 = vld [vmem:[%s17468_s9 + $0x11a4] ss:$16 sps:$4 sm:$0xff]   ;;  %v15634_v46 = vld [vmem:[%s17468_s9 + $0x11ac] ss:$16 sps:$4 sm:$0xff]  }
 0x24e   : > { %10618 = vmatprep.subr.bf16.mxu0 %v15547_v47  ;;  %11643 = vmatprep.subr.bf16.mxu1 %v15550_v50  ;;  %v15629_v47 = vld [vmem:[%s17468_s9 + $0x11a0] ss:$16 sps:$4 sm:$0xff]   ;;  %v15632_v50 = vld [vmem:[%s17468_s9 + $0x11a8] ss:$16 sps:$4 sm:$0xff]  }
 0x251   : > { %10619 = vmatpush1.bf16.msra.mxu0 %v15545_v51  ;;  %11644 = vmatpush1.bf16.msra.mxu1 %v15548_v53  ;;  %v15637_v51 = vld [vmem:[%s17468_s9 + $0x11c4] ss:$16 sps:$4 sm:$0xff]   ;;  %v15640_v53 = vld [vmem:[%s17468_s9 + $0x11cc] ss:$16 sps:$4 sm:$0xff]  }
 0x252   : > { %10629 = vmatprep.subr.bf16.mxu0 %v15553_v54  ;;  %11654 = vmatprep.subr.bf16.mxu1 %v15556_v55  ;;  %v15635_v54 = vld [vmem:[%s17468_s9 + $0x11c0] ss:$16 sps:$4 sm:$0xff]   ;;  %v15638_v55 = vld [vmem:[%s17468_s9 + $0x11c8] ss:$16 sps:$4 sm:$0xff]  }
 0x254   : > { %10621 = vmatmul.mubr.bf16.vlgmr.msra.gmra.mrb[0].mxu0 %v2030_v56  ;;  %11646 = vmatmul.mubr.bf16.vlgmr.msra.gmra.mrb[0].mxu1 %v2030_v56  ;;  %v15646_v56 = vld [vmem:[%s17468_s9 + $0x11ec] ss:$16 sps:$4 sm:$0xff]  }
 0x255   : > { %10630 = vmatpush1.bf16.msra.mxu0 %v15551_v57  ;;  %11655 = vmatpush1.bf16.msra.mxu1 %v15554_v58  ;;  %v15641_v57 = vld [vmem:[%s17468_s9 + $0x11e0] ss:$16 sps:$4 sm:$0xff]   ;;  %v15644_v58 = vld [vmem:[%s17468_s9 + $0x11e8] ss:$16 sps:$4 sm:$0xff]  }
 0x256   : > { %10631 = vmatprep.subr.bf16.mxu0 %v15559_v48  ;;  %11656 = vmatprep.subr.bf16.mxu1 %v15562_v59  ;;  %v15649_v48 = vld [vmem:[%s17468_s9 + $0x1204] ss:$16 sps:$4 sm:$0xff]   ;;  %v15652_v59 = vld [vmem:[%s17468_s9 + $0x120c] ss:$16 sps:$4 sm:$0xff]  }
 0x257   : > { %10661 = vmatprep.mubr.bf16.mxu0 %v18093_v60  ;;  %11686 = vmatprep.mubr.bf16.mxu1 %v18093_v60 }
 0x259   : > { %10632 = vmatpush1.bf16.msra.mxu0 %v15557_v13  ;;  %11657 = vmatpush1.bf16.msra.mxu1 %v15560_v61  ;;  %v18159_v13 = vrot.slane %v18074_v35, %v17527_v49  ;;  %v15647_v61 = vld [vmem:[%s17468_s9 + $0x1200] ss:$16 sps:$4 sm:$0xff]  }
 0x25a   : > { %10633 = vmatprep.subr.bf16.mxu0 %v15565_v62  ;;  %11658 = vmatprep.subr.bf16.mxu1 %v15568_v63  ;;  %v15650_v62 = vld [vmem:[%s17468_s9 + $0x1208] ss:$16 sps:$4 sm:$0xff]   ;;  %v15655_v63 = vld [vmem:[%s17468_s9 + $0x1224] ss:$16 sps:$4 sm:$0xff]   ;;  %v15653_v35 = vld [vmem:[%s17468_s9 + $0x1220] ss:$16 sps:$4 sm:$0xff]  }
 0x25d   : > { %10634 = vmatpush1.bf16.msra.mxu0 %v15563_v0  ;;  %11659 = vmatpush1.bf16.msra.mxu1 %v15566_v1  ;;  %v15658_v0 = vld [vmem:[%s17468_s9 + $0x122c] ss:$16 sps:$4 sm:$0xff]   ;;  %v2080_v1 = vcombine.high %v18093_v60, %v18093_v60  ;;  %v15659_v60 = vld [vmem:[%s17468_s9 + $0x1240] ss:$16 sps:$4 sm:$0xff]  }
 0x25e   : > { %10635 = vmatprep.subr.bf16.mxu0 %v15571_v2  ;;  %11660 = vmatprep.subr.bf16.mxu1 %v15574_v3  ;;  %v15656_v2 = vld [vmem:[%s17468_s9 + $0x1228] ss:$16 sps:$4 sm:$0xff]   ;;  %v15661_v3 = vld [vmem:[%s17468_s9 + $0x1244] ss:$16 sps:$4 sm:$0xff]  }
 0x261   : > { %10636 = vmatpush1.bf16.msra.mxu0 %v15569_v4  ;;  %11661 = vmatpush1.bf16.msra.mxu1 %v15572_v5  ;;  %v15664_v4 = vld [vmem:[%s17468_s9 + $0x124c] ss:$16 sps:$4 sm:$0xff]   ;;  %v15662_v5 = vld [vmem:[%s17468_s9 + $0x1248] ss:$16 sps:$4 sm:$0xff]  }
 0x262   : > { %10637 = vmatprep.subr.bf16.mxu0 %v15577_v6  ;;  %11662 = vmatprep.subr.bf16.mxu1 %v15580_v7  ;;  %v15667_v6 = vld [vmem:[%s17468_s9 + $0x1264] ss:$16 sps:$4 sm:$0xff]   ;;  %v15670_v7 = vld [vmem:[%s17468_s9 + $0x126c] ss:$16 sps:$4 sm:$0xff]  }
 0x265   : > { %10638 = vmatpush1.bf16.msra.mxu0 %v15575_v8  ;;  %11663 = vmatpush1.bf16.msra.mxu1 %v15578_v9  ;;  %v15665_v8 = vld [vmem:[%s17468_s9 + $0x1260] ss:$16 sps:$4 sm:$0xff]   ;;  %v15668_v9 = vld [vmem:[%s17468_s9 + $0x1268] ss:$16 sps:$4 sm:$0xff]  }
 0x266   : > { %10639 = vmatprep.subr.bf16.mxu0 %v15583_v10  ;;  %11664 = vmatprep.subr.bf16.mxu1 %v15586_v11  ;;  %v15673_v10 = vld [vmem:[%s17468_s9 + $0x1284] ss:$16 sps:$4 sm:$0xff]   ;;  %v15676_v11 = vld [vmem:[%s17468_s9 + $0x128c] ss:$16 sps:$4 sm:$0xff]  }
 0x269   : > { %10640 = vmatpush1.bf16.msra.mxu0 %v15581_v12  ;;  %11665 = vmatpush1.bf16.msra.mxu1 %v15584_v14  ;;  %v15671_v12 = vld [vmem:[%s17468_s9 + $0x1280] ss:$16 sps:$4 sm:$0xff]   ;;  %v15674_v14 = vld [vmem:[%s17468_s9 + $0x1288] ss:$16 sps:$4 sm:$0xff]  }
 0x26a   : > { %10641 = vmatprep.subr.bf16.mxu0 %v15589_v16  ;;  %11666 = vmatprep.subr.bf16.mxu1 %v15592_v52  ;;  %v15679_v16 = vld [vmem:[%s17468_s9 + $0x12a4] ss:$16 sps:$4 sm:$0xff]   ;;  %v15682_v52 = vld [vmem:[%s17468_s9 + $0x12ac] ss:$16 sps:$4 sm:$0xff]  }
 0x26d   : > { %10642 = vmatpush1.bf16.msra.mxu0 %v15587_v17  ;;  %11667 = vmatpush1.bf16.msra.mxu1 %v15590_v18  ;;  %v15677_v17 = vld [vmem:[%s17468_s9 + $0x12a0] ss:$16 sps:$4 sm:$0xff]   ;;  %v15680_v18 = vld [vmem:[%s17468_s9 + $0x12a8] ss:$16 sps:$4 sm:$0xff]  }
 0x26e   : > { %10643 = vmatprep.subr.bf16.mxu0 %v15595_v19  ;;  %11668 = vmatprep.subr.bf16.mxu1 %v15598_v20  ;;  %v15685_v19 = vld [vmem:[%s17468_s9 + $0x12c4] ss:$16 sps:$4 sm:$0xff]   ;;  %v15688_v20 = vld [vmem:[%s17468_s9 + $0x12cc] ss:$16 sps:$4 sm:$0xff]  }
 0x271   : > { %10644 = vmatpush1.bf16.msra.mxu0 %v15593_v22  ;;  %11669 = vmatpush1.bf16.msra.mxu1 %v15596_v23  ;;  %v15683_v22 = vld [vmem:[%s17468_s9 + $0x12c0] ss:$16 sps:$4 sm:$0xff]   ;;  %v15686_v23 = vld [vmem:[%s17468_s9 + $0x12c8] ss:$16 sps:$4 sm:$0xff]  }
 0x272   : > { %10645 = vmatprep.subr.bf16.mxu0 %v15601_v24  ;;  %11670 = vmatprep.subr.bf16.mxu1 %v15604_v26  ;;  %v15691_v24 = vld [vmem:[%s17468_s9 + $0x12e4] ss:$16 sps:$4 sm:$0xff]   ;;  %v15694_v26 = vld [vmem:[%s17468_s9 + $0x12ec] ss:$16 sps:$4 sm:$0xff]  }
 0x275   : > { %10646 = vmatpush1.bf16.msra.mxu0 %v15599_v27  ;;  %11671 = vmatpush1.bf16.msra.mxu1 %v15602_v28  ;;  %v15689_v27 = vld [vmem:[%s17468_s9 + $0x12e0] ss:$16 sps:$4 sm:$0xff]   ;;  %v15692_v28 = vld [vmem:[%s17468_s9 + $0x12e8] ss:$16 sps:$4 sm:$0xff]  }
 0x276   : > { %10647 = vmatprep.subr.bf16.mxu0 %v15607_v29  ;;  %11672 = vmatprep.subr.bf16.mxu1 %v15610_v30  ;;  %v15697_v29 = vld [vmem:[%s17468_s9 + $0x1304] ss:$16 sps:$4 sm:$0xff]   ;;  %v15700_v30 = vld [vmem:[%s17468_s9 + $0x130c] ss:$16 sps:$4 sm:$0xff]  }
 0x279   : > { %10648 = vmatpush1.bf16.msra.mxu0 %v15605_v15  ;;  %11673 = vmatpush1.bf16.msra.mxu1 %v15608_v31  ;;  %v15695_v15 = vld [vmem:[%s17468_s9 + $0x1300] ss:$16 sps:$4 sm:$0xff]   ;;  %v15698_v31 = vld [vmem:[%s17468_s9 + $0x1308] ss:$16 sps:$4 sm:$0xff]  }
 0x27a   : > { %10649 = vmatprep.subr.bf16.mxu0 %v15613_v32  ;;  %11674 = vmatprep.subr.bf16.mxu1 %v15616_v33  ;;  %v15703_v32 = vld [vmem:[%s17468_s9 + $0x1324] ss:$16 sps:$4 sm:$0xff]   ;;  %v15706_v33 = vld [vmem:[%s17468_s9 + $0x132c] ss:$16 sps:$4 sm:$0xff]  }
 0x27d   : > { %10650 = vmatpush1.bf16.msra.mxu0 %v15611_v25  ;;  %11675 = vmatpush1.bf16.msra.mxu1 %v15614_v34  ;;  %v15701_v25 = vld [vmem:[%s17468_s9 + $0x1320] ss:$16 sps:$4 sm:$0xff]   ;;  %v15704_v34 = vld [vmem:[%s17468_s9 + $0x1328] ss:$16 sps:$4 sm:$0xff]  }
 0x27e   : > { %10651 = vmatprep.subr.bf16.mxu0 %v15619_v36  ;;  %11676 = vmatprep.subr.bf16.mxu1 %v15622_v37  ;;  %v15709_v36 = vld [vmem:[%s17468_s9 + $0x1344] ss:$16 sps:$4 sm:$0xff]   ;;  %v15712_v37 = vld [vmem:[%s17468_s9 + $0x134c] ss:$16 sps:$4 sm:$0xff]  }
 0x281   : > { %10652 = vmatpush1.bf16.msra.mxu0 %v15617_v39  ;;  %11677 = vmatpush1.bf16.msra.mxu1 %v15620_v40  ;;  %v15707_v39 = vld [vmem:[%s17468_s9 + $0x1340] ss:$16 sps:$4 sm:$0xff]   ;;  %v15710_v40 = vld [vmem:[%s17468_s9 + $0x1348] ss:$16 sps:$4 sm:$0xff]  }
 0x282   : > { %10653 = vmatprep.subr.bf16.mxu0 %v15625_v21  ;;  %11678 = vmatprep.subr.bf16.mxu1 %v15628_v41  ;;  %v15715_v21 = vld [vmem:[%s17468_s9 + $0x1364] ss:$16 sps:$4 sm:$0xff]   ;;  %v15718_v41 = vld [vmem:[%s17468_s9 + $0x136c] ss:$16 sps:$4 sm:$0xff]  }
 0x285   : > { %10654 = vmatpush1.bf16.msra.mxu0 %v15623_v42  ;;  %11679 = vmatpush1.bf16.msra.mxu1 %v15626_v44  ;;  %v15713_v42 = vld [vmem:[%s17468_s9 + $0x1360] ss:$16 sps:$4 sm:$0xff]   ;;  %v15716_v44 = vld [vmem:[%s17468_s9 + $0x1368] ss:$16 sps:$4 sm:$0xff]  }
 0x286   : > { %10655 = vmatprep.subr.bf16.mxu0 %v15631_v45  ;;  %11680 = vmatprep.subr.bf16.mxu1 %v15634_v46  ;;  %v15721_v45 = vld [vmem:[%s17468_s9 + $0x1384] ss:$16 sps:$4 sm:$0xff]   ;;  %v15724_v46 = vld [vmem:[%s17468_s9 + $0x138c] ss:$16 sps:$4 sm:$0xff]  }
 0x289   : > { %10656 = vmatpush1.bf16.msra.mxu0 %v15629_v47  ;;  %11681 = vmatpush1.bf16.msra.mxu1 %v15632_v50  ;;  %v15719_v47 = vld [vmem:[%s17468_s9 + $0x1380] ss:$16 sps:$4 sm:$0xff]   ;;  %v15722_v50 = vld [vmem:[%s17468_s9 + $0x1388] ss:$16 sps:$4 sm:$0xff]  }
 0x28a   : > { %10657 = vmatprep.subr.bf16.mxu0 %v15637_v51  ;;  %11682 = vmatprep.subr.bf16.mxu1 %v15640_v53  ;;  %v15727_v51 = vld [vmem:[%s17468_s9 + $0x13a4] ss:$16 sps:$4 sm:$0xff]   ;;  %v15730_v53 = vld [vmem:[%s17468_s9 + $0x13ac] ss:$16 sps:$4 sm:$0xff]  }
 0x28d   : > { %10658 = vmatpush1.bf16.msra.mxu0 %v15635_v54  ;;  %11683 = vmatpush1.bf16.msra.mxu1 %v15638_v55  ;;  %v15725_v54 = vld [vmem:[%s17468_s9 + $0x13a0] ss:$16 sps:$4 sm:$0xff]   ;;  %v15728_v55 = vld [vmem:[%s17468_s9 + $0x13a8] ss:$16 sps:$4 sm:$0xff]  }
 0x28e   : > { %10659 = vmatprep.subr.bf16.mxu0 %v15643_v38  ;;  %11684 = vmatprep.subr.bf16.mxu1 %v15646_v56  ;;  %v15733_v38 = vld [vmem:[%s17468_s9 + $0x13c4] ss:$16 sps:$4 sm:$0xff]   ;;  %v15736_v56 = vld [vmem:[%s17468_s9 + $0x13cc] ss:$16 sps:$4 sm:$0xff]  }
 0x291   : > { %10660 = vmatpush1.bf16.msra.mxu0 %v15641_v57  ;;  %11685 = vmatpush1.bf16.msra.mxu1 %v15644_v58  ;;  %v17188_v57 = vld [vmem:[%s19465_s0 + $0x10] sm:$0xff] }
 0x292   : > { %10670 = vmatprep.subr.bf16.mxu0 %v15649_v48  ;;  %11695 = vmatprep.subr.bf16.mxu1 %v15652_v59  ;;  %v2033_v58 = vcombine.high %v17188_v57, %v17188_v57  ;;  %v15731_v48 = vld [vmem:[%s17468_s9 + $0x13c0] ss:$16 sps:$4 sm:$0xff]   ;;  %v15734_v59 = vld [vmem:[%s17468_s9 + $0x13c8] ss:$16 sps:$4 sm:$0xff]  }
 0x293   : > { %v15815_v57 = vld [vmem:[%s17468_s9 + $0x1580] ss:$16 sps:$4 sm:$0xff]  }
 0x294   : > { %10662 = vmatmul.mubr.bf16.vlgmr.msra.gmra.mrb[0].mxu0 %v18159_v13  ;;  %11687 = vmatmul.mubr.bf16.vlgmr.msra.gmra.mrb[0].mxu1 %v18159_v13 }
 0x295   : > { %10671 = vmatpush1.bf16.msra.mxu0 %v15647_v61  ;;  %11696 = vmatpush1.bf16.msra.mxu1 %v15650_v62  ;;  %v15739_v61 = vld [vmem:[%s17468_s9 + $0x13e4] ss:$16 sps:$4 sm:$0xff]   ;;  %v15742_v62 = vld [vmem:[%s17468_s9 + $0x13ec] ss:$16 sps:$4 sm:$0xff]  }
 0x296   : > { %10672 = vmatprep.subr.bf16.mxu0 %v15655_v63  ;;  %11697 = vmatprep.subr.bf16.mxu1 %v15658_v0  ;;  %v18229_v63 = vrot.slane %v2033_v58, %v17527_v49  ;;  %v15737_v0 = vld [vmem:[%s17468_s9 + $0x13e0] ss:$16 sps:$4 sm:$0xff]   ;;  %v15818_v58 = vld [vmem:[%s17468_s9 + $0x1588] ss:$16 sps:$4 sm:$0xff]  }
 0x297   : > { %10702 = vmatprep.mubr.bf16.mxu0 %v2080_v1  ;;  %11727 = vmatprep.mubr.bf16.mxu1 %v2080_v1  ;;  %v15740_v1 = vld [vmem:[%s17468_s9 + $0x13e8] ss:$16 sps:$4 sm:$0xff]  }
 0x299   : > { %10673 = vmatpush1.bf16.msra.mxu0 %v15653_v35  ;;  %11698 = vmatpush1.bf16.msra.mxu1 %v15656_v2  ;;  %v15745_v35 = vld [vmem:[%s17468_s9 + $0x1404] ss:$16 sps:$4 sm:$0xff]   ;;  %v15748_v2 = vld [vmem:[%s17468_s9 + $0x140c] ss:$16 sps:$4 sm:$0xff]  }
 0x29a   : > { %10674 = vmatprep.subr.bf16.mxu0 %v15661_v3  ;;  %11699 = vmatprep.subr.bf16.mxu1 %v15664_v4  ;;  %v2049_v3 = vcombine.high %v18229_v63, %v18229_v63  ;;  %v2078_v4 = vcombine.high %v18159_v13, %v18159_v13  ;;  %v15749_v13 = vld [vmem:[%s17468_s9 + $0x1420] ss:$16 sps:$4 sm:$0xff]  }
 0x29d   : > { %10675 = vmatpush1.bf16.msra.mxu0 %v15659_v60  ;;  %11700 = vmatpush1.bf16.msra.mxu1 %v15662_v5  ;;  %v15743_v60 = vld [vmem:[%s17468_s9 + $0x1400] ss:$16 sps:$4 sm:$0xff]   ;;  %v15746_v5 = vld [vmem:[%s17468_s9 + $0x1408] ss:$16 sps:$4 sm:$0xff]  }
 0x29e   : > { %10676 = vmatprep.subr.bf16.mxu0 %v15667_v6  ;;  %11701 = vmatprep.subr.bf16.mxu1 %v15670_v7  ;;  %v15751_v6 = vld [vmem:[%s17468_s9 + $0x1424] ss:$16 sps:$4 sm:$0xff]   ;;  %v15754_v7 = vld [vmem:[%s17468_s9 + $0x142c] ss:$16 sps:$4 sm:$0xff]  }
 0x2a1   : > { %10677 = vmatpush1.bf16.msra.mxu0 %v15665_v8  ;;  %11702 = vmatpush1.bf16.msra.mxu1 %v15668_v9  ;;  %v18244_v8 = vrot.slane %v2049_v3, %v17527_v49  ;;  %v15752_v9 = vld [vmem:[%s17468_s9 + $0x1428] ss:$16 sps:$4 sm:$0xff]   ;;  %v15835_v3 = vld [vmem:[%s17468_s9 + $0x15e4] ss:$16 sps:$4 sm:$0xff]  }
 0x2a2   : > { %10678 = vmatprep.subr.bf16.mxu0 %v15673_v10  ;;  %11703 = vmatprep.subr.bf16.mxu1 %v15676_v11  ;;  %v15757_v10 = vld [vmem:[%s17468_s9 + $0x1444] ss:$16 sps:$4 sm:$0xff]   ;;  %v15760_v11 = vld [vmem:[%s17468_s9 + $0x144c] ss:$16 sps:$4 sm:$0xff]  }
 0x2a5   : > { %10679 = vmatpush1.bf16.msra.mxu0 %v15671_v12  ;;  %11704 = vmatpush1.bf16.msra.mxu1 %v15674_v14  ;;  %v15755_v12 = vld [vmem:[%s17468_s9 + $0x1440] ss:$16 sps:$4 sm:$0xff]   ;;  %v15758_v14 = vld [vmem:[%s17468_s9 + $0x1448] ss:$16 sps:$4 sm:$0xff]  }
 0x2a6   : > { %10680 = vmatprep.subr.bf16.mxu0 %v15679_v16  ;;  %11705 = vmatprep.subr.bf16.mxu1 %v15682_v52  ;;  %v15763_v16 = vld [vmem:[%s17468_s9 + $0x1464] ss:$16 sps:$4 sm:$0xff]   ;;  %v15766_v52 = vld [vmem:[%s17468_s9 + $0x146c] ss:$16 sps:$4 sm:$0xff]  }
 0x2a9   : > { %10681 = vmatpush1.bf16.msra.mxu0 %v15677_v17  ;;  %11706 = vmatpush1.bf16.msra.mxu1 %v15680_v18  ;;  %v15761_v17 = vld [vmem:[%s17468_s9 + $0x1460] ss:$16 sps:$4 sm:$0xff]   ;;  %v15764_v18 = vld [vmem:[%s17468_s9 + $0x1468] ss:$16 sps:$4 sm:$0xff]  }
 0x2aa   : > { %10682 = vmatprep.subr.bf16.mxu0 %v15685_v19  ;;  %11707 = vmatprep.subr.bf16.mxu1 %v15688_v20  ;;  %v15769_v19 = vld [vmem:[%s17468_s9 + $0x1484] ss:$16 sps:$4 sm:$0xff]   ;;  %v15772_v20 = vld [vmem:[%s17468_s9 + $0x148c] ss:$16 sps:$4 sm:$0xff]  }
 0x2ad   : > { %10683 = vmatpush1.bf16.msra.mxu0 %v15683_v22  ;;  %11708 = vmatpush1.bf16.msra.mxu1 %v15686_v23  ;;  %v15767_v22 = vld [vmem:[%s17468_s9 + $0x1480] ss:$16 sps:$4 sm:$0xff]   ;;  %v15770_v23 = vld [vmem:[%s17468_s9 + $0x1488] ss:$16 sps:$4 sm:$0xff]  }
 0x2ae   : > { %10684 = vmatprep.subr.bf16.mxu0 %v15691_v24  ;;  %11709 = vmatprep.subr.bf16.mxu1 %v15694_v26  ;;  %v15775_v24 = vld [vmem:[%s17468_s9 + $0x14a4] ss:$16 sps:$4 sm:$0xff]   ;;  %v15778_v26 = vld [vmem:[%s17468_s9 + $0x14ac] ss:$16 sps:$4 sm:$0xff]  }
 0x2b1   : > { %10685 = vmatpush1.bf16.msra.mxu0 %v15689_v27  ;;  %11710 = vmatpush1.bf16.msra.mxu1 %v15692_v28  ;;  %v15773_v27 = vld [vmem:[%s17468_s9 + $0x14a0] ss:$16 sps:$4 sm:$0xff]   ;;  %v15776_v28 = vld [vmem:[%s17468_s9 + $0x14a8] ss:$16 sps:$4 sm:$0xff]  }
 0x2b2   : > { %10686 = vmatprep.subr.bf16.mxu0 %v15697_v29  ;;  %11711 = vmatprep.subr.bf16.mxu1 %v15700_v30  ;;  %v15781_v29 = vld [vmem:[%s17468_s9 + $0x14c4] ss:$16 sps:$4 sm:$0xff]   ;;  %v15784_v30 = vld [vmem:[%s17468_s9 + $0x14cc] ss:$16 sps:$4 sm:$0xff]  }
 0x2b5   : > { %10687 = vmatpush1.bf16.msra.mxu0 %v15695_v15  ;;  %11712 = vmatpush1.bf16.msra.mxu1 %v15698_v31  ;;  %v15779_v15 = vld [vmem:[%s17468_s9 + $0x14c0] ss:$16 sps:$4 sm:$0xff]   ;;  %v15782_v31 = vld [vmem:[%s17468_s9 + $0x14c8] ss:$16 sps:$4 sm:$0xff]  }
 0x2b6   : > { %10688 = vmatprep.subr.bf16.mxu0 %v15703_v32  ;;  %11713 = vmatprep.subr.bf16.mxu1 %v15706_v33  ;;  %v15787_v32 = vld [vmem:[%s17468_s9 + $0x14e4] ss:$16 sps:$4 sm:$0xff]   ;;  %v15790_v33 = vld [vmem:[%s17468_s9 + $0x14ec] ss:$16 sps:$4 sm:$0xff]  }
 0x2b9   : > { %10689 = vmatpush1.bf16.msra.mxu0 %v15701_v25  ;;  %11714 = vmatpush1.bf16.msra.mxu1 %v15704_v34  ;;  %v15785_v25 = vld [vmem:[%s17468_s9 + $0x14e0] ss:$16 sps:$4 sm:$0xff]   ;;  %v15788_v34 = vld [vmem:[%s17468_s9 + $0x14e8] ss:$16 sps:$4 sm:$0xff]  }
 0x2ba   : > { %10690 = vmatprep.subr.bf16.mxu0 %v15709_v36  ;;  %11715 = vmatprep.subr.bf16.mxu1 %v15712_v37  ;;  %v15793_v36 = vld [vmem:[%s17468_s9 + $0x1504] ss:$16 sps:$4 sm:$0xff]   ;;  %v15796_v37 = vld [vmem:[%s17468_s9 + $0x150c] ss:$16 sps:$4 sm:$0xff]  }
 0x2bd   : > { %10691 = vmatpush1.bf16.msra.mxu0 %v15707_v39  ;;  %11716 = vmatpush1.bf16.msra.mxu1 %v15710_v40  ;;  %v15791_v39 = vld [vmem:[%s17468_s9 + $0x1500] ss:$16 sps:$4 sm:$0xff]   ;;  %v15794_v40 = vld [vmem:[%s17468_s9 + $0x1508] ss:$16 sps:$4 sm:$0xff]  }
 0x2be   : > { %10692 = vmatprep.subr.bf16.mxu0 %v15715_v21  ;;  %11717 = vmatprep.subr.bf16.mxu1 %v15718_v41  ;;  %v15799_v21 = vld [vmem:[%s17468_s9 + $0x1524] ss:$16 sps:$4 sm:$0xff]   ;;  %v15802_v41 = vld [vmem:[%s17468_s9 + $0x152c] ss:$16 sps:$4 sm:$0xff]  }
 0x2c1   : > { %10693 = vmatpush1.bf16.msra.mxu0 %v15713_v42  ;;  %11718 = vmatpush1.bf16.msra.mxu1 %v15716_v44  ;;  %v15797_v42 = vld [vmem:[%s17468_s9 + $0x1520] ss:$16 sps:$4 sm:$0xff]   ;;  %v15800_v44 = vld [vmem:[%s17468_s9 + $0x1528] ss:$16 sps:$4 sm:$0xff]  }
 0x2c2   : > { %10694 = vmatprep.subr.bf16.mxu0 %v15721_v45  ;;  %11719 = vmatprep.subr.bf16.mxu1 %v15724_v46  ;;  %v15805_v45 = vld [vmem:[%s17468_s9 + $0x1544] ss:$16 sps:$4 sm:$0xff]   ;;  %v15808_v46 = vld [vmem:[%s17468_s9 + $0x154c] ss:$16 sps:$4 sm:$0xff]  }
 0x2c5   : > { %10695 = vmatpush1.bf16.msra.mxu0 %v15719_v47  ;;  %11720 = vmatpush1.bf16.msra.mxu1 %v15722_v50  ;;  %v15803_v47 = vld [vmem:[%s17468_s9 + $0x1540] ss:$16 sps:$4 sm:$0xff]   ;;  %v15806_v50 = vld [vmem:[%s17468_s9 + $0x1548] ss:$16 sps:$4 sm:$0xff]  }
 0x2c6   : > { %10696 = vmatprep.subr.bf16.mxu0 %v15727_v51  ;;  %11721 = vmatprep.subr.bf16.mxu1 %v15730_v53  ;;  %v15811_v51 = vld [vmem:[%s17468_s9 + $0x1564] ss:$16 sps:$4 sm:$0xff]   ;;  %v15814_v53 = vld [vmem:[%s17468_s9 + $0x156c] ss:$16 sps:$4 sm:$0xff]  }
 0x2c9   : > { %10697 = vmatpush1.bf16.msra.mxu0 %v15725_v54  ;;  %11722 = vmatpush1.bf16.msra.mxu1 %v15728_v55  ;;  %v15809_v54 = vld [vmem:[%s17468_s9 + $0x1560] ss:$16 sps:$4 sm:$0xff]   ;;  %v15812_v55 = vld [vmem:[%s17468_s9 + $0x1568] ss:$16 sps:$4 sm:$0xff]  }
 0x2ca   : > { %10698 = vmatprep.subr.bf16.mxu0 %v15733_v38  ;;  %11723 = vmatprep.subr.bf16.mxu1 %v15736_v56  ;;  %v15817_v38 = vld [vmem:[%s17468_s9 + $0x1584] ss:$16 sps:$4 sm:$0xff]   ;;  %v15820_v56 = vld [vmem:[%s17468_s9 + $0x158c] ss:$16 sps:$4 sm:$0xff]  }
 0x2cd   : > { %10699 = vmatpush1.bf16.msra.mxu0 %v15731_v48  ;;  %11724 = vmatpush1.bf16.msra.mxu1 %v15734_v59  ;;  %v15823_v48 = vld [vmem:[%s17468_s9 + $0x15a4] ss:$16 sps:$4 sm:$0xff]   ;;  %v15826_v59 = vld [vmem:[%s17468_s9 + $0x15ac] ss:$16 sps:$4 sm:$0xff]  }
 0x2ce   : > { %10700 = vmatprep.subr.bf16.mxu0 %v15739_v61  ;;  %11725 = vmatprep.subr.bf16.mxu1 %v15742_v62  ;;  %v15821_v61 = vld [vmem:[%s17468_s9 + $0x15a0] ss:$16 sps:$4 sm:$0xff]   ;;  %v15824_v62 = vld [vmem:[%s17468_s9 + $0x15a8] ss:$16 sps:$4 sm:$0xff]  }
 0x2d1   : > { %10701 = vmatpush1.bf16.msra.mxu0 %v15737_v0  ;;  %11726 = vmatpush1.bf16.msra.mxu1 %v15740_v1  ;;  %v15829_v0 = vld [vmem:[%s17468_s9 + $0x15c4] ss:$16 sps:$4 sm:$0xff]   ;;  %v15832_v1 = vld [vmem:[%s17468_s9 + $0x15cc] ss:$16 sps:$4 sm:$0xff]  }
 0x2d2   : > { %10711 = vmatprep.subr.bf16.mxu0 %v15745_v35  ;;  %11736 = vmatprep.subr.bf16.mxu1 %v15748_v2  ;;  %v15827_v35 = vld [vmem:[%s17468_s9 + $0x15c0] ss:$16 sps:$4 sm:$0xff]   ;;  %v15830_v2 = vld [vmem:[%s17468_s9 + $0x15c8] ss:$16 sps:$4 sm:$0xff]  }
 0x2d4   : > { %10703 = vmatmul.mubr.bf16.vlgmr.msra.gmra.mrb[0].mxu0 %v2078_v4  ;;  %11728 = vmatmul.mubr.bf16.vlgmr.msra.gmra.mrb[0].mxu1 %v2078_v4  ;;  %v15838_v4 = vld [vmem:[%s17468_s9 + $0x15ec] ss:$16 sps:$4 sm:$0xff]  }
 0x2d5   : > { %10712 = vmatpush1.bf16.msra.mxu0 %v15743_v60  ;;  %11737 = vmatpush1.bf16.msra.mxu1 %v15746_v5  ;;  %v15833_v60 = vld [vmem:[%s17468_s9 + $0x15e0] ss:$16 sps:$4 sm:$0xff]   ;;  %v15836_v5 = vld [vmem:[%s17468_s9 + $0x15e8] ss:$16 sps:$4 sm:$0xff]  }
 0x2d6   : > { %10713 = vmatprep.subr.bf16.mxu0 %v15751_v6  ;;  %11738 = vmatprep.subr.bf16.mxu1 %v15754_v7  ;;  %v15842_v6 = vld [vmem:[%s17468_s9 + $0x1604] ss:$16 sps:$4 sm:$0xff]   ;;  %v15845_v7 = vld [vmem:[%s17468_s9 + $0x160c] ss:$16 sps:$4 sm:$0xff]  }
 0x2d7   : > { %10743 = vmatprep.mubr.bf16.mxu0 %v18244_v8  ;;  %11768 = vmatprep.mubr.bf16.mxu1 %v18244_v8 }
 0x2d9   : > { %10714 = vmatpush1.bf16.msra.mxu0 %v15749_v13  ;;  %11739 = vmatpush1.bf16.msra.mxu1 %v15752_v9  ;;  %v18310_v13 = vrot.slane %v18229_v63, %v17527_v49  ;;  %v15840_v9 = vld [vmem:[%s17468_s9 + $0x1600] ss:$16 sps:$4 sm:$0xff]  }
 0x2da   : > { %10715 = vmatprep.subr.bf16.mxu0 %v15757_v10  ;;  %11740 = vmatprep.subr.bf16.mxu1 %v15760_v11  ;;  %v15843_v10 = vld [vmem:[%s17468_s9 + $0x1608] ss:$16 sps:$4 sm:$0xff]   ;;  %v15848_v11 = vld [vmem:[%s17468_s9 + $0x1624] ss:$16 sps:$4 sm:$0xff]   ;;  %v15846_v63 = vld [vmem:[%s17468_s9 + $0x1620] ss:$16 sps:$4 sm:$0xff]  }
 0x2dd   : > { %10716 = vmatpush1.bf16.msra.mxu0 %v15755_v12  ;;  %11741 = vmatpush1.bf16.msra.mxu1 %v15758_v14  ;;  %v15851_v12 = vld [vmem:[%s17468_s9 + $0x162c] ss:$16 sps:$4 sm:$0xff]   ;;  %v2081_v14 = vcombine.high %v18244_v8, %v18244_v8  ;;  %v15852_v8 = vld [vmem:[%s17468_s9 + $0x1640] ss:$16 sps:$4 sm:$0xff]  }
 0x2de   : > { %10717 = vmatprep.subr.bf16.mxu0 %v15763_v16  ;;  %11742 = vmatprep.subr.bf16.mxu1 %v15766_v52  ;;  %v15849_v16 = vld [vmem:[%s17468_s9 + $0x1628] ss:$16 sps:$4 sm:$0xff]   ;;  %v15854_v52 = vld [vmem:[%s17468_s9 + $0x1644] ss:$16 sps:$4 sm:$0xff]  }
 0x2e1   : > { %10718 = vmatpush1.bf16.msra.mxu0 %v15761_v17  ;;  %11743 = vmatpush1.bf16.msra.mxu1 %v15764_v18  ;;  %v15857_v17 = vld [vmem:[%s17468_s9 + $0x164c] ss:$16 sps:$4 sm:$0xff]   ;;  %v15855_v18 = vld [vmem:[%s17468_s9 + $0x1648] ss:$16 sps:$4 sm:$0xff]  }
 0x2e2   : > { %10719 = vmatprep.subr.bf16.mxu0 %v15769_v19  ;;  %11744 = vmatprep.subr.bf16.mxu1 %v15772_v20  ;;  %v15860_v19 = vld [vmem:[%s17468_s9 + $0x1664] ss:$16 sps:$4 sm:$0xff]   ;;  %v15863_v20 = vld [vmem:[%s17468_s9 + $0x166c] ss:$16 sps:$4 sm:$0xff]  }
 0x2e5   : > { %10720 = vmatpush1.bf16.msra.mxu0 %v15767_v22  ;;  %11745 = vmatpush1.bf16.msra.mxu1 %v15770_v23  ;;  %v15858_v22 = vld [vmem:[%s17468_s9 + $0x1660] ss:$16 sps:$4 sm:$0xff]   ;;  %v15861_v23 = vld [vmem:[%s17468_s9 + $0x1668] ss:$16 sps:$4 sm:$0xff]  }
 0x2e6   : > { %10721 = vmatprep.subr.bf16.mxu0 %v15775_v24  ;;  %11746 = vmatprep.subr.bf16.mxu1 %v15778_v26  ;;  %v15866_v24 = vld [vmem:[%s17468_s9 + $0x1684] ss:$16 sps:$4 sm:$0xff]   ;;  %v15869_v26 = vld [vmem:[%s17468_s9 + $0x168c] ss:$16 sps:$4 sm:$0xff]  }
 0x2e9   : > { %10722 = vmatpush1.bf16.msra.mxu0 %v15773_v27  ;;  %11747 = vmatpush1.bf16.msra.mxu1 %v15776_v28  ;;  %v15864_v27 = vld [vmem:[%s17468_s9 + $0x1680] ss:$16 sps:$4 sm:$0xff]   ;;  %v15867_v28 = vld [vmem:[%s17468_s9 + $0x1688] ss:$16 sps:$4 sm:$0xff]  }
 0x2ea   : > { %10723 = vmatprep.subr.bf16.mxu0 %v15781_v29  ;;  %11748 = vmatprep.subr.bf16.mxu1 %v15784_v30  ;;  %v15872_v29 = vld [vmem:[%s17468_s9 + $0x16a4] ss:$16 sps:$4 sm:$0xff]   ;;  %v15875_v30 = vld [vmem:[%s17468_s9 + $0x16ac] ss:$16 sps:$4 sm:$0xff]  }
 0x2ed   : > { %10724 = vmatpush1.bf16.msra.mxu0 %v15779_v15  ;;  %11749 = vmatpush1.bf16.msra.mxu1 %v15782_v31  ;;  %v15870_v15 = vld [vmem:[%s17468_s9 + $0x16a0] ss:$16 sps:$4 sm:$0xff]   ;;  %v15873_v31 = vld [vmem:[%s17468_s9 + $0x16a8] ss:$16 sps:$4 sm:$0xff]  }
 0x2ee   : > { %10725 = vmatprep.subr.bf16.mxu0 %v15787_v32  ;;  %11750 = vmatprep.subr.bf16.mxu1 %v15790_v33  ;;  %v15878_v32 = vld [vmem:[%s17468_s9 + $0x16c4] ss:$16 sps:$4 sm:$0xff]   ;;  %v15881_v33 = vld [vmem:[%s17468_s9 + $0x16cc] ss:$16 sps:$4 sm:$0xff]  }
 0x2f1   : > { %10726 = vmatpush1.bf16.msra.mxu0 %v15785_v25  ;;  %11751 = vmatpush1.bf16.msra.mxu1 %v15788_v34  ;;  %v15876_v25 = vld [vmem:[%s17468_s9 + $0x16c0] ss:$16 sps:$4 sm:$0xff]   ;;  %v15879_v34 = vld [vmem:[%s17468_s9 + $0x16c8] ss:$16 sps:$4 sm:$0xff]  }
 0x2f2   : > { %10727 = vmatprep.subr.bf16.mxu0 %v15793_v36  ;;  %11752 = vmatprep.subr.bf16.mxu1 %v15796_v37  ;;  %v15884_v36 = vld [vmem:[%s17468_s9 + $0x16e4] ss:$16 sps:$4 sm:$0xff]   ;;  %v15887_v37 = vld [vmem:[%s17468_s9 + $0x16ec] ss:$16 sps:$4 sm:$0xff]  }
 0x2f5   : > { %10728 = vmatpush1.bf16.msra.mxu0 %v15791_v39  ;;  %11753 = vmatpush1.bf16.msra.mxu1 %v15794_v40  ;;  %v15882_v39 = vld [vmem:[%s17468_s9 + $0x16e0] ss:$16 sps:$4 sm:$0xff]   ;;  %v15885_v40 = vld [vmem:[%s17468_s9 + $0x16e8] ss:$16 sps:$4 sm:$0xff]  }
 0x2f6   : > { %10729 = vmatprep.subr.bf16.mxu0 %v15799_v21  ;;  %11754 = vmatprep.subr.bf16.mxu1 %v15802_v41  ;;  %v15890_v21 = vld [vmem:[%s17468_s9 + $0x1704] ss:$16 sps:$4 sm:$0xff]   ;;  %v15893_v41 = vld [vmem:[%s17468_s9 + $0x170c] ss:$16 sps:$4 sm:$0xff]  }
 0x2f9   : > { %10730 = vmatpush1.bf16.msra.mxu0 %v15797_v42  ;;  %11755 = vmatpush1.bf16.msra.mxu1 %v15800_v44  ;;  %v15888_v42 = vld [vmem:[%s17468_s9 + $0x1700] ss:$16 sps:$4 sm:$0xff]   ;;  %v15891_v44 = vld [vmem:[%s17468_s9 + $0x1708] ss:$16 sps:$4 sm:$0xff]  }
 0x2fa   : > { %10731 = vmatprep.subr.bf16.mxu0 %v15805_v45  ;;  %11756 = vmatprep.subr.bf16.mxu1 %v15808_v46  ;;  %v15896_v45 = vld [vmem:[%s17468_s9 + $0x1724] ss:$16 sps:$4 sm:$0xff]   ;;  %v15899_v46 = vld [vmem:[%s17468_s9 + $0x172c] ss:$16 sps:$4 sm:$0xff]  }
 0x2fd   : > { %10732 = vmatpush1.bf16.msra.mxu0 %v15803_v47  ;;  %11757 = vmatpush1.bf16.msra.mxu1 %v15806_v50  ;;  %v15894_v47 = vld [vmem:[%s17468_s9 + $0x1720] ss:$16 sps:$4 sm:$0xff]   ;;  %v15897_v50 = vld [vmem:[%s17468_s9 + $0x1728] ss:$16 sps:$4 sm:$0xff]  }
 0x2fe   : > { %10733 = vmatprep.subr.bf16.mxu0 %v15811_v51  ;;  %11758 = vmatprep.subr.bf16.mxu1 %v15814_v53  ;;  %v15902_v51 = vld [vmem:[%s17468_s9 + $0x1744] ss:$16 sps:$4 sm:$0xff]   ;;  %v15905_v53 = vld [vmem:[%s17468_s9 + $0x174c] ss:$16 sps:$4 sm:$0xff]  }
 0x301   : > { %10734 = vmatpush1.bf16.msra.mxu0 %v15809_v54  ;;  %11759 = vmatpush1.bf16.msra.mxu1 %v15812_v55  ;;  %v15900_v54 = vld [vmem:[%s17468_s9 + $0x1740] ss:$16 sps:$4 sm:$0xff]   ;;  %v15903_v55 = vld [vmem:[%s17468_s9 + $0x1748] ss:$16 sps:$4 sm:$0xff]  }
 0x302   : > { %10735 = vmatprep.subr.bf16.mxu0 %v15817_v38  ;;  %11760 = vmatprep.subr.bf16.mxu1 %v15820_v56  ;;  %v15908_v38 = vld [vmem:[%s17468_s9 + $0x1764] ss:$16 sps:$4 sm:$0xff]   ;;  %v15911_v56 = vld [vmem:[%s17468_s9 + $0x176c] ss:$16 sps:$4 sm:$0xff]  }
 0x305   : > { %10736 = vmatpush1.bf16.msra.mxu0 %v15815_v57  ;;  %11761 = vmatpush1.bf16.msra.mxu1 %v15818_v58  ;;  %v15906_v57 = vld [vmem:[%s17468_s9 + $0x1760] ss:$16 sps:$4 sm:$0xff]   ;;  %v15909_v58 = vld [vmem:[%s17468_s9 + $0x1768] ss:$16 sps:$4 sm:$0xff]  }
 0x306   : > { %10737 = vmatprep.subr.bf16.mxu0 %v15823_v48  ;;  %11762 = vmatprep.subr.bf16.mxu1 %v15826_v59  ;;  %v15914_v48 = vld [vmem:[%s17468_s9 + $0x1784] ss:$16 sps:$4 sm:$0xff]   ;;  %v15917_v59 = vld [vmem:[%s17468_s9 + $0x178c] ss:$16 sps:$4 sm:$0xff]  }
 0x309   : > { %10738 = vmatpush1.bf16.msra.mxu0 %v15821_v61  ;;  %11763 = vmatpush1.bf16.msra.mxu1 %v15824_v62  ;;  %v15912_v61 = vld [vmem:[%s17468_s9 + $0x1780] ss:$16 sps:$4 sm:$0xff]   ;;  %v15915_v62 = vld [vmem:[%s17468_s9 + $0x1788] ss:$16 sps:$4 sm:$0xff]  }
 0x30a   : > { %10739 = vmatprep.subr.bf16.mxu0 %v15829_v0  ;;  %11764 = vmatprep.subr.bf16.mxu1 %v15832_v1  ;;  %v15920_v0 = vld [vmem:[%s17468_s9 + $0x17a4] ss:$16 sps:$4 sm:$0xff]   ;;  %v15923_v1 = vld [vmem:[%s17468_s9 + $0x17ac] ss:$16 sps:$4 sm:$0xff]  }
 0x30d   : > { %10740 = vmatpush1.bf16.msra.mxu0 %v15827_v35  ;;  %11765 = vmatpush1.bf16.msra.mxu1 %v15830_v2  ;;  %v15918_v35 = vld [vmem:[%s17468_s9 + $0x17a0] ss:$16 sps:$4 sm:$0xff]   ;;  %v15921_v2 = vld [vmem:[%s17468_s9 + $0x17a8] ss:$16 sps:$4 sm:$0xff]  }
 0x30e   : > { %10741 = vmatprep.subr.bf16.mxu0 %v15835_v3  ;;  %11766 = vmatprep.subr.bf16.mxu1 %v15838_v4  ;;  %v15926_v3 = vld [vmem:[%s17468_s9 + $0x17c4] ss:$16 sps:$4 sm:$0xff]   ;;  %v15929_v4 = vld [vmem:[%s17468_s9 + $0x17cc] ss:$16 sps:$4 sm:$0xff]  }
 0x311   : > { %10742 = vmatpush1.bf16.msra.mxu0 %v15833_v60  ;;  %11767 = vmatpush1.bf16.msra.mxu1 %v15836_v5  ;;  %v18375_v60 = vld [vmem:[%s19465_s0 + $0x18] sm:$0xff]  ;;  %v15924_v5 = vld [vmem:[%s17468_s9 + $0x17c0] ss:$16 sps:$4 sm:$0xff]  }
 0x312   : > { %10752 = vmatprep.subr.bf16.mxu0 %v15842_v6  ;;  %11777 = vmatprep.subr.bf16.mxu1 %v15845_v7  ;;  %v15927_v6 = vld [vmem:[%s17468_s9 + $0x17c8] ss:$16 sps:$4 sm:$0xff]   ;;  %v15932_v7 = vld [vmem:[%s17468_s9 + $0x17e4] ss:$16 sps:$4 sm:$0xff]  }
 0x314   : > { %10744 = vmatmul.mubr.bf16.vlgmr.msra.gmra.mrb[0].mxu0 %v18310_v13  ;;  %11769 = vmatmul.mubr.bf16.vlgmr.msra.gmra.mrb[0].mxu1 %v18310_v13 }
 0x315   : > { %10753 = vmatpush1.bf16.msra.mxu0 %v15840_v9  ;;  %11778 = vmatpush1.bf16.msra.mxu1 %v15843_v10  ;;  %v15935_v9 = vld [vmem:[%s17468_s9 + $0x17ec] ss:$16 sps:$4 sm:$0xff]   ;;  %v18383_v10 = vrot.slane %v18375_v60, %v17527_v49 }
 0x316   : > { %10754 = vmatprep.subr.bf16.mxu0 %v15848_v11  ;;  %11779 = vmatprep.subr.bf16.mxu1 %v15851_v12  ;;  %v15930_v11 = vld [vmem:[%s17468_s9 + $0x17e0] ss:$16 sps:$4 sm:$0xff]   ;;  %v15933_v12 = vld [vmem:[%s17468_s9 + $0x17e8] ss:$16 sps:$4 sm:$0xff]  }
 0x317   : > { %10784 = vmatprep.mubr.bf16.mxu0 %v2081_v14  ;;  %11809 = vmatprep.mubr.bf16.mxu1 %v2081_v14  ;;  %v15938_v14 = vld [vmem:[%s17468_s9 + $0x1804] ss:$16 sps:$4 sm:$0xff]  }
 0x319   : > { %10755 = vmatpush1.bf16.msra.mxu0 %v15846_v63  ;;  %11780 = vmatpush1.bf16.msra.mxu1 %v15849_v16  ;;  %v15941_v63 = vld [vmem:[%s17468_s9 + $0x180c] ss:$16 sps:$4 sm:$0xff]   ;;  %v2097_v16 = vcombine.high %v18383_v10, %v18383_v10 }
 0x31a   : > { %10756 = vmatprep.subr.bf16.mxu0 %v15854_v52  ;;  %11781 = vmatprep.subr.bf16.mxu1 %v15857_v17  ;;  %v2079_v52 = vcombine.high %v18310_v13, %v18310_v13  ;;  %v15936_v17 = vld [vmem:[%s17468_s9 + $0x1800] ss:$16 sps:$4 sm:$0xff]  }
 0x31b   : > { %v15942_v13 = vld [vmem:[%s17468_s9 + $0x1820] ss:$16 sps:$4 sm:$0xff]  }
 0x31d   : > { %10757 = vmatpush1.bf16.msra.mxu0 %v15852_v8  ;;  %11782 = vmatpush1.bf16.msra.mxu1 %v15855_v18  ;;  %v15939_v8 = vld [vmem:[%s17468_s9 + $0x1808] ss:$16 sps:$4 sm:$0xff]   ;;  %v15944_v18 = vld [vmem:[%s17468_s9 + $0x1824] ss:$16 sps:$4 sm:$0xff]  }
 0x31e   : > { %10758 = vmatprep.subr.bf16.mxu0 %v15860_v19  ;;  %11783 = vmatprep.subr.bf16.mxu1 %v15863_v20  ;;  %v15947_v19 = vld [vmem:[%s17468_s9 + $0x182c] ss:$16 sps:$4 sm:$0xff]   ;;  %v18398_v20 = vrot.slane %v2097_v16, %v17527_v49  ;;  %v16023_v16 = vld [vmem:[%s17468_s9 + $0x19c8] ss:$16 sps:$4 sm:$0xff]  }
 0x321   : > { %10759 = vmatpush1.bf16.msra.mxu0 %v15858_v22  ;;  %11784 = vmatpush1.bf16.msra.mxu1 %v15861_v23  ;;  %v15945_v22 = vld [vmem:[%s17468_s9 + $0x1828] ss:$16 sps:$4 sm:$0xff]   ;;  %v15950_v23 = vld [vmem:[%s17468_s9 + $0x1844] ss:$16 sps:$4 sm:$0xff]  }
 0x322   : > { %10760 = vmatprep.subr.bf16.mxu0 %v15866_v24  ;;  %11785 = vmatprep.subr.bf16.mxu1 %v15869_v26  ;;  %v15953_v24 = vld [vmem:[%s17468_s9 + $0x184c] ss:$16 sps:$4 sm:$0xff]   ;;  %v15948_v26 = vld [vmem:[%s17468_s9 + $0x1840] ss:$16 sps:$4 sm:$0xff]  }
 0x325   : > { %10761 = vmatpush1.bf16.msra.mxu0 %v15864_v27  ;;  %11786 = vmatpush1.bf16.msra.mxu1 %v15867_v28  ;;  %v15951_v27 = vld [vmem:[%s17468_s9 + $0x1848] ss:$16 sps:$4 sm:$0xff]   ;;  %v15956_v28 = vld [vmem:[%s17468_s9 + $0x1864] ss:$16 sps:$4 sm:$0xff]  }
 0x326   : > { %10762 = vmatprep.subr.bf16.mxu0 %v15872_v29  ;;  %11787 = vmatprep.subr.bf16.mxu1 %v15875_v30  ;;  %v15959_v29 = vld [vmem:[%s17468_s9 + $0x186c] ss:$16 sps:$4 sm:$0xff]   ;;  %v15954_v30 = vld [vmem:[%s17468_s9 + $0x1860] ss:$16 sps:$4 sm:$0xff]  }
 0x329   : > { %10763 = vmatpush1.bf16.msra.mxu0 %v15870_v15  ;;  %11788 = vmatpush1.bf16.msra.mxu1 %v15873_v31  ;;  %v15957_v15 = vld [vmem:[%s17468_s9 + $0x1868] ss:$16 sps:$4 sm:$0xff]   ;;  %v15962_v31 = vld [vmem:[%s17468_s9 + $0x1884] ss:$16 sps:$4 sm:$0xff]  }
 0x32a   : > { %10764 = vmatprep.subr.bf16.mxu0 %v15878_v32  ;;  %11789 = vmatprep.subr.bf16.mxu1 %v15881_v33  ;;  %v15965_v32 = vld [vmem:[%s17468_s9 + $0x188c] ss:$16 sps:$4 sm:$0xff]   ;;  %v15960_v33 = vld [vmem:[%s17468_s9 + $0x1880] ss:$16 sps:$4 sm:$0xff]  }
 0x32d   : > { %10765 = vmatpush1.bf16.msra.mxu0 %v15876_v25  ;;  %11790 = vmatpush1.bf16.msra.mxu1 %v15879_v34  ;;  %v15963_v25 = vld [vmem:[%s17468_s9 + $0x1888] ss:$16 sps:$4 sm:$0xff]   ;;  %v15968_v34 = vld [vmem:[%s17468_s9 + $0x18a4] ss:$16 sps:$4 sm:$0xff]  }
 0x32e   : > { %10766 = vmatprep.subr.bf16.mxu0 %v15884_v36  ;;  %11791 = vmatprep.subr.bf16.mxu1 %v15887_v37  ;;  %v15971_v36 = vld [vmem:[%s17468_s9 + $0x18ac] ss:$16 sps:$4 sm:$0xff]   ;;  %v15966_v37 = vld [vmem:[%s17468_s9 + $0x18a0] ss:$16 sps:$4 sm:$0xff]  }
 0x331   : > { %10767 = vmatpush1.bf16.msra.mxu0 %v15882_v39  ;;  %11792 = vmatpush1.bf16.msra.mxu1 %v15885_v40  ;;  %v15969_v39 = vld [vmem:[%s17468_s9 + $0x18a8] ss:$16 sps:$4 sm:$0xff]   ;;  %v15974_v40 = vld [vmem:[%s17468_s9 + $0x18c4] ss:$16 sps:$4 sm:$0xff]  }
 0x332   : > { %10768 = vmatprep.subr.bf16.mxu0 %v15890_v21  ;;  %11793 = vmatprep.subr.bf16.mxu1 %v15893_v41  ;;  %v15977_v21 = vld [vmem:[%s17468_s9 + $0x18cc] ss:$16 sps:$4 sm:$0xff]   ;;  %v15972_v41 = vld [vmem:[%s17468_s9 + $0x18c0] ss:$16 sps:$4 sm:$0xff]  }
 0x335   : > { %10769 = vmatpush1.bf16.msra.mxu0 %v15888_v42  ;;  %11794 = vmatpush1.bf16.msra.mxu1 %v15891_v44  ;;  %v15975_v42 = vld [vmem:[%s17468_s9 + $0x18c8] ss:$16 sps:$4 sm:$0xff]   ;;  %v15980_v44 = vld [vmem:[%s17468_s9 + $0x18e4] ss:$16 sps:$4 sm:$0xff]  }
 0x336   : > { %10770 = vmatprep.subr.bf16.mxu0 %v15896_v45  ;;  %11795 = vmatprep.subr.bf16.mxu1 %v15899_v46  ;;  %v15983_v45 = vld [vmem:[%s17468_s9 + $0x18ec] ss:$16 sps:$4 sm:$0xff]   ;;  %v15978_v46 = vld [vmem:[%s17468_s9 + $0x18e0] ss:$16 sps:$4 sm:$0xff]  }
 0x339   : > { %10771 = vmatpush1.bf16.msra.mxu0 %v15894_v47  ;;  %11796 = vmatpush1.bf16.msra.mxu1 %v15897_v50  ;;  %v15981_v47 = vld [vmem:[%s17468_s9 + $0x18e8] ss:$16 sps:$4 sm:$0xff]   ;;  %v15986_v50 = vld [vmem:[%s17468_s9 + $0x1904] ss:$16 sps:$4 sm:$0xff]  }
 0x33a   : > { %10772 = vmatprep.subr.bf16.mxu0 %v15902_v51  ;;  %11797 = vmatprep.subr.bf16.mxu1 %v15905_v53  ;;  %v15989_v51 = vld [vmem:[%s17468_s9 + $0x190c] ss:$16 sps:$4 sm:$0xff]   ;;  %v15984_v53 = vld [vmem:[%s17468_s9 + $0x1900] ss:$16 sps:$4 sm:$0xff]  }
 0x33d   : > { %10773 = vmatpush1.bf16.msra.mxu0 %v15900_v54  ;;  %11798 = vmatpush1.bf16.msra.mxu1 %v15903_v55  ;;  %v15987_v54 = vld [vmem:[%s17468_s9 + $0x1908] ss:$16 sps:$4 sm:$0xff]   ;;  %v15992_v55 = vld [vmem:[%s17468_s9 + $0x1924] ss:$16 sps:$4 sm:$0xff]  }
 0x33e   : > { %10774 = vmatprep.subr.bf16.mxu0 %v15908_v38  ;;  %11799 = vmatprep.subr.bf16.mxu1 %v15911_v56  ;;  %v15995_v38 = vld [vmem:[%s17468_s9 + $0x192c] ss:$16 sps:$4 sm:$0xff]   ;;  %v15990_v56 = vld [vmem:[%s17468_s9 + $0x1920] ss:$16 sps:$4 sm:$0xff]  }
 0x341   : > { %10775 = vmatpush1.bf16.msra.mxu0 %v15906_v57  ;;  %11800 = vmatpush1.bf16.msra.mxu1 %v15909_v58  ;;  %v15993_v57 = vld [vmem:[%s17468_s9 + $0x1928] ss:$16 sps:$4 sm:$0xff]   ;;  %v15998_v58 = vld [vmem:[%s17468_s9 + $0x1944] ss:$16 sps:$4 sm:$0xff]  }
 0x342   : > { %10776 = vmatprep.subr.bf16.mxu0 %v15914_v48  ;;  %11801 = vmatprep.subr.bf16.mxu1 %v15917_v59  ;;  %v16001_v48 = vld [vmem:[%s17468_s9 + $0x194c] ss:$16 sps:$4 sm:$0xff]   ;;  %v15996_v59 = vld [vmem:[%s17468_s9 + $0x1940] ss:$16 sps:$4 sm:$0xff]  }
 0x345   : > { %10777 = vmatpush1.bf16.msra.mxu0 %v15912_v61  ;;  %11802 = vmatpush1.bf16.msra.mxu1 %v15915_v62  ;;  %v15999_v61 = vld [vmem:[%s17468_s9 + $0x1948] ss:$16 sps:$4 sm:$0xff]   ;;  %v16004_v62 = vld [vmem:[%s17468_s9 + $0x1964] ss:$16 sps:$4 sm:$0xff]  }
 0x346   : > { %10778 = vmatprep.subr.bf16.mxu0 %v15920_v0  ;;  %11803 = vmatprep.subr.bf16.mxu1 %v15923_v1  ;;  %v16007_v0 = vld [vmem:[%s17468_s9 + $0x196c] ss:$16 sps:$4 sm:$0xff]   ;;  %v16002_v1 = vld [vmem:[%s17468_s9 + $0x1960] ss:$16 sps:$4 sm:$0xff]  }
 0x349   : > { %10779 = vmatpush1.bf16.msra.mxu0 %v15918_v35  ;;  %11804 = vmatpush1.bf16.msra.mxu1 %v15921_v2  ;;  %v16005_v35 = vld [vmem:[%s17468_s9 + $0x1968] ss:$16 sps:$4 sm:$0xff]   ;;  %v16010_v2 = vld [vmem:[%s17468_s9 + $0x1984] ss:$16 sps:$4 sm:$0xff]  }
 0x34a   : > { %10780 = vmatprep.subr.bf16.mxu0 %v15926_v3  ;;  %11805 = vmatprep.subr.bf16.mxu1 %v15929_v4  ;;  %v16013_v3 = vld [vmem:[%s17468_s9 + $0x198c] ss:$16 sps:$4 sm:$0xff]   ;;  %v16008_v4 = vld [vmem:[%s17468_s9 + $0x1980] ss:$16 sps:$4 sm:$0xff]  }
 0x34d   : > { %10781 = vmatpush1.bf16.msra.mxu0 %v15924_v5  ;;  %11806 = vmatpush1.bf16.msra.mxu1 %v15927_v6  ;;  %v16011_v5 = vld [vmem:[%s17468_s9 + $0x1988] ss:$16 sps:$4 sm:$0xff]   ;;  %v16016_v6 = vld [vmem:[%s17468_s9 + $0x19a4] ss:$16 sps:$4 sm:$0xff]  }
 0x34e   : > { %10782 = vmatprep.subr.bf16.mxu0 %v15932_v7  ;;  %11807 = vmatprep.subr.bf16.mxu1 %v15935_v9  ;;  %v16019_v7 = vld [vmem:[%s17468_s9 + $0x19ac] ss:$16 sps:$4 sm:$0xff]   ;;  %v16014_v9 = vld [vmem:[%s17468_s9 + $0x19a0] ss:$16 sps:$4 sm:$0xff]  }
 0x351   : > { %10783 = vmatpush1.bf16.msra.mxu0 %v15930_v11  ;;  %11808 = vmatpush1.bf16.msra.mxu1 %v15933_v12  ;;  %v16017_v11 = vld [vmem:[%s17468_s9 + $0x19a8] ss:$16 sps:$4 sm:$0xff]   ;;  %v16022_v12 = vld [vmem:[%s17468_s9 + $0x19c4] ss:$16 sps:$4 sm:$0xff]  }
 0x352   : > { %10793 = vmatprep.subr.bf16.mxu0 %v15938_v14  ;;  %11818 = vmatprep.subr.bf16.mxu1 %v15941_v63  ;;  %v16025_v14 = vld [vmem:[%s17468_s9 + $0x19cc] ss:$16 sps:$4 sm:$0xff]   ;;  %v16020_v63 = vld [vmem:[%s17468_s9 + $0x19c0] ss:$16 sps:$4 sm:$0xff]  }
 0x354   : > { %10785 = vmatmul.mubr.bf16.vlgmr.msra.gmra.mrb[0].mxu0 %v2079_v52  ;;  %11810 = vmatmul.mubr.bf16.vlgmr.msra.gmra.mrb[0].mxu1 %v2079_v52  ;;  %v16028_v52 = vld [vmem:[%s17468_s9 + $0x19e4] ss:$16 sps:$4 sm:$0xff]  }
 0x355   : > { %10794 = vmatpush1.bf16.msra.mxu0 %v15936_v17  ;;  %11819 = vmatpush1.bf16.msra.mxu1 %v15939_v8  ;;  %v16031_v17 = vld [vmem:[%s17468_s9 + $0x19ec] ss:$16 sps:$4 sm:$0xff]   ;;  %v16026_v8 = vld [vmem:[%s17468_s9 + $0x19e0] ss:$16 sps:$4 sm:$0xff]  }
 0x356   : > { %10795 = vmatprep.subr.bf16.mxu0 %v15944_v18  ;;  %11820 = vmatprep.subr.bf16.mxu1 %v15947_v19  ;;  %v16029_v18 = vld [vmem:[%s17468_s9 + $0x19e8] ss:$16 sps:$4 sm:$0xff]   ;;  %v16034_v19 = vld [vmem:[%s17468_s9 + $0x1a04] ss:$16 sps:$4 sm:$0xff]  }
 0x357   : > { %10825 = vmatprep.mubr.bf16.mxu0 %v18398_v20  ;;  %11850 = vmatprep.mubr.bf16.mxu1 %v18398_v20 }
 0x359   : > { %10796 = vmatpush1.bf16.msra.mxu0 %v15942_v13  ;;  %11821 = vmatpush1.bf16.msra.mxu1 %v15945_v22  ;;  %v16037_v13 = vld [vmem:[%s17468_s9 + $0x1a0c] ss:$16 sps:$4 sm:$0xff]   ;;  %v18464_v22 = vrot.slane %v18383_v10, %v17527_v49  ;;  %v16038_v10 = vld [vmem:[%s17468_s9 + $0x1a20] ss:$16 sps:$4 sm:$0xff]  }
 0x35a   : > { %10797 = vmatprep.subr.bf16.mxu0 %v15950_v23  ;;  %11822 = vmatprep.subr.bf16.mxu1 %v15953_v24  ;;  %v16032_v23 = vld [vmem:[%s17468_s9 + $0x1a00] ss:$16 sps:$4 sm:$0xff]   ;;  %v16035_v24 = vld [vmem:[%s17468_s9 + $0x1a08] ss:$16 sps:$4 sm:$0xff]  }
 0x35d   : > { %10798 = vmatpush1.bf16.msra.mxu0 %v15948_v26  ;;  %11823 = vmatpush1.bf16.msra.mxu1 %v15951_v27  ;;  %v16040_v26 = vld [vmem:[%s17468_s9 + $0x1a24] ss:$16 sps:$4 sm:$0xff]   ;;  %v16043_v27 = vld [vmem:[%s17468_s9 + $0x1a2c] ss:$16 sps:$4 sm:$0xff]  }
 0x35e   : > { %10799 = vmatprep.subr.bf16.mxu0 %v15956_v28  ;;  %11824 = vmatprep.subr.bf16.mxu1 %v15959_v29  ;;  %v2129_v28 = vcombine.high %v18398_v20, %v18398_v20  ;;  %v16041_v29 = vld [vmem:[%s17468_s9 + $0x1a28] ss:$16 sps:$4 sm:$0xff]   ;;  %v16044_v20 = vld [vmem:[%s17468_s9 + $0x1a40] ss:$16 sps:$4 sm:$0xff]  }
 0x361   : > { %10800 = vmatpush1.bf16.msra.mxu0 %v15954_v30  ;;  %11825 = vmatpush1.bf16.msra.mxu1 %v15957_v15  ;;  %v16046_v30 = vld [vmem:[%s17468_s9 + $0x1a44] ss:$16 sps:$4 sm:$0xff]   ;;  %v16049_v15 = vld [vmem:[%s17468_s9 + $0x1a4c] ss:$16 sps:$4 sm:$0xff]  }
 0x362   : > { %10801 = vmatprep.subr.bf16.mxu0 %v15962_v31  ;;  %11826 = vmatprep.subr.bf16.mxu1 %v15965_v32  ;;  %v16047_v31 = vld [vmem:[%s17468_s9 + $0x1a48] ss:$16 sps:$4 sm:$0xff]   ;;  %v16052_v32 = vld [vmem:[%s17468_s9 + $0x1a64] ss:$16 sps:$4 sm:$0xff]  }
 0x365   : > { %10802 = vmatpush1.bf16.msra.mxu0 %v15960_v33  ;;  %11827 = vmatpush1.bf16.msra.mxu1 %v15963_v25  ;;  %v16055_v33 = vld [vmem:[%s17468_s9 + $0x1a6c] ss:$16 sps:$4 sm:$0xff]   ;;  %v16050_v25 = vld [vmem:[%s17468_s9 + $0x1a60] ss:$16 sps:$4 sm:$0xff]  }
 0x366   : > { %10803 = vmatprep.subr.bf16.mxu0 %v15968_v34  ;;  %11828 = vmatprep.subr.bf16.mxu1 %v15971_v36  ;;  %v16053_v34 = vld [vmem:[%s17468_s9 + $0x1a68] ss:$16 sps:$4 sm:$0xff]   ;;  %v16058_v36 = vld [vmem:[%s17468_s9 + $0x1a84] ss:$16 sps:$4 sm:$0xff]  }
 0x369   : > { %10804 = vmatpush1.bf16.msra.mxu0 %v15966_v37  ;;  %11829 = vmatpush1.bf16.msra.mxu1 %v15969_v39  ;;  %v16061_v37 = vld [vmem:[%s17468_s9 + $0x1a8c] ss:$16 sps:$4 sm:$0xff]   ;;  %v16056_v39 = vld [vmem:[%s17468_s9 + $0x1a80] ss:$16 sps:$4 sm:$0xff]  }
 0x36a   : > { %10805 = vmatprep.subr.bf16.mxu0 %v15974_v40  ;;  %11830 = vmatprep.subr.bf16.mxu1 %v15977_v21  ;;  %v16059_v40 = vld [vmem:[%s17468_s9 + $0x1a88] ss:$16 sps:$4 sm:$0xff]   ;;  %v16064_v21 = vld [vmem:[%s17468_s9 + $0x1aa4] ss:$16 sps:$4 sm:$0xff]  }
 0x36d   : > { %10806 = vmatpush1.bf16.msra.mxu0 %v15972_v41  ;;  %11831 = vmatpush1.bf16.msra.mxu1 %v15975_v42  ;;  %v16067_v41 = vld [vmem:[%s17468_s9 + $0x1aac] ss:$16 sps:$4 sm:$0xff]   ;;  %v16062_v42 = vld [vmem:[%s17468_s9 + $0x1aa0] ss:$16 sps:$4 sm:$0xff]  }
 0x36e   : > { %10807 = vmatprep.subr.bf16.mxu0 %v15980_v44  ;;  %11832 = vmatprep.subr.bf16.mxu1 %v15983_v45  ;;  %v16065_v44 = vld [vmem:[%s17468_s9 + $0x1aa8] ss:$16 sps:$4 sm:$0xff]   ;;  %v16070_v45 = vld [vmem:[%s17468_s9 + $0x1ac4] ss:$16 sps:$4 sm:$0xff]  }
 0x371   : > { %10808 = vmatpush1.bf16.msra.mxu0 %v15978_v46  ;;  %11833 = vmatpush1.bf16.msra.mxu1 %v15981_v47  ;;  %v16073_v46 = vld [vmem:[%s17468_s9 + $0x1acc] ss:$16 sps:$4 sm:$0xff]   ;;  %v16068_v47 = vld [vmem:[%s17468_s9 + $0x1ac0] ss:$16 sps:$4 sm:$0xff]  }
 0x372   : > { %10809 = vmatprep.subr.bf16.mxu0 %v15986_v50  ;;  %11834 = vmatprep.subr.bf16.mxu1 %v15989_v51  ;;  %v16071_v50 = vld [vmem:[%s17468_s9 + $0x1ac8] ss:$16 sps:$4 sm:$0xff]   ;;  %v16076_v51 = vld [vmem:[%s17468_s9 + $0x1ae4] ss:$16 sps:$4 sm:$0xff]  }
 0x375   : > { %10810 = vmatpush1.bf16.msra.mxu0 %v15984_v53  ;;  %11835 = vmatpush1.bf16.msra.mxu1 %v15987_v54  ;;  %v16079_v53 = vld [vmem:[%s17468_s9 + $0x1aec] ss:$16 sps:$4 sm:$0xff]   ;;  %v16074_v54 = vld [vmem:[%s17468_s9 + $0x1ae0] ss:$16 sps:$4 sm:$0xff]  }
 0x376   : > { %10811 = vmatprep.subr.bf16.mxu0 %v15992_v55  ;;  %11836 = vmatprep.subr.bf16.mxu1 %v15995_v38  ;;  %v16077_v55 = vld [vmem:[%s17468_s9 + $0x1ae8] ss:$16 sps:$4 sm:$0xff]   ;;  %v16082_v38 = vld [vmem:[%s17468_s9 + $0x1b04] ss:$16 sps:$4 sm:$0xff]  }
 0x379   : > { %10812 = vmatpush1.bf16.msra.mxu0 %v15990_v56  ;;  %11837 = vmatpush1.bf16.msra.mxu1 %v15993_v57  ;;  %v16085_v56 = vld [vmem:[%s17468_s9 + $0x1b0c] ss:$16 sps:$4 sm:$0xff]   ;;  %v16080_v57 = vld [vmem:[%s17468_s9 + $0x1b00] ss:$16 sps:$4 sm:$0xff]  }
 0x37a   : > { %10813 = vmatprep.subr.bf16.mxu0 %v15998_v58  ;;  %11838 = vmatprep.subr.bf16.mxu1 %v16001_v48  ;;  %v16083_v58 = vld [vmem:[%s17468_s9 + $0x1b08] ss:$16 sps:$4 sm:$0xff]   ;;  %v16088_v48 = vld [vmem:[%s17468_s9 + $0x1b24] ss:$16 sps:$4 sm:$0xff]  }
 0x37d   : > { %10814 = vmatpush1.bf16.msra.mxu0 %v15996_v59  ;;  %11839 = vmatpush1.bf16.msra.mxu1 %v15999_v61  ;;  %v16091_v59 = vld [vmem:[%s17468_s9 + $0x1b2c] ss:$16 sps:$4 sm:$0xff]   ;;  %v16086_v61 = vld [vmem:[%s17468_s9 + $0x1b20] ss:$16 sps:$4 sm:$0xff]  }
 0x37e   : > { %10815 = vmatprep.subr.bf16.mxu0 %v16004_v62  ;;  %11840 = vmatprep.subr.bf16.mxu1 %v16007_v0  ;;  %v16089_v62 = vld [vmem:[%s17468_s9 + $0x1b28] ss:$16 sps:$4 sm:$0xff]   ;;  %v16094_v0 = vld [vmem:[%s17468_s9 + $0x1b44] ss:$16 sps:$4 sm:$0xff]  }
 0x381   : > { %10816 = vmatpush1.bf16.msra.mxu0 %v16002_v1  ;;  %11841 = vmatpush1.bf16.msra.mxu1 %v16005_v35  ;;  %v16097_v1 = vld [vmem:[%s17468_s9 + $0x1b4c] ss:$16 sps:$4 sm:$0xff]   ;;  %v16092_v35 = vld [vmem:[%s17468_s9 + $0x1b40] ss:$16 sps:$4 sm:$0xff]  }
 0x382   : > { %10817 = vmatprep.subr.bf16.mxu0 %v16010_v2  ;;  %11842 = vmatprep.subr.bf16.mxu1 %v16013_v3  ;;  %v16095_v2 = vld [vmem:[%s17468_s9 + $0x1b48] ss:$16 sps:$4 sm:$0xff]   ;;  %v16100_v3 = vld [vmem:[%s17468_s9 + $0x1b64] ss:$16 sps:$4 sm:$0xff]  }
 0x385   : > { %10818 = vmatpush1.bf16.msra.mxu0 %v16008_v4  ;;  %11843 = vmatpush1.bf16.msra.mxu1 %v16011_v5  ;;  %v16103_v4 = vld [vmem:[%s17468_s9 + $0x1b6c] ss:$16 sps:$4 sm:$0xff]   ;;  %v16098_v5 = vld [vmem:[%s17468_s9 + $0x1b60] ss:$16 sps:$4 sm:$0xff]  }
 0x386   : > { %10819 = vmatprep.subr.bf16.mxu0 %v16016_v6  ;;  %11844 = vmatprep.subr.bf16.mxu1 %v16019_v7  ;;  %v16101_v6 = vld [vmem:[%s17468_s9 + $0x1b68] ss:$16 sps:$4 sm:$0xff]   ;;  %v16106_v7 = vld [vmem:[%s17468_s9 + $0x1b84] ss:$16 sps:$4 sm:$0xff]  }
 0x389   : > { %10820 = vmatpush1.bf16.msra.mxu0 %v16014_v9  ;;  %11845 = vmatpush1.bf16.msra.mxu1 %v16017_v11  ;;  %v16109_v9 = vld [vmem:[%s17468_s9 + $0x1b8c] ss:$16 sps:$4 sm:$0xff]   ;;  %v16104_v11 = vld [vmem:[%s17468_s9 + $0x1b80] ss:$16 sps:$4 sm:$0xff]  }
 0x38a   : > { %10821 = vmatprep.subr.bf16.mxu0 %v16022_v12  ;;  %11846 = vmatprep.subr.bf16.mxu1 %v16025_v14  ;;  %v16107_v12 = vld [vmem:[%s17468_s9 + $0x1b88] ss:$16 sps:$4 sm:$0xff]   ;;  %v16112_v14 = vld [vmem:[%s17468_s9 + $0x1ba4] ss:$16 sps:$4 sm:$0xff]  }
 0x38d   : > { %10822 = vmatpush1.bf16.msra.mxu0 %v16020_v63  ;;  %11847 = vmatpush1.bf16.msra.mxu1 %v16023_v16  ;;  %v16115_v63 = vld [vmem:[%s17468_s9 + $0x1bac] ss:$16 sps:$4 sm:$0xff]   ;;  %v16110_v16 = vld [vmem:[%s17468_s9 + $0x1ba0] ss:$16 sps:$4 sm:$0xff]  }
 0x38e   : > { %10823 = vmatprep.subr.bf16.mxu0 %v16028_v52  ;;  %11848 = vmatprep.subr.bf16.mxu1 %v16031_v17  ;;  %v16113_v52 = vld [vmem:[%s17468_s9 + $0x1ba8] ss:$16 sps:$4 sm:$0xff]   ;;  %v16118_v17 = vld [vmem:[%s17468_s9 + $0x1bc4] ss:$16 sps:$4 sm:$0xff]  }
 0x391   : > { %10824 = vmatpush1.bf16.msra.mxu0 %v16026_v8  ;;  %11849 = vmatpush1.bf16.msra.mxu1 %v16029_v18  ;;  %v16121_v8 = vld [vmem:[%s17468_s9 + $0x1bcc] ss:$16 sps:$4 sm:$0xff]   ;;  %v2082_v18 = vcombine.high %v18375_v60, %v18375_v60  ;;  %v16122_v60 = vld [vmem:[%s17468_s9 + $0x1be0] ss:$16 sps:$4 sm:$0xff]  }
 0x392   : > { %10834 = vmatprep.subr.bf16.mxu0 %v16034_v19  ;;  %11859 = vmatprep.subr.bf16.mxu1 %v16037_v13  ;;  %v16116_v19 = vld [vmem:[%s17468_s9 + $0x1bc0] ss:$16 sps:$4 sm:$0xff]   ;;  %v16119_v13 = vld [vmem:[%s17468_s9 + $0x1bc8] ss:$16 sps:$4 sm:$0xff]  }
 0x394   : > { %10826 = vmatmul.mubr.bf16.vlgmr.msra.gmra.mrb[0].mxu0 %v18464_v22  ;;  %11851 = vmatmul.mubr.bf16.vlgmr.msra.gmra.mrb[0].mxu1 %v18464_v22 }
 0x395   : > { %10835 = vmatpush1.bf16.msra.mxu0 %v16032_v23  ;;  %11860 = vmatpush1.bf16.msra.mxu1 %v16035_v24  ;;  %v16124_v23 = vld [vmem:[%s17468_s9 + $0x1be4] ss:$16 sps:$4 sm:$0xff]   ;;  %v16127_v24 = vld [vmem:[%s17468_s9 + $0x1bec] ss:$16 sps:$4 sm:$0xff]  }
 0x396   : > { %10836 = vmatprep.subr.bf16.mxu0 %v16040_v26  ;;  %11861 = vmatprep.subr.bf16.mxu1 %v16043_v27  ;;  %v18533_v26 = vrot.slane %v2082_v18, %v17527_v49  ;;  %v16125_v27 = vld [vmem:[%s17468_s9 + $0x1be8] ss:$16 sps:$4 sm:$0xff]  }
 0x397   : > { %10866 = vmatprep.mubr.bf16.mxu0 %v2129_v28  ;;  %11891 = vmatprep.mubr.bf16.mxu1 %v2129_v28  ;;  %v16130_v28 = vld [vmem:[%s17468_s9 + $0x1c04] ss:$16 sps:$4 sm:$0xff]   ;;  %v16203_v18 = vld [vmem:[%s17468_s9 + $0x1d88] ss:$16 sps:$4 sm:$0xff]  }
 0x399   : > { %10837 = vmatpush1.bf16.msra.mxu0 %v16038_v10  ;;  %11862 = vmatpush1.bf16.msra.mxu1 %v16041_v29  ;;  %v16133_v10 = vld [vmem:[%s17468_s9 + $0x1c0c] ss:$16 sps:$4 sm:$0xff]   ;;  %v2098_v29 = vcombine.high %v18533_v26, %v18533_v26 }
 0x39a   : > { %10838 = vmatprep.subr.bf16.mxu0 %v16046_v30  ;;  %11863 = vmatprep.subr.bf16.mxu1 %v16049_v15  ;;  %v2127_v30 = vcombine.high %v18464_v22, %v18464_v22  ;;  %v16128_v15 = vld [vmem:[%s17468_s9 + $0x1c00] ss:$16 sps:$4 sm:$0xff]  }
 0x39b   : > { %v16134_v22 = vld [vmem:[%s17468_s9 + $0x1c20] ss:$16 sps:$4 sm:$0xff]  }
 0x39d   : > { %10839 = vmatpush1.bf16.msra.mxu0 %v16044_v20  ;;  %11864 = vmatpush1.bf16.msra.mxu1 %v16047_v31  ;;  %v16131_v20 = vld [vmem:[%s17468_s9 + $0x1c08] ss:$16 sps:$4 sm:$0xff]   ;;  %v16136_v31 = vld [vmem:[%s17468_s9 + $0x1c24] ss:$16 sps:$4 sm:$0xff]  }
 0x39e   : > { %10840 = vmatprep.subr.bf16.mxu0 %v16052_v32  ;;  %11865 = vmatprep.subr.bf16.mxu1 %v16055_v33  ;;  %v16139_v32 = vld [vmem:[%s17468_s9 + $0x1c2c] ss:$16 sps:$4 sm:$0xff]   ;;  %v18548_v33 = vrot.slane %v2098_v29, %v17527_v49  ;;  %v16220_v29 = vld [vmem:[%s17468_s9 + $0x1de4] ss:$16 sps:$4 sm:$0xff]  }
 0x3a1   : > { %10841 = vmatpush1.bf16.msra.mxu0 %v16050_v25  ;;  %11866 = vmatpush1.bf16.msra.mxu1 %v16053_v34  ;;  %v16137_v25 = vld [vmem:[%s17468_s9 + $0x1c28] ss:$16 sps:$4 sm:$0xff]   ;;  %v16142_v34 = vld [vmem:[%s17468_s9 + $0x1c44] ss:$16 sps:$4 sm:$0xff]  }
 0x3a2   : > { %10842 = vmatprep.subr.bf16.mxu0 %v16058_v36  ;;  %11867 = vmatprep.subr.bf16.mxu1 %v16061_v37  ;;  %v16145_v36 = vld [vmem:[%s17468_s9 + $0x1c4c] ss:$16 sps:$4 sm:$0xff]   ;;  %v16140_v37 = vld [vmem:[%s17468_s9 + $0x1c40] ss:$16 sps:$4 sm:$0xff]  }
 0x3a5   : > { %10843 = vmatpush1.bf16.msra.mxu0 %v16056_v39  ;;  %11868 = vmatpush1.bf16.msra.mxu1 %v16059_v40  ;;  %v16143_v39 = vld [vmem:[%s17468_s9 + $0x1c48] ss:$16 sps:$4 sm:$0xff]   ;;  %v16148_v40 = vld [vmem:[%s17468_s9 + $0x1c64] ss:$16 sps:$4 sm:$0xff]  }
 0x3a6   : > { %10844 = vmatprep.subr.bf16.mxu0 %v16064_v21  ;;  %11869 = vmatprep.subr.bf16.mxu1 %v16067_v41  ;;  %v16151_v21 = vld [vmem:[%s17468_s9 + $0x1c6c] ss:$16 sps:$4 sm:$0xff]   ;;  %v16146_v41 = vld [vmem:[%s17468_s9 + $0x1c60] ss:$16 sps:$4 sm:$0xff]  }
 0x3a9   : > { %10845 = vmatpush1.bf16.msra.mxu0 %v16062_v42  ;;  %11870 = vmatpush1.bf16.msra.mxu1 %v16065_v44  ;;  %v16149_v42 = vld [vmem:[%s17468_s9 + $0x1c68] ss:$16 sps:$4 sm:$0xff]   ;;  %v16154_v44 = vld [vmem:[%s17468_s9 + $0x1c84] ss:$16 sps:$4 sm:$0xff]  }
 0x3aa   : > { %10846 = vmatprep.subr.bf16.mxu0 %v16070_v45  ;;  %11871 = vmatprep.subr.bf16.mxu1 %v16073_v46  ;;  %v16157_v45 = vld [vmem:[%s17468_s9 + $0x1c8c] ss:$16 sps:$4 sm:$0xff]   ;;  %v16152_v46 = vld [vmem:[%s17468_s9 + $0x1c80] ss:$16 sps:$4 sm:$0xff]  }
 0x3ad   : > { %10847 = vmatpush1.bf16.msra.mxu0 %v16068_v47  ;;  %11872 = vmatpush1.bf16.msra.mxu1 %v16071_v50  ;;  %v16155_v47 = vld [vmem:[%s17468_s9 + $0x1c88] ss:$16 sps:$4 sm:$0xff]   ;;  %v16160_v50 = vld [vmem:[%s17468_s9 + $0x1ca4] ss:$16 sps:$4 sm:$0xff]  }
 0x3ae   : > { %10848 = vmatprep.subr.bf16.mxu0 %v16076_v51  ;;  %11873 = vmatprep.subr.bf16.mxu1 %v16079_v53  ;;  %v16163_v51 = vld [vmem:[%s17468_s9 + $0x1cac] ss:$16 sps:$4 sm:$0xff]   ;;  %v16158_v53 = vld [vmem:[%s17468_s9 + $0x1ca0] ss:$16 sps:$4 sm:$0xff]  }
 0x3b1   : > { %10849 = vmatpush1.bf16.msra.mxu0 %v16074_v54  ;;  %11874 = vmatpush1.bf16.msra.mxu1 %v16077_v55  ;;  %v16161_v54 = vld [vmem:[%s17468_s9 + $0x1ca8] ss:$16 sps:$4 sm:$0xff]   ;;  %v16166_v55 = vld [vmem:[%s17468_s9 + $0x1cc4] ss:$16 sps:$4 sm:$0xff]  }
 0x3b2   : > { %10850 = vmatprep.subr.bf16.mxu0 %v16082_v38  ;;  %11875 = vmatprep.subr.bf16.mxu1 %v16085_v56  ;;  %v16169_v38 = vld [vmem:[%s17468_s9 + $0x1ccc] ss:$16 sps:$4 sm:$0xff]   ;;  %v16164_v56 = vld [vmem:[%s17468_s9 + $0x1cc0] ss:$16 sps:$4 sm:$0xff]  }
 0x3b5   : > { %10851 = vmatpush1.bf16.msra.mxu0 %v16080_v57  ;;  %11876 = vmatpush1.bf16.msra.mxu1 %v16083_v58  ;;  %v16167_v57 = vld [vmem:[%s17468_s9 + $0x1cc8] ss:$16 sps:$4 sm:$0xff]   ;;  %v16172_v58 = vld [vmem:[%s17468_s9 + $0x1ce4] ss:$16 sps:$4 sm:$0xff]  }
 0x3b6   : > { %10852 = vmatprep.subr.bf16.mxu0 %v16088_v48  ;;  %11877 = vmatprep.subr.bf16.mxu1 %v16091_v59  ;;  %v16175_v48 = vld [vmem:[%s17468_s9 + $0x1cec] ss:$16 sps:$4 sm:$0xff]   ;;  %v16170_v59 = vld [vmem:[%s17468_s9 + $0x1ce0] ss:$16 sps:$4 sm:$0xff]  }
 0x3b9   : > { %10853 = vmatpush1.bf16.msra.mxu0 %v16086_v61  ;;  %11878 = vmatpush1.bf16.msra.mxu1 %v16089_v62  ;;  %v16173_v61 = vld [vmem:[%s17468_s9 + $0x1ce8] ss:$16 sps:$4 sm:$0xff]   ;;  %v16178_v62 = vld [vmem:[%s17468_s9 + $0x1d04] ss:$16 sps:$4 sm:$0xff]  }
 0x3ba   : > { %10854 = vmatprep.subr.bf16.mxu0 %v16094_v0  ;;  %11879 = vmatprep.subr.bf16.mxu1 %v16097_v1  ;;  %v16181_v0 = vld [vmem:[%s17468_s9 + $0x1d0c] ss:$16 sps:$4 sm:$0xff]   ;;  %v16176_v1 = vld [vmem:[%s17468_s9 + $0x1d00] ss:$16 sps:$4 sm:$0xff]  }
 0x3bd   : > { %10855 = vmatpush1.bf16.msra.mxu0 %v16092_v35  ;;  %11880 = vmatpush1.bf16.msra.mxu1 %v16095_v2  ;;  %v16179_v35 = vld [vmem:[%s17468_s9 + $0x1d08] ss:$16 sps:$4 sm:$0xff]   ;;  %v16184_v2 = vld [vmem:[%s17468_s9 + $0x1d24] ss:$16 sps:$4 sm:$0xff]  }
 0x3be   : > { %10856 = vmatprep.subr.bf16.mxu0 %v16100_v3  ;;  %11881 = vmatprep.subr.bf16.mxu1 %v16103_v4  ;;  %v16187_v3 = vld [vmem:[%s17468_s9 + $0x1d2c] ss:$16 sps:$4 sm:$0xff]   ;;  %v16182_v4 = vld [vmem:[%s17468_s9 + $0x1d20] ss:$16 sps:$4 sm:$0xff]  }
 0x3c1   : > { %10857 = vmatpush1.bf16.msra.mxu0 %v16098_v5  ;;  %11882 = vmatpush1.bf16.msra.mxu1 %v16101_v6  ;;  %v16185_v5 = vld [vmem:[%s17468_s9 + $0x1d28] ss:$16 sps:$4 sm:$0xff]   ;;  %v16190_v6 = vld [vmem:[%s17468_s9 + $0x1d44] ss:$16 sps:$4 sm:$0xff]  }
 0x3c2   : > { %10858 = vmatprep.subr.bf16.mxu0 %v16106_v7  ;;  %11883 = vmatprep.subr.bf16.mxu1 %v16109_v9  ;;  %v16193_v7 = vld [vmem:[%s17468_s9 + $0x1d4c] ss:$16 sps:$4 sm:$0xff]   ;;  %v16188_v9 = vld [vmem:[%s17468_s9 + $0x1d40] ss:$16 sps:$4 sm:$0xff]  }
 0x3c5   : > { %10859 = vmatpush1.bf16.msra.mxu0 %v16104_v11  ;;  %11884 = vmatpush1.bf16.msra.mxu1 %v16107_v12  ;;  %v16191_v11 = vld [vmem:[%s17468_s9 + $0x1d48] ss:$16 sps:$4 sm:$0xff]   ;;  %v16196_v12 = vld [vmem:[%s17468_s9 + $0x1d64] ss:$16 sps:$4 sm:$0xff]  }
 0x3c6   : > { %10860 = vmatprep.subr.bf16.mxu0 %v16112_v14  ;;  %11885 = vmatprep.subr.bf16.mxu1 %v16115_v63  ;;  %v16199_v14 = vld [vmem:[%s17468_s9 + $0x1d6c] ss:$16 sps:$4 sm:$0xff]   ;;  %v16194_v63 = vld [vmem:[%s17468_s9 + $0x1d60] ss:$16 sps:$4 sm:$0xff]  }
 0x3c9   : > { %10861 = vmatpush1.bf16.msra.mxu0 %v16110_v16  ;;  %11886 = vmatpush1.bf16.msra.mxu1 %v16113_v52  ;;  %v16197_v16 = vld [vmem:[%s17468_s9 + $0x1d68] ss:$16 sps:$4 sm:$0xff]   ;;  %v16202_v52 = vld [vmem:[%s17468_s9 + $0x1d84] ss:$16 sps:$4 sm:$0xff]  }
 0x3ca   : > { %10862 = vmatprep.subr.bf16.mxu0 %v16118_v17  ;;  %11887 = vmatprep.subr.bf16.mxu1 %v16121_v8  ;;  %v16205_v17 = vld [vmem:[%s17468_s9 + $0x1d8c] ss:$16 sps:$4 sm:$0xff]   ;;  %v16200_v8 = vld [vmem:[%s17468_s9 + $0x1d80] ss:$16 sps:$4 sm:$0xff]  }
 0x3cd   : > { %10863 = vmatpush1.bf16.msra.mxu0 %v16116_v19  ;;  %11888 = vmatpush1.bf16.msra.mxu1 %v16119_v13  ;;  %v16208_v19 = vld [vmem:[%s17468_s9 + $0x1da4] ss:$16 sps:$4 sm:$0xff]   ;;  %v16211_v13 = vld [vmem:[%s17468_s9 + $0x1dac] ss:$16 sps:$4 sm:$0xff]  }
 0x3ce   : > { %10864 = vmatprep.subr.bf16.mxu0 %v16124_v23  ;;  %11889 = vmatprep.subr.bf16.mxu1 %v16127_v24  ;;  %v16206_v23 = vld [vmem:[%s17468_s9 + $0x1da0] ss:$16 sps:$4 sm:$0xff]   ;;  %v16209_v24 = vld [vmem:[%s17468_s9 + $0x1da8] ss:$16 sps:$4 sm:$0xff]  }
 0x3d1   : > { %10865 = vmatpush1.bf16.msra.mxu0 %v16122_v60  ;;  %11890 = vmatpush1.bf16.msra.mxu1 %v16125_v27  ;;  %v16214_v60 = vld [vmem:[%s17468_s9 + $0x1dc4] ss:$16 sps:$4 sm:$0xff]   ;;  %v16217_v27 = vld [vmem:[%s17468_s9 + $0x1dcc] ss:$16 sps:$4 sm:$0xff]  }
 0x3d2   : > { %10875 = vmatprep.subr.bf16.mxu0 %v16130_v28  ;;  %11900 = vmatprep.subr.bf16.mxu1 %v16133_v10  ;;  %v16212_v28 = vld [vmem:[%s17468_s9 + $0x1dc0] ss:$16 sps:$4 sm:$0xff]   ;;  %v16215_v10 = vld [vmem:[%s17468_s9 + $0x1dc8] ss:$16 sps:$4 sm:$0xff]  }
 0x3d4   : > { %10867 = vmatmul.mubr.bf16.vlgmr.msra.gmra.mrb[0].mxu0 %v2127_v30  ;;  %11892 = vmatmul.mubr.bf16.vlgmr.msra.gmra.mrb[0].mxu1 %v2127_v30  ;;  %v16223_v30 = vld [vmem:[%s17468_s9 + $0x1dec] ss:$16 sps:$4 sm:$0xff]  }
 0x3d5   : > { %10876 = vmatpush1.bf16.msra.mxu0 %v16128_v15  ;;  %11901 = vmatpush1.bf16.msra.mxu1 %v16131_v20  ;;  %v16218_v15 = vld [vmem:[%s17468_s9 + $0x1de0] ss:$16 sps:$4 sm:$0xff]   ;;  %v16221_v20 = vld [vmem:[%s17468_s9 + $0x1de8] ss:$16 sps:$4 sm:$0xff]  }
 0x3d6   : > { %10877 = vmatprep.subr.bf16.mxu0 %v16136_v31  ;;  %11902 = vmatprep.subr.bf16.mxu1 %v16139_v32  ;;  %v16227_v31 = vld [vmem:[%s17468_s9 + $0x1e04] ss:$16 sps:$4 sm:$0xff]   ;;  %v16230_v32 = vld [vmem:[%s17468_s9 + $0x1e0c] ss:$16 sps:$4 sm:$0xff]  }
 0x3d7   : > { %10907 = vmatprep.mubr.bf16.mxu0 %v18548_v33  ;;  %11932 = vmatprep.mubr.bf16.mxu1 %v18548_v33 }
 0x3d9   : > { %10878 = vmatpush1.bf16.msra.mxu0 %v16134_v22  ;;  %11903 = vmatpush1.bf16.msra.mxu1 %v16137_v25  ;;  %v18614_v22 = vrot.slane %v18533_v26, %v17527_v49  ;;  %v16225_v25 = vld [vmem:[%s17468_s9 + $0x1e00] ss:$16 sps:$4 sm:$0xff]  }
 0x3da   : > { %10879 = vmatprep.subr.bf16.mxu0 %v16142_v34  ;;  %11904 = vmatprep.subr.bf16.mxu1 %v16145_v36  ;;  %v16228_v34 = vld [vmem:[%s17468_s9 + $0x1e08] ss:$16 sps:$4 sm:$0xff]   ;;  %v16233_v36 = vld [vmem:[%s17468_s9 + $0x1e24] ss:$16 sps:$4 sm:$0xff]   ;;  %v16231_v26 = vld [vmem:[%s17468_s9 + $0x1e20] ss:$16 sps:$4 sm:$0xff]  }
 0x3dd   : > { %10880 = vmatpush1.bf16.msra.mxu0 %v16140_v37  ;;  %11905 = vmatpush1.bf16.msra.mxu1 %v16143_v39  ;;  %v16236_v37 = vld [vmem:[%s17468_s9 + $0x1e2c] ss:$16 sps:$4 sm:$0xff]   ;;  %v2130_v39 = vcombine.high %v18548_v33, %v18548_v33  ;;  %v16237_v33 = vld [vmem:[%s17468_s9 + $0x1e40] ss:$16 sps:$4 sm:$0xff]  }
 0x3de   : > { %10881 = vmatprep.subr.bf16.mxu0 %v16148_v40  ;;  %11906 = vmatprep.subr.bf16.mxu1 %v16151_v21  ;;  %v16234_v40 = vld [vmem:[%s17468_s9 + $0x1e28] ss:$16 sps:$4 sm:$0xff]   ;;  %v16239_v21 = vld [vmem:[%s17468_s9 + $0x1e44] ss:$16 sps:$4 sm:$0xff]  }
 0x3e1   : > { %10882 = vmatpush1.bf16.msra.mxu0 %v16146_v41  ;;  %11907 = vmatpush1.bf16.msra.mxu1 %v16149_v42  ;;  %v16242_v41 = vld [vmem:[%s17468_s9 + $0x1e4c] ss:$16 sps:$4 sm:$0xff]   ;;  %v16240_v42 = vld [vmem:[%s17468_s9 + $0x1e48] ss:$16 sps:$4 sm:$0xff]  }
 0x3e2   : > { %10883 = vmatprep.subr.bf16.mxu0 %v16154_v44  ;;  %11908 = vmatprep.subr.bf16.mxu1 %v16157_v45  ;;  %v16245_v44 = vld [vmem:[%s17468_s9 + $0x1e64] ss:$16 sps:$4 sm:$0xff]   ;;  %v16248_v45 = vld [vmem:[%s17468_s9 + $0x1e6c] ss:$16 sps:$4 sm:$0xff]  }
 0x3e5   : > { %10884 = vmatpush1.bf16.msra.mxu0 %v16152_v46  ;;  %11909 = vmatpush1.bf16.msra.mxu1 %v16155_v47  ;;  %v16243_v46 = vld [vmem:[%s17468_s9 + $0x1e60] ss:$16 sps:$4 sm:$0xff]   ;;  %v16246_v47 = vld [vmem:[%s17468_s9 + $0x1e68] ss:$16 sps:$4 sm:$0xff]  }
 0x3e6   : > { %10885 = vmatprep.subr.bf16.mxu0 %v16160_v50  ;;  %11910 = vmatprep.subr.bf16.mxu1 %v16163_v51  ;;  %v16251_v50 = vld [vmem:[%s17468_s9 + $0x1e84] ss:$16 sps:$4 sm:$0xff]   ;;  %v16254_v51 = vld [vmem:[%s17468_s9 + $0x1e8c] ss:$16 sps:$4 sm:$0xff]  }
 0x3e9   : > { %10886 = vmatpush1.bf16.msra.mxu0 %v16158_v53  ;;  %11911 = vmatpush1.bf16.msra.mxu1 %v16161_v54  ;;  %v16249_v53 = vld [vmem:[%s17468_s9 + $0x1e80] ss:$16 sps:$4 sm:$0xff]   ;;  %v16252_v54 = vld [vmem:[%s17468_s9 + $0x1e88] ss:$16 sps:$4 sm:$0xff]  }
 0x3ea   : > { %10887 = vmatprep.subr.bf16.mxu0 %v16166_v55  ;;  %11912 = vmatprep.subr.bf16.mxu1 %v16169_v38  ;;  %v16257_v55 = vld [vmem:[%s17468_s9 + $0x1ea4] ss:$16 sps:$4 sm:$0xff]   ;;  %v16260_v38 = vld [vmem:[%s17468_s9 + $0x1eac] ss:$16 sps:$4 sm:$0xff]  }
 0x3ed   : > { %10888 = vmatpush1.bf16.msra.mxu0 %v16164_v56  ;;  %11913 = vmatpush1.bf16.msra.mxu1 %v16167_v57  ;;  %v16255_v56 = vld [vmem:[%s17468_s9 + $0x1ea0] ss:$16 sps:$4 sm:$0xff]   ;;  %v16258_v57 = vld [vmem:[%s17468_s9 + $0x1ea8] ss:$16 sps:$4 sm:$0xff]  }
 0x3ee   : > { %10889 = vmatprep.subr.bf16.mxu0 %v16172_v58  ;;  %11914 = vmatprep.subr.bf16.mxu1 %v16175_v48  ;;  %v16263_v58 = vld [vmem:[%s17468_s9 + $0x1ec4] ss:$16 sps:$4 sm:$0xff]   ;;  %v16266_v48 = vld [vmem:[%s17468_s9 + $0x1ecc] ss:$16 sps:$4 sm:$0xff]  }
 0x3f1   : > { %10890 = vmatpush1.bf16.msra.mxu0 %v16170_v59  ;;  %11915 = vmatpush1.bf16.msra.mxu1 %v16173_v61  ;;  %v16261_v59 = vld [vmem:[%s17468_s9 + $0x1ec0] ss:$16 sps:$4 sm:$0xff]   ;;  %v16264_v61 = vld [vmem:[%s17468_s9 + $0x1ec8] ss:$16 sps:$4 sm:$0xff]  }
 0x3f2   : > { %10891 = vmatprep.subr.bf16.mxu0 %v16178_v62  ;;  %11916 = vmatprep.subr.bf16.mxu1 %v16181_v0  ;;  %v16269_v62 = vld [vmem:[%s17468_s9 + $0x1ee4] ss:$16 sps:$4 sm:$0xff]   ;;  %v16272_v0 = vld [vmem:[%s17468_s9 + $0x1eec] ss:$16 sps:$4 sm:$0xff]  }
 0x3f5   : > { %10892 = vmatpush1.bf16.msra.mxu0 %v16176_v1  ;;  %11917 = vmatpush1.bf16.msra.mxu1 %v16179_v35  ;;  %v16267_v1 = vld [vmem:[%s17468_s9 + $0x1ee0] ss:$16 sps:$4 sm:$0xff]   ;;  %v16270_v35 = vld [vmem:[%s17468_s9 + $0x1ee8] ss:$16 sps:$4 sm:$0xff]  }
 0x3f6   : > { %10893 = vmatprep.subr.bf16.mxu0 %v16184_v2  ;;  %11918 = vmatprep.subr.bf16.mxu1 %v16187_v3  ;;  %v16275_v2 = vld [vmem:[%s17468_s9 + $0x1f04] ss:$16 sps:$4 sm:$0xff]   ;;  %v16278_v3 = vld [vmem:[%s17468_s9 + $0x1f0c] ss:$16 sps:$4 sm:$0xff]  }
 0x3f9   : > { %10894 = vmatpush1.bf16.msra.mxu0 %v16182_v4  ;;  %11919 = vmatpush1.bf16.msra.mxu1 %v16185_v5  ;;  %v16273_v4 = vld [vmem:[%s17468_s9 + $0x1f00] ss:$16 sps:$4 sm:$0xff]   ;;  %v16276_v5 = vld [vmem:[%s17468_s9 + $0x1f08] ss:$16 sps:$4 sm:$0xff]  }
 0x3fa   : > { %10895 = vmatprep.subr.bf16.mxu0 %v16190_v6  ;;  %11920 = vmatprep.subr.bf16.mxu1 %v16193_v7  ;;  %v16281_v6 = vld [vmem:[%s17468_s9 + $0x1f24] ss:$16 sps:$4 sm:$0xff]   ;;  %v16284_v7 = vld [vmem:[%s17468_s9 + $0x1f2c] ss:$16 sps:$4 sm:$0xff]  }
 0x3fd   : > { %10896 = vmatpush1.bf16.msra.mxu0 %v16188_v9  ;;  %11921 = vmatpush1.bf16.msra.mxu1 %v16191_v11  ;;  %v16279_v9 = vld [vmem:[%s17468_s9 + $0x1f20] ss:$16 sps:$4 sm:$0xff]   ;;  %v16282_v11 = vld [vmem:[%s17468_s9 + $0x1f28] ss:$16 sps:$4 sm:$0xff]  }
 0x3fe   : > { %10897 = vmatprep.subr.bf16.mxu0 %v16196_v12  ;;  %11922 = vmatprep.subr.bf16.mxu1 %v16199_v14  ;;  %v16287_v12 = vld [vmem:[%s17468_s9 + $0x1f44] ss:$16 sps:$4 sm:$0xff]   ;;  %v16290_v14 = vld [vmem:[%s17468_s9 + $0x1f4c] ss:$16 sps:$4 sm:$0xff]  }
 0x401   : > { %10898 = vmatpush1.bf16.msra.mxu0 %v16194_v63  ;;  %11923 = vmatpush1.bf16.msra.mxu1 %v16197_v16  ;;  %v16285_v63 = vld [vmem:[%s17468_s9 + $0x1f40] ss:$16 sps:$4 sm:$0xff]   ;;  %v16288_v16 = vld [vmem:[%s17468_s9 + $0x1f48] ss:$16 sps:$4 sm:$0xff]  }
 0x402   : > { %10899 = vmatprep.subr.bf16.mxu0 %v16202_v52  ;;  %11924 = vmatprep.subr.bf16.mxu1 %v16205_v17  ;;  %v16293_v52 = vld [vmem:[%s17468_s9 + $0x1f64] ss:$16 sps:$4 sm:$0xff]   ;;  %v16296_v17 = vld [vmem:[%s17468_s9 + $0x1f6c] ss:$16 sps:$4 sm:$0xff]  }
 0x405   : > { %10900 = vmatpush1.bf16.msra.mxu0 %v16200_v8  ;;  %11925 = vmatpush1.bf16.msra.mxu1 %v16203_v18  ;;  %v16291_v8 = vld [vmem:[%s17468_s9 + $0x1f60] ss:$16 sps:$4 sm:$0xff]   ;;  %v16294_v18 = vld [vmem:[%s17468_s9 + $0x1f68] ss:$16 sps:$4 sm:$0xff]  }
 0x406   : > { %10901 = vmatprep.subr.bf16.mxu0 %v16208_v19  ;;  %11926 = vmatprep.subr.bf16.mxu1 %v16211_v13  ;;  %v16299_v19 = vld [vmem:[%s17468_s9 + $0x1f84] ss:$16 sps:$4 sm:$0xff]   ;;  %v16302_v13 = vld [vmem:[%s17468_s9 + $0x1f8c] ss:$16 sps:$4 sm:$0xff]  }
 0x409   : > { %10902 = vmatpush1.bf16.msra.mxu0 %v16206_v23  ;;  %11927 = vmatpush1.bf16.msra.mxu1 %v16209_v24  ;;  %v16297_v23 = vld [vmem:[%s17468_s9 + $0x1f80] ss:$16 sps:$4 sm:$0xff]   ;;  %v16300_v24 = vld [vmem:[%s17468_s9 + $0x1f88] ss:$16 sps:$4 sm:$0xff]  }
 0x40a   : > { %10903 = vmatprep.subr.bf16.mxu0 %v16214_v60  ;;  %11928 = vmatprep.subr.bf16.mxu1 %v16217_v27  ;;  %v16305_v60 = vld [vmem:[%s17468_s9 + $0x1fa4] ss:$16 sps:$4 sm:$0xff]   ;;  %v16308_v27 = vld [vmem:[%s17468_s9 + $0x1fac] ss:$16 sps:$4 sm:$0xff]  }
 0x40d   : > { %10904 = vmatpush1.bf16.msra.mxu0 %v16212_v28  ;;  %11929 = vmatpush1.bf16.msra.mxu1 %v16215_v10  ;;  %v16303_v28 = vld [vmem:[%s17468_s9 + $0x1fa0] ss:$16 sps:$4 sm:$0xff]   ;;  %v16306_v10 = vld [vmem:[%s17468_s9 + $0x1fa8] ss:$16 sps:$4 sm:$0xff]  }
 0x40e   : > { %10905 = vmatprep.subr.bf16.mxu0 %v16220_v29  ;;  %11930 = vmatprep.subr.bf16.mxu1 %v16223_v30  ;;  %v16311_v29 = vld [vmem:[%s17468_s9 + $0x1fc4] ss:$16 sps:$4 sm:$0xff]   ;;  %v16314_v30 = vld [vmem:[%s17468_s9 + $0x1fcc] ss:$16 sps:$4 sm:$0xff]  }
 0x411   : > { %10906 = vmatpush1.bf16.msra.mxu0 %v16218_v15  ;;  %11931 = vmatpush1.bf16.msra.mxu1 %v16221_v20  ;;  %v18679_v15 = vld [vmem:[%s19465_s0 + $0x20] sm:$0xff] }
 0x412   : > { %10916 = vmatprep.subr.bf16.mxu0 %v16227_v31  ;;  %11941 = vmatprep.subr.bf16.mxu1 %v16230_v32  ;;  %v16309_v20 = vld [vmem:[%s17468_s9 + $0x1fc0] ss:$16 sps:$4 sm:$0xff]   ;;  %v16312_v31 = vld [vmem:[%s17468_s9 + $0x1fc8] ss:$16 sps:$4 sm:$0xff]   ;;  %v16317_v32 = vld [vmem:[%s17468_s9 + $0x1fe4] ss:$16 sps:$4 sm:$0xff]  }
 0x414   : > { %10908 = vmatmul.mubr.bf16.vlgmr.msra.gmra.mrb[0].mxu0 %v18614_v22  ;;  %11933 = vmatmul.mubr.bf16.vlgmr.msra.gmra.mrb[0].mxu1 %v18614_v22 }
 0x415   : > { %10917 = vmatpush1.bf16.msra.mxu0 %v16225_v25  ;;  %11942 = vmatpush1.bf16.msra.mxu1 %v16228_v34  ;;  %v16320_v25 = vld [vmem:[%s17468_s9 + $0x1fec] ss:$16 sps:$4 sm:$0xff]   ;;  %v18687_v34 = vrot.slane %v18679_v15, %v17527_v49 }
 0x416   : > { %10918 = vmatprep.subr.bf16.mxu0 %v16233_v36  ;;  %11943 = vmatprep.subr.bf16.mxu1 %v16236_v37  ;;  %v16315_v36 = vld [vmem:[%s17468_s9 + $0x1fe0] ss:$16 sps:$4 sm:$0xff]   ;;  %v16318_v37 = vld [vmem:[%s17468_s9 + $0x1fe8] ss:$16 sps:$4 sm:$0xff]  }
 0x417   : > { %10948 = vmatprep.mubr.bf16.mxu0 %v2130_v39  ;;  %11973 = vmatprep.mubr.bf16.mxu1 %v2130_v39  ;;  %v16323_v39 = vld [vmem:[%s17468_s9 + $0x2004] ss:$16 sps:$4 sm:$0xff]  }
 0x419   : > { %10919 = vmatpush1.bf16.msra.mxu0 %v16231_v26  ;;  %11944 = vmatpush1.bf16.msra.mxu1 %v16234_v40  ;;  %v16326_v26 = vld [vmem:[%s17468_s9 + $0x200c] ss:$16 sps:$4 sm:$0xff]   ;;  %v2146_v40 = vcombine.high %v18687_v34, %v18687_v34 }
 0x41a   : > { %10920 = vmatprep.subr.bf16.mxu0 %v16239_v21  ;;  %11945 = vmatprep.subr.bf16.mxu1 %v16242_v41  ;;  %v2128_v21 = vcombine.high %v18614_v22, %v18614_v22  ;;  %v16321_v41 = vld [vmem:[%s17468_s9 + $0x2000] ss:$16 sps:$4 sm:$0xff]  }
 0x41b   : > { %v16327_v22 = vld [vmem:[%s17468_s9 + $0x2020] ss:$16 sps:$4 sm:$0xff]  }
 0x41d   : > { %10921 = vmatpush1.bf16.msra.mxu0 %v16237_v33  ;;  %11946 = vmatpush1.bf16.msra.mxu1 %v16240_v42  ;;  %v16324_v33 = vld [vmem:[%s17468_s9 + $0x2008] ss:$16 sps:$4 sm:$0xff]   ;;  %v16329_v42 = vld [vmem:[%s17468_s9 + $0x2024] ss:$16 sps:$4 sm:$0xff]  }
 0x41e   : > { %10922 = vmatprep.subr.bf16.mxu0 %v16245_v44  ;;  %11947 = vmatprep.subr.bf16.mxu1 %v16248_v45  ;;  %v16332_v44 = vld [vmem:[%s17468_s9 + $0x202c] ss:$16 sps:$4 sm:$0xff]   ;;  %v18702_v45 = vrot.slane %v2146_v40, %v17527_v49  ;;  %v16408_v40 = vld [vmem:[%s17468_s9 + $0x21c8] ss:$16 sps:$4 sm:$0xff]  }
 0x421   : > { %10923 = vmatpush1.bf16.msra.mxu0 %v16243_v46  ;;  %11948 = vmatpush1.bf16.msra.mxu1 %v16246_v47  ;;  %v16330_v46 = vld [vmem:[%s17468_s9 + $0x2028] ss:$16 sps:$4 sm:$0xff]   ;;  %v16335_v47 = vld [vmem:[%s17468_s9 + $0x2044] ss:$16 sps:$4 sm:$0xff]  }
 0x422   : > { %10924 = vmatprep.subr.bf16.mxu0 %v16251_v50  ;;  %11949 = vmatprep.subr.bf16.mxu1 %v16254_v51  ;;  %v16338_v50 = vld [vmem:[%s17468_s9 + $0x204c] ss:$16 sps:$4 sm:$0xff]   ;;  %v16333_v51 = vld [vmem:[%s17468_s9 + $0x2040] ss:$16 sps:$4 sm:$0xff]  }
 0x425   : > { %10925 = vmatpush1.bf16.msra.mxu0 %v16249_v53  ;;  %11950 = vmatpush1.bf16.msra.mxu1 %v16252_v54  ;;  %v16336_v53 = vld [vmem:[%s17468_s9 + $0x2048] ss:$16 sps:$4 sm:$0xff]   ;;  %v16341_v54 = vld [vmem:[%s17468_s9 + $0x2064] ss:$16 sps:$4 sm:$0xff]  }
 0x426   : > { %10926 = vmatprep.subr.bf16.mxu0 %v16257_v55  ;;  %11951 = vmatprep.subr.bf16.mxu1 %v16260_v38  ;;  %v16344_v55 = vld [vmem:[%s17468_s9 + $0x206c] ss:$16 sps:$4 sm:$0xff]   ;;  %v16339_v38 = vld [vmem:[%s17468_s9 + $0x2060] ss:$16 sps:$4 sm:$0xff]  }
 0x429   : > { %10927 = vmatpush1.bf16.msra.mxu0 %v16255_v56  ;;  %11952 = vmatpush1.bf16.msra.mxu1 %v16258_v57  ;;  %v16342_v56 = vld [vmem:[%s17468_s9 + $0x2068] ss:$16 sps:$4 sm:$0xff]   ;;  %v16347_v57 = vld [vmem:[%s17468_s9 + $0x2084] ss:$16 sps:$4 sm:$0xff]  }
 0x42a   : > { %10928 = vmatprep.subr.bf16.mxu0 %v16263_v58  ;;  %11953 = vmatprep.subr.bf16.mxu1 %v16266_v48  ;;  %v16350_v58 = vld [vmem:[%s17468_s9 + $0x208c] ss:$16 sps:$4 sm:$0xff]   ;;  %v16345_v48 = vld [vmem:[%s17468_s9 + $0x2080] ss:$16 sps:$4 sm:$0xff]  }
 0x42d   : > { %10929 = vmatpush1.bf16.msra.mxu0 %v16261_v59  ;;  %11954 = vmatpush1.bf16.msra.mxu1 %v16264_v61  ;;  %v16348_v59 = vld [vmem:[%s17468_s9 + $0x2088] ss:$16 sps:$4 sm:$0xff]   ;;  %v16353_v61 = vld [vmem:[%s17468_s9 + $0x20a4] ss:$16 sps:$4 sm:$0xff]  }
 0x42e   : > { %10930 = vmatprep.subr.bf16.mxu0 %v16269_v62  ;;  %11955 = vmatprep.subr.bf16.mxu1 %v16272_v0  ;;  %v16356_v62 = vld [vmem:[%s17468_s9 + $0x20ac] ss:$16 sps:$4 sm:$0xff]   ;;  %v16351_v0 = vld [vmem:[%s17468_s9 + $0x20a0] ss:$16 sps:$4 sm:$0xff]  }
 0x431   : > { %10931 = vmatpush1.bf16.msra.mxu0 %v16267_v1  ;;  %11956 = vmatpush1.bf16.msra.mxu1 %v16270_v35  ;;  %v16354_v1 = vld [vmem:[%s17468_s9 + $0x20a8] ss:$16 sps:$4 sm:$0xff]   ;;  %v16359_v35 = vld [vmem:[%s17468_s9 + $0x20c4] ss:$16 sps:$4 sm:$0xff]  }
 0x432   : > { %10932 = vmatprep.subr.bf16.mxu0 %v16275_v2  ;;  %11957 = vmatprep.subr.bf16.mxu1 %v16278_v3  ;;  %v16362_v2 = vld [vmem:[%s17468_s9 + $0x20cc] ss:$16 sps:$4 sm:$0xff]   ;;  %v16357_v3 = vld [vmem:[%s17468_s9 + $0x20c0] ss:$16 sps:$4 sm:$0xff]  }
 0x435   : > { %10933 = vmatpush1.bf16.msra.mxu0 %v16273_v4  ;;  %11958 = vmatpush1.bf16.msra.mxu1 %v16276_v5  ;;  %v16360_v4 = vld [vmem:[%s17468_s9 + $0x20c8] ss:$16 sps:$4 sm:$0xff]   ;;  %v16365_v5 = vld [vmem:[%s17468_s9 + $0x20e4] ss:$16 sps:$4 sm:$0xff]  }
 0x436   : > { %10934 = vmatprep.subr.bf16.mxu0 %v16281_v6  ;;  %11959 = vmatprep.subr.bf16.mxu1 %v16284_v7  ;;  %v16368_v6 = vld [vmem:[%s17468_s9 + $0x20ec] ss:$16 sps:$4 sm:$0xff]   ;;  %v16363_v7 = vld [vmem:[%s17468_s9 + $0x20e0] ss:$16 sps:$4 sm:$0xff]  }
 0x439   : > { %10935 = vmatpush1.bf16.msra.mxu0 %v16279_v9  ;;  %11960 = vmatpush1.bf16.msra.mxu1 %v16282_v11  ;;  %v16366_v9 = vld [vmem:[%s17468_s9 + $0x20e8] ss:$16 sps:$4 sm:$0xff]   ;;  %v16371_v11 = vld [vmem:[%s17468_s9 + $0x2104] ss:$16 sps:$4 sm:$0xff]  }
 0x43a   : > { %10936 = vmatprep.subr.bf16.mxu0 %v16287_v12  ;;  %11961 = vmatprep.subr.bf16.mxu1 %v16290_v14  ;;  %v16374_v12 = vld [vmem:[%s17468_s9 + $0x210c] ss:$16 sps:$4 sm:$0xff]   ;;  %v16369_v14 = vld [vmem:[%s17468_s9 + $0x2100] ss:$16 sps:$4 sm:$0xff]  }
 0x43d   : > { %10937 = vmatpush1.bf16.msra.mxu0 %v16285_v63  ;;  %11962 = vmatpush1.bf16.msra.mxu1 %v16288_v16  ;;  %v16372_v63 = vld [vmem:[%s17468_s9 + $0x2108] ss:$16 sps:$4 sm:$0xff]   ;;  %v16377_v16 = vld [vmem:[%s17468_s9 + $0x2124] ss:$16 sps:$4 sm:$0xff]  }
 0x43e   : > { %10938 = vmatprep.subr.bf16.mxu0 %v16293_v52  ;;  %11963 = vmatprep.subr.bf16.mxu1 %v16296_v17  ;;  %v16380_v52 = vld [vmem:[%s17468_s9 + $0x212c] ss:$16 sps:$4 sm:$0xff]   ;;  %v16375_v17 = vld [vmem:[%s17468_s9 + $0x2120] ss:$16 sps:$4 sm:$0xff]  }
 0x441   : > { %10939 = vmatpush1.bf16.msra.mxu0 %v16291_v8  ;;  %11964 = vmatpush1.bf16.msra.mxu1 %v16294_v18  ;;  %v16378_v8 = vld [vmem:[%s17468_s9 + $0x2128] ss:$16 sps:$4 sm:$0xff]   ;;  %v16383_v18 = vld [vmem:[%s17468_s9 + $0x2144] ss:$16 sps:$4 sm:$0xff]  }
 0x442   : > { %10940 = vmatprep.subr.bf16.mxu0 %v16299_v19  ;;  %11965 = vmatprep.subr.bf16.mxu1 %v16302_v13  ;;  %v16386_v19 = vld [vmem:[%s17468_s9 + $0x214c] ss:$16 sps:$4 sm:$0xff]   ;;  %v16381_v13 = vld [vmem:[%s17468_s9 + $0x2140] ss:$16 sps:$4 sm:$0xff]  }
 0x445   : > { %10941 = vmatpush1.bf16.msra.mxu0 %v16297_v23  ;;  %11966 = vmatpush1.bf16.msra.mxu1 %v16300_v24  ;;  %v16384_v23 = vld [vmem:[%s17468_s9 + $0x2148] ss:$16 sps:$4 sm:$0xff]   ;;  %v16389_v24 = vld [vmem:[%s17468_s9 + $0x2164] ss:$16 sps:$4 sm:$0xff]  }
 0x446   : > { %10942 = vmatprep.subr.bf16.mxu0 %v16305_v60  ;;  %11967 = vmatprep.subr.bf16.mxu1 %v16308_v27  ;;  %v16392_v60 = vld [vmem:[%s17468_s9 + $0x216c] ss:$16 sps:$4 sm:$0xff]   ;;  %v16387_v27 = vld [vmem:[%s17468_s9 + $0x2160] ss:$16 sps:$4 sm:$0xff]  }
 0x449   : > { %10943 = vmatpush1.bf16.msra.mxu0 %v16303_v28  ;;  %11968 = vmatpush1.bf16.msra.mxu1 %v16306_v10  ;;  %v16390_v28 = vld [vmem:[%s17468_s9 + $0x2168] ss:$16 sps:$4 sm:$0xff]   ;;  %v16395_v10 = vld [vmem:[%s17468_s9 + $0x2184] ss:$16 sps:$4 sm:$0xff]  }
 0x44a   : > { %10944 = vmatprep.subr.bf16.mxu0 %v16311_v29  ;;  %11969 = vmatprep.subr.bf16.mxu1 %v16314_v30  ;;  %v16398_v29 = vld [vmem:[%s17468_s9 + $0x218c] ss:$16 sps:$4 sm:$0xff]   ;;  %v16393_v30 = vld [vmem:[%s17468_s9 + $0x2180] ss:$16 sps:$4 sm:$0xff]  }
 0x44d   : > { %10945 = vmatpush1.bf16.msra.mxu0 %v16309_v20  ;;  %11970 = vmatpush1.bf16.msra.mxu1 %v16312_v31  ;;  %v16396_v20 = vld [vmem:[%s17468_s9 + $0x2188] ss:$16 sps:$4 sm:$0xff]   ;;  %v16401_v31 = vld [vmem:[%s17468_s9 + $0x21a4] ss:$16 sps:$4 sm:$0xff]  }
 0x44e   : > { %10946 = vmatprep.subr.bf16.mxu0 %v16317_v32  ;;  %11971 = vmatprep.subr.bf16.mxu1 %v16320_v25  ;;  %v16404_v32 = vld [vmem:[%s17468_s9 + $0x21ac] ss:$16 sps:$4 sm:$0xff]   ;;  %v16399_v25 = vld [vmem:[%s17468_s9 + $0x21a0] ss:$16 sps:$4 sm:$0xff]  }
 0x451   : > { %10947 = vmatpush1.bf16.msra.mxu0 %v16315_v36  ;;  %11972 = vmatpush1.bf16.msra.mxu1 %v16318_v37  ;;  %v16402_v36 = vld [vmem:[%s17468_s9 + $0x21a8] ss:$16 sps:$4 sm:$0xff]   ;;  %v16407_v37 = vld [vmem:[%s17468_s9 + $0x21c4] ss:$16 sps:$4 sm:$0xff]  }
 0x452   : > { %10957 = vmatprep.subr.bf16.mxu0 %v16323_v39  ;;  %11982 = vmatprep.subr.bf16.mxu1 %v16326_v26  ;;  %v16410_v39 = vld [vmem:[%s17468_s9 + $0x21cc] ss:$16 sps:$4 sm:$0xff]   ;;  %v16405_v26 = vld [vmem:[%s17468_s9 + $0x21c0] ss:$16 sps:$4 sm:$0xff]  }
 0x454   : > { %10949 = vmatmul.mubr.bf16.vlgmr.msra.gmra.mrb[0].mxu0 %v2128_v21  ;;  %11974 = vmatmul.mubr.bf16.vlgmr.msra.gmra.mrb[0].mxu1 %v2128_v21  ;;  %v16413_v21 = vld [vmem:[%s17468_s9 + $0x21e4] ss:$16 sps:$4 sm:$0xff]  }
 0x455   : > { %10958 = vmatpush1.bf16.msra.mxu0 %v16321_v41  ;;  %11983 = vmatpush1.bf16.msra.mxu1 %v16324_v33  ;;  %v16416_v41 = vld [vmem:[%s17468_s9 + $0x21ec] ss:$16 sps:$4 sm:$0xff]   ;;  %v16411_v33 = vld [vmem:[%s17468_s9 + $0x21e0] ss:$16 sps:$4 sm:$0xff]  }
 0x456   : > { %10959 = vmatprep.subr.bf16.mxu0 %v16329_v42  ;;  %11984 = vmatprep.subr.bf16.mxu1 %v16332_v44  ;;  %v16414_v42 = vld [vmem:[%s17468_s9 + $0x21e8] ss:$16 sps:$4 sm:$0xff]   ;;  %v16419_v44 = vld [vmem:[%s17468_s9 + $0x2204] ss:$16 sps:$4 sm:$0xff]  }
 0x457   : > { %10989 = vmatprep.mubr.bf16.mxu0 %v18702_v45  ;;  %12014 = vmatprep.mubr.bf16.mxu1 %v18702_v45 }
 0x459   : > { %10960 = vmatpush1.bf16.msra.mxu0 %v16327_v22  ;;  %11985 = vmatpush1.bf16.msra.mxu1 %v16330_v46  ;;  %v16422_v22 = vld [vmem:[%s17468_s9 + $0x220c] ss:$16 sps:$4 sm:$0xff]   ;;  %v18768_v46 = vrot.slane %v18687_v34, %v17527_v49  ;;  %v16423_v34 = vld [vmem:[%s17468_s9 + $0x2220] ss:$16 sps:$4 sm:$0xff]  }
 0x45a   : > { %10961 = vmatprep.subr.bf16.mxu0 %v16335_v47  ;;  %11986 = vmatprep.subr.bf16.mxu1 %v16338_v50  ;;  %v16417_v47 = vld [vmem:[%s17468_s9 + $0x2200] ss:$16 sps:$4 sm:$0xff]   ;;  %v16420_v50 = vld [vmem:[%s17468_s9 + $0x2208] ss:$16 sps:$4 sm:$0xff]  }
 0x45d   : > { %10962 = vmatpush1.bf16.msra.mxu0 %v16333_v51  ;;  %11987 = vmatpush1.bf16.msra.mxu1 %v16336_v53  ;;  %v16425_v51 = vld [vmem:[%s17468_s9 + $0x2224] ss:$16 sps:$4 sm:$0xff]   ;;  %v16428_v53 = vld [vmem:[%s17468_s9 + $0x222c] ss:$16 sps:$4 sm:$0xff]  }
 0x45e   : > { %10963 = vmatprep.subr.bf16.mxu0 %v16341_v54  ;;  %11988 = vmatprep.subr.bf16.mxu1 %v16344_v55  ;;  %v2178_v54 = vcombine.high %v18702_v45, %v18702_v45  ;;  %v16426_v55 = vld [vmem:[%s17468_s9 + $0x2228] ss:$16 sps:$4 sm:$0xff]   ;;  %v16429_v45 = vld [vmem:[%s17468_s9 + $0x2240] ss:$16 sps:$4 sm:$0xff]  }
 0x461   : > { %10964 = vmatpush1.bf16.msra.mxu0 %v16339_v38  ;;  %11989 = vmatpush1.bf16.msra.mxu1 %v16342_v56  ;;  %v16431_v38 = vld [vmem:[%s17468_s9 + $0x2244] ss:$16 sps:$4 sm:$0xff]   ;;  %v16434_v56 = vld [vmem:[%s17468_s9 + $0x224c] ss:$16 sps:$4 sm:$0xff]  }
 0x462   : > { %10965 = vmatprep.subr.bf16.mxu0 %v16347_v57  ;;  %11990 = vmatprep.subr.bf16.mxu1 %v16350_v58  ;;  %v16432_v57 = vld [vmem:[%s17468_s9 + $0x2248] ss:$16 sps:$4 sm:$0xff]   ;;  %v16437_v58 = vld [vmem:[%s17468_s9 + $0x2264] ss:$16 sps:$4 sm:$0xff]  }
 0x465   : > { %10966 = vmatpush1.bf16.msra.mxu0 %v16345_v48  ;;  %11991 = vmatpush1.bf16.msra.mxu1 %v16348_v59  ;;  %v16440_v48 = vld [vmem:[%s17468_s9 + $0x226c] ss:$16 sps:$4 sm:$0xff]   ;;  %v16435_v59 = vld [vmem:[%s17468_s9 + $0x2260] ss:$16 sps:$4 sm:$0xff]  }
 0x466   : > { %10967 = vmatprep.subr.bf16.mxu0 %v16353_v61  ;;  %11992 = vmatprep.subr.bf16.mxu1 %v16356_v62  ;;  %v16438_v61 = vld [vmem:[%s17468_s9 + $0x2268] ss:$16 sps:$4 sm:$0xff]   ;;  %v16443_v62 = vld [vmem:[%s17468_s9 + $0x2284] ss:$16 sps:$4 sm:$0xff]  }
 0x469   : > { %10968 = vmatpush1.bf16.msra.mxu0 %v16351_v0  ;;  %11993 = vmatpush1.bf16.msra.mxu1 %v16354_v1  ;;  %v16446_v0 = vld [vmem:[%s17468_s9 + $0x228c] ss:$16 sps:$4 sm:$0xff]   ;;  %v16441_v1 = vld [vmem:[%s17468_s9 + $0x2280] ss:$16 sps:$4 sm:$0xff]  }
 0x46a   : > { %10969 = vmatprep.subr.bf16.mxu0 %v16359_v35  ;;  %11994 = vmatprep.subr.bf16.mxu1 %v16362_v2  ;;  %v16444_v35 = vld [vmem:[%s17468_s9 + $0x2288] ss:$16 sps:$4 sm:$0xff]   ;;  %v16449_v2 = vld [vmem:[%s17468_s9 + $0x22a4] ss:$16 sps:$4 sm:$0xff]  }
 0x46d   : > { %10970 = vmatpush1.bf16.msra.mxu0 %v16357_v3  ;;  %11995 = vmatpush1.bf16.msra.mxu1 %v16360_v4  ;;  %v16452_v3 = vld [vmem:[%s17468_s9 + $0x22ac] ss:$16 sps:$4 sm:$0xff]   ;;  %v16447_v4 = vld [vmem:[%s17468_s9 + $0x22a0] ss:$16 sps:$4 sm:$0xff]  }
 0x46e   : > { %10971 = vmatprep.subr.bf16.mxu0 %v16365_v5  ;;  %11996 = vmatprep.subr.bf16.mxu1 %v16368_v6  ;;  %v16450_v5 = vld [vmem:[%s17468_s9 + $0x22a8] ss:$16 sps:$4 sm:$0xff]   ;;  %v16455_v6 = vld [vmem:[%s17468_s9 + $0x22c4] ss:$16 sps:$4 sm:$0xff]  }
 0x471   : > { %10972 = vmatpush1.bf16.msra.mxu0 %v16363_v7  ;;  %11997 = vmatpush1.bf16.msra.mxu1 %v16366_v9  ;;  %v16458_v7 = vld [vmem:[%s17468_s9 + $0x22cc] ss:$16 sps:$4 sm:$0xff]   ;;  %v16453_v9 = vld [vmem:[%s17468_s9 + $0x22c0] ss:$16 sps:$4 sm:$0xff]  }
 0x472   : > { %10973 = vmatprep.subr.bf16.mxu0 %v16371_v11  ;;  %11998 = vmatprep.subr.bf16.mxu1 %v16374_v12  ;;  %v16456_v11 = vld [vmem:[%s17468_s9 + $0x22c8] ss:$16 sps:$4 sm:$0xff]   ;;  %v16461_v12 = vld [vmem:[%s17468_s9 + $0x22e4] ss:$16 sps:$4 sm:$0xff]  }
 0x475   : > { %10974 = vmatpush1.bf16.msra.mxu0 %v16369_v14  ;;  %11999 = vmatpush1.bf16.msra.mxu1 %v16372_v63  ;;  %v16464_v14 = vld [vmem:[%s17468_s9 + $0x22ec] ss:$16 sps:$4 sm:$0xff]   ;;  %v16459_v63 = vld [vmem:[%s17468_s9 + $0x22e0] ss:$16 sps:$4 sm:$0xff]  }
 0x476   : > { %10975 = vmatprep.subr.bf16.mxu0 %v16377_v16  ;;  %12000 = vmatprep.subr.bf16.mxu1 %v16380_v52  ;;  %v16462_v16 = vld [vmem:[%s17468_s9 + $0x22e8] ss:$16 sps:$4 sm:$0xff]   ;;  %v16467_v52 = vld [vmem:[%s17468_s9 + $0x2304] ss:$16 sps:$4 sm:$0xff]  }
 0x479   : > { %10976 = vmatpush1.bf16.msra.mxu0 %v16375_v17  ;;  %12001 = vmatpush1.bf16.msra.mxu1 %v16378_v8  ;;  %v16470_v17 = vld [vmem:[%s17468_s9 + $0x230c] ss:$16 sps:$4 sm:$0xff]   ;;  %v16465_v8 = vld [vmem:[%s17468_s9 + $0x2300] ss:$16 sps:$4 sm:$0xff]  }
 0x47a   : > { %10977 = vmatprep.subr.bf16.mxu0 %v16383_v18  ;;  %12002 = vmatprep.subr.bf16.mxu1 %v16386_v19  ;;  %v16468_v18 = vld [vmem:[%s17468_s9 + $0x2308] ss:$16 sps:$4 sm:$0xff]   ;;  %v16473_v19 = vld [vmem:[%s17468_s9 + $0x2324] ss:$16 sps:$4 sm:$0xff]  }
 0x47d   : > { %10978 = vmatpush1.bf16.msra.mxu0 %v16381_v13  ;;  %12003 = vmatpush1.bf16.msra.mxu1 %v16384_v23  ;;  %v16476_v13 = vld [vmem:[%s17468_s9 + $0x232c] ss:$16 sps:$4 sm:$0xff]   ;;  %v16471_v23 = vld [vmem:[%s17468_s9 + $0x2320] ss:$16 sps:$4 sm:$0xff]  }
 0x47e   : > { %10979 = vmatprep.subr.bf16.mxu0 %v16389_v24  ;;  %12004 = vmatprep.subr.bf16.mxu1 %v16392_v60  ;;  %v16474_v24 = vld [vmem:[%s17468_s9 + $0x2328] ss:$16 sps:$4 sm:$0xff]   ;;  %v16479_v60 = vld [vmem:[%s17468_s9 + $0x2344] ss:$16 sps:$4 sm:$0xff]  }
 0x481   : > { %10980 = vmatpush1.bf16.msra.mxu0 %v16387_v27  ;;  %12005 = vmatpush1.bf16.msra.mxu1 %v16390_v28  ;;  %v16482_v27 = vld [vmem:[%s17468_s9 + $0x234c] ss:$16 sps:$4 sm:$0xff]   ;;  %v16477_v28 = vld [vmem:[%s17468_s9 + $0x2340] ss:$16 sps:$4 sm:$0xff]  }
 0x482   : > { %10981 = vmatprep.subr.bf16.mxu0 %v16395_v10  ;;  %12006 = vmatprep.subr.bf16.mxu1 %v16398_v29  ;;  %v16480_v10 = vld [vmem:[%s17468_s9 + $0x2348] ss:$16 sps:$4 sm:$0xff]   ;;  %v16485_v29 = vld [vmem:[%s17468_s9 + $0x2364] ss:$16 sps:$4 sm:$0xff]  }
 0x485   : > { %10982 = vmatpush1.bf16.msra.mxu0 %v16393_v30  ;;  %12007 = vmatpush1.bf16.msra.mxu1 %v16396_v20  ;;  %v16488_v30 = vld [vmem:[%s17468_s9 + $0x236c] ss:$16 sps:$4 sm:$0xff]   ;;  %v16483_v20 = vld [vmem:[%s17468_s9 + $0x2360] ss:$16 sps:$4 sm:$0xff]  }
 0x486   : > { %10983 = vmatprep.subr.bf16.mxu0 %v16401_v31  ;;  %12008 = vmatprep.subr.bf16.mxu1 %v16404_v32  ;;  %v16486_v31 = vld [vmem:[%s17468_s9 + $0x2368] ss:$16 sps:$4 sm:$0xff]   ;;  %v16491_v32 = vld [vmem:[%s17468_s9 + $0x2384] ss:$16 sps:$4 sm:$0xff]  }
 0x489   : > { %10984 = vmatpush1.bf16.msra.mxu0 %v16399_v25  ;;  %12009 = vmatpush1.bf16.msra.mxu1 %v16402_v36  ;;  %v16494_v25 = vld [vmem:[%s17468_s9 + $0x238c] ss:$16 sps:$4 sm:$0xff]   ;;  %v16489_v36 = vld [vmem:[%s17468_s9 + $0x2380] ss:$16 sps:$4 sm:$0xff]  }
 0x48a   : > { %10985 = vmatprep.subr.bf16.mxu0 %v16407_v37  ;;  %12010 = vmatprep.subr.bf16.mxu1 %v16410_v39  ;;  %v16492_v37 = vld [vmem:[%s17468_s9 + $0x2388] ss:$16 sps:$4 sm:$0xff]   ;;  %v16497_v39 = vld [vmem:[%s17468_s9 + $0x23a4] ss:$16 sps:$4 sm:$0xff]  }
 0x48d   : > { %10986 = vmatpush1.bf16.msra.mxu0 %v16405_v26  ;;  %12011 = vmatpush1.bf16.msra.mxu1 %v16408_v40  ;;  %v16500_v26 = vld [vmem:[%s17468_s9 + $0x23ac] ss:$16 sps:$4 sm:$0xff]   ;;  %v16495_v40 = vld [vmem:[%s17468_s9 + $0x23a0] ss:$16 sps:$4 sm:$0xff]  }
 0x48e   : > { %10987 = vmatprep.subr.bf16.mxu0 %v16413_v21  ;;  %12012 = vmatprep.subr.bf16.mxu1 %v16416_v41  ;;  %v16498_v21 = vld [vmem:[%s17468_s9 + $0x23a8] ss:$16 sps:$4 sm:$0xff]   ;;  %v16503_v41 = vld [vmem:[%s17468_s9 + $0x23c4] ss:$16 sps:$4 sm:$0xff]  }
 0x491   : > { %10988 = vmatpush1.bf16.msra.mxu0 %v16411_v33  ;;  %12013 = vmatpush1.bf16.msra.mxu1 %v16414_v42  ;;  %v16506_v33 = vld [vmem:[%s17468_s9 + $0x23cc] ss:$16 sps:$4 sm:$0xff]   ;;  %v2131_v42 = vcombine.high %v18679_v15, %v18679_v15  ;;  %v16507_v15 = vld [vmem:[%s17468_s9 + $0x23e0] ss:$16 sps:$4 sm:$0xff]  }
 0x492   : > { %10998 = vmatprep.subr.bf16.mxu0 %v16419_v44  ;;  %12023 = vmatprep.subr.bf16.mxu1 %v16422_v22  ;;  %v16501_v44 = vld [vmem:[%s17468_s9 + $0x23c0] ss:$16 sps:$4 sm:$0xff]   ;;  %v16504_v22 = vld [vmem:[%s17468_s9 + $0x23c8] ss:$16 sps:$4 sm:$0xff]  }
 0x494   : > { %10990 = vmatmul.mubr.bf16.vlgmr.msra.gmra.mrb[0].mxu0 %v18768_v46  ;;  %12015 = vmatmul.mubr.bf16.vlgmr.msra.gmra.mrb[0].mxu1 %v18768_v46 }
 0x495   : > { %10999 = vmatpush1.bf16.msra.mxu0 %v16417_v47  ;;  %12024 = vmatpush1.bf16.msra.mxu1 %v16420_v50  ;;  %v16509_v47 = vld [vmem:[%s17468_s9 + $0x23e4] ss:$16 sps:$4 sm:$0xff]   ;;  %v16512_v50 = vld [vmem:[%s17468_s9 + $0x23ec] ss:$16 sps:$4 sm:$0xff]  }
 0x496   : > { %11000 = vmatprep.subr.bf16.mxu0 %v16425_v51  ;;  %12025 = vmatprep.subr.bf16.mxu1 %v16428_v53  ;;  %v18837_v51 = vrot.slane %v2131_v42, %v17527_v49  ;;  %v16510_v53 = vld [vmem:[%s17468_s9 + $0x23e8] ss:$16 sps:$4 sm:$0xff]  }
 0x497   : > { %11030 = vmatprep.mubr.bf16.mxu0 %v2178_v54  ;;  %12055 = vmatprep.mubr.bf16.mxu1 %v2178_v54  ;;  %v16515_v54 = vld [vmem:[%s17468_s9 + $0x2404] ss:$16 sps:$4 sm:$0xff]   ;;  %v16588_v42 = vld [vmem:[%s17468_s9 + $0x2588] ss:$16 sps:$4 sm:$0xff]  }
 0x499   : > { %11001 = vmatpush1.bf16.msra.mxu0 %v16423_v34  ;;  %12026 = vmatpush1.bf16.msra.mxu1 %v16426_v55  ;;  %v16518_v34 = vld [vmem:[%s17468_s9 + $0x240c] ss:$16 sps:$4 sm:$0xff]   ;;  %v2147_v55 = vcombine.high %v18837_v51, %v18837_v51 }
 0x49a   : > { %11002 = vmatprep.subr.bf16.mxu0 %v16431_v38  ;;  %12027 = vmatprep.subr.bf16.mxu1 %v16434_v56  ;;  %v2176_v38 = vcombine.high %v18768_v46, %v18768_v46  ;;  %v16513_v56 = vld [vmem:[%s17468_s9 + $0x2400] ss:$16 sps:$4 sm:$0xff]  }
 0x49b   : > { %v16519_v46 = vld [vmem:[%s17468_s9 + $0x2420] ss:$16 sps:$4 sm:$0xff]  }
 0x49d   : > { %11003 = vmatpush1.bf16.msra.mxu0 %v16429_v45  ;;  %12028 = vmatpush1.bf16.msra.mxu1 %v16432_v57  ;;  %v16516_v45 = vld [vmem:[%s17468_s9 + $0x2408] ss:$16 sps:$4 sm:$0xff]   ;;  %v16521_v57 = vld [vmem:[%s17468_s9 + $0x2424] ss:$16 sps:$4 sm:$0xff]  }
 0x49e   : > { %11004 = vmatprep.subr.bf16.mxu0 %v16437_v58  ;;  %12029 = vmatprep.subr.bf16.mxu1 %v16440_v48  ;;  %v16524_v58 = vld [vmem:[%s17468_s9 + $0x242c] ss:$16 sps:$4 sm:$0xff]   ;;  %v18852_v48 = vrot.slane %v2147_v55, %v17527_v49  ;;  %v16605_v55 = vld [vmem:[%s17468_s9 + $0x25e4] ss:$16 sps:$4 sm:$0xff]  }
 0x4a1   : > { %11005 = vmatpush1.bf16.msra.mxu0 %v16435_v59  ;;  %12030 = vmatpush1.bf16.msra.mxu1 %v16438_v61  ;;  %v16522_v59 = vld [vmem:[%s17468_s9 + $0x2428] ss:$16 sps:$4 sm:$0xff]   ;;  %v16527_v61 = vld [vmem:[%s17468_s9 + $0x2444] ss:$16 sps:$4 sm:$0xff]  }
 0x4a2   : > { %11006 = vmatprep.subr.bf16.mxu0 %v16443_v62  ;;  %12031 = vmatprep.subr.bf16.mxu1 %v16446_v0  ;;  %v16530_v62 = vld [vmem:[%s17468_s9 + $0x244c] ss:$16 sps:$4 sm:$0xff]   ;;  %v16525_v0 = vld [vmem:[%s17468_s9 + $0x2440] ss:$16 sps:$4 sm:$0xff]  }
 0x4a5   : > { %11007 = vmatpush1.bf16.msra.mxu0 %v16441_v1  ;;  %12032 = vmatpush1.bf16.msra.mxu1 %v16444_v35  ;;  %v16528_v1 = vld [vmem:[%s17468_s9 + $0x2448] ss:$16 sps:$4 sm:$0xff]   ;;  %v16533_v35 = vld [vmem:[%s17468_s9 + $0x2464] ss:$16 sps:$4 sm:$0xff]  }
 0x4a6   : > { %11008 = vmatprep.subr.bf16.mxu0 %v16449_v2  ;;  %12033 = vmatprep.subr.bf16.mxu1 %v16452_v3  ;;  %v16536_v2 = vld [vmem:[%s17468_s9 + $0x246c] ss:$16 sps:$4 sm:$0xff]   ;;  %v16531_v3 = vld [vmem:[%s17468_s9 + $0x2460] ss:$16 sps:$4 sm:$0xff]  }
 0x4a9   : > { %11009 = vmatpush1.bf16.msra.mxu0 %v16447_v4  ;;  %12034 = vmatpush1.bf16.msra.mxu1 %v16450_v5  ;;  %v16534_v4 = vld [vmem:[%s17468_s9 + $0x2468] ss:$16 sps:$4 sm:$0xff]   ;;  %v16539_v5 = vld [vmem:[%s17468_s9 + $0x2484] ss:$16 sps:$4 sm:$0xff]  }
 0x4aa   : > { %11010 = vmatprep.subr.bf16.mxu0 %v16455_v6  ;;  %12035 = vmatprep.subr.bf16.mxu1 %v16458_v7  ;;  %v16542_v6 = vld [vmem:[%s17468_s9 + $0x248c] ss:$16 sps:$4 sm:$0xff]   ;;  %v16537_v7 = vld [vmem:[%s17468_s9 + $0x2480] ss:$16 sps:$4 sm:$0xff]  }
 0x4ad   : > { %11011 = vmatpush1.bf16.msra.mxu0 %v16453_v9  ;;  %12036 = vmatpush1.bf16.msra.mxu1 %v16456_v11  ;;  %v16540_v9 = vld [vmem:[%s17468_s9 + $0x2488] ss:$16 sps:$4 sm:$0xff]   ;;  %v16545_v11 = vld [vmem:[%s17468_s9 + $0x24a4] ss:$16 sps:$4 sm:$0xff]  }
 0x4ae   : > { %11012 = vmatprep.subr.bf16.mxu0 %v16461_v12  ;;  %12037 = vmatprep.subr.bf16.mxu1 %v16464_v14  ;;  %v16548_v12 = vld [vmem:[%s17468_s9 + $0x24ac] ss:$16 sps:$4 sm:$0xff]   ;;  %v16543_v14 = vld [vmem:[%s17468_s9 + $0x24a0] ss:$16 sps:$4 sm:$0xff]  }
 0x4b1   : > { %11013 = vmatpush1.bf16.msra.mxu0 %v16459_v63  ;;  %12038 = vmatpush1.bf16.msra.mxu1 %v16462_v16  ;;  %v16546_v63 = vld [vmem:[%s17468_s9 + $0x24a8] ss:$16 sps:$4 sm:$0xff]   ;;  %v16551_v16 = vld [vmem:[%s17468_s9 + $0x24c4] ss:$16 sps:$4 sm:$0xff]  }
 0x4b2   : > { %11014 = vmatprep.subr.bf16.mxu0 %v16467_v52  ;;  %12039 = vmatprep.subr.bf16.mxu1 %v16470_v17  ;;  %v16554_v52 = vld [vmem:[%s17468_s9 + $0x24cc] ss:$16 sps:$4 sm:$0xff]   ;;  %v16549_v17 = vld [vmem:[%s17468_s9 + $0x24c0] ss:$16 sps:$4 sm:$0xff]  }
 0x4b5   : > { %11015 = vmatpush1.bf16.msra.mxu0 %v16465_v8  ;;  %12040 = vmatpush1.bf16.msra.mxu1 %v16468_v18  ;;  %v16552_v8 = vld [vmem:[%s17468_s9 + $0x24c8] ss:$16 sps:$4 sm:$0xff]   ;;  %v16557_v18 = vld [vmem:[%s17468_s9 + $0x24e4] ss:$16 sps:$4 sm:$0xff]  }
 0x4b6   : > { %11016 = vmatprep.subr.bf16.mxu0 %v16473_v19  ;;  %12041 = vmatprep.subr.bf16.mxu1 %v16476_v13  ;;  %v16560_v19 = vld [vmem:[%s17468_s9 + $0x24ec] ss:$16 sps:$4 sm:$0xff]   ;;  %v16555_v13 = vld [vmem:[%s17468_s9 + $0x24e0] ss:$16 sps:$4 sm:$0xff]  }
 0x4b9   : > { %11017 = vmatpush1.bf16.msra.mxu0 %v16471_v23  ;;  %12042 = vmatpush1.bf16.msra.mxu1 %v16474_v24  ;;  %v16558_v23 = vld [vmem:[%s17468_s9 + $0x24e8] ss:$16 sps:$4 sm:$0xff]   ;;  %v16563_v24 = vld [vmem:[%s17468_s9 + $0x2504] ss:$16 sps:$4 sm:$0xff]  }
 0x4ba   : > { %11018 = vmatprep.subr.bf16.mxu0 %v16479_v60  ;;  %12043 = vmatprep.subr.bf16.mxu1 %v16482_v27  ;;  %v16566_v60 = vld [vmem:[%s17468_s9 + $0x250c] ss:$16 sps:$4 sm:$0xff]   ;;  %v16561_v27 = vld [vmem:[%s17468_s9 + $0x2500] ss:$16 sps:$4 sm:$0xff]  }
 0x4bd   : > { %11019 = vmatpush1.bf16.msra.mxu0 %v16477_v28  ;;  %12044 = vmatpush1.bf16.msra.mxu1 %v16480_v10  ;;  %v16564_v28 = vld [vmem:[%s17468_s9 + $0x2508] ss:$16 sps:$4 sm:$0xff]   ;;  %v16569_v10 = vld [vmem:[%s17468_s9 + $0x2524] ss:$16 sps:$4 sm:$0xff]  }
 0x4be   : > { %11020 = vmatprep.subr.bf16.mxu0 %v16485_v29  ;;  %12045 = vmatprep.subr.bf16.mxu1 %v16488_v30  ;;  %v16572_v29 = vld [vmem:[%s17468_s9 + $0x252c] ss:$16 sps:$4 sm:$0xff]   ;;  %v16567_v30 = vld [vmem:[%s17468_s9 + $0x2520] ss:$16 sps:$4 sm:$0xff]  }
 0x4c1   : > { %11021 = vmatpush1.bf16.msra.mxu0 %v16483_v20  ;;  %12046 = vmatpush1.bf16.msra.mxu1 %v16486_v31  ;;  %v16570_v20 = vld [vmem:[%s17468_s9 + $0x2528] ss:$16 sps:$4 sm:$0xff]   ;;  %v16575_v31 = vld [vmem:[%s17468_s9 + $0x2544] ss:$16 sps:$4 sm:$0xff]  }
 0x4c2   : > { %11022 = vmatprep.subr.bf16.mxu0 %v16491_v32  ;;  %12047 = vmatprep.subr.bf16.mxu1 %v16494_v25  ;;  %v16578_v32 = vld [vmem:[%s17468_s9 + $0x254c] ss:$16 sps:$4 sm:$0xff]   ;;  %v16573_v25 = vld [vmem:[%s17468_s9 + $0x2540] ss:$16 sps:$4 sm:$0xff]  }
 0x4c5   : > { %11023 = vmatpush1.bf16.msra.mxu0 %v16489_v36  ;;  %12048 = vmatpush1.bf16.msra.mxu1 %v16492_v37  ;;  %v16576_v36 = vld [vmem:[%s17468_s9 + $0x2548] ss:$16 sps:$4 sm:$0xff]   ;;  %v16581_v37 = vld [vmem:[%s17468_s9 + $0x2564] ss:$16 sps:$4 sm:$0xff]  }
 0x4c6   : > { %11024 = vmatprep.subr.bf16.mxu0 %v16497_v39  ;;  %12049 = vmatprep.subr.bf16.mxu1 %v16500_v26  ;;  %v16584_v39 = vld [vmem:[%s17468_s9 + $0x256c] ss:$16 sps:$4 sm:$0xff]   ;;  %v16579_v26 = vld [vmem:[%s17468_s9 + $0x2560] ss:$16 sps:$4 sm:$0xff]  }
 0x4c9   : > { %11025 = vmatpush1.bf16.msra.mxu0 %v16495_v40  ;;  %12050 = vmatpush1.bf16.msra.mxu1 %v16498_v21  ;;  %v16582_v40 = vld [vmem:[%s17468_s9 + $0x2568] ss:$16 sps:$4 sm:$0xff]   ;;  %v16587_v21 = vld [vmem:[%s17468_s9 + $0x2584] ss:$16 sps:$4 sm:$0xff]  }
 0x4ca   : > { %11026 = vmatprep.subr.bf16.mxu0 %v16503_v41  ;;  %12051 = vmatprep.subr.bf16.mxu1 %v16506_v33  ;;  %v16590_v41 = vld [vmem:[%s17468_s9 + $0x258c] ss:$16 sps:$4 sm:$0xff]   ;;  %v16585_v33 = vld [vmem:[%s17468_s9 + $0x2580] ss:$16 sps:$4 sm:$0xff]  }
 0x4cd   : > { %11027 = vmatpush1.bf16.msra.mxu0 %v16501_v44  ;;  %12052 = vmatpush1.bf16.msra.mxu1 %v16504_v22  ;;  %v16593_v44 = vld [vmem:[%s17468_s9 + $0x25a4] ss:$16 sps:$4 sm:$0xff]   ;;  %v16596_v22 = vld [vmem:[%s17468_s9 + $0x25ac] ss:$16 sps:$4 sm:$0xff]  }
 0x4ce   : > { %11028 = vmatprep.subr.bf16.mxu0 %v16509_v47  ;;  %12053 = vmatprep.subr.bf16.mxu1 %v16512_v50  ;;  %v16591_v47 = vld [vmem:[%s17468_s9 + $0x25a0] ss:$16 sps:$4 sm:$0xff]   ;;  %v16594_v50 = vld [vmem:[%s17468_s9 + $0x25a8] ss:$16 sps:$4 sm:$0xff]  }
 0x4d1   : > { %11029 = vmatpush1.bf16.msra.mxu0 %v16507_v15  ;;  %12054 = vmatpush1.bf16.msra.mxu1 %v16510_v53  ;;  %v16599_v15 = vld [vmem:[%s17468_s9 + $0x25c4] ss:$16 sps:$4 sm:$0xff]   ;;  %v16602_v53 = vld [vmem:[%s17468_s9 + $0x25cc] ss:$16 sps:$4 sm:$0xff]  }
 0x4d2   : > { %11039 = vmatprep.subr.bf16.mxu0 %v16515_v54  ;;  %12064 = vmatprep.subr.bf16.mxu1 %v16518_v34  ;;  %v16597_v54 = vld [vmem:[%s17468_s9 + $0x25c0] ss:$16 sps:$4 sm:$0xff]   ;;  %v16600_v34 = vld [vmem:[%s17468_s9 + $0x25c8] ss:$16 sps:$4 sm:$0xff]  }
 0x4d4   : > { %11031 = vmatmul.mubr.bf16.vlgmr.msra.gmra.mrb[0].mxu0 %v2176_v38  ;;  %12056 = vmatmul.mubr.bf16.vlgmr.msra.gmra.mrb[0].mxu1 %v2176_v38  ;;  %v16608_v38 = vld [vmem:[%s17468_s9 + $0x25ec] ss:$16 sps:$4 sm:$0xff]  }
 0x4d5   : > { %11040 = vmatpush1.bf16.msra.mxu0 %v16513_v56  ;;  %12065 = vmatpush1.bf16.msra.mxu1 %v16516_v45  ;;  %v16603_v56 = vld [vmem:[%s17468_s9 + $0x25e0] ss:$16 sps:$4 sm:$0xff]   ;;  %v16606_v45 = vld [vmem:[%s17468_s9 + $0x25e8] ss:$16 sps:$4 sm:$0xff]  }
 0x4d6   : > { %11041 = vmatprep.subr.bf16.mxu0 %v16521_v57  ;;  %12066 = vmatprep.subr.bf16.mxu1 %v16524_v58  ;;  %v16612_v57 = vld [vmem:[%s17468_s9 + $0x2604] ss:$16 sps:$4 sm:$0xff]   ;;  %v16615_v58 = vld [vmem:[%s17468_s9 + $0x260c] ss:$16 sps:$4 sm:$0xff]  }
 0x4d7   : > { %11071 = vmatprep.mubr.bf16.mxu0 %v18852_v48  ;;  %12096 = vmatprep.mubr.bf16.mxu1 %v18852_v48 }
 0x4d9   : > { %11042 = vmatpush1.bf16.msra.mxu0 %v16519_v46  ;;  %12067 = vmatpush1.bf16.msra.mxu1 %v16522_v59  ;;  %v18918_v46 = vrot.slane %v18837_v51, %v17527_v49  ;;  %v16610_v59 = vld [vmem:[%s17468_s9 + $0x2600] ss:$16 sps:$4 sm:$0xff]  }
 0x4da   : > { %11043 = vmatprep.subr.bf16.mxu0 %v16527_v61  ;;  %12068 = vmatprep.subr.bf16.mxu1 %v16530_v62  ;;  %v16613_v61 = vld [vmem:[%s17468_s9 + $0x2608] ss:$16 sps:$4 sm:$0xff]   ;;  %v16618_v62 = vld [vmem:[%s17468_s9 + $0x2624] ss:$16 sps:$4 sm:$0xff]   ;;  %v16616_v51 = vld [vmem:[%s17468_s9 + $0x2620] ss:$16 sps:$4 sm:$0xff]  }
 0x4dd   : > { %11044 = vmatpush1.bf16.msra.mxu0 %v16525_v0  ;;  %12069 = vmatpush1.bf16.msra.mxu1 %v16528_v1  ;;  %v16621_v0 = vld [vmem:[%s17468_s9 + $0x262c] ss:$16 sps:$4 sm:$0xff]   ;;  %v2179_v1 = vcombine.high %v18852_v48, %v18852_v48  ;;  %v16622_v48 = vld [vmem:[%s17468_s9 + $0x2640] ss:$16 sps:$4 sm:$0xff]  }
 0x4de   : > { %11045 = vmatprep.subr.bf16.mxu0 %v16533_v35  ;;  %12070 = vmatprep.subr.bf16.mxu1 %v16536_v2  ;;  %v16619_v35 = vld [vmem:[%s17468_s9 + $0x2628] ss:$16 sps:$4 sm:$0xff]   ;;  %v16624_v2 = vld [vmem:[%s17468_s9 + $0x2644] ss:$16 sps:$4 sm:$0xff]  }
 0x4e1   : > { %11046 = vmatpush1.bf16.msra.mxu0 %v16531_v3  ;;  %12071 = vmatpush1.bf16.msra.mxu1 %v16534_v4  ;;  %v16627_v3 = vld [vmem:[%s17468_s9 + $0x264c] ss:$16 sps:$4 sm:$0xff]   ;;  %v16625_v4 = vld [vmem:[%s17468_s9 + $0x2648] ss:$16 sps:$4 sm:$0xff]  }
 0x4e2   : > { %11047 = vmatprep.subr.bf16.mxu0 %v16539_v5  ;;  %12072 = vmatprep.subr.bf16.mxu1 %v16542_v6  ;;  %v16630_v5 = vld [vmem:[%s17468_s9 + $0x2664] ss:$16 sps:$4 sm:$0xff]   ;;  %v16633_v6 = vld [vmem:[%s17468_s9 + $0x266c] ss:$16 sps:$4 sm:$0xff]  }
 0x4e5   : > { %11048 = vmatpush1.bf16.msra.mxu0 %v16537_v7  ;;  %12073 = vmatpush1.bf16.msra.mxu1 %v16540_v9  ;;  %v16628_v7 = vld [vmem:[%s17468_s9 + $0x2660] ss:$16 sps:$4 sm:$0xff]   ;;  %v16631_v9 = vld [vmem:[%s17468_s9 + $0x2668] ss:$16 sps:$4 sm:$0xff]  }
 0x4e6   : > { %11049 = vmatprep.subr.bf16.mxu0 %v16545_v11  ;;  %12074 = vmatprep.subr.bf16.mxu1 %v16548_v12  ;;  %v16636_v11 = vld [vmem:[%s17468_s9 + $0x2684] ss:$16 sps:$4 sm:$0xff]   ;;  %v16639_v12 = vld [vmem:[%s17468_s9 + $0x268c] ss:$16 sps:$4 sm:$0xff]  }
 0x4e9   : > { %11050 = vmatpush1.bf16.msra.mxu0 %v16543_v14  ;;  %12075 = vmatpush1.bf16.msra.mxu1 %v16546_v63  ;;  %v16634_v14 = vld [vmem:[%s17468_s9 + $0x2680] ss:$16 sps:$4 sm:$0xff]   ;;  %v16637_v63 = vld [vmem:[%s17468_s9 + $0x2688] ss:$16 sps:$4 sm:$0xff]  }
 0x4ea   : > { %11051 = vmatprep.subr.bf16.mxu0 %v16551_v16  ;;  %12076 = vmatprep.subr.bf16.mxu1 %v16554_v52  ;;  %v16642_v16 = vld [vmem:[%s17468_s9 + $0x26a4] ss:$16 sps:$4 sm:$0xff]   ;;  %v16645_v52 = vld [vmem:[%s17468_s9 + $0x26ac] ss:$16 sps:$4 sm:$0xff]  }
 0x4ed   : > { %11052 = vmatpush1.bf16.msra.mxu0 %v16549_v17  ;;  %12077 = vmatpush1.bf16.msra.mxu1 %v16552_v8  ;;  %v16640_v17 = vld [vmem:[%s17468_s9 + $0x26a0] ss:$16 sps:$4 sm:$0xff]   ;;  %v16643_v8 = vld [vmem:[%s17468_s9 + $0x26a8] ss:$16 sps:$4 sm:$0xff]  }
 0x4ee   : > { %11053 = vmatprep.subr.bf16.mxu0 %v16557_v18  ;;  %12078 = vmatprep.subr.bf16.mxu1 %v16560_v19  ;;  %v16648_v18 = vld [vmem:[%s17468_s9 + $0x26c4] ss:$16 sps:$4 sm:$0xff]   ;;  %v16651_v19 = vld [vmem:[%s17468_s9 + $0x26cc] ss:$16 sps:$4 sm:$0xff]  }
 0x4f1   : > { %11054 = vmatpush1.bf16.msra.mxu0 %v16555_v13  ;;  %12079 = vmatpush1.bf16.msra.mxu1 %v16558_v23  ;;  %v16646_v13 = vld [vmem:[%s17468_s9 + $0x26c0] ss:$16 sps:$4 sm:$0xff]   ;;  %v16649_v23 = vld [vmem:[%s17468_s9 + $0x26c8] ss:$16 sps:$4 sm:$0xff]  }
 0x4f2   : > { %11055 = vmatprep.subr.bf16.mxu0 %v16563_v24  ;;  %12080 = vmatprep.subr.bf16.mxu1 %v16566_v60  ;;  %v16654_v24 = vld [vmem:[%s17468_s9 + $0x26e4] ss:$16 sps:$4 sm:$0xff]   ;;  %v16657_v60 = vld [vmem:[%s17468_s9 + $0x26ec] ss:$16 sps:$4 sm:$0xff]  }
 0x4f5   : > { %11056 = vmatpush1.bf16.msra.mxu0 %v16561_v27  ;;  %12081 = vmatpush1.bf16.msra.mxu1 %v16564_v28  ;;  %v16652_v27 = vld [vmem:[%s17468_s9 + $0x26e0] ss:$16 sps:$4 sm:$0xff]   ;;  %v16655_v28 = vld [vmem:[%s17468_s9 + $0x26e8] ss:$16 sps:$4 sm:$0xff]  }
 0x4f6   : > { %11057 = vmatprep.subr.bf16.mxu0 %v16569_v10  ;;  %12082 = vmatprep.subr.bf16.mxu1 %v16572_v29  ;;  %v16660_v10 = vld [vmem:[%s17468_s9 + $0x2704] ss:$16 sps:$4 sm:$0xff]   ;;  %v16663_v29 = vld [vmem:[%s17468_s9 + $0x270c] ss:$16 sps:$4 sm:$0xff]  }
 0x4f9   : > { %11058 = vmatpush1.bf16.msra.mxu0 %v16567_v30  ;;  %12083 = vmatpush1.bf16.msra.mxu1 %v16570_v20  ;;  %v16658_v30 = vld [vmem:[%s17468_s9 + $0x2700] ss:$16 sps:$4 sm:$0xff]   ;;  %v16661_v20 = vld [vmem:[%s17468_s9 + $0x2708] ss:$16 sps:$4 sm:$0xff]  }
 0x4fa   : > { %11059 = vmatprep.subr.bf16.mxu0 %v16575_v31  ;;  %12084 = vmatprep.subr.bf16.mxu1 %v16578_v32  ;;  %v16666_v31 = vld [vmem:[%s17468_s9 + $0x2724] ss:$16 sps:$4 sm:$0xff]   ;;  %v16669_v32 = vld [vmem:[%s17468_s9 + $0x272c] ss:$16 sps:$4 sm:$0xff]  }
 0x4fd   : > { %11060 = vmatpush1.bf16.msra.mxu0 %v16573_v25  ;;  %12085 = vmatpush1.bf16.msra.mxu1 %v16576_v36  ;;  %v16664_v25 = vld [vmem:[%s17468_s9 + $0x2720] ss:$16 sps:$4 sm:$0xff]   ;;  %v16667_v36 = vld [vmem:[%s17468_s9 + $0x2728] ss:$16 sps:$4 sm:$0xff]  }
 0x4fe   : > { %11061 = vmatprep.subr.bf16.mxu0 %v16581_v37  ;;  %12086 = vmatprep.subr.bf16.mxu1 %v16584_v39  ;;  %v16672_v37 = vld [vmem:[%s17468_s9 + $0x2744] ss:$16 sps:$4 sm:$0xff]   ;;  %v16675_v39 = vld [vmem:[%s17468_s9 + $0x274c] ss:$16 sps:$4 sm:$0xff]  }
 0x501   : > { %11062 = vmatpush1.bf16.msra.mxu0 %v16579_v26  ;;  %12087 = vmatpush1.bf16.msra.mxu1 %v16582_v40  ;;  %v16670_v26 = vld [vmem:[%s17468_s9 + $0x2740] ss:$16 sps:$4 sm:$0xff]   ;;  %v16673_v40 = vld [vmem:[%s17468_s9 + $0x2748] ss:$16 sps:$4 sm:$0xff]  }
 0x502   : > { %11063 = vmatprep.subr.bf16.mxu0 %v16587_v21  ;;  %12088 = vmatprep.subr.bf16.mxu1 %v16590_v41  ;;  %v16678_v21 = vld [vmem:[%s17468_s9 + $0x2764] ss:$16 sps:$4 sm:$0xff]   ;;  %v16681_v41 = vld [vmem:[%s17468_s9 + $0x276c] ss:$16 sps:$4 sm:$0xff]  }
 0x505   : > { %11064 = vmatpush1.bf16.msra.mxu0 %v16585_v33  ;;  %12089 = vmatpush1.bf16.msra.mxu1 %v16588_v42  ;;  %v16676_v33 = vld [vmem:[%s17468_s9 + $0x2760] ss:$16 sps:$4 sm:$0xff]   ;;  %v16679_v42 = vld [vmem:[%s17468_s9 + $0x2768] ss:$16 sps:$4 sm:$0xff]  }
 0x506   : > { %11065 = vmatprep.subr.bf16.mxu0 %v16593_v44  ;;  %12090 = vmatprep.subr.bf16.mxu1 %v16596_v22  ;;  %v16684_v44 = vld [vmem:[%s17468_s9 + $0x2784] ss:$16 sps:$4 sm:$0xff]   ;;  %v16687_v22 = vld [vmem:[%s17468_s9 + $0x278c] ss:$16 sps:$4 sm:$0xff]  }
 0x509   : > { %11066 = vmatpush1.bf16.msra.mxu0 %v16591_v47  ;;  %12091 = vmatpush1.bf16.msra.mxu1 %v16594_v50  ;;  %v16682_v47 = vld [vmem:[%s17468_s9 + $0x2780] ss:$16 sps:$4 sm:$0xff]   ;;  %v16685_v50 = vld [vmem:[%s17468_s9 + $0x2788] ss:$16 sps:$4 sm:$0xff]  }
 0x50a   : > { %11067 = vmatprep.subr.bf16.mxu0 %v16599_v15  ;;  %12092 = vmatprep.subr.bf16.mxu1 %v16602_v53  ;;  %v16690_v15 = vld [vmem:[%s17468_s9 + $0x27a4] ss:$16 sps:$4 sm:$0xff]   ;;  %v16693_v53 = vld [vmem:[%s17468_s9 + $0x27ac] ss:$16 sps:$4 sm:$0xff]  }
 0x50d   : > { %11068 = vmatpush1.bf16.msra.mxu0 %v16597_v54  ;;  %12093 = vmatpush1.bf16.msra.mxu1 %v16600_v34  ;;  %v16688_v54 = vld [vmem:[%s17468_s9 + $0x27a0] ss:$16 sps:$4 sm:$0xff]   ;;  %v16691_v34 = vld [vmem:[%s17468_s9 + $0x27a8] ss:$16 sps:$4 sm:$0xff]  }
 0x50e   : > { %11069 = vmatprep.subr.bf16.mxu0 %v16605_v55  ;;  %12094 = vmatprep.subr.bf16.mxu1 %v16608_v38  ;;  %v16696_v55 = vld [vmem:[%s17468_s9 + $0x27c4] ss:$16 sps:$4 sm:$0xff]   ;;  %v16699_v38 = vld [vmem:[%s17468_s9 + $0x27cc] ss:$16 sps:$4 sm:$0xff]  }
 0x511   : > { %11070 = vmatpush1.bf16.msra.mxu0 %v16603_v56  ;;  %12095 = vmatpush1.bf16.msra.mxu1 %v16606_v45  ;;  %v18983_v56 = vld [vmem:[%s19465_s0 + $0x28] sm:$0xff]  ;;  %v16694_v45 = vld [vmem:[%s17468_s9 + $0x27c0] ss:$16 sps:$4 sm:$0xff]  }
 0x512   : > { %11080 = vmatprep.subr.bf16.mxu0 %v16612_v57  ;;  %12105 = vmatprep.subr.bf16.mxu1 %v16615_v58  ;;  %v16697_v57 = vld [vmem:[%s17468_s9 + $0x27c8] ss:$16 sps:$4 sm:$0xff]   ;;  %v16702_v58 = vld [vmem:[%s17468_s9 + $0x27e4] ss:$16 sps:$4 sm:$0xff]  }
 0x514   : > { %11072 = vmatmul.mubr.bf16.vlgmr.msra.gmra.mrb[0].mxu0 %v18918_v46  ;;  %12097 = vmatmul.mubr.bf16.vlgmr.msra.gmra.mrb[0].mxu1 %v18918_v46 }
 0x515   : > { %11081 = vmatpush1.bf16.msra.mxu0 %v16610_v59  ;;  %12106 = vmatpush1.bf16.msra.mxu1 %v16613_v61  ;;  %v16705_v59 = vld [vmem:[%s17468_s9 + $0x27ec] ss:$16 sps:$4 sm:$0xff]   ;;  %v18991_v61 = vrot.slane %v18983_v56, %v17527_v49 }
 0x516   : > { %11082 = vmatprep.subr.bf16.mxu0 %v16618_v62  ;;  %12107 = vmatprep.subr.bf16.mxu1 %v16621_v0  ;;  %v16700_v62 = vld [vmem:[%s17468_s9 + $0x27e0] ss:$16 sps:$4 sm:$0xff]   ;;  %v16703_v0 = vld [vmem:[%s17468_s9 + $0x27e8] ss:$16 sps:$4 sm:$0xff]  }
 0x517   : > { %11112 = vmatprep.mubr.bf16.mxu0 %v2179_v1  ;;  %12137 = vmatprep.mubr.bf16.mxu1 %v2179_v1  ;;  %v16708_v1 = vld [vmem:[%s17468_s9 + $0x2804] ss:$16 sps:$4 sm:$0xff]  }
 0x519   : > { %11083 = vmatpush1.bf16.msra.mxu0 %v16616_v51  ;;  %12108 = vmatpush1.bf16.msra.mxu1 %v16619_v35  ;;  %v16711_v51 = vld [vmem:[%s17468_s9 + $0x280c] ss:$16 sps:$4 sm:$0xff]   ;;  %v2195_v35 = vcombine.high %v18991_v61, %v18991_v61 }
 0x51a   : > { %11084 = vmatprep.subr.bf16.mxu0 %v16624_v2  ;;  %12109 = vmatprep.subr.bf16.mxu1 %v16627_v3  ;;  %v2177_v2 = vcombine.high %v18918_v46, %v18918_v46  ;;  %v16706_v3 = vld [vmem:[%s17468_s9 + $0x2800] ss:$16 sps:$4 sm:$0xff]  }
 0x51b   : > { %v16712_v46 = vld [vmem:[%s17468_s9 + $0x2820] ss:$16 sps:$4 sm:$0xff]  }
 0x51d   : > { %11085 = vmatpush1.bf16.msra.mxu0 %v16622_v48  ;;  %12110 = vmatpush1.bf16.msra.mxu1 %v16625_v4  ;;  %v16709_v48 = vld [vmem:[%s17468_s9 + $0x2808] ss:$16 sps:$4 sm:$0xff]   ;;  %v16714_v4 = vld [vmem:[%s17468_s9 + $0x2824] ss:$16 sps:$4 sm:$0xff]  }
 0x51e   : > { %11086 = vmatprep.subr.bf16.mxu0 %v16630_v5  ;;  %12111 = vmatprep.subr.bf16.mxu1 %v16633_v6  ;;  %v16717_v5 = vld [vmem:[%s17468_s9 + $0x282c] ss:$16 sps:$4 sm:$0xff]   ;;  %v19006_v6 = vrot.slane %v2195_v35, %v17527_v49  ;;  %v16793_v35 = vld [vmem:[%s17468_s9 + $0x29c8] ss:$16 sps:$4 sm:$0xff]  }
 0x521   : > { %11087 = vmatpush1.bf16.msra.mxu0 %v16628_v7  ;;  %12112 = vmatpush1.bf16.msra.mxu1 %v16631_v9  ;;  %v16715_v7 = vld [vmem:[%s17468_s9 + $0x2828] ss:$16 sps:$4 sm:$0xff]   ;;  %v16720_v9 = vld [vmem:[%s17468_s9 + $0x2844] ss:$16 sps:$4 sm:$0xff]  }
 0x522   : > { %11088 = vmatprep.subr.bf16.mxu0 %v16636_v11  ;;  %12113 = vmatprep.subr.bf16.mxu1 %v16639_v12  ;;  %v16723_v11 = vld [vmem:[%s17468_s9 + $0x284c] ss:$16 sps:$4 sm:$0xff]   ;;  %v16718_v12 = vld [vmem:[%s17468_s9 + $0x2840] ss:$16 sps:$4 sm:$0xff]  }
 0x525   : > { %11089 = vmatpush1.bf16.msra.mxu0 %v16634_v14  ;;  %12114 = vmatpush1.bf16.msra.mxu1 %v16637_v63  ;;  %v16721_v14 = vld [vmem:[%s17468_s9 + $0x2848] ss:$16 sps:$4 sm:$0xff]   ;;  %v16726_v63 = vld [vmem:[%s17468_s9 + $0x2864] ss:$16 sps:$4 sm:$0xff]  }
 0x526   : > { %11090 = vmatprep.subr.bf16.mxu0 %v16642_v16  ;;  %12115 = vmatprep.subr.bf16.mxu1 %v16645_v52  ;;  %v16729_v16 = vld [vmem:[%s17468_s9 + $0x286c] ss:$16 sps:$4 sm:$0xff]   ;;  %v16724_v52 = vld [vmem:[%s17468_s9 + $0x2860] ss:$16 sps:$4 sm:$0xff]  }
 0x529   : > { %11091 = vmatpush1.bf16.msra.mxu0 %v16640_v17  ;;  %12116 = vmatpush1.bf16.msra.mxu1 %v16643_v8  ;;  %v16727_v17 = vld [vmem:[%s17468_s9 + $0x2868] ss:$16 sps:$4 sm:$0xff]   ;;  %v16732_v8 = vld [vmem:[%s17468_s9 + $0x2884] ss:$16 sps:$4 sm:$0xff]  }
 0x52a   : > { %11092 = vmatprep.subr.bf16.mxu0 %v16648_v18  ;;  %12117 = vmatprep.subr.bf16.mxu1 %v16651_v19  ;;  %v16735_v18 = vld [vmem:[%s17468_s9 + $0x288c] ss:$16 sps:$4 sm:$0xff]   ;;  %v16730_v19 = vld [vmem:[%s17468_s9 + $0x2880] ss:$16 sps:$4 sm:$0xff]  }
 0x52d   : > { %11093 = vmatpush1.bf16.msra.mxu0 %v16646_v13  ;;  %12118 = vmatpush1.bf16.msra.mxu1 %v16649_v23  ;;  %v16733_v13 = vld [vmem:[%s17468_s9 + $0x2888] ss:$16 sps:$4 sm:$0xff]   ;;  %v16738_v23 = vld [vmem:[%s17468_s9 + $0x28a4] ss:$16 sps:$4 sm:$0xff]  }
 0x52e   : > { %11094 = vmatprep.subr.bf16.mxu0 %v16654_v24  ;;  %12119 = vmatprep.subr.bf16.mxu1 %v16657_v60  ;;  %v16741_v24 = vld [vmem:[%s17468_s9 + $0x28ac] ss:$16 sps:$4 sm:$0xff]   ;;  %v16736_v60 = vld [vmem:[%s17468_s9 + $0x28a0] ss:$16 sps:$4 sm:$0xff]  }
 0x531   : > { %11095 = vmatpush1.bf16.msra.mxu0 %v16652_v27  ;;  %12120 = vmatpush1.bf16.msra.mxu1 %v16655_v28  ;;  %v16739_v27 = vld [vmem:[%s17468_s9 + $0x28a8] ss:$16 sps:$4 sm:$0xff]   ;;  %v16744_v28 = vld [vmem:[%s17468_s9 + $0x28c4] ss:$16 sps:$4 sm:$0xff]  }
 0x532   : > { %11096 = vmatprep.subr.bf16.mxu0 %v16660_v10  ;;  %12121 = vmatprep.subr.bf16.mxu1 %v16663_v29  ;;  %v16747_v10 = vld [vmem:[%s17468_s9 + $0x28cc] ss:$16 sps:$4 sm:$0xff]   ;;  %v16742_v29 = vld [vmem:[%s17468_s9 + $0x28c0] ss:$16 sps:$4 sm:$0xff]  }
 0x535   : > { %11097 = vmatpush1.bf16.msra.mxu0 %v16658_v30  ;;  %12122 = vmatpush1.bf16.msra.mxu1 %v16661_v20  ;;  %v16745_v30 = vld [vmem:[%s17468_s9 + $0x28c8] ss:$16 sps:$4 sm:$0xff]   ;;  %v16750_v20 = vld [vmem:[%s17468_s9 + $0x28e4] ss:$16 sps:$4 sm:$0xff]  }
 0x536   : > { %11098 = vmatprep.subr.bf16.mxu0 %v16666_v31  ;;  %12123 = vmatprep.subr.bf16.mxu1 %v16669_v32  ;;  %v16753_v31 = vld [vmem:[%s17468_s9 + $0x28ec] ss:$16 sps:$4 sm:$0xff]   ;;  %v16748_v32 = vld [vmem:[%s17468_s9 + $0x28e0] ss:$16 sps:$4 sm:$0xff]  }
 0x539   : > { %11099 = vmatpush1.bf16.msra.mxu0 %v16664_v25  ;;  %12124 = vmatpush1.bf16.msra.mxu1 %v16667_v36  ;;  %v16751_v25 = vld [vmem:[%s17468_s9 + $0x28e8] ss:$16 sps:$4 sm:$0xff]   ;;  %v16756_v36 = vld [vmem:[%s17468_s9 + $0x2904] ss:$16 sps:$4 sm:$0xff]  }
 0x53a   : > { %11100 = vmatprep.subr.bf16.mxu0 %v16672_v37  ;;  %12125 = vmatprep.subr.bf16.mxu1 %v16675_v39  ;;  %v16759_v37 = vld [vmem:[%s17468_s9 + $0x290c] ss:$16 sps:$4 sm:$0xff]   ;;  %v16754_v39 = vld [vmem:[%s17468_s9 + $0x2900] ss:$16 sps:$4 sm:$0xff]  }
 0x53d   : > { %11101 = vmatpush1.bf16.msra.mxu0 %v16670_v26  ;;  %12126 = vmatpush1.bf16.msra.mxu1 %v16673_v40  ;;  %v16757_v26 = vld [vmem:[%s17468_s9 + $0x2908] ss:$16 sps:$4 sm:$0xff]   ;;  %v16762_v40 = vld [vmem:[%s17468_s9 + $0x2924] ss:$16 sps:$4 sm:$0xff]  }
 0x53e   : > { %11102 = vmatprep.subr.bf16.mxu0 %v16678_v21  ;;  %12127 = vmatprep.subr.bf16.mxu1 %v16681_v41  ;;  %v16765_v21 = vld [vmem:[%s17468_s9 + $0x292c] ss:$16 sps:$4 sm:$0xff]   ;;  %v16760_v41 = vld [vmem:[%s17468_s9 + $0x2920] ss:$16 sps:$4 sm:$0xff]  }
 0x541   : > { %11103 = vmatpush1.bf16.msra.mxu0 %v16676_v33  ;;  %12128 = vmatpush1.bf16.msra.mxu1 %v16679_v42  ;;  %v16763_v33 = vld [vmem:[%s17468_s9 + $0x2928] ss:$16 sps:$4 sm:$0xff]   ;;  %v16768_v42 = vld [vmem:[%s17468_s9 + $0x2944] ss:$16 sps:$4 sm:$0xff]  }
 0x542   : > { %11104 = vmatprep.subr.bf16.mxu0 %v16684_v44  ;;  %12129 = vmatprep.subr.bf16.mxu1 %v16687_v22  ;;  %v16771_v44 = vld [vmem:[%s17468_s9 + $0x294c] ss:$16 sps:$4 sm:$0xff]   ;;  %v16766_v22 = vld [vmem:[%s17468_s9 + $0x2940] ss:$16 sps:$4 sm:$0xff]  }
 0x545   : > { %11105 = vmatpush1.bf16.msra.mxu0 %v16682_v47  ;;  %12130 = vmatpush1.bf16.msra.mxu1 %v16685_v50  ;;  %v16769_v47 = vld [vmem:[%s17468_s9 + $0x2948] ss:$16 sps:$4 sm:$0xff]   ;;  %v16774_v50 = vld [vmem:[%s17468_s9 + $0x2964] ss:$16 sps:$4 sm:$0xff]  }
 0x546   : > { %11106 = vmatprep.subr.bf16.mxu0 %v16690_v15  ;;  %12131 = vmatprep.subr.bf16.mxu1 %v16693_v53  ;;  %v16777_v15 = vld [vmem:[%s17468_s9 + $0x296c] ss:$16 sps:$4 sm:$0xff]   ;;  %v16772_v53 = vld [vmem:[%s17468_s9 + $0x2960] ss:$16 sps:$4 sm:$0xff]  }
 0x549   : > { %11107 = vmatpush1.bf16.msra.mxu0 %v16688_v54  ;;  %12132 = vmatpush1.bf16.msra.mxu1 %v16691_v34  ;;  %v16775_v54 = vld [vmem:[%s17468_s9 + $0x2968] ss:$16 sps:$4 sm:$0xff]   ;;  %v16780_v34 = vld [vmem:[%s17468_s9 + $0x2984] ss:$16 sps:$4 sm:$0xff]  }
 0x54a   : > { %11108 = vmatprep.subr.bf16.mxu0 %v16696_v55  ;;  %12133 = vmatprep.subr.bf16.mxu1 %v16699_v38  ;;  %v16783_v55 = vld [vmem:[%s17468_s9 + $0x298c] ss:$16 sps:$4 sm:$0xff]   ;;  %v16778_v38 = vld [vmem:[%s17468_s9 + $0x2980] ss:$16 sps:$4 sm:$0xff]  }
 0x54d   : > { %11109 = vmatpush1.bf16.msra.mxu0 %v16694_v45  ;;  %12134 = vmatpush1.bf16.msra.mxu1 %v16697_v57  ;;  %v16781_v45 = vld [vmem:[%s17468_s9 + $0x2988] ss:$16 sps:$4 sm:$0xff]   ;;  %v16786_v57 = vld [vmem:[%s17468_s9 + $0x29a4] ss:$16 sps:$4 sm:$0xff]  }
 0x54e   : > { %11110 = vmatprep.subr.bf16.mxu0 %v16702_v58  ;;  %12135 = vmatprep.subr.bf16.mxu1 %v16705_v59  ;;  %v16789_v58 = vld [vmem:[%s17468_s9 + $0x29ac] ss:$16 sps:$4 sm:$0xff]   ;;  %v16784_v59 = vld [vmem:[%s17468_s9 + $0x29a0] ss:$16 sps:$4 sm:$0xff]  }
 0x551   : > { %11111 = vmatpush1.bf16.msra.mxu0 %v16700_v62  ;;  %12136 = vmatpush1.bf16.msra.mxu1 %v16703_v0  ;;  %v16787_v62 = vld [vmem:[%s17468_s9 + $0x29a8] ss:$16 sps:$4 sm:$0xff]   ;;  %v16792_v0 = vld [vmem:[%s17468_s9 + $0x29c4] ss:$16 sps:$4 sm:$0xff]  }
 0x552   : > { %11121 = vmatprep.subr.bf16.mxu0 %v16708_v1  ;;  %12146 = vmatprep.subr.bf16.mxu1 %v16711_v51  ;;  %v16795_v1 = vld [vmem:[%s17468_s9 + $0x29cc] ss:$16 sps:$4 sm:$0xff]   ;;  %v16790_v51 = vld [vmem:[%s17468_s9 + $0x29c0] ss:$16 sps:$4 sm:$0xff]  }
 0x554   : > { %11113 = vmatmul.mubr.bf16.vlgmr.msra.gmra.mrb[0].mxu0 %v2177_v2  ;;  %12138 = vmatmul.mubr.bf16.vlgmr.msra.gmra.mrb[0].mxu1 %v2177_v2  ;;  %v16798_v2 = vld [vmem:[%s17468_s9 + $0x29e4] ss:$16 sps:$4 sm:$0xff]  }
 0x555   : > { %11122 = vmatpush1.bf16.msra.mxu0 %v16706_v3  ;;  %12147 = vmatpush1.bf16.msra.mxu1 %v16709_v48  ;;  %v16801_v3 = vld [vmem:[%s17468_s9 + $0x29ec] ss:$16 sps:$4 sm:$0xff]   ;;  %v16796_v48 = vld [vmem:[%s17468_s9 + $0x29e0] ss:$16 sps:$4 sm:$0xff]  }
 0x556   : > { %11123 = vmatprep.subr.bf16.mxu0 %v16714_v4  ;;  %12148 = vmatprep.subr.bf16.mxu1 %v16717_v5  ;;  %v16799_v4 = vld [vmem:[%s17468_s9 + $0x29e8] ss:$16 sps:$4 sm:$0xff]   ;;  %v16804_v5 = vld [vmem:[%s17468_s9 + $0x2a04] ss:$16 sps:$4 sm:$0xff]  }
 0x557   : > { %11153 = vmatprep.mubr.bf16.mxu0 %v19006_v6  ;;  %12178 = vmatprep.mubr.bf16.mxu1 %v19006_v6 }
 0x559   : > { %11124 = vmatpush1.bf16.msra.mxu0 %v16712_v46  ;;  %12149 = vmatpush1.bf16.msra.mxu1 %v16715_v7  ;;  %v16807_v46 = vld [vmem:[%s17468_s9 + $0x2a0c] ss:$16 sps:$4 sm:$0xff]   ;;  %v19072_v7 = vrot.slane %v18991_v61, %v17527_v49  ;;  %v16808_v61 = vld [vmem:[%s17468_s9 + $0x2a20] ss:$16 sps:$4 sm:$0xff]  }
 0x55a   : > { %11125 = vmatprep.subr.bf16.mxu0 %v16720_v9  ;;  %12150 = vmatprep.subr.bf16.mxu1 %v16723_v11  ;;  %v16802_v9 = vld [vmem:[%s17468_s9 + $0x2a00] ss:$16 sps:$4 sm:$0xff]   ;;  %v16805_v11 = vld [vmem:[%s17468_s9 + $0x2a08] ss:$16 sps:$4 sm:$0xff]  }
 0x55d   : > { %11126 = vmatpush1.bf16.msra.mxu0 %v16718_v12  ;;  %12151 = vmatpush1.bf16.msra.mxu1 %v16721_v14  ;;  %v16810_v12 = vld [vmem:[%s17468_s9 + $0x2a24] ss:$16 sps:$4 sm:$0xff]   ;;  %v16813_v14 = vld [vmem:[%s17468_s9 + $0x2a2c] ss:$16 sps:$4 sm:$0xff]  }
 0x55e   : > { %11127 = vmatprep.subr.bf16.mxu0 %v16726_v63  ;;  %12152 = vmatprep.subr.bf16.mxu1 %v16729_v16  ;;  %v2227_v63 = vcombine.high %v19006_v6, %v19006_v6  ;;  %v16811_v16 = vld [vmem:[%s17468_s9 + $0x2a28] ss:$16 sps:$4 sm:$0xff]   ;;  %v16814_v6 = vld [vmem:[%s17468_s9 + $0x2a40] ss:$16 sps:$4 sm:$0xff]  }
 0x561   : > { %11128 = vmatpush1.bf16.msra.mxu0 %v16724_v52  ;;  %12153 = vmatpush1.bf16.msra.mxu1 %v16727_v17  ;;  %v16816_v52 = vld [vmem:[%s17468_s9 + $0x2a44] ss:$16 sps:$4 sm:$0xff]   ;;  %v16819_v17 = vld [vmem:[%s17468_s9 + $0x2a4c] ss:$16 sps:$4 sm:$0xff]  }
 0x562   : > { %11129 = vmatprep.subr.bf16.mxu0 %v16732_v8  ;;  %12154 = vmatprep.subr.bf16.mxu1 %v16735_v18  ;;  %v16817_v8 = vld [vmem:[%s17468_s9 + $0x2a48] ss:$16 sps:$4 sm:$0xff]   ;;  %v16822_v18 = vld [vmem:[%s17468_s9 + $0x2a64] ss:$16 sps:$4 sm:$0xff]  }
 0x565   : > { %11130 = vmatpush1.bf16.msra.mxu0 %v16730_v19  ;;  %12155 = vmatpush1.bf16.msra.mxu1 %v16733_v13  ;;  %v16825_v19 = vld [vmem:[%s17468_s9 + $0x2a6c] ss:$16 sps:$4 sm:$0xff]   ;;  %v16820_v13 = vld [vmem:[%s17468_s9 + $0x2a60] ss:$16 sps:$4 sm:$0xff]  }
 0x566   : > { %11131 = vmatprep.subr.bf16.mxu0 %v16738_v23  ;;  %12156 = vmatprep.subr.bf16.mxu1 %v16741_v24  ;;  %v16823_v23 = vld [vmem:[%s17468_s9 + $0x2a68] ss:$16 sps:$4 sm:$0xff]   ;;  %v16828_v24 = vld [vmem:[%s17468_s9 + $0x2a84] ss:$16 sps:$4 sm:$0xff]  }
 0x569   : > { %11132 = vmatpush1.bf16.msra.mxu0 %v16736_v60  ;;  %12157 = vmatpush1.bf16.msra.mxu1 %v16739_v27  ;;  %v16831_v60 = vld [vmem:[%s17468_s9 + $0x2a8c] ss:$16 sps:$4 sm:$0xff]   ;;  %v16826_v27 = vld [vmem:[%s17468_s9 + $0x2a80] ss:$16 sps:$4 sm:$0xff]  }
 0x56a   : > { %11133 = vmatprep.subr.bf16.mxu0 %v16744_v28  ;;  %12158 = vmatprep.subr.bf16.mxu1 %v16747_v10  ;;  %v16829_v28 = vld [vmem:[%s17468_s9 + $0x2a88] ss:$16 sps:$4 sm:$0xff]   ;;  %v16834_v10 = vld [vmem:[%s17468_s9 + $0x2aa4] ss:$16 sps:$4 sm:$0xff]  }
 0x56d   : > { %11134 = vmatpush1.bf16.msra.mxu0 %v16742_v29  ;;  %12159 = vmatpush1.bf16.msra.mxu1 %v16745_v30  ;;  %v16837_v29 = vld [vmem:[%s17468_s9 + $0x2aac] ss:$16 sps:$4 sm:$0xff]   ;;  %v16832_v30 = vld [vmem:[%s17468_s9 + $0x2aa0] ss:$16 sps:$4 sm:$0xff]  }
 0x56e   : > { %11135 = vmatprep.subr.bf16.mxu0 %v16750_v20  ;;  %12160 = vmatprep.subr.bf16.mxu1 %v16753_v31  ;;  %v16835_v20 = vld [vmem:[%s17468_s9 + $0x2aa8] ss:$16 sps:$4 sm:$0xff]   ;;  %v16840_v31 = vld [vmem:[%s17468_s9 + $0x2ac4] ss:$16 sps:$4 sm:$0xff]  }
 0x571   : > { %11136 = vmatpush1.bf16.msra.mxu0 %v16748_v32  ;;  %12161 = vmatpush1.bf16.msra.mxu1 %v16751_v25  ;;  %v16843_v32 = vld [vmem:[%s17468_s9 + $0x2acc] ss:$16 sps:$4 sm:$0xff]   ;;  %v16838_v25 = vld [vmem:[%s17468_s9 + $0x2ac0] ss:$16 sps:$4 sm:$0xff]  }
 0x572   : > { %11137 = vmatprep.subr.bf16.mxu0 %v16756_v36  ;;  %12162 = vmatprep.subr.bf16.mxu1 %v16759_v37  ;;  %v16841_v36 = vld [vmem:[%s17468_s9 + $0x2ac8] ss:$16 sps:$4 sm:$0xff]   ;;  %v16846_v37 = vld [vmem:[%s17468_s9 + $0x2ae4] ss:$16 sps:$4 sm:$0xff]  }
 0x575   : > { %11138 = vmatpush1.bf16.msra.mxu0 %v16754_v39  ;;  %12163 = vmatpush1.bf16.msra.mxu1 %v16757_v26  ;;  %v16849_v39 = vld [vmem:[%s17468_s9 + $0x2aec] ss:$16 sps:$4 sm:$0xff]   ;;  %v16844_v26 = vld [vmem:[%s17468_s9 + $0x2ae0] ss:$16 sps:$4 sm:$0xff]  }
 0x576   : > { %11139 = vmatprep.subr.bf16.mxu0 %v16762_v40  ;;  %12164 = vmatprep.subr.bf16.mxu1 %v16765_v21  ;;  %v16847_v40 = vld [vmem:[%s17468_s9 + $0x2ae8] ss:$16 sps:$4 sm:$0xff]   ;;  %v16852_v21 = vld [vmem:[%s17468_s9 + $0x2b04] ss:$16 sps:$4 sm:$0xff]  }
 0x579   : > { %11140 = vmatpush1.bf16.msra.mxu0 %v16760_v41  ;;  %12165 = vmatpush1.bf16.msra.mxu1 %v16763_v33  ;;  %v16855_v41 = vld [vmem:[%s17468_s9 + $0x2b0c] ss:$16 sps:$4 sm:$0xff]   ;;  %v16850_v33 = vld [vmem:[%s17468_s9 + $0x2b00] ss:$16 sps:$4 sm:$0xff]  }
 0x57a   : > { %11141 = vmatprep.subr.bf16.mxu0 %v16768_v42  ;;  %12166 = vmatprep.subr.bf16.mxu1 %v16771_v44  ;;  %v16853_v42 = vld [vmem:[%s17468_s9 + $0x2b08] ss:$16 sps:$4 sm:$0xff]   ;;  %v16858_v44 = vld [vmem:[%s17468_s9 + $0x2b24] ss:$16 sps:$4 sm:$0xff]  }
 0x57d   : > { %11142 = vmatpush1.bf16.msra.mxu0 %v16766_v22  ;;  %12167 = vmatpush1.bf16.msra.mxu1 %v16769_v47  ;;  %v16861_v22 = vld [vmem:[%s17468_s9 + $0x2b2c] ss:$16 sps:$4 sm:$0xff]   ;;  %v16856_v47 = vld [vmem:[%s17468_s9 + $0x2b20] ss:$16 sps:$4 sm:$0xff]  }
 0x57e   : > { %11143 = vmatprep.subr.bf16.mxu0 %v16774_v50  ;;  %12168 = vmatprep.subr.bf16.mxu1 %v16777_v15  ;;  %v16859_v50 = vld [vmem:[%s17468_s9 + $0x2b28] ss:$16 sps:$4 sm:$0xff]   ;;  %v16864_v15 = vld [vmem:[%s17468_s9 + $0x2b44] ss:$16 sps:$4 sm:$0xff]  }
 0x581   : > { %11144 = vmatpush1.bf16.msra.mxu0 %v16772_v53  ;;  %12169 = vmatpush1.bf16.msra.mxu1 %v16775_v54  ;;  %v16867_v53 = vld [vmem:[%s17468_s9 + $0x2b4c] ss:$16 sps:$4 sm:$0xff]   ;;  %v16862_v54 = vld [vmem:[%s17468_s9 + $0x2b40] ss:$16 sps:$4 sm:$0xff]  }
 0x582   : > { %11145 = vmatprep.subr.bf16.mxu0 %v16780_v34  ;;  %12170 = vmatprep.subr.bf16.mxu1 %v16783_v55  ;;  %v16865_v34 = vld [vmem:[%s17468_s9 + $0x2b48] ss:$16 sps:$4 sm:$0xff]   ;;  %v16870_v55 = vld [vmem:[%s17468_s9 + $0x2b64] ss:$16 sps:$4 sm:$0xff]  }
 0x585   : > { %11146 = vmatpush1.bf16.msra.mxu0 %v16778_v38  ;;  %12171 = vmatpush1.bf16.msra.mxu1 %v16781_v45  ;;  %v16873_v38 = vld [vmem:[%s17468_s9 + $0x2b6c] ss:$16 sps:$4 sm:$0xff]   ;;  %v16868_v45 = vld [vmem:[%s17468_s9 + $0x2b60] ss:$16 sps:$4 sm:$0xff]  }
 0x586   : > { %11147 = vmatprep.subr.bf16.mxu0 %v16786_v57  ;;  %12172 = vmatprep.subr.bf16.mxu1 %v16789_v58  ;;  %v16871_v57 = vld [vmem:[%s17468_s9 + $0x2b68] ss:$16 sps:$4 sm:$0xff]   ;;  %v16876_v58 = vld [vmem:[%s17468_s9 + $0x2b84] ss:$16 sps:$4 sm:$0xff]  }
 0x589   : > { %11148 = vmatpush1.bf16.msra.mxu0 %v16784_v59  ;;  %12173 = vmatpush1.bf16.msra.mxu1 %v16787_v62  ;;  %v16879_v59 = vld [vmem:[%s17468_s9 + $0x2b8c] ss:$16 sps:$4 sm:$0xff]   ;;  %v16874_v62 = vld [vmem:[%s17468_s9 + $0x2b80] ss:$16 sps:$4 sm:$0xff]  }
 0x58a   : > { %11149 = vmatprep.subr.bf16.mxu0 %v16792_v0  ;;  %12174 = vmatprep.subr.bf16.mxu1 %v16795_v1  ;;  %v16877_v0 = vld [vmem:[%s17468_s9 + $0x2b88] ss:$16 sps:$4 sm:$0xff]   ;;  %v16882_v1 = vld [vmem:[%s17468_s9 + $0x2ba4] ss:$16 sps:$4 sm:$0xff]  }
 0x58d   : > { %11150 = vmatpush1.bf16.msra.mxu0 %v16790_v51  ;;  %12175 = vmatpush1.bf16.msra.mxu1 %v16793_v35  ;;  %v16885_v51 = vld [vmem:[%s17468_s9 + $0x2bac] ss:$16 sps:$4 sm:$0xff]   ;;  %v16880_v35 = vld [vmem:[%s17468_s9 + $0x2ba0] ss:$16 sps:$4 sm:$0xff]  }
 0x58e   : > { %11151 = vmatprep.subr.bf16.mxu0 %v16798_v2  ;;  %12176 = vmatprep.subr.bf16.mxu1 %v16801_v3  ;;  %v16883_v2 = vld [vmem:[%s17468_s9 + $0x2ba8] ss:$16 sps:$4 sm:$0xff]   ;;  %v16888_v3 = vld [vmem:[%s17468_s9 + $0x2bc4] ss:$16 sps:$4 sm:$0xff]  }
 0x591   : > { %11152 = vmatpush1.bf16.msra.mxu0 %v16796_v48  ;;  %12177 = vmatpush1.bf16.msra.mxu1 %v16799_v4  ;;  %v16891_v48 = vld [vmem:[%s17468_s9 + $0x2bcc] ss:$16 sps:$4 sm:$0xff]   ;;  %v2180_v4 = vcombine.high %v18983_v56, %v18983_v56  ;;  %v16892_v56 = vld [vmem:[%s17468_s9 + $0x2be0] ss:$16 sps:$4 sm:$0xff]  }
 0x592   : > { %11162 = vmatprep.subr.bf16.mxu0 %v16804_v5  ;;  %12187 = vmatprep.subr.bf16.mxu1 %v16807_v46  ;;  %v16886_v5 = vld [vmem:[%s17468_s9 + $0x2bc0] ss:$16 sps:$4 sm:$0xff]   ;;  %v16889_v46 = vld [vmem:[%s17468_s9 + $0x2bc8] ss:$16 sps:$4 sm:$0xff]  }
 0x594   : > { %11154 = vmatmul.mubr.bf16.vlgmr.msra.gmra.mrb[0].mxu0 %v19072_v7  ;;  %12179 = vmatmul.mubr.bf16.vlgmr.msra.gmra.mrb[0].mxu1 %v19072_v7 }
 0x595   : > { %11163 = vmatpush1.bf16.msra.mxu0 %v16802_v9  ;;  %12188 = vmatpush1.bf16.msra.mxu1 %v16805_v11  ;;  %v16894_v9 = vld [vmem:[%s17468_s9 + $0x2be4] ss:$16 sps:$4 sm:$0xff]   ;;  %v16897_v11 = vld [vmem:[%s17468_s9 + $0x2bec] ss:$16 sps:$4 sm:$0xff]  }
 0x596   : > { %11164 = vmatprep.subr.bf16.mxu0 %v16810_v12  ;;  %12189 = vmatprep.subr.bf16.mxu1 %v16813_v14  ;;  %v19141_v12 = vrot.slane %v2180_v4, %v17527_v49  ;;  %v16895_v14 = vld [vmem:[%s17468_s9 + $0x2be8] ss:$16 sps:$4 sm:$0xff]  }
 0x597   : > { %11194 = vmatprep.mubr.bf16.mxu0 %v2227_v63  ;;  %12219 = vmatprep.mubr.bf16.mxu1 %v2227_v63  ;;  %v16900_v63 = vld [vmem:[%s17468_s9 + $0x2c04] ss:$16 sps:$4 sm:$0xff]   ;;  %v16973_v4 = vld [vmem:[%s17468_s9 + $0x2d88] ss:$16 sps:$4 sm:$0xff]  }
 0x599   : > { %11165 = vmatpush1.bf16.msra.mxu0 %v16808_v61  ;;  %12190 = vmatpush1.bf16.msra.mxu1 %v16811_v16  ;;  %v16903_v61 = vld [vmem:[%s17468_s9 + $0x2c0c] ss:$16 sps:$4 sm:$0xff]   ;;  %v2196_v16 = vcombine.high %v19141_v12, %v19141_v12 }
 0x59a   : > { %11166 = vmatprep.subr.bf16.mxu0 %v16816_v52  ;;  %12191 = vmatprep.subr.bf16.mxu1 %v16819_v17  ;;  %v2225_v52 = vcombine.high %v19072_v7, %v19072_v7  ;;  %v16898_v17 = vld [vmem:[%s17468_s9 + $0x2c00] ss:$16 sps:$4 sm:$0xff]  }
 0x59b   : > { %v16904_v7 = vld [vmem:[%s17468_s9 + $0x2c20] ss:$16 sps:$4 sm:$0xff]  }
 0x59d   : > { %11167 = vmatpush1.bf16.msra.mxu0 %v16814_v6  ;;  %12192 = vmatpush1.bf16.msra.mxu1 %v16817_v8  ;;  %v16901_v6 = vld [vmem:[%s17468_s9 + $0x2c08] ss:$16 sps:$4 sm:$0xff]   ;;  %v16906_v8 = vld [vmem:[%s17468_s9 + $0x2c24] ss:$16 sps:$4 sm:$0xff]  }
 0x59e   : > { %11168 = vmatprep.subr.bf16.mxu0 %v16822_v18  ;;  %12193 = vmatprep.subr.bf16.mxu1 %v16825_v19  ;;  %v16909_v18 = vld [vmem:[%s17468_s9 + $0x2c2c] ss:$16 sps:$4 sm:$0xff]   ;;  %v19156_v19 = vrot.slane %v2196_v16, %v17527_v49  ;;  %v16990_v16 = vld [vmem:[%s17468_s9 + $0x2de4] ss:$16 sps:$4 sm:$0xff]  }
 0x5a1   : > { %11169 = vmatpush1.bf16.msra.mxu0 %v16820_v13  ;;  %12194 = vmatpush1.bf16.msra.mxu1 %v16823_v23  ;;  %v16907_v13 = vld [vmem:[%s17468_s9 + $0x2c28] ss:$16 sps:$4 sm:$0xff]   ;;  %v16912_v23 = vld [vmem:[%s17468_s9 + $0x2c44] ss:$16 sps:$4 sm:$0xff]  }
 0x5a2   : > { %11170 = vmatprep.subr.bf16.mxu0 %v16828_v24  ;;  %12195 = vmatprep.subr.bf16.mxu1 %v16831_v60  ;;  %v16915_v24 = vld [vmem:[%s17468_s9 + $0x2c4c] ss:$16 sps:$4 sm:$0xff]   ;;  %v16910_v60 = vld [vmem:[%s17468_s9 + $0x2c40] ss:$16 sps:$4 sm:$0xff]  }
 0x5a5   : > { %11171 = vmatpush1.bf16.msra.mxu0 %v16826_v27  ;;  %12196 = vmatpush1.bf16.msra.mxu1 %v16829_v28  ;;  %v16913_v27 = vld [vmem:[%s17468_s9 + $0x2c48] ss:$16 sps:$4 sm:$0xff]   ;;  %v16918_v28 = vld [vmem:[%s17468_s9 + $0x2c64] ss:$16 sps:$4 sm:$0xff]  }
 0x5a6   : > { %11172 = vmatprep.subr.bf16.mxu0 %v16834_v10  ;;  %12197 = vmatprep.subr.bf16.mxu1 %v16837_v29  ;;  %v16921_v10 = vld [vmem:[%s17468_s9 + $0x2c6c] ss:$16 sps:$4 sm:$0xff]   ;;  %v16916_v29 = vld [vmem:[%s17468_s9 + $0x2c60] ss:$16 sps:$4 sm:$0xff]  }
 0x5a9   : > { %11173 = vmatpush1.bf16.msra.mxu0 %v16832_v30  ;;  %12198 = vmatpush1.bf16.msra.mxu1 %v16835_v20  ;;  %v16919_v30 = vld [vmem:[%s17468_s9 + $0x2c68] ss:$16 sps:$4 sm:$0xff]   ;;  %v16924_v20 = vld [vmem:[%s17468_s9 + $0x2c84] ss:$16 sps:$4 sm:$0xff]  }
 0x5aa   : > { %11174 = vmatprep.subr.bf16.mxu0 %v16840_v31  ;;  %12199 = vmatprep.subr.bf16.mxu1 %v16843_v32  ;;  %v16927_v31 = vld [vmem:[%s17468_s9 + $0x2c8c] ss:$16 sps:$4 sm:$0xff]   ;;  %v16922_v32 = vld [vmem:[%s17468_s9 + $0x2c80] ss:$16 sps:$4 sm:$0xff]  }
 0x5ad   : > { %11175 = vmatpush1.bf16.msra.mxu0 %v16838_v25  ;;  %12200 = vmatpush1.bf16.msra.mxu1 %v16841_v36  ;;  %v16925_v25 = vld [vmem:[%s17468_s9 + $0x2c88] ss:$16 sps:$4 sm:$0xff]   ;;  %v16930_v36 = vld [vmem:[%s17468_s9 + $0x2ca4] ss:$16 sps:$4 sm:$0xff]  }
 0x5ae   : > { %11176 = vmatprep.subr.bf16.mxu0 %v16846_v37  ;;  %12201 = vmatprep.subr.bf16.mxu1 %v16849_v39  ;;  %v16933_v37 = vld [vmem:[%s17468_s9 + $0x2cac] ss:$16 sps:$4 sm:$0xff]   ;;  %v16928_v39 = vld [vmem:[%s17468_s9 + $0x2ca0] ss:$16 sps:$4 sm:$0xff]  }
 0x5b1   : > { %11177 = vmatpush1.bf16.msra.mxu0 %v16844_v26  ;;  %12202 = vmatpush1.bf16.msra.mxu1 %v16847_v40  ;;  %v16931_v26 = vld [vmem:[%s17468_s9 + $0x2ca8] ss:$16 sps:$4 sm:$0xff]   ;;  %v16936_v40 = vld [vmem:[%s17468_s9 + $0x2cc4] ss:$16 sps:$4 sm:$0xff]  }
 0x5b2   : > { %11178 = vmatprep.subr.bf16.mxu0 %v16852_v21  ;;  %12203 = vmatprep.subr.bf16.mxu1 %v16855_v41  ;;  %v16939_v21 = vld [vmem:[%s17468_s9 + $0x2ccc] ss:$16 sps:$4 sm:$0xff]   ;;  %v16934_v41 = vld [vmem:[%s17468_s9 + $0x2cc0] ss:$16 sps:$4 sm:$0xff]  }
 0x5b5   : > { %11179 = vmatpush1.bf16.msra.mxu0 %v16850_v33  ;;  %12204 = vmatpush1.bf16.msra.mxu1 %v16853_v42  ;;  %v16937_v33 = vld [vmem:[%s17468_s9 + $0x2cc8] ss:$16 sps:$4 sm:$0xff]   ;;  %v16942_v42 = vld [vmem:[%s17468_s9 + $0x2ce4] ss:$16 sps:$4 sm:$0xff]  }
 0x5b6   : > { %11180 = vmatprep.subr.bf16.mxu0 %v16858_v44  ;;  %12205 = vmatprep.subr.bf16.mxu1 %v16861_v22  ;;  %v16945_v44 = vld [vmem:[%s17468_s9 + $0x2cec] ss:$16 sps:$4 sm:$0xff]   ;;  %v16940_v22 = vld [vmem:[%s17468_s9 + $0x2ce0] ss:$16 sps:$4 sm:$0xff]  }
 0x5b9   : > { %11181 = vmatpush1.bf16.msra.mxu0 %v16856_v47  ;;  %12206 = vmatpush1.bf16.msra.mxu1 %v16859_v50  ;;  %v16943_v47 = vld [vmem:[%s17468_s9 + $0x2ce8] ss:$16 sps:$4 sm:$0xff]   ;;  %v16948_v50 = vld [vmem:[%s17468_s9 + $0x2d04] ss:$16 sps:$4 sm:$0xff]  }
 0x5ba   : > { %11182 = vmatprep.subr.bf16.mxu0 %v16864_v15  ;;  %12207 = vmatprep.subr.bf16.mxu1 %v16867_v53  ;;  %v16951_v15 = vld [vmem:[%s17468_s9 + $0x2d0c] ss:$16 sps:$4 sm:$0xff]   ;;  %v16946_v53 = vld [vmem:[%s17468_s9 + $0x2d00] ss:$16 sps:$4 sm:$0xff]  }
 0x5bd   : > { %11183 = vmatpush1.bf16.msra.mxu0 %v16862_v54  ;;  %12208 = vmatpush1.bf16.msra.mxu1 %v16865_v34  ;;  %v16949_v54 = vld [vmem:[%s17468_s9 + $0x2d08] ss:$16 sps:$4 sm:$0xff]   ;;  %v16954_v34 = vld [vmem:[%s17468_s9 + $0x2d24] ss:$16 sps:$4 sm:$0xff]  }
 0x5be   : > { %11184 = vmatprep.subr.bf16.mxu0 %v16870_v55  ;;  %12209 = vmatprep.subr.bf16.mxu1 %v16873_v38  ;;  %v16957_v55 = vld [vmem:[%s17468_s9 + $0x2d2c] ss:$16 sps:$4 sm:$0xff]   ;;  %v16952_v38 = vld [vmem:[%s17468_s9 + $0x2d20] ss:$16 sps:$4 sm:$0xff]  }
 0x5c1   : > { %11185 = vmatpush1.bf16.msra.mxu0 %v16868_v45  ;;  %12210 = vmatpush1.bf16.msra.mxu1 %v16871_v57  ;;  %v16955_v45 = vld [vmem:[%s17468_s9 + $0x2d28] ss:$16 sps:$4 sm:$0xff]   ;;  %v16960_v57 = vld [vmem:[%s17468_s9 + $0x2d44] ss:$16 sps:$4 sm:$0xff]  }
 0x5c2   : > { %11186 = vmatprep.subr.bf16.mxu0 %v16876_v58  ;;  %12211 = vmatprep.subr.bf16.mxu1 %v16879_v59  ;;  %v16963_v58 = vld [vmem:[%s17468_s9 + $0x2d4c] ss:$16 sps:$4 sm:$0xff]   ;;  %v16958_v59 = vld [vmem:[%s17468_s9 + $0x2d40] ss:$16 sps:$4 sm:$0xff]  }
 0x5c5   : > { %11187 = vmatpush1.bf16.msra.mxu0 %v16874_v62  ;;  %12212 = vmatpush1.bf16.msra.mxu1 %v16877_v0  ;;  %v16961_v62 = vld [vmem:[%s17468_s9 + $0x2d48] ss:$16 sps:$4 sm:$0xff]   ;;  %v16966_v0 = vld [vmem:[%s17468_s9 + $0x2d64] ss:$16 sps:$4 sm:$0xff]  }
 0x5c6   : > { %11188 = vmatprep.subr.bf16.mxu0 %v16882_v1  ;;  %12213 = vmatprep.subr.bf16.mxu1 %v16885_v51  ;;  %v16969_v1 = vld [vmem:[%s17468_s9 + $0x2d6c] ss:$16 sps:$4 sm:$0xff]   ;;  %v16964_v51 = vld [vmem:[%s17468_s9 + $0x2d60] ss:$16 sps:$4 sm:$0xff]  }
 0x5c9   : > { %11189 = vmatpush1.bf16.msra.mxu0 %v16880_v35  ;;  %12214 = vmatpush1.bf16.msra.mxu1 %v16883_v2  ;;  %v16967_v35 = vld [vmem:[%s17468_s9 + $0x2d68] ss:$16 sps:$4 sm:$0xff]   ;;  %v16972_v2 = vld [vmem:[%s17468_s9 + $0x2d84] ss:$16 sps:$4 sm:$0xff]  }
 0x5ca   : > { %11190 = vmatprep.subr.bf16.mxu0 %v16888_v3  ;;  %12215 = vmatprep.subr.bf16.mxu1 %v16891_v48  ;;  %v16975_v3 = vld [vmem:[%s17468_s9 + $0x2d8c] ss:$16 sps:$4 sm:$0xff]   ;;  %v16970_v48 = vld [vmem:[%s17468_s9 + $0x2d80] ss:$16 sps:$4 sm:$0xff]  }
 0x5cd   : > { %11191 = vmatpush1.bf16.msra.mxu0 %v16886_v5  ;;  %12216 = vmatpush1.bf16.msra.mxu1 %v16889_v46  ;;  %v16978_v5 = vld [vmem:[%s17468_s9 + $0x2da4] ss:$16 sps:$4 sm:$0xff]   ;;  %v16981_v46 = vld [vmem:[%s17468_s9 + $0x2dac] ss:$16 sps:$4 sm:$0xff]  }
 0x5ce   : > { %11192 = vmatprep.subr.bf16.mxu0 %v16894_v9  ;;  %12217 = vmatprep.subr.bf16.mxu1 %v16897_v11  ;;  %v16976_v9 = vld [vmem:[%s17468_s9 + $0x2da0] ss:$16 sps:$4 sm:$0xff]   ;;  %v16979_v11 = vld [vmem:[%s17468_s9 + $0x2da8] ss:$16 sps:$4 sm:$0xff]  }
 0x5d1   : > { %11193 = vmatpush1.bf16.msra.mxu0 %v16892_v56  ;;  %12218 = vmatpush1.bf16.msra.mxu1 %v16895_v14  ;;  %v16984_v56 = vld [vmem:[%s17468_s9 + $0x2dc4] ss:$16 sps:$4 sm:$0xff]   ;;  %v16987_v14 = vld [vmem:[%s17468_s9 + $0x2dcc] ss:$16 sps:$4 sm:$0xff]  }
 0x5d2   : > { %11203 = vmatprep.subr.bf16.mxu0 %v16900_v63  ;;  %12228 = vmatprep.subr.bf16.mxu1 %v16903_v61  ;;  %v16982_v63 = vld [vmem:[%s17468_s9 + $0x2dc0] ss:$16 sps:$4 sm:$0xff]   ;;  %v16985_v61 = vld [vmem:[%s17468_s9 + $0x2dc8] ss:$16 sps:$4 sm:$0xff]  }
 0x5d4   : > { %11195 = vmatmul.mubr.bf16.vlgmr.msra.gmra.mrb[0].mxu0 %v2225_v52  ;;  %12220 = vmatmul.mubr.bf16.vlgmr.msra.gmra.mrb[0].mxu1 %v2225_v52  ;;  %v16993_v52 = vld [vmem:[%s17468_s9 + $0x2dec] ss:$16 sps:$4 sm:$0xff]  }
 0x5d5   : > { %11204 = vmatpush1.bf16.msra.mxu0 %v16898_v17  ;;  %12229 = vmatpush1.bf16.msra.mxu1 %v16901_v6  ;;  %v16988_v17 = vld [vmem:[%s17468_s9 + $0x2de0] ss:$16 sps:$4 sm:$0xff]   ;;  %v16991_v6 = vld [vmem:[%s17468_s9 + $0x2de8] ss:$16 sps:$4 sm:$0xff]  }
 0x5d6   : > { %11205 = vmatprep.subr.bf16.mxu0 %v16906_v8  ;;  %12230 = vmatprep.subr.bf16.mxu1 %v16909_v18  ;;  %v16997_v8 = vld [vmem:[%s17468_s9 + $0x2e04] ss:$16 sps:$4 sm:$0xff]   ;;  %v17000_v18 = vld [vmem:[%s17468_s9 + $0x2e0c] ss:$16 sps:$4 sm:$0xff]  }
 0x5d7   : > { %11235 = vmatprep.mubr.bf16.mxu0 %v19156_v19  ;;  %12260 = vmatprep.mubr.bf16.mxu1 %v19156_v19 }
 0x5d9   : > { %11206 = vmatpush1.bf16.msra.mxu0 %v16904_v7  ;;  %12231 = vmatpush1.bf16.msra.mxu1 %v16907_v13  ;;  %v19222_v7 = vrot.slane %v19141_v12, %v17527_v49  ;;  %v16995_v13 = vld [vmem:[%s17468_s9 + $0x2e00] ss:$16 sps:$4 sm:$0xff]  }
 0x5da   : > { %11207 = vmatprep.subr.bf16.mxu0 %v16912_v23  ;;  %12232 = vmatprep.subr.bf16.mxu1 %v16915_v24  ;;  %v16998_v23 = vld [vmem:[%s17468_s9 + $0x2e08] ss:$16 sps:$4 sm:$0xff]   ;;  %v17003_v24 = vld [vmem:[%s17468_s9 + $0x2e24] ss:$16 sps:$4 sm:$0xff]   ;;  %v17001_v12 = vld [vmem:[%s17468_s9 + $0x2e20] ss:$16 sps:$4 sm:$0xff]  }
 0x5dd   : > { %11208 = vmatpush1.bf16.msra.mxu0 %v16910_v60  ;;  %12233 = vmatpush1.bf16.msra.mxu1 %v16913_v27  ;;  %v17006_v60 = vld [vmem:[%s17468_s9 + $0x2e2c] ss:$16 sps:$4 sm:$0xff]   ;;  %v2228_v27 = vcombine.high %v19156_v19, %v19156_v19  ;;  %v17007_v19 = vld [vmem:[%s17468_s9 + $0x2e40] ss:$16 sps:$4 sm:$0xff]  }
 0x5de   : > { %11209 = vmatprep.subr.bf16.mxu0 %v16918_v28  ;;  %12234 = vmatprep.subr.bf16.mxu1 %v16921_v10  ;;  %v17004_v28 = vld [vmem:[%s17468_s9 + $0x2e28] ss:$16 sps:$4 sm:$0xff]   ;;  %v17009_v10 = vld [vmem:[%s17468_s9 + $0x2e44] ss:$16 sps:$4 sm:$0xff]  }
 0x5e1   : > { %11210 = vmatpush1.bf16.msra.mxu0 %v16916_v29  ;;  %12235 = vmatpush1.bf16.msra.mxu1 %v16919_v30  ;;  %v17012_v29 = vld [vmem:[%s17468_s9 + $0x2e4c] ss:$16 sps:$4 sm:$0xff]   ;;  %v17010_v30 = vld [vmem:[%s17468_s9 + $0x2e48] ss:$16 sps:$4 sm:$0xff]  }
 0x5e2   : > { %11211 = vmatprep.subr.bf16.mxu0 %v16924_v20  ;;  %12236 = vmatprep.subr.bf16.mxu1 %v16927_v31  ;;  %v17015_v20 = vld [vmem:[%s17468_s9 + $0x2e64] ss:$16 sps:$4 sm:$0xff]   ;;  %v17018_v31 = vld [vmem:[%s17468_s9 + $0x2e6c] ss:$16 sps:$4 sm:$0xff]  }
 0x5e5   : > { %11212 = vmatpush1.bf16.msra.mxu0 %v16922_v32  ;;  %12237 = vmatpush1.bf16.msra.mxu1 %v16925_v25  ;;  %v17013_v32 = vld [vmem:[%s17468_s9 + $0x2e60] ss:$16 sps:$4 sm:$0xff]   ;;  %v17016_v25 = vld [vmem:[%s17468_s9 + $0x2e68] ss:$16 sps:$4 sm:$0xff]  }
 0x5e6   : > { %11213 = vmatprep.subr.bf16.mxu0 %v16930_v36  ;;  %12238 = vmatprep.subr.bf16.mxu1 %v16933_v37  ;;  %v17021_v36 = vld [vmem:[%s17468_s9 + $0x2e84] ss:$16 sps:$4 sm:$0xff]   ;;  %v17024_v37 = vld [vmem:[%s17468_s9 + $0x2e8c] ss:$16 sps:$4 sm:$0xff]  }
 0x5e9   : > { %11214 = vmatpush1.bf16.msra.mxu0 %v16928_v39  ;;  %12239 = vmatpush1.bf16.msra.mxu1 %v16931_v26  ;;  %v17019_v39 = vld [vmem:[%s17468_s9 + $0x2e80] ss:$16 sps:$4 sm:$0xff]   ;;  %v17022_v26 = vld [vmem:[%s17468_s9 + $0x2e88] ss:$16 sps:$4 sm:$0xff]  }
 0x5ea   : > { %11215 = vmatprep.subr.bf16.mxu0 %v16936_v40  ;;  %12240 = vmatprep.subr.bf16.mxu1 %v16939_v21  ;;  %v17027_v40 = vld [vmem:[%s17468_s9 + $0x2ea4] ss:$16 sps:$4 sm:$0xff]   ;;  %v17030_v21 = vld [vmem:[%s17468_s9 + $0x2eac] ss:$16 sps:$4 sm:$0xff]  }
 0x5ed   : > { %11216 = vmatpush1.bf16.msra.mxu0 %v16934_v41  ;;  %12241 = vmatpush1.bf16.msra.mxu1 %v16937_v33  ;;  %v17025_v41 = vld [vmem:[%s17468_s9 + $0x2ea0] ss:$16 sps:$4 sm:$0xff]   ;;  %v17028_v33 = vld [vmem:[%s17468_s9 + $0x2ea8] ss:$16 sps:$4 sm:$0xff]  }
 0x5ee   : > { %11217 = vmatprep.subr.bf16.mxu0 %v16942_v42  ;;  %12242 = vmatprep.subr.bf16.mxu1 %v16945_v44  ;;  %v17033_v42 = vld [vmem:[%s17468_s9 + $0x2ec4] ss:$16 sps:$4 sm:$0xff]   ;;  %v17036_v44 = vld [vmem:[%s17468_s9 + $0x2ecc] ss:$16 sps:$4 sm:$0xff]  }
 0x5f1   : > { %11218 = vmatpush1.bf16.msra.mxu0 %v16940_v22  ;;  %12243 = vmatpush1.bf16.msra.mxu1 %v16943_v47  ;;  %v17031_v22 = vld [vmem:[%s17468_s9 + $0x2ec0] ss:$16 sps:$4 sm:$0xff]   ;;  %v17034_v47 = vld [vmem:[%s17468_s9 + $0x2ec8] ss:$16 sps:$4 sm:$0xff]  }
 0x5f2   : > { %11219 = vmatprep.subr.bf16.mxu0 %v16948_v50  ;;  %12244 = vmatprep.subr.bf16.mxu1 %v16951_v15  ;;  %v17039_v50 = vld [vmem:[%s17468_s9 + $0x2ee4] ss:$16 sps:$4 sm:$0xff]   ;;  %v17042_v15 = vld [vmem:[%s17468_s9 + $0x2eec] ss:$16 sps:$4 sm:$0xff]  }
 0x5f5   : > { %11220 = vmatpush1.bf16.msra.mxu0 %v16946_v53  ;;  %12245 = vmatpush1.bf16.msra.mxu1 %v16949_v54  ;;  %v17037_v53 = vld [vmem:[%s17468_s9 + $0x2ee0] ss:$16 sps:$4 sm:$0xff]   ;;  %v17040_v54 = vld [vmem:[%s17468_s9 + $0x2ee8] ss:$16 sps:$4 sm:$0xff]  }
 0x5f6   : > { %11221 = vmatprep.subr.bf16.mxu0 %v16954_v34  ;;  %12246 = vmatprep.subr.bf16.mxu1 %v16957_v55  ;;  %v17045_v34 = vld [vmem:[%s17468_s9 + $0x2f04] ss:$16 sps:$4 sm:$0xff]   ;;  %v17048_v55 = vld [vmem:[%s17468_s9 + $0x2f0c] ss:$16 sps:$4 sm:$0xff]  }
 0x5f9   : > { %11222 = vmatpush1.bf16.msra.mxu0 %v16952_v38  ;;  %12247 = vmatpush1.bf16.msra.mxu1 %v16955_v45  ;;  %v17043_v38 = vld [vmem:[%s17468_s9 + $0x2f00] ss:$16 sps:$4 sm:$0xff]   ;;  %v17046_v45 = vld [vmem:[%s17468_s9 + $0x2f08] ss:$16 sps:$4 sm:$0xff]  }
 0x5fa   : > { %11223 = vmatprep.subr.bf16.mxu0 %v16960_v57  ;;  %12248 = vmatprep.subr.bf16.mxu1 %v16963_v58  ;;  %v17051_v57 = vld [vmem:[%s17468_s9 + $0x2f24] ss:$16 sps:$4 sm:$0xff]   ;;  %v17054_v58 = vld [vmem:[%s17468_s9 + $0x2f2c] ss:$16 sps:$4 sm:$0xff]  }
 0x5fd   : > { %11224 = vmatpush1.bf16.msra.mxu0 %v16958_v59  ;;  %12249 = vmatpush1.bf16.msra.mxu1 %v16961_v62  ;;  %v17049_v59 = vld [vmem:[%s17468_s9 + $0x2f20] ss:$16 sps:$4 sm:$0xff]   ;;  %v17052_v62 = vld [vmem:[%s17468_s9 + $0x2f28] ss:$16 sps:$4 sm:$0xff]  }
 0x5fe   : > { %11225 = vmatprep.subr.bf16.mxu0 %v16966_v0  ;;  %12250 = vmatprep.subr.bf16.mxu1 %v16969_v1  ;;  %v17057_v0 = vld [vmem:[%s17468_s9 + $0x2f44] ss:$16 sps:$4 sm:$0xff]   ;;  %v17060_v1 = vld [vmem:[%s17468_s9 + $0x2f4c] ss:$16 sps:$4 sm:$0xff]  }
 0x601   : > { %11226 = vmatpush1.bf16.msra.mxu0 %v16964_v51  ;;  %12251 = vmatpush1.bf16.msra.mxu1 %v16967_v35  ;;  %v17055_v51 = vld [vmem:[%s17468_s9 + $0x2f40] ss:$16 sps:$4 sm:$0xff]   ;;  %v17058_v35 = vld [vmem:[%s17468_s9 + $0x2f48] ss:$16 sps:$4 sm:$0xff]  }
 0x602   : > { %11227 = vmatprep.subr.bf16.mxu0 %v16972_v2  ;;  %12252 = vmatprep.subr.bf16.mxu1 %v16975_v3  ;;  %v17063_v2 = vld [vmem:[%s17468_s9 + $0x2f64] ss:$16 sps:$4 sm:$0xff]   ;;  %v17066_v3 = vld [vmem:[%s17468_s9 + $0x2f6c] ss:$16 sps:$4 sm:$0xff]  }
 0x605   : > { %11228 = vmatpush1.bf16.msra.mxu0 %v16970_v48  ;;  %12253 = vmatpush1.bf16.msra.mxu1 %v16973_v4  ;;  %v17061_v48 = vld [vmem:[%s17468_s9 + $0x2f60] ss:$16 sps:$4 sm:$0xff]   ;;  %v17064_v4 = vld [vmem:[%s17468_s9 + $0x2f68] ss:$16 sps:$4 sm:$0xff]  }
 0x606   : > { %11229 = vmatprep.subr.bf16.mxu0 %v16978_v5  ;;  %12254 = vmatprep.subr.bf16.mxu1 %v16981_v46  ;;  %v17069_v5 = vld [vmem:[%s17468_s9 + $0x2f84] ss:$16 sps:$4 sm:$0xff]   ;;  %v17072_v46 = vld [vmem:[%s17468_s9 + $0x2f8c] ss:$16 sps:$4 sm:$0xff]  }
 0x609   : > { %11230 = vmatpush1.bf16.msra.mxu0 %v16976_v9  ;;  %12255 = vmatpush1.bf16.msra.mxu1 %v16979_v11  ;;  %v17067_v9 = vld [vmem:[%s17468_s9 + $0x2f80] ss:$16 sps:$4 sm:$0xff]   ;;  %v17070_v11 = vld [vmem:[%s17468_s9 + $0x2f88] ss:$16 sps:$4 sm:$0xff]  }
 0x60a   : > { %11231 = vmatprep.subr.bf16.mxu0 %v16984_v56  ;;  %12256 = vmatprep.subr.bf16.mxu1 %v16987_v14  ;;  %v17075_v56 = vld [vmem:[%s17468_s9 + $0x2fa4] ss:$16 sps:$4 sm:$0xff]   ;;  %v17078_v14 = vld [vmem:[%s17468_s9 + $0x2fac] ss:$16 sps:$4 sm:$0xff]  }
 0x60d   : > { %11232 = vmatpush1.bf16.msra.mxu0 %v16982_v63  ;;  %12257 = vmatpush1.bf16.msra.mxu1 %v16985_v61  ;;  %v17073_v63 = vld [vmem:[%s17468_s9 + $0x2fa0] ss:$16 sps:$4 sm:$0xff]   ;;  %v17076_v61 = vld [vmem:[%s17468_s9 + $0x2fa8] ss:$16 sps:$4 sm:$0xff]  }
 0x60e   : > { %11233 = vmatprep.subr.bf16.mxu0 %v16990_v16  ;;  %12258 = vmatprep.subr.bf16.mxu1 %v16993_v52  ;;  %v17081_v16 = vld [vmem:[%s17468_s9 + $0x2fc4] ss:$16 sps:$4 sm:$0xff]   ;;  %v17084_v52 = vld [vmem:[%s17468_s9 + $0x2fcc] ss:$16 sps:$4 sm:$0xff]  }
 0x611   : > { %11234 = vmatpush1.bf16.msra.mxu0 %v16988_v17  ;;  %12259 = vmatpush1.bf16.msra.mxu1 %v16991_v6  ;;  %v17079_v17 = vld [vmem:[%s17468_s9 + $0x2fc0] ss:$16 sps:$4 sm:$0xff]   ;;  %v17082_v6 = vld [vmem:[%s17468_s9 + $0x2fc8] ss:$16 sps:$4 sm:$0xff]  }
 0x612   : > { %11244 = vmatprep.subr.bf16.mxu0 %v16997_v8  ;;  %12269 = vmatprep.subr.bf16.mxu1 %v17000_v18  ;;  %v17087_v8 = vld [vmem:[%s17468_s9 + $0x2fe4] ss:$16 sps:$4 sm:$0xff]   ;;  %v17090_v18 = vld [vmem:[%s17468_s9 + $0x2fec] ss:$16 sps:$4 sm:$0xff]  }
 0x614   : > { %11236 = vmatmul.mubr.bf16.vlgmr.msra.gmra.mrb[0].mxu0 %v19222_v7  ;;  %12261 = vmatmul.mubr.bf16.vlgmr.msra.gmra.mrb[0].mxu1 %v19222_v7 }
 0x615   : > { %11245 = vmatpush1.bf16.msra.mxu0 %v16995_v13  ;;  %12270 = vmatpush1.bf16.msra.mxu1 %v16998_v23  ;;  %v19291_v13 = vld.sshfl [vmem:[%s19465_s0 + $0x30] sm:$0x11 pattern:$0x75316420] }
 0x616   : > { %11246 = vmatprep.subr.bf16.mxu0 %v17003_v24  ;;  %12271 = vmatprep.subr.bf16.mxu1 %v17006_v60  ;;  %v17085_v23 = vld [vmem:[%s17468_s9 + $0x2fe0] ss:$16 sps:$4 sm:$0xff]   ;;  %v17088_v24 = vld [vmem:[%s17468_s9 + $0x2fe8] ss:$16 sps:$4 sm:$0xff]   ;;  %v17093_v60 = vld [vmem:[%s17468_s9 + $0x3004] ss:$16 sps:$4 sm:$0xff]  }
 0x617   : > { %11276 = vmatprep.mubr.bf16.mxu0 %v2228_v27  ;;  %12301 = vmatprep.mubr.bf16.mxu1 %v2228_v27  ;;  %v17096_v27 = vld [vmem:[%s17468_s9 + $0x300c] ss:$16 sps:$4 sm:$0xff]  }
 0x619   : > { %11247 = vmatpush1.bf16.msra.mxu0 %v17001_v12  ;;  %12272 = vmatpush1.bf16.msra.mxu1 %v17004_v28  ;;  %v2236_v12 = vcombine.high %v19291_v13, %v19291_v13  ;;  %v2226_v28 = vcombine.high %v19222_v7, %v19222_v7  ;;  %v17097_v7 = vld [vmem:[%s17468_s9 + $0x3020] ss:$16 sps:$4 sm:$0xff]  }
 0x61a   : > { %11248 = vmatprep.subr.bf16.mxu0 %v17009_v10  ;;  %12273 = vmatprep.subr.bf16.mxu1 %v17012_v29  ;;  %v17091_v10 = vld [vmem:[%s17468_s9 + $0x3000] ss:$16 sps:$4 sm:$0xff]   ;;  %v17094_v29 = vld [vmem:[%s17468_s9 + $0x3008] ss:$16 sps:$4 sm:$0xff]  }
 0x61d   : > { %11249 = vmatpush1.bf16.msra.mxu0 %v17007_v19  ;;  %12274 = vmatpush1.bf16.msra.mxu1 %v17010_v30  ;;  %v17099_v19 = vld [vmem:[%s17468_s9 + $0x3024] ss:$16 sps:$4 sm:$0xff]   ;;  %v17102_v30 = vld [vmem:[%s17468_s9 + $0x302c] ss:$16 sps:$4 sm:$0xff]  }
 0x61e   : > { %11250 = vmatprep.subr.bf16.mxu0 %v17015_v20  ;;  %12275 = vmatprep.subr.bf16.mxu1 %v17018_v31  ;;  %v2250_v20 = vrot.slane %v2236_v12, %v17527_v49  ;;  %v17100_v31 = vld [vmem:[%s17468_s9 + $0x3028] ss:$16 sps:$4 sm:$0xff]   ;;  %v17183_v12 = vld [vmem:[%s17468_s9 + $0x31e4] ss:$16 sps:$4 sm:$0xff]  }
 0x621   : > { %11251 = vmatpush1.bf16.msra.mxu0 %v17013_v32  ;;  %12276 = vmatpush1.bf16.msra.mxu1 %v17016_v25  ;;  %v17105_v32 = vld [vmem:[%s17468_s9 + $0x3044] ss:$16 sps:$4 sm:$0xff]   ;;  %v17108_v25 = vld [vmem:[%s17468_s9 + $0x304c] ss:$16 sps:$4 sm:$0xff]  }
 0x622   : > { %11252 = vmatprep.subr.bf16.mxu0 %v17021_v36  ;;  %12277 = vmatprep.subr.bf16.mxu1 %v17024_v37  ;;  %v17103_v36 = vld [vmem:[%s17468_s9 + $0x3040] ss:$16 sps:$4 sm:$0xff]   ;;  %v17106_v37 = vld [vmem:[%s17468_s9 + $0x3048] ss:$16 sps:$4 sm:$0xff]  }
 0x625   : > { %11253 = vmatpush1.bf16.msra.mxu0 %v17019_v39  ;;  %12278 = vmatpush1.bf16.msra.mxu1 %v17022_v26  ;;  %v17111_v39 = vld [vmem:[%s17468_s9 + $0x3064] ss:$16 sps:$4 sm:$0xff]   ;;  %v17114_v26 = vld [vmem:[%s17468_s9 + $0x306c] ss:$16 sps:$4 sm:$0xff]  }
 0x626   : > { %11254 = vmatprep.subr.bf16.mxu0 %v17027_v40  ;;  %12279 = vmatprep.subr.bf16.mxu1 %v17030_v21  ;;  %v17109_v40 = vld [vmem:[%s17468_s9 + $0x3060] ss:$16 sps:$4 sm:$0xff]   ;;  %v17112_v21 = vld [vmem:[%s17468_s9 + $0x3068] ss:$16 sps:$4 sm:$0xff]  }
 0x629   : > { %11255 = vmatpush1.bf16.msra.mxu0 %v17025_v41  ;;  %12280 = vmatpush1.bf16.msra.mxu1 %v17028_v33  ;;  %v17117_v41 = vld [vmem:[%s17468_s9 + $0x3084] ss:$16 sps:$4 sm:$0xff]   ;;  %v17120_v33 = vld [vmem:[%s17468_s9 + $0x308c] ss:$16 sps:$4 sm:$0xff]  }
 0x62a   : > { %11256 = vmatprep.subr.bf16.mxu0 %v17033_v42  ;;  %12281 = vmatprep.subr.bf16.mxu1 %v17036_v44  ;;  %v17115_v42 = vld [vmem:[%s17468_s9 + $0x3080] ss:$16 sps:$4 sm:$0xff]   ;;  %v17118_v44 = vld [vmem:[%s17468_s9 + $0x3088] ss:$16 sps:$4 sm:$0xff]  }
 0x62d   : > { %11257 = vmatpush1.bf16.msra.mxu0 %v17031_v22  ;;  %12282 = vmatpush1.bf16.msra.mxu1 %v17034_v47  ;;  %v17123_v22 = vld [vmem:[%s17468_s9 + $0x30a4] ss:$16 sps:$4 sm:$0xff]   ;;  %v17126_v47 = vld [vmem:[%s17468_s9 + $0x30ac] ss:$16 sps:$4 sm:$0xff]  }
 0x62e   : > { %11258 = vmatprep.subr.bf16.mxu0 %v17039_v50  ;;  %12283 = vmatprep.subr.bf16.mxu1 %v17042_v15  ;;  %v17121_v50 = vld [vmem:[%s17468_s9 + $0x30a0] ss:$16 sps:$4 sm:$0xff]   ;;  %v17124_v15 = vld [vmem:[%s17468_s9 + $0x30a8] ss:$16 sps:$4 sm:$0xff]  }
 0x631   : > { %11259 = vmatpush1.bf16.msra.mxu0 %v17037_v53  ;;  %12284 = vmatpush1.bf16.msra.mxu1 %v17040_v54  ;;  %v17129_v53 = vld [vmem:[%s17468_s9 + $0x30c4] ss:$16 sps:$4 sm:$0xff]   ;;  %v17132_v54 = vld [vmem:[%s17468_s9 + $0x30cc] ss:$16 sps:$4 sm:$0xff]  }
 0x632   : > { %11260 = vmatprep.subr.bf16.mxu0 %v17045_v34  ;;  %12285 = vmatprep.subr.bf16.mxu1 %v17048_v55  ;;  %v17127_v34 = vld [vmem:[%s17468_s9 + $0x30c0] ss:$16 sps:$4 sm:$0xff]   ;;  %v17130_v55 = vld [vmem:[%s17468_s9 + $0x30c8] ss:$16 sps:$4 sm:$0xff]  }
 0x635   : > { %11261 = vmatpush1.bf16.msra.mxu0 %v17043_v38  ;;  %12286 = vmatpush1.bf16.msra.mxu1 %v17046_v45  ;;  %v17135_v38 = vld [vmem:[%s17468_s9 + $0x30e4] ss:$16 sps:$4 sm:$0xff]   ;;  %v17138_v45 = vld [vmem:[%s17468_s9 + $0x30ec] ss:$16 sps:$4 sm:$0xff]  }
 0x636   : > { %11262 = vmatprep.subr.bf16.mxu0 %v17051_v57  ;;  %12287 = vmatprep.subr.bf16.mxu1 %v17054_v58  ;;  %v17133_v57 = vld [vmem:[%s17468_s9 + $0x30e0] ss:$16 sps:$4 sm:$0xff]   ;;  %v17136_v58 = vld [vmem:[%s17468_s9 + $0x30e8] ss:$16 sps:$4 sm:$0xff]  }
 0x639   : > { %11263 = vmatpush1.bf16.msra.mxu0 %v17049_v59  ;;  %12288 = vmatpush1.bf16.msra.mxu1 %v17052_v62  ;;  %v17141_v59 = vld [vmem:[%s17468_s9 + $0x3104] ss:$16 sps:$4 sm:$0xff]   ;;  %v17144_v62 = vld [vmem:[%s17468_s9 + $0x310c] ss:$16 sps:$4 sm:$0xff]  }
 0x63a   : > { %11264 = vmatprep.subr.bf16.mxu0 %v17057_v0  ;;  %12289 = vmatprep.subr.bf16.mxu1 %v17060_v1  ;;  %v17139_v0 = vld [vmem:[%s17468_s9 + $0x3100] ss:$16 sps:$4 sm:$0xff]   ;;  %v17142_v1 = vld [vmem:[%s17468_s9 + $0x3108] ss:$16 sps:$4 sm:$0xff]  }
 0x63d   : > { %11265 = vmatpush1.bf16.msra.mxu0 %v17055_v51  ;;  %12290 = vmatpush1.bf16.msra.mxu1 %v17058_v35  ;;  %v17147_v51 = vld [vmem:[%s17468_s9 + $0x3124] ss:$16 sps:$4 sm:$0xff]   ;;  %v17150_v35 = vld [vmem:[%s17468_s9 + $0x312c] ss:$16 sps:$4 sm:$0xff]  }
 0x63e   : > { %11266 = vmatprep.subr.bf16.mxu0 %v17063_v2  ;;  %12291 = vmatprep.subr.bf16.mxu1 %v17066_v3  ;;  %v17145_v2 = vld [vmem:[%s17468_s9 + $0x3120] ss:$16 sps:$4 sm:$0xff]   ;;  %v17148_v3 = vld [vmem:[%s17468_s9 + $0x3128] ss:$16 sps:$4 sm:$0xff]  }
 0x641   : > { %11267 = vmatpush1.bf16.msra.mxu0 %v17061_v48  ;;  %12292 = vmatpush1.bf16.msra.mxu1 %v17064_v4  ;;  %v17153_v48 = vld [vmem:[%s17468_s9 + $0x3144] ss:$16 sps:$4 sm:$0xff]   ;;  %v17156_v4 = vld [vmem:[%s17468_s9 + $0x314c] ss:$16 sps:$4 sm:$0xff]  }
 0x642   : > { %11268 = vmatprep.subr.bf16.mxu0 %v17069_v5  ;;  %12293 = vmatprep.subr.bf16.mxu1 %v17072_v46  ;;  %v17151_v5 = vld [vmem:[%s17468_s9 + $0x3140] ss:$16 sps:$4 sm:$0xff]   ;;  %v17154_v46 = vld [vmem:[%s17468_s9 + $0x3148] ss:$16 sps:$4 sm:$0xff]  }
 0x645   : > { %11269 = vmatpush1.bf16.msra.mxu0 %v17067_v9  ;;  %12294 = vmatpush1.bf16.msra.mxu1 %v17070_v11  ;;  %v17159_v9 = vld [vmem:[%s17468_s9 + $0x3164] ss:$16 sps:$4 sm:$0xff]   ;;  %v17162_v11 = vld [vmem:[%s17468_s9 + $0x316c] ss:$16 sps:$4 sm:$0xff]  }
 0x646   : > { %11270 = vmatprep.subr.bf16.mxu0 %v17075_v56  ;;  %12295 = vmatprep.subr.bf16.mxu1 %v17078_v14  ;;  %v17157_v56 = vld [vmem:[%s17468_s9 + $0x3160] ss:$16 sps:$4 sm:$0xff]   ;;  %v17160_v14 = vld [vmem:[%s17468_s9 + $0x3168] ss:$16 sps:$4 sm:$0xff]  }
 0x649   : > { %11271 = vmatpush1.bf16.msra.mxu0 %v17073_v63  ;;  %12296 = vmatpush1.bf16.msra.mxu1 %v17076_v61  ;;  %v17165_v63 = vld [vmem:[%s17468_s9 + $0x3184] ss:$16 sps:$4 sm:$0xff]   ;;  %v17168_v61 = vld [vmem:[%s17468_s9 + $0x318c] ss:$16 sps:$4 sm:$0xff]  }
 0x64a   : > { %11272 = vmatprep.subr.bf16.mxu0 %v17081_v16  ;;  %12297 = vmatprep.subr.bf16.mxu1 %v17084_v52  ;;  %v17163_v16 = vld [vmem:[%s17468_s9 + $0x3180] ss:$16 sps:$4 sm:$0xff]   ;;  %v17166_v52 = vld [vmem:[%s17468_s9 + $0x3188] ss:$16 sps:$4 sm:$0xff]  }
 0x64d   : > { %11273 = vmatpush1.bf16.msra.mxu0 %v17079_v17  ;;  %12298 = vmatpush1.bf16.msra.mxu1 %v17082_v6  ;;  %v17171_v17 = vld [vmem:[%s17468_s9 + $0x31a4] ss:$16 sps:$4 sm:$0xff]   ;;  %v17174_v6 = vld [vmem:[%s17468_s9 + $0x31ac] ss:$16 sps:$4 sm:$0xff]  }
 0x64e   : > { %11274 = vmatprep.subr.bf16.mxu0 %v17087_v8  ;;  %12299 = vmatprep.subr.bf16.mxu1 %v17090_v18  ;;  %v17169_v8 = vld [vmem:[%s17468_s9 + $0x31a0] ss:$16 sps:$4 sm:$0xff]   ;;  %v17172_v18 = vld [vmem:[%s17468_s9 + $0x31a8] ss:$16 sps:$4 sm:$0xff]  }
 0x651   : > { %11275 = vmatpush1.bf16.msra.mxu0 %v17085_v23  ;;  %12300 = vmatpush1.bf16.msra.mxu1 %v17088_v24  ;;  %v17177_v23 = vld [vmem:[%s17468_s9 + $0x31c4] ss:$16 sps:$4 sm:$0xff]   ;;  %v17180_v24 = vld [vmem:[%s17468_s9 + $0x31cc] ss:$16 sps:$4 sm:$0xff]  }
 0x652   : > { %11285 = vmatprep.subr.bf16.mxu0 %v17093_v60  ;;  %12310 = vmatprep.subr.bf16.mxu1 %v17096_v27  ;;  %v17175_v60 = vld [vmem:[%s17468_s9 + $0x31c0] ss:$16 sps:$4 sm:$0xff]   ;;  %v17178_v27 = vld [vmem:[%s17468_s9 + $0x31c8] ss:$16 sps:$4 sm:$0xff]  }
 0x654   : > { %11277 = vmatmul.mubr.bf16.vlgmr.msra.gmra.mrb[0].mxu0 %v2226_v28  ;;  %12302 = vmatmul.mubr.bf16.vlgmr.msra.gmra.mrb[0].mxu1 %v2226_v28  ;;  %v17186_v28 = vld [vmem:[%s17468_s9 + $0x31ec] ss:$16 sps:$4 sm:$0xff]  }
 0x655   : > { %11286 = vmatpush1.bf16.msra.mxu0 %v17091_v10  ;;  %12311 = vmatpush1.bf16.msra.mxu1 %v17094_v29  ;;  %v12433_v10 = vld [vmem:[%s19362_s29 + $0x80] sm:$0xff]  ;;  %v12434_v29 = vld [vmem:[%s19362_s29 + $0x88] sm:$0xff] }
 0x656   : > { %11287 = vmatprep.subr.bf16.mxu0 %v17099_v19  ;;  %12312 = vmatprep.subr.bf16.mxu1 %v17102_v30  ;;  %v12465_v19 = vld [vmem:[%s19362_s29 + $0x180] sm:$0xff]  ;;  %v12466_v30 = vld [vmem:[%s19362_s29 + $0x188] sm:$0xff] }
 0x657   : > { %11317 = vmatprep.mubr.bf16.mxu0 %v2250_v20  ;;  %12342 = vmatprep.mubr.bf16.mxu1 %v2250_v20  ;;  %v17181_v20 = vld [vmem:[%s17468_s9 + $0x31e0] ss:$16 sps:$4 sm:$0xff]  }
 0x659   : > { %11288 = vmatpush1.bf16.msra.mxu0 %v17097_v7  ;;  %12313 = vmatpush1.bf16.msra.mxu1 %v17100_v31  ;;  %v17184_v7 = vld [vmem:[%s17468_s9 + $0x31e8] ss:$16 sps:$4 sm:$0xff]   ;;  %v12417_v31 = vld [vmem:[%s19362_s29] sm:$0xff]  ;;  %s12782_s9 = sshll.u32 %s19487_s18, 1 }
 0x65a   : > { %11289 = vmatprep.subr.bf16.mxu0 %v17105_v32  ;;  %12314 = vmatprep.subr.bf16.mxu1 %v17108_v25  ;;  %v12418_v32 = vld [vmem:[%s19362_s29 + $0x8] sm:$0xff]  ;;  %v14458_v25 = vpack.c.bf16 %v12434_v29, %v12433_v10  ;;  %v12443_v10 = vld [vmem:[%s19362_s29 + $0xd0] sm:$0xff]  ;;  %v12444_v29 = vld [vmem:[%s19362_s29 + $0xd8] sm:$0xff]  ;;  %s314_s5 = scalar_lea.vmem %s19469_s4, %s12782_s9 }
 0x65d   : > { %11290 = vmatpush1.bf16.msra.mxu0 %v17103_v36  ;;  %12315 = vmatpush1.bf16.msra.mxu1 %v17106_v37  ;;  %v14490_v36 = vpack.c.bf16 %v12466_v30, %v12465_v19  ;;  %v12449_v37 = vld [vmem:[%s19362_s29 + $0x100] sm:$0xff]  ;;  %v14478_v19 = vpack.c.bf16 %v12444_v29, %v12443_v10  ;;  %v12427_v30 = vld [vmem:[%s19362_s29 + $0x50] sm:$0xff] }
 0x65e   : > { %11291 = vmatprep.subr.bf16.mxu0 %v17111_v39  ;;  %12316 = vmatprep.subr.bf16.mxu1 %v17114_v26  ;;  %v12450_v39 = vld [vmem:[%s19362_s29 + $0x108] sm:$0xff]  ;;  %v12435_v26 = vld [vmem:[%s19362_s29 + $0x90] sm:$0xff] }
 0x661   : > { %11292 = vmatpush1.bf16.msra.mxu0 %v17109_v40  ;;  %12317 = vmatpush1.bf16.msra.mxu1 %v17112_v21  ;;  %v12436_v40 = vld [vmem:[%s19362_s29 + $0x98] sm:$0xff]  ;;  %v12467_v21 = vld [vmem:[%s19362_s29 + $0x190] sm:$0xff] }
 0x662   : > { %11293 = vmatprep.subr.bf16.mxu0 %v17117_v41  ;;  %12318 = vmatprep.subr.bf16.mxu1 %v17120_v33  ;;  %v12468_v41 = vld [vmem:[%s19362_s29 + $0x198] sm:$0xff]  ;;  %v2243_v33 = vrot.slane %v19291_v13, %v17527_v49  ;;  %v12469_v49 = vld [vmem:[%s19362_s29 + $0x1a0] sm:$0xff]  ;;  %v12470_v13 = vld [vmem:[%s19362_s29 + $0x1a8] sm:$0xff] }
 0x665   : > { %11294 = vmatpush1.bf16.msra.mxu0 %v17115_v42  ;;  %12319 = vmatpush1.bf16.msra.mxu1 %v17118_v44  ;;  %v14460_v42 = vpack.c.bf16 %v12418_v32, %v12417_v31  ;;  %v14492_v44 = vpack.c.bf16 %v12450_v39, %v12449_v37  ;;  %v12475_v31 = vld [vmem:[%s19362_s29 + $0x1d0] sm:$0xff]  ;;  %v12476_v32 = vld [vmem:[%s19362_s29 + $0x1d8] sm:$0xff] }
 0x666   : > { %11295 = vmatprep.subr.bf16.mxu0 %v17123_v22  ;;  %12320 = vmatprep.subr.bf16.mxu1 %v17126_v47  ;;  %v12419_v22 = vld [vmem:[%s19362_s29 + $0x10] sm:$0xff]  ;;  %v12420_v47 = vld [vmem:[%s19362_s29 + $0x18] sm:$0xff] }
 0x667   : > { %v12460_v37 = vld [vmem:[%s19362_s29 + $0x158] sm:$0xff] }
 0x669   : > { %11296 = vmatpush1.bf16.msra.mxu0 %v17121_v50  ;;  %12321 = vmatpush1.bf16.msra.mxu1 %v17124_v15  ;;  %v14462_v50 = vpack.c.bf16 %v12436_v40, %v12435_v26  ;;  %v14494_v15 = vpack.c.bf16 %v12468_v41, %v12467_v21  ;;  %v12445_v26 = vld [vmem:[%s19362_s29 + $0xe0] sm:$0xff]  ;;  %v12446_v40 = vld [vmem:[%s19362_s29 + $0xe8] sm:$0xff] }
 0x66a   : > { %11297 = vmatprep.subr.bf16.mxu0 %v17129_v53  ;;  %12322 = vmatprep.subr.bf16.mxu1 %v17132_v54  ;;  %v12451_v53 = vld [vmem:[%s19362_s29 + $0x110] sm:$0xff]  ;;  %v12452_v54 = vld [vmem:[%s19362_s29 + $0x118] sm:$0xff]  ;;  %v14482_v21 = vpack.c.bf16 %v12446_v40, %v12445_v26  ;;  %v12429_v41 = vld [vmem:[%s19362_s29 + $0x60] sm:$0xff] }
 0x66d   : > { %11298 = vmatpush1.bf16.msra.mxu0 %v17127_v34  ;;  %12323 = vmatpush1.bf16.msra.mxu1 %v17130_v55  ;;  %v12437_v34 = vld [vmem:[%s19362_s29 + $0xa0] sm:$0xff]  ;;  %v12438_v55 = vld [vmem:[%s19362_s29 + $0xa8] sm:$0xff] }
 0x66e   : > { %11299 = vmatprep.subr.bf16.mxu0 %v17135_v38  ;;  %12324 = vmatprep.subr.bf16.mxu1 %v17138_v45  ;;  %v14464_v38 = vpack.c.bf16 %v12420_v47, %v12419_v22  ;;  %v14496_v45 = vpack.c.bf16 %v12452_v54, %v12451_v53  ;;  %v12478_v22 = vld [vmem:[%s19362_s29 + $0x1e8] sm:$0xff]  ;;  %v12447_v54 = vld [vmem:[%s19362_s29 + $0xf0] sm:$0xff] }
 0x671   : > { %11300 = vmatpush1.bf16.msra.mxu0 %v17133_v57  ;;  %12325 = vmatpush1.bf16.msra.mxu1 %v17136_v58  ;;  %v12421_v57 = vld [vmem:[%s19362_s29 + $0x20] sm:$0xff]  ;;  %v12422_v58 = vld [vmem:[%s19362_s29 + $0x28] sm:$0xff] }
 0x672   : > { %11301 = vmatprep.subr.bf16.mxu0 %v17141_v59  ;;  %12326 = vmatprep.subr.bf16.mxu1 %v17144_v62  ;;  %v14466_v59 = vpack.c.bf16 %v12438_v55, %v12437_v34  ;;  %v14498_v62 = vpack.c.bf16 %v12470_v13, %v12469_v49  ;;  %v12448_v34 = vld [vmem:[%s19362_s29 + $0xf8] sm:$0xff]  ;;  %v12431_v55 = vld [vmem:[%s19362_s29 + $0x70] sm:$0xff] }
 0x673   : > { %v14486_v49 = vpack.c.bf16 %v12448_v34, %v12447_v54  ;;  %v12432_v13 = vld [vmem:[%s19362_s29 + $0x78] sm:$0xff] }
 0x675   : > { %11302 = vmatpush1.bf16.msra.mxu0 %v17139_v0  ;;  %12327 = vmatpush1.bf16.msra.mxu1 %v17142_v1  ;;  %v12453_v0 = vld [vmem:[%s19362_s29 + $0x120] sm:$0xff]  ;;  %v12454_v1 = vld [vmem:[%s19362_s29 + $0x128] sm:$0xff] }
 0x676   : > { %11303 = vmatprep.subr.bf16.mxu0 %v17147_v51  ;;  %12328 = vmatprep.subr.bf16.mxu1 %v17150_v35  ;;  %v12439_v51 = vld [vmem:[%s19362_s29 + $0xb0] sm:$0xff]  ;;  %v12440_v35 = vld [vmem:[%s19362_s29 + $0xb8] sm:$0xff] }
 0x679   : > { %11304 = vmatpush1.bf16.msra.mxu0 %v17145_v2  ;;  %12329 = vmatpush1.bf16.msra.mxu1 %v17148_v3  ;;  %v12471_v2 = vld [vmem:[%s19362_s29 + $0x1b0] sm:$0xff]  ;;  %v12472_v3 = vld [vmem:[%s19362_s29 + $0x1b8] sm:$0xff] }
 0x67a   : > { %11305 = vmatprep.subr.bf16.mxu0 %v17153_v48  ;;  %12330 = vmatprep.subr.bf16.mxu1 %v17156_v4  ;;  %v14468_v48 = vpack.c.bf16 %v12422_v58, %v12421_v57  ;;  %v14500_v4 = vpack.c.bf16 %v12454_v1, %v12453_v0  ;;  %v14488_v57 = vpack.c.bf16 %v12432_v13, %v12431_v55  ;;  %v17313_v1 = vmov 1983009808  }
 0x67d   : > { %11306 = vmatpush1.bf16.msra.mxu0 %v17151_v5  ;;  %12331 = vmatpush1.bf16.msra.mxu1 %v17154_v46  ;;  %v14470_v5 = vpack.c.bf16 %v12440_v35, %v12439_v51  ;;  %v12423_v46 = vld [vmem:[%s19362_s29 + $0x30] sm:$0xff]  ;;  %v12358_v51 = vunpack.c.l.s4 %v17313_v1  ;;  %v12383_v35 = vsub.s32 0, %v17519_v43 }
 0x67e   : > { %11307 = vmatprep.subr.bf16.mxu0 %v17159_v9  ;;  %12332 = vmatprep.subr.bf16.mxu1 %v17162_v11  ;;  %v12424_v9 = vld [vmem:[%s19362_s29 + $0x38] sm:$0xff]  ;;  %v14502_v11 = vpack.c.bf16 %v12472_v3, %v12471_v2  ;;  %v12387_v2 = vsub.s32 1, %v17519_v43  ;;  %v12391_v3 = vsub.s32 2, %v17519_v43 }
 0x681   : > { %11308 = vmatpush1.bf16.msra.mxu0 %v17157_v56  ;;  %12333 = vmatpush1.bf16.msra.mxu1 %v17160_v14  ;;  %v14472_v56 = vpack.c.bf16 %v12424_v9, %v12423_v46  ;;  %v12455_v14 = vld [vmem:[%s19362_s29 + $0x130] sm:$0xff] }
 0x682   : > { %11309 = vmatprep.subr.bf16.mxu0 %v17165_v63  ;;  %12334 = vmatprep.subr.bf16.mxu1 %v17168_v61  ;;  %v12456_v63 = vld [vmem:[%s19362_s29 + $0x138] sm:$0xff] }
 0x683   : > { %v14504_v61 = vpack.c.bf16 %v12456_v63, %v12455_v14 }
 0x685   : > { %11310 = vmatpush1.bf16.msra.mxu0 %v17163_v16  ;;  %12335 = vmatpush1.bf16.msra.mxu1 %v17166_v52  ;;  %v12441_v16 = vld [vmem:[%s19362_s29 + $0xc0] sm:$0xff]  ;;  %v12442_v52 = vld [vmem:[%s19362_s29 + $0xc8] sm:$0xff] }
 0x686   : > { %11311 = vmatprep.subr.bf16.mxu0 %v17171_v17  ;;  %12336 = vmatprep.subr.bf16.mxu1 %v17174_v6  ;;  %v14474_v17 = vpack.c.bf16 %v12442_v52, %v12441_v16  ;;  %v12425_v6 = vld [vmem:[%s19362_s29 + $0x40] sm:$0xff] }
 0x689   : > { %11312 = vmatpush1.bf16.msra.mxu0 %v17169_v8  ;;  %12337 = vmatpush1.bf16.msra.mxu1 %v17172_v18  ;;  %v12426_v8 = vld [vmem:[%s19362_s29 + $0x48] sm:$0xff] }
 0x68a   : > { %11313 = vmatprep.subr.bf16.mxu0 %v17177_v23  ;;  %12338 = vmatprep.subr.bf16.mxu1 %v17180_v24  ;;  %v14476_v18 = vpack.c.bf16 %v12426_v8, %v12425_v6  ;;  %v12473_v23 = vld [vmem:[%s19362_s29 + $0x1c0] sm:$0xff]  ;;  %v12474_v24 = vld [vmem:[%s19362_s29 + $0x1c8] sm:$0xff] }
 0x68d   : > { %11314 = vmatpush1.bf16.msra.mxu0 %v17175_v60  ;;  %12339 = vmatpush1.bf16.msra.mxu1 %v17178_v27  ;;  %v14506_v60 = vpack.c.bf16 %v12474_v24, %v12473_v23  ;;  %v12457_v27 = vld [vmem:[%s19362_s29 + $0x140] sm:$0xff] }
 0x68e   : > { %11315 = vmatprep.subr.bf16.mxu0 %v17183_v12  ;;  %12340 = vmatprep.subr.bf16.mxu1 %v17186_v28  ;;  %v12458_v12 = vld [vmem:[%s19362_s29 + $0x148] sm:$0xff] }
 0x68f   : > { %v14508_v28 = vpack.c.bf16 %v12458_v12, %v12457_v27 }
 0x691   : > { %11316 = vmatpush1.bf16.msra.mxu0 %v17181_v20  ;;  %12341 = vmatpush1.bf16.msra.mxu1 %v17184_v7  ;;  %v12428_v20 = vld [vmem:[%s19362_s29 + $0x58] sm:$0xff] }
 0x692   : > { %14459 = vmatprep.subr.bf16.mxu0 %v14458_v25  ;;  %14491 = vmatprep.subr.bf16.mxu1 %v14490_v36  ;;  %v14480_v7 = vpack.c.bf16 %v12428_v20, %v12427_v30  ;;  %v14510_v25 = vpack.c.bf16 %v12476_v32, %v12475_v31  ;;  %v12459_v36 = vld [vmem:[%s19362_s29 + $0x150] sm:$0xff] }
 0x693   : > { %v14512_v39 = vpack.c.bf16 %v12460_v37, %v12459_v36 }
 0x694   : > { %11318 = vmatmul.mubr.bf16.vlgmr.msra.gmra.mrb[0].mxu0 %v2243_v33  ;;  %12343 = vmatmul.mubr.bf16.vlgmr.msra.gmra.mrb[0].mxu1 %v2243_v33  ;;  %v12430_v33 = vld [vmem:[%s19362_s29 + $0x68] sm:$0xff] }
 0x695   : > { %14461 = vmatpush3.bf16.msra.mxu0 %v14460_v42  ;;  %14493 = vmatpush3.bf16.msra.mxu1 %v14492_v44  ;;  %v14484_v42 = vpack.c.bf16 %v12430_v33, %v12429_v41  ;;  %v12477_v44 = vld [vmem:[%s19362_s29 + $0x1e0] sm:$0xff] }
 0x696   : > { %14463 = vmatprep.subr.bf16.mxu0 %v14462_v50  ;;  %14495 = vmatprep.subr.bf16.mxu1 %v14494_v15  ;;  %v14514_v47 = vpack.c.bf16 %v12478_v22, %v12477_v44  ;;  %v12461_v50 = vld [vmem:[%s19362_s29 + $0x160] sm:$0xff]  ;;  %v12462_v15 = vld [vmem:[%s19362_s29 + $0x168] sm:$0xff] }
 0x697   : > { %v14516_v53 = vpack.c.bf16 %v12462_v15, %v12461_v50 }
 0x699   : > { %14465 = vmatpush3.bf16.msra.mxu0 %v14464_v38  ;;  %14497 = vmatpush3.bf16.msra.mxu1 %v14496_v45  ;;  %v12479_v38 = vld [vmem:[%s19362_s29 + $0x1f0] sm:$0xff]  ;;  %v12480_v45 = vld [vmem:[%s19362_s29 + $0x1f8] sm:$0xff] }
 0x69a   : > { %14467 = vmatprep.subr.bf16.mxu0 %v14466_v59  ;;  %14499 = vmatprep.subr.bf16.mxu1 %v14498_v62  ;;  %v14518_v58 = vpack.c.bf16 %v12480_v45, %v12479_v38  ;;  %v12463_v59 = vld [vmem:[%s19362_s29 + $0x170] sm:$0xff]  ;;  %v12464_v62 = vld [vmem:[%s19362_s29 + $0x178] sm:$0xff] }
 0x69b   : > { %v14520_v0 = vpack.c.bf16 %v12464_v62, %v12463_v59 }
 0x69d   : > { %14469 = vmatpush3.bf16.msra.mxu0 %v14468_v48  ;;  %14501 = vmatpush3.bf16.msra.mxu1 %v14500_v4  ;;  %v12395_v48 = vsub.s32 3, %v17519_v43  ;;  %v12379_v4 = vld [vmem:[%s17474_s28] sm:$0xf] }
 0x69e   : > { %14471 = vmatprep.subr.bf16.mxu0 %v14470_v5  ;;  %14503 = vmatprep.subr.bf16.mxu1 %v14502_v11  ;;  %v12359_v5 = vunpack.c.0.s8 %v12358_v51  ;;  %v12384_v46 = vrot.slane %v12379_v4, %v12383_v35  ;;  %v12388_v9 = vrot.slane %v12379_v4, %v12387_v2  ;;  %v12392_v11 = vrot.slane %v12379_v4, %v12391_v3 }
 0x6a0   : > { %v12362_v14 = vsub.s32 %v12359_v5, %v17519_v43  ;;  %v12397_v63 = vcombine.low %v12384_v46, %v12388_v9 }
 0x6a1   : > { %14473 = vmatpush3.bf16.msra.mxu0 %v14472_v56  ;;  %14505 = vmatpush3.bf16.msra.mxu1 %v14504_v61  ;;  %v12396_v56 = vrot.slane %v12379_v4, %v12395_v48 }
 0x6a2   : > { %14475 = vmatprep.subr.bf16.mxu0 %v14474_v17  ;;  %14507 = vmatprep.subr.bf16.mxu1 %v14506_v60  ;;  %v12405_v17 = vrot.slane %v12397_v63, %v12362_v14 }
 0x6a3   : > { %v12398_v61 = vcombine.low %v12392_v11, %v12396_v56 }
 0x6a5   : > { %14477 = vmatpush3.bf16.msra.mxu0 %v14476_v18  ;;  %14509 = vmatpush3.bf16.msra.mxu1 %v14508_v28  ;;  %v12412_v6 = vrot.slane %v12398_v61, %v12362_v14 }
 0x6a6   : > { %14479 = vmatprep.subr.bf16.mxu0 %v14478_v19  ;;  %14511 = vmatprep.subr.bf16.mxu1 %v14510_v25 }
 0x6a7   : > { %v12413_v19 = vcombine.low %v12405_v17, %v12412_v6 }
 0x6a9   : > { %14481 = vmatpush3.bf16.msra.mxu0 %v14480_v7  ;;  %14513 = vmatpush3.bf16.msra.mxu1 %v14512_v39 }
 0x6aa   : > { %14483 = vmatprep.subr.bf16.mxu0 %v14482_v21  ;;  %14515 = vmatprep.subr.bf16.mxu1 %v14514_v47 }
 0x6ad   : > { %14485 = vmatpush3.bf16.msra.mxu0 %v14484_v42  ;;  %14517 = vmatpush3.bf16.msra.mxu1 %v14516_v53 }
 0x6ae   : > { %14487 = vmatprep.subr.bf16.mxu0 %v14486_v49  ;;  %14519 = vmatprep.subr.bf16.mxu1 %v14518_v58 }
 0x6b1   : > { %14489 = vmatpush3.bf16.msra.mxu0 %v14488_v57  ;;  %14521 = vmatpush3.bf16.msra.mxu1 %v14520_v0 }
 0x767   : > { %v11319_v16 = vpop.f32.mrb[0].mxu0  ;;  %v12344_v52 = vpop.f32.mrb[0].mxu1 }
 0x768   : > { %v11321_v8 = vpop.f32.mrb[1].mxu0  ;;  %v12346_v18 = vpop.f32.mrb[1].mxu1 }
 0x769   : > { %v12355_v23 = vcombine.low %v11319_v16, %v11321_v8  ;;  %v12356_v24 = vcombine.low %v12344_v52, %v12346_v18  ;;  %v11323_v60 = vpop.f32.mrb[2].mxu0  ;;  %v12348_v27 = vpop.f32.mrb[2].mxu1 }
 0x76a   : > { %v11324_v12 = vpop.f32.mrb[3].mxu0  ;;  %v12349_v28 = vpop.f32.mrb[3].mxu1 }
 0x76b   : > { %v12363_v10 = vrot.slane %v12355_v23, %v12362_v14  ;;  %v12370_v29 = vrot.slane %v12356_v24, %v12362_v14 }
 0x76d   : > { %v12371_v43 = vcombine.low %v12363_v10, %v12370_v29 }
 0x76f   : > { %v12415_v30 = vadd.f32 %v12413_v19, %v12371_v43 }
 0x771   : > { %v12416_v20 = vmax.f32 %v12415_v30, 0.0 }
 0x773   : > { %v12489_v7 = vrot.slane %v12416_v20, %v12362_v14  ;;  %v12482_v31 = vcombine.high %v12416_v20, %v12416_v20 }
 0x775   : > { %v12497_v32 = vcombine.high %v12489_v7, %v12489_v7  ;;  %v12496_v25 = vrot.slane %v12482_v31, %v12362_v14 }
 0x777   : > { %12567 = vmatprep.mubr.f32.mxu0 %v12497_v32  ;;  %v12498_v36 = vcombine.high %v12496_v25, %v12496_v25 }
 0x778   : > { %12568 = vmatmul.mubr.f32.vlgmr.msra.gmra.mrb[4].mxu0 %v12489_v7 }
 0x779   : > { %12637 = vmatprep.mubr.f32.mxu1 %v12498_v36 }
 0x77a   : > { %12638 = vmatmul.mubr.f32.vlgmr.msra.gmra.mrb[4].mxu1 %v12496_v25 }
 0x84b   : > { %v14420_v37 = vpop.f32.mrb[4].mxu0 }
 0x84c   : > { %v14421_v39 = vpop.f32.mrb[5].mxu0 }
 0x84d   : > { %v14422_v26 = vadd.f32 %v14421_v39, %v14420_v37  ;;  %v14455_v40 = vpop.f32.mrb[4].mxu1 }
 0x84e   : > { %v14456_v21 = vpop.f32.mrb[5].mxu1 }
 0x84f   : > { %v14457_v41 = vadd.f32 %v14456_v21, %v14455_v40 }
 0x851   : > { %v12640_v33 = vadd.f32 %v14457_v41, %v14422_v26 }
 0x853   : > { %12644 = vst.msk [vmem:[%s314_s5] sm:$0x3] %vm12643_vm0, %v12640_v33 }
 0x854 PF: > { %s20_s20 = sadd.s32 1, %s17305_s20   ;;  %s19477_s15 = smov %s17289_s16 }
 0x855   : > { %p17_p4 = scmp.ge.s32.totalorder %s20_s20, 4   ;;  %s19478_s16 = smov %s17293_s17 }
 0x856   : > { %s19479_s17 = smov %s17384_s26  ;;  %s19480_s18 = smov %s17301_s19 }
 0x857   : > { %s19481_s19 = smov %s19483_s22  ;;  %19 = sbr.rel (!%p17_p4) target bundleno = 6 (0x6), region = 103 }
 0x85e   :  { %12664 = vsyncpa [#allocation4], 1 }
 0x85f   :  { %12666 = vsyncpa [#allocation4 + $0x1], 1 }
 0x860   :  { %12667 = vsyncpa [#allocation6], 1 }
 0x861   :  { %12669 = vsyncpa [#allocation6 + $0x1], 1 }

</bundles_post_ra>
